<compile_context>
chip_gen: v6e
topology: v6e:2x2x1
jax: 0.10.0
libtpu: 0.0.40
codegen_flags: <defaults>
</compile_context>

<pallas_src>
import math

import jax
import jax.numpy as jnp
from jax import lax
from jax.experimental import pallas as pl
from jax.experimental.pallas import tpu as pltpu

MAX_HISTORY = 56          # max_history_length in the PyTorch script
SEQ_LEN = 8               # T (acts as the "batch of samples" in the original)
IN_DIM = 8                # LSTM input feature size
HID = 8                   # hidden size of lstm1..lstm3
HID_LAST = 1              # hidden size of lstm4
MLP_IN = MAX_HISTORY + 1  # 57
MLP_HID = 400
MLP_PAD = 512             # MLP hidden width padded to a lane-dense 4x128
LEAKY_SLOPE = 0.01        # nn.LeakyReLU default

LSTM_PACK_STRIDE = 24     # rows per layer in the packed LSTM parameter slab
GATE_STRIDE = 128         # each gate group starts at a 128-lane boundary
GATE_W = 4 * GATE_STRIDE  # 512 lanes in the packed gates vector
LSTM_HIDS = (HID, HID, HID, HID_LAST)
LSTM_INS = (IN_DIM, HID, HID, HID)
NUM_LAYERS = 4


def _sigmoid(x):
    # sigmoid(x) == 0.5*(tanh(x/2)+1): exact, and tanh runs on the EUP slot
    # so no divide sits on the serial recurrence critical path.
    return 0.5 * (jnp.tanh(0.5 * x) + 1.0)


def _leaky_relu(x):
    return jnp.where(x >= 0, x, LEAKY_SLOPE * x)


# ----------------------------------------------------------------------------
# Fused kernel: LSTM stack (register-resident wavefront) + concat-free MLP head
# ----------------------------------------------------------------------------
def _mlp1_kernel(x_ref, hist_ref, lstm_ref, w1h_ref, w1l_ref, b_ref, wo_ref,
                 w2_hbm, w3_hbm, out_ref,
                 w2_vmem, w3_vmem, dma_sem, xproj_ref, lstm_buf):
    seq_len = xproj_ref.shape[0]

    # ---- Kick off the big MLP weight DMAs; they overlap the whole LSTM ----
    w2_cp = pltpu.make_async_copy(w2_hbm, w2_vmem, dma_sem.at[0])
    w3_cp = pltpu.make_async_copy(w3_hbm, w3_vmem, dma_sem.at[1])
    w2_cp.start()
    w3_cp.start()

    # ---- Layer-0 input projection hoisted (no serial dependency on it) ----
    base0 = 0
    w_ih0 = lstm_ref[base0:base0 + LSTM_INS[0], :]               # (8, 512)
    b0 = lstm_ref[base0 + 16:base0 + 17, :]                      # (1, 512)
    xproj_ref[...] = (jnp.dot(x_ref[...], w_ih0,
                              preferred_element_type=jnp.float32) + b0)

    # ---- LSTM recurrence: register-resident, fully unrolled wavefront ------
    # Step (l, t) depends only on (l-1, t) and (l, t-1); the unrolled trace
    # exposes that DAG directly to the scheduler (no scratch round trips).
    h = [jnp.zeros((1, LSTM_HIDS[l]), jnp.float32) for l in range(NUM_LAYERS)]
    c = [jnp.zeros((1, LSTM_HIDS[l]), jnp.float32) for l in range(NUM_LAYERS)]

    for t in range(seq_len):
        for l in range(NUM_LAYERS):
            hid = LSTM_HIDS[l]
            base = l * LSTM_PACK_STRIDE
            w_hh_t = lstm_ref[base + 8:base + 8 + hid, :]        # (H, 512)
            if l == 0:
                pre = xproj_ref[t:t + 1, :]                      # ref row read
            else:
                w_ih_t = lstm_ref[base:base + LSTM_INS[l], :]    # (In, 512)
                bl = lstm_ref[base + 16:base + 17, :]            # (1, 512)
                pre = jnp.dot(h[l - 1], w_ih_t,
                              preferred_element_type=jnp.float32) + bl
            gates = pre + jnp.dot(h[l], w_hh_t,
                                  preferred_element_type=jnp.float32)
            # Lane-aligned gate slices: each starts at lane 0 of its own vreg,
            # so no XLU rotations on the serial chain.
            i = _sigmoid(gates[:, 0 * GATE_STRIDE:0 * GATE_STRIDE + hid])
            f = _sigmoid(gates[:, 1 * GATE_STRIDE:1 * GATE_STRIDE + hid])
            g = jnp.tanh(gates[:, 2 * GATE_STRIDE:2 * GATE_STRIDE + hid])
            o = _sigmoid(gates[:, 3 * GATE_STRIDE:3 * GATE_STRIDE + hid])
            c[l] = f * c[l] + i * g
            h[l] = o * jnp.tanh(c[l])
        lstm_buf[t:t + 1, :] = h[NUM_LAYERS - 1]                 # (1, 1) store

    lstm_out = lstm_buf[...]                                     # (T, 1)

    # ---- MLP head, concat eliminated via the split first-layer weight ------
    hist = hist_ref[...]                                         # (T, 56)
    h1 = (jnp.dot(hist, w1h_ref[...], preferred_element_type=jnp.float32)
          + lstm_out * w1l_ref[...]                              # (T,1)*(1,512)
          + b_ref[0:1, :])
    h1 = _leaky_relu(h1)

    w2_cp.wait()                                                 # DMA hidden
    h2 = _leaky_relu(jnp.dot(h1, w2_vmem[...],
                             preferred_element_type=jnp.float32) + b_ref[1:2, :])
    w3_cp.wait()
    h3 = _leaky_relu(jnp.dot(h2, w3_vmem[...],
                             preferred_element_type=jnp.float32) + b_ref[2:3, :])
    y = jnp.dot(h3, wo_ref[...],
                preferred_element_type=jnp.float32) + b_ref[3:4, 0:1]
    out_ref[...] = jnp.maximum(y, 0.0)                           # final ReLU


# ----------------------------------------------------------------------------
# Wrapper
# ----------------------------------------------------------------------------
@jax.jit
def mlp1_forward(x, history, packed):
    """x: (T, 1, 8) f32, history: (T, 56) f32 -> (T, 1) f32."""
    lstm_pack, w1h, w1l, bias_pack, w2p, w3p, wop = packed
    seq_len = x.shape[0]

    def full_spec(shape):
        return pl.BlockSpec(shape, lambda i: (0,) * len(shape))

    return pl.pallas_call(
        _mlp1_kernel,
        out_shape=jax.ShapeDtypeStruct((seq_len, 1), jnp.float32),
        grid=(1,),
        in_specs=[
            # (T, 1, 8) with the batch=1 axis squeezed away for the kernel.
            pl.BlockSpec((seq_len, pl.Squeezed(), IN_DIM),
                         lambda i: (0, 0, 0)),
            full_spec(history.shape),
            full_spec(lstm_pack.shape),
            full_spec(w1h.shape),
            full_spec(w1l.shape),
            full_spec(bias_pack.shape),
            full_spec(wop.shape),
            # Big MLP weights stay in HBM; the kernel DMAs them manually so
            # the transfer overlaps the LSTM recurrence (no serial prologue).
            pl.BlockSpec(memory_space=pl.ANY),
            pl.BlockSpec(memory_space=pl.ANY),
        ],
        out_specs=pl.BlockSpec((seq_len, 1), lambda i: (0, 0)),
        scratch_shapes=[
            pltpu.VMEM((MLP_PAD, MLP_PAD), jnp.float32),   # w2 landing buffer
            pltpu.VMEM((MLP_PAD, MLP_PAD), jnp.float32),   # w3 landing buffer
            pltpu.SemaphoreType.DMA((2,)),
            pltpu.VMEM((seq_len, GATE_W), jnp.float32),    # layer-0 x_proj
            pltpu.VMEM((seq_len, 1), jnp.float32),         # lstm4 outputs
        ],
        compiler_params=pltpu.CompilerParams(
            dimension_semantics=("arbitrary",)),
    )(x, history, lstm_pack, w1h, w1l, bias_pack, wop, w2p, w3p)


# ----------------------------------------------------------------------------
# Parameter construction (PyTorch-style uniform init) and packing
# ----------------------------------------------------------------------------
def _uniform(key, shape, bound):
    return jax.random.uniform(key, shape, jnp.float32, -bound, bound)


def make_params(key):
    """Logical (unpadded) params, matching the PyTorch module's shapes."""
    lstm_dims = list(zip(LSTM_INS, LSTM_HIDS))
    lstm_params = []
    for (in_dim, hid) in lstm_dims:
        key, k1, k2, k3, k4 = jax.random.split(key, 5)
        bound = 1.0 / math.sqrt(hid)
        w_ih = _uniform(k1, (4 * hid, in_dim), bound)
        w_hh = _uniform(k2, (4 * hid, hid), bound)
        b_ih = _uniform(k3, (4 * hid,), bound)
        b_hh = _uniform(k4, (4 * hid,), bound)
        lstm_params.append((w_ih.T, w_hh.T, (b_ih + b_hh)[None, :]))

    mlp_dims = [(MLP_IN, MLP_HID), (MLP_HID, MLP_HID), (MLP_HID, MLP_HID),
                (MLP_HID, 1)]
    mlp_params = []
    for (in_dim, out_dim) in mlp_dims:
        key, k1, k2 = jax.random.split(key, 3)
        bound = 1.0 / math.sqrt(in_dim)
        w = _uniform(k1, (out_dim, in_dim), bound)
        b = _uniform(k2, (out_dim,), bound)
        mlp_params.append((w.T, b[None, :]))

    return lstm_params, mlp_params


def pack_params(lstm_params, mlp_params):
    """Pack/pad params into the kernel layout (done once, outside the jit)."""
    # LSTM slab: 24 rows per layer, 512 lanes; gate k (i,f,g,o) occupies
    # lanes [k*128, k*128+H):
    #   [base      : base+In ]  w_ih^T      (In, 4H -> lane-aligned)
    #   [base+8    : base+8+H]  w_hh^T      (H,  4H -> lane-aligned)
    #   [base+16]               b_ih + b_hh (1,  4H -> lane-aligned)
    lstm_pack = jnp.zeros((NUM_LAYERS * LSTM_PACK_STRIDE, GATE_W), jnp.float32)
    for layer, (w_ih_t, w_hh_t, b) in enumerate(lstm_params):
        base = layer * LSTM_PACK_STRIDE
        in_dim = w_ih_t.shape[0]
        hid = w_hh_t.shape[0]
        for gate in range(4):
            src = slice(gate * hid, (gate + 1) * hid)
            dst = slice(gate * GATE_STRIDE, gate * GATE_STRIDE + hid)
            lstm_pack = lstm_pack.at[base:base + in_dim, dst].set(
                w_ih_t[:, src])
            lstm_pack = lstm_pack.at[base + 8:base + 8 + hid, dst].set(
                w_hh_t[:, src])
            lstm_pack = lstm_pack.at[base + 16, dst].set(b[0, src])

    (w1, b1), (w2, b2), (w3, b3), (wo, bo) = mlp_params

    def pad_cols(w):
        return jnp.pad(w, ((0, 0), (0, MLP_PAD - w.shape[1])))

    w1l = pad_cols(w1[0:1, :])                     # lstm_out column   (1, 512)
    w1h = pad_cols(w1[1:, :])                      # history columns  (56, 512)
    w2p = jnp.pad(w2, ((0, MLP_PAD - w2.shape[0]), (0, MLP_PAD - w2.shape[1])))
    w3p = jnp.pad(w3, ((0, MLP_PAD - w3.shape[0]), (0, MLP_PAD - w3.shape[1])))
    wop = jnp.pad(wo, ((0, MLP_PAD - wo.shape[0]), (0, 0)))          # (512, 1)

    bias_pack = jnp.zeros((4, MLP_PAD), jnp.float32)
    bias_pack = bias_pack.at[0, :MLP_HID].set(b1[0])
    bias_pack = bias_pack.at[1, :MLP_HID].set(b2[0])
    bias_pack = bias_pack.at[2, :MLP_HID].set(b3[0])
    bias_pack = bias_pack.at[3, 0].set(bo[0, 0])

    return (lstm_pack, w1h, w1l, bias_pack, w2p, w3p, wop)


# ----------------------------------------------------------------------------
# Pure-JAX reference (same math, logical/unpadded params) for sanity check
# ----------------------------------------------------------------------------
def _lstm_layer_ref(x, w_ih_t, w_hh_t, b, hidden):
    def step(carry, x_t):
        h, c = carry
        gates = x_t[None, :] @ w_ih_t + h @ w_hh_t + b
        i = jax.nn.sigmoid(gates[:, 0 * hidden:1 * hidden])
        f = jax.nn.sigmoid(gates[:, 1 * hidden:2 * hidden])
        g = jnp.tanh(gates[:, 2 * hidden:3 * hidden])
        o = jax.nn.sigmoid(gates[:, 3 * hidden:4 * hidden])
        c = f * c + i * g
        h = o * jnp.tanh(c)
        return (h, c), h[0]

    h0 = jnp.zeros((1, hidden), jnp.float32)
    c0 = jnp.zeros((1, hidden), jnp.float32)
    _, hs = lax.scan(step, (h0, c0), x)
    return hs


def mlp1_reference(x, history, lstm_params, mlp_params):
    h = x[:, 0, :]
    for (wih, whh, b), hd in zip(lstm_params, LSTM_HIDS):
        h = _lstm_layer_ref(h, wih, whh, b, hd)
    combined = jnp.concatenate([h, history], axis=1)
    for (w, b) in mlp_params[:-1]:
        z = combined @ w + b
        combined = jnp.where(z >= 0, z, LEAKY_SLOPE * z)
    wo, bo = mlp_params[-1]
    return jnp.maximum(combined @ wo + bo, 0.0)


if __name__ == "__main__":
    key = jax.random.PRNGKey(0)
    kx, kh, kp = jax.random.split(key, 3)

    x = jax.random.normal(kx, (SEQ_LEN, 1, IN_DIM), jnp.float32)
    history = jax.random.normal(kh, (SEQ_LEN, MAX_HISTORY), jnp.float32)
    lstm_params, mlp_params = make_params(kp)
    packed = pack_params(lstm_params, mlp_params)

    out = jax.block_until_ready(mlp1_forward(x, history, packed))
    ref = jax.block_until_ready(mlp1_reference(x, history, lstm_params,
                                               mlp_params))

    assert out.shape == (SEQ_LEN, 1)
    err = float(jnp.max(jnp.abs(out - ref)))
    assert err < 5e-4, f"max abs err {err}"
    print("KERNEL_OK")
</pallas_src>

<mosaic_0001>
module attributes {stable_mosaic.version = 11 : i64} {
  func.func @_mlp1_kernel(%arg0: i32, %arg1: memref<8x1x8xf32, #tpu.memory_space<vmem>>, %arg2: memref<8x56xf32, #tpu.memory_space<vmem>>, %arg3: memref<96x512xf32, #tpu.memory_space<vmem>>, %arg4: memref<56x512xf32, #tpu.memory_space<vmem>>, %arg5: memref<1x512xf32, #tpu.memory_space<vmem>>, %arg6: memref<4x512xf32, #tpu.memory_space<vmem>>, %arg7: memref<512x1xf32, #tpu.memory_space<vmem>>, %arg8: memref<512x512xf32, #tpu.memory_space<any>>, %arg9: memref<512x512xf32, #tpu.memory_space<any>>, %arg10: memref<8x1xf32, #tpu.memory_space<vmem>>, %arg11: memref<512x512xf32, #tpu.memory_space<vmem>>, %arg12: memref<512x512xf32, #tpu.memory_space<vmem>>, %arg13: memref<2x!tpu.dma_semaphore, #tpu.memory_space<semaphore_mem>>, %arg14: memref<8x512xf32, #tpu.memory_space<vmem>>, %arg15: memref<8x1xf32, #tpu.memory_space<vmem>>) attributes {dimension_semantics = [#tpu.dimension_semantics<arbitrary>], iteration_bounds = array<i64: 1>, scalar_prefetch = 0 : i64, scratch_operands = 5 : i64, tpu.core_type = #tpu.core_type<tc>, window_params = [{pipeline_mode = #tpu.pipeline_mode<synchronous>, transform_indices = @transform_0, window_bounds = array<i64: 8, 1, 8>}, {pipeline_mode = #tpu.pipeline_mode<synchronous>, transform_indices = @transform_1, window_bounds = array<i64: 8, 56>}, {pipeline_mode = #tpu.pipeline_mode<synchronous>, transform_indices = @transform_2, window_bounds = array<i64: 96, 512>}, {pipeline_mode = #tpu.pipeline_mode<synchronous>, transform_indices = @transform_3, window_bounds = array<i64: 56, 512>}, {pipeline_mode = #tpu.pipeline_mode<synchronous>, transform_indices = @transform_4, window_bounds = array<i64: 1, 512>}, {pipeline_mode = #tpu.pipeline_mode<synchronous>, transform_indices = @transform_5, window_bounds = array<i64: 4, 512>}, {pipeline_mode = #tpu.pipeline_mode<synchronous>, transform_indices = @transform_6, window_bounds = array<i64: 512, 1>}, {}, {}, {pipeline_mode = #tpu.pipeline_mode<synchronous>, transform_indices = @transform_9, window_bounds = array<i64: 8, 1>}]} {
    %c0_i32 = arith.constant 0 : i32
    %0 = tpu.memref_slice %arg13[%c0_i32] : memref<2x!tpu.dma_semaphore, #tpu.memory_space<semaphore_mem>> -> memref<1x!tpu.dma_semaphore, #tpu.memory_space<semaphore_mem>>
    %1 = tpu.memref_squeeze %0 : memref<1x!tpu.dma_semaphore, #tpu.memory_space<semaphore_mem>> -> memref<!tpu.dma_semaphore, #tpu.memory_space<semaphore_mem>>
    tpu.enqueue_dma source(%arg8 : memref<512x512xf32, #tpu.memory_space<any>>) target(%arg11 : memref<512x512xf32, #tpu.memory_space<vmem>>) target_semaphore(%1 : memref<!tpu.dma_semaphore, #tpu.memory_space<semaphore_mem>>)
    %c1_i32 = arith.constant 1 : i32
    %2 = tpu.memref_slice %arg13[%c1_i32] : memref<2x!tpu.dma_semaphore, #tpu.memory_space<semaphore_mem>> -> memref<1x!tpu.dma_semaphore, #tpu.memory_space<semaphore_mem>>
    %3 = tpu.memref_squeeze %2 : memref<1x!tpu.dma_semaphore, #tpu.memory_space<semaphore_mem>> -> memref<!tpu.dma_semaphore, #tpu.memory_space<semaphore_mem>>
    tpu.enqueue_dma source(%arg9 : memref<512x512xf32, #tpu.memory_space<any>>) target(%arg12 : memref<512x512xf32, #tpu.memory_space<vmem>>) target_semaphore(%3 : memref<!tpu.dma_semaphore, #tpu.memory_space<semaphore_mem>>)
    %c0 = arith.constant 0 : index
    %c0_0 = arith.constant 0 : index
    %4 = vector.load %arg3[%c0, %c0_0] : memref<96x512xf32, #tpu.memory_space<vmem>>, vector<8x512xf32>
    %c16 = arith.constant 16 : index
    %c0_1 = arith.constant 0 : index
    %5 = vector.load %arg3[%c16, %c0_1] : memref<96x512xf32, #tpu.memory_space<vmem>>, vector<1x512xf32>
    %c0_2 = arith.constant 0 : index
    %c0_3 = arith.constant 0 : index
    %c0_4 = arith.constant 0 : index
    %6 = vector.load %arg1[%c0_2, %c0_3, %c0_4] : memref<8x1x8xf32, #tpu.memory_space<vmem>>, vector<8x1x8xf32>
    %7 = vector.shape_cast %6 : vector<8x1x8xf32> to vector<8x8xf32>
    %cst = arith.constant dense<0.000000e+00> : vector<8x512xf32>
    %8 = tpu.matmul %7, %4, %cst {dimension_numbers = #tpu.dot_dimension_numbers<[1], [0], [0], [1], [0, 0, 1, 1], [], []>} : vector<8x8xf32>, vector<8x512xf32>, vector<8x512xf32> -> vector<8x512xf32>
    %9 = vector.broadcast %5 : vector<1x512xf32> to vector<8x512xf32>
    %10 = arith.addf %8, %9 : vector<8x512xf32>
    %c0_5 = arith.constant 0 : index
    %c0_6 = arith.constant 0 : index
    %11 = vector.load %arg14[%c0_5, %c0_6] : memref<8x512xf32, #tpu.memory_space<vmem>>, vector<8x512xf32>
    tpu.vector_store %arg14[%c0_5, %c0_6], %10 {strides = array<i32>} : memref<8x512xf32, #tpu.memory_space<vmem>>, vector<8x512xf32>,
    %cst_7 = arith.constant 0.000000e+00 : f32
    %12 = vector.broadcast %cst_7 : f32 to vector<1x8xf32>
    %cst_8 = arith.constant 0.000000e+00 : f32
    %13 = vector.broadcast %cst_8 : f32 to vector<1x8xf32>
    %cst_9 = arith.constant 0.000000e+00 : f32
    %14 = vector.broadcast %cst_9 : f32 to vector<1x8xf32>
    %cst_10 = arith.constant 0.000000e+00 : f32
    %15 = vector.broadcast %cst_10 : f32 to vector<1x1xf32>
    %cst_11 = arith.constant 0.000000e+00 : f32
    %16 = vector.broadcast %cst_11 : f32 to vector<1x8xf32>
    %cst_12 = arith.constant 0.000000e+00 : f32
    %17 = vector.broadcast %cst_12 : f32 to vector<1x8xf32>
    %cst_13 = arith.constant 0.000000e+00 : f32
    %18 = vector.broadcast %cst_13 : f32 to vector<1x8xf32>
    %cst_14 = arith.constant 0.000000e+00 : f32
    %19 = vector.broadcast %cst_14 : f32 to vector<1x1xf32>
    %c8 = arith.constant 8 : index
    %c0_15 = arith.constant 0 : index
    %20 = vector.load %arg3[%c8, %c0_15] : memref<96x512xf32, #tpu.memory_space<vmem>>, vector<8x512xf32>
    %c0_16 = arith.constant 0 : index
    %c0_17 = arith.constant 0 : index
    %21 = vector.load %arg14[%c0_16, %c0_17] : memref<8x512xf32, #tpu.memory_space<vmem>>, vector<1x512xf32>
    %cst_18 = arith.constant dense<0.000000e+00> : vector<1x512xf32>
    %22 = tpu.matmul %12, %20, %cst_18 {dimension_numbers = #tpu.dot_dimension_numbers<[1], [0], [0], [1], [0, 0, 1, 1], [], []>} : vector<1x8xf32>, vector<8x512xf32>, vector<1x512xf32> -> vector<1x512xf32>
    %23 = arith.addf %21, %22 : vector<1x512xf32>
    %24 = vector.extract_strided_slice %23 {offsets = [0, 0], sizes = [1, 8], strides = [1, 1]} : vector<1x512xf32> to vector<1x8xf32>
    %cst_19 = arith.constant 5.000000e-01 : f32
    %25 = vector.broadcast %cst_19 : f32 to vector<1x8xf32>
    %26 = arith.mulf %25, %24 : vector<1x8xf32>
    %27 = math.tanh %26 : vector<1x8xf32>
    %cst_20 = arith.constant 1.000000e+00 : f32
    %28 = vector.broadcast %cst_20 : f32 to vector<1x8xf32>
    %29 = arith.addf %27, %28 : vector<1x8xf32>
    %cst_21 = arith.constant 5.000000e-01 : f32
    %30 = vector.broadcast %cst_21 : f32 to vector<1x8xf32>
    %31 = arith.mulf %30, %29 : vector<1x8xf32>
    %32 = vector.extract_strided_slice %23 {offsets = [0, 128], sizes = [1, 8], strides = [1, 1]} : vector<1x512xf32> to vector<1x8xf32>
    %cst_22 = arith.constant 5.000000e-01 : f32
    %33 = vector.broadcast %cst_22 : f32 to vector<1x8xf32>
    %34 = arith.mulf %33, %32 : vector<1x8xf32>
    %35 = math.tanh %34 : vector<1x8xf32>
    %cst_23 = arith.constant 1.000000e+00 : f32
    %36 = vector.broadcast %cst_23 : f32 to vector<1x8xf32>
    %37 = arith.addf %35, %36 : vector<1x8xf32>
    %cst_24 = arith.constant 5.000000e-01 : f32
    %38 = vector.broadcast %cst_24 : f32 to vector<1x8xf32>
    %39 = arith.mulf %38, %37 : vector<1x8xf32>
    %40 = vector.extract_strided_slice %23 {offsets = [0, 256], sizes = [1, 8], strides = [1, 1]} : vector<1x512xf32> to vector<1x8xf32>
    %41 = math.tanh %40 : vector<1x8xf32>
    %42 = vector.extract_strided_slice %23 {offsets = [0, 384], sizes = [1, 8], strides = [1, 1]} : vector<1x512xf32> to vector<1x8xf32>
    %cst_25 = arith.constant 5.000000e-01 : f32
    %43 = vector.broadcast %cst_25 : f32 to vector<1x8xf32>
    %44 = arith.mulf %43, %42 : vector<1x8xf32>
    %45 = math.tanh %44 : vector<1x8xf32>
    %cst_26 = arith.constant 1.000000e+00 : f32
    %46 = vector.broadcast %cst_26 : f32 to vector<1x8xf32>
    %47 = arith.addf %45, %46 : vector<1x8xf32>
    %cst_27 = arith.constant 5.000000e-01 : f32
    %48 = vector.broadcast %cst_27 : f32 to vector<1x8xf32>
    %49 = arith.mulf %48, %47 : vector<1x8xf32>
    %50 = arith.mulf %39, %16 : vector<1x8xf32>
    %51 = arith.mulf %31, %41 : vector<1x8xf32>
    %52 = arith.addf %50, %51 : vector<1x8xf32>
    %53 = math.tanh %52 : vector<1x8xf32>
    %54 = arith.mulf %49, %53 : vector<1x8xf32>
    %c32 = arith.constant 32 : index
    %c0_28 = arith.constant 0 : index
    %55 = vector.load %arg3[%c32, %c0_28] : memref<96x512xf32, #tpu.memory_space<vmem>>, vector<8x512xf32>
    %c24 = arith.constant 24 : index
    %c0_29 = arith.constant 0 : index
    %56 = vector.load %arg3[%c24, %c0_29] : memref<96x512xf32, #tpu.memory_space<vmem>>, vector<8x512xf32>
    %c40 = arith.constant 40 : index
    %c0_30 = arith.constant 0 : index
    %57 = vector.load %arg3[%c40, %c0_30] : memref<96x512xf32, #tpu.memory_space<vmem>>, vector<1x512xf32>
    %cst_31 = arith.constant dense<0.000000e+00> : vector<1x512xf32>
    %58 = tpu.matmul %54, %56, %cst_31 {dimension_numbers = #tpu.dot_dimension_numbers<[1], [0], [0], [1], [0, 0, 1, 1], [], []>} : vector<1x8xf32>, vector<8x512xf32>, vector<1x512xf32> -> vector<1x512xf32>
    %59 = arith.addf %58, %57 : vector<1x512xf32>
    %cst_32 = arith.constant dense<0.000000e+00> : vector<1x512xf32>
    %60 = tpu.matmul %13, %55, %cst_32 {dimension_numbers = #tpu.dot_dimension_numbers<[1], [0], [0], [1], [0, 0, 1, 1], [], []>} : vector<1x8xf32>, vector<8x512xf32>, vector<1x512xf32> -> vector<1x512xf32>
    %61 = arith.addf %59, %60 : vector<1x512xf32>
    %62 = vector.extract_strided_slice %61 {offsets = [0, 0], sizes = [1, 8], strides = [1, 1]} : vector<1x512xf32> to vector<1x8xf32>
    %cst_33 = arith.constant 5.000000e-01 : f32
    %63 = vector.broadcast %cst_33 : f32 to vector<1x8xf32>
    %64 = arith.mulf %63, %62 : vector<1x8xf32>
    %65 = math.tanh %64 : vector<1x8xf32>
    %cst_34 = arith.constant 1.000000e+00 : f32
    %66 = vector.broadcast %cst_34 : f32 to vector<1x8xf32>
    %67 = arith.addf %65, %66 : vector<1x8xf32>
    %cst_35 = arith.constant 5.000000e-01 : f32
    %68 = vector.broadcast %cst_35 : f32 to vector<1x8xf32>
    %69 = arith.mulf %68, %67 : vector<1x8xf32>
    %70 = vector.extract_strided_slice %61 {offsets = [0, 128], sizes = [1, 8], strides = [1, 1]} : vector<1x512xf32> to vector<1x8xf32>
    %cst_36 = arith.constant 5.000000e-01 : f32
    %71 = vector.broadcast %cst_36 : f32 to vector<1x8xf32>
    %72 = arith.mulf %71, %70 : vector<1x8xf32>
    %73 = math.tanh %72 : vector<1x8xf32>
    %cst_37 = arith.constant 1.000000e+00 : f32
    %74 = vector.broadcast %cst_37 : f32 to vector<1x8xf32>
    %75 = arith.addf %73, %74 : vector<1x8xf32>
    %cst_38 = arith.constant 5.000000e-01 : f32
    %76 = vector.broadcast %cst_38 : f32 to vector<1x8xf32>
    %77 = arith.mulf %76, %75 : vector<1x8xf32>
    %78 = vector.extract_strided_slice %61 {offsets = [0, 256], sizes = [1, 8], strides = [1, 1]} : vector<1x512xf32> to vector<1x8xf32>
    %79 = math.tanh %78 : vector<1x8xf32>
    %80 = vector.extract_strided_slice %61 {offsets = [0, 384], sizes = [1, 8], strides = [1, 1]} : vector<1x512xf32> to vector<1x8xf32>
    %cst_39 = arith.constant 5.000000e-01 : f32
    %81 = vector.broadcast %cst_39 : f32 to vector<1x8xf32>
    %82 = arith.mulf %81, %80 : vector<1x8xf32>
    %83 = math.tanh %82 : vector<1x8xf32>
    %cst_40 = arith.constant 1.000000e+00 : f32
    %84 = vector.broadcast %cst_40 : f32 to vector<1x8xf32>
    %85 = arith.addf %83, %84 : vector<1x8xf32>
    %cst_41 = arith.constant 5.000000e-01 : f32
    %86 = vector.broadcast %cst_41 : f32 to vector<1x8xf32>
    %87 = arith.mulf %86, %85 : vector<1x8xf32>
    %88 = arith.mulf %77, %17 : vector<1x8xf32>
    %89 = arith.mulf %69, %79 : vector<1x8xf32>
    %90 = arith.addf %88, %89 : vector<1x8xf32>
    %91 = math.tanh %90 : vector<1x8xf32>
    %92 = arith.mulf %87, %91 : vector<1x8xf32>
    %c56 = arith.constant 56 : index
    %c0_42 = arith.constant 0 : index
    %93 = vector.load %arg3[%c56, %c0_42] : memref<96x512xf32, #tpu.memory_space<vmem>>, vector<8x512xf32>
    %c48 = arith.constant 48 : index
    %c0_43 = arith.constant 0 : index
    %94 = vector.load %arg3[%c48, %c0_43] : memref<96x512xf32, #tpu.memory_space<vmem>>, vector<8x512xf32>
    %c64 = arith.constant 64 : index
    %c0_44 = arith.constant 0 : index
    %95 = vector.load %arg3[%c64, %c0_44] : memref<96x512xf32, #tpu.memory_space<vmem>>, vector<1x512xf32>
    %cst_45 = arith.constant dense<0.000000e+00> : vector<1x512xf32>
    %96 = tpu.matmul %92, %94, %cst_45 {dimension_numbers = #tpu.dot_dimension_numbers<[1], [0], [0], [1], [0, 0, 1, 1], [], []>} : vector<1x8xf32>, vector<8x512xf32>, vector<1x512xf32> -> vector<1x512xf32>
    %97 = arith.addf %96, %95 : vector<1x512xf32>
    %cst_46 = arith.constant dense<0.000000e+00> : vector<1x512xf32>
    %98 = tpu.matmul %14, %93, %cst_46 {dimension_numbers = #tpu.dot_dimension_numbers<[1], [0], [0], [1], [0, 0, 1, 1], [], []>} : vector<1x8xf32>, vector<8x512xf32>, vector<1x512xf32> -> vector<1x512xf32>
    %99 = arith.addf %97, %98 : vector<1x512xf32>
    %100 = vector.extract_strided_slice %99 {offsets = [0, 0], sizes = [1, 8], strides = [1, 1]} : vector<1x512xf32> to vector<1x8xf32>
    %cst_47 = arith.constant 5.000000e-01 : f32
    %101 = vector.broadcast %cst_47 : f32 to vector<1x8xf32>
    %102 = arith.mulf %101, %100 : vector<1x8xf32>
    %103 = math.tanh %102 : vector<1x8xf32>
    %cst_48 = arith.constant 1.000000e+00 : f32
    %104 = vector.broadcast %cst_48 : f32 to vector<1x8xf32>
    %105 = arith.addf %103, %104 : vector<1x8xf32>
    %cst_49 = arith.constant 5.000000e-01 : f32
    %106 = vector.broadcast %cst_49 : f32 to vector<1x8xf32>
    %107 = arith.mulf %106, %105 : vector<1x8xf32>
    %108 = vector.extract_strided_slice %99 {offsets = [0, 128], sizes = [1, 8], strides = [1, 1]} : vector<1x512xf32> to vector<1x8xf32>
    %cst_50 = arith.constant 5.000000e-01 : f32
    %109 = vector.broadcast %cst_50 : f32 to vector<1x8xf32>
    %110 = arith.mulf %109, %108 : vector<1x8xf32>
    %111 = math.tanh %110 : vector<1x8xf32>
    %cst_51 = arith.constant 1.000000e+00 : f32
    %112 = vector.broadcast %cst_51 : f32 to vector<1x8xf32>
    %113 = arith.addf %111, %112 : vector<1x8xf32>
    %cst_52 = arith.constant 5.000000e-01 : f32
    %114 = vector.broadcast %cst_52 : f32 to vector<1x8xf32>
    %115 = arith.mulf %114, %113 : vector<1x8xf32>
    %116 = vector.extract_strided_slice %99 {offsets = [0, 256], sizes = [1, 8], strides = [1, 1]} : vector<1x512xf32> to vector<1x8xf32>
    %117 = math.tanh %116 : vector<1x8xf32>
    %118 = vector.extract_strided_slice %99 {offsets = [0, 384], sizes = [1, 8], strides = [1, 1]} : vector<1x512xf32> to vector<1x8xf32>
    %cst_53 = arith.constant 5.000000e-01 : f32
    %119 = vector.broadcast %cst_53 : f32 to vector<1x8xf32>
    %120 = arith.mulf %119, %118 : vector<1x8xf32>
    %121 = math.tanh %120 : vector<1x8xf32>
    %cst_54 = arith.constant 1.000000e+00 : f32
    %122 = vector.broadcast %cst_54 : f32 to vector<1x8xf32>
    %123 = arith.addf %121, %122 : vector<1x8xf32>
    %cst_55 = arith.constant 5.000000e-01 : f32
    %124 = vector.broadcast %cst_55 : f32 to vector<1x8xf32>
    %125 = arith.mulf %124, %123 : vector<1x8xf32>
    %126 = arith.mulf %115, %18 : vector<1x8xf32>
    %127 = arith.mulf %107, %117 : vector<1x8xf32>
    %128 = arith.addf %126, %127 : vector<1x8xf32>
    %129 = math.tanh %128 : vector<1x8xf32>
    %130 = arith.mulf %125, %129 : vector<1x8xf32>
    %c80 = arith.constant 80 : index
    %c0_56 = arith.constant 0 : index
    %131 = vector.load %arg3[%c80, %c0_56] : memref<96x512xf32, #tpu.memory_space<vmem>>, vector<1x512xf32>
    %c72 = arith.constant 72 : index
    %c0_57 = arith.constant 0 : index
    %132 = vector.load %arg3[%c72, %c0_57] : memref<96x512xf32, #tpu.memory_space<vmem>>, vector<8x512xf32>
    %c88 = arith.constant 88 : index
    %c0_58 = arith.constant 0 : index
    %133 = vector.load %arg3[%c88, %c0_58] : memref<96x512xf32, #tpu.memory_space<vmem>>, vector<1x512xf32>
    %cst_59 = arith.constant dense<0.000000e+00> : vector<1x512xf32>
    %134 = tpu.matmul %130, %132, %cst_59 {dimension_numbers = #tpu.dot_dimension_numbers<[1], [0], [0], [1], [0, 0, 1, 1], [], []>} : vector<1x8xf32>, vector<8x512xf32>, vector<1x512xf32> -> vector<1x512xf32>
    %135 = arith.addf %134, %133 : vector<1x512xf32>
    %cst_60 = arith.constant dense<0.000000e+00> : vector<1x512xf32>
    %136 = tpu.matmul %15, %131, %cst_60 {dimension_numbers = #tpu.dot_dimension_numbers<[1], [0], [0], [1], [0, 0, 1, 1], [], []>} : vector<1x1xf32>, vector<1x512xf32>, vector<1x512xf32> -> vector<1x512xf32>
    %137 = arith.addf %135, %136 : vector<1x512xf32>
    %138 = vector.extract_strided_slice %137 {offsets = [0, 0], sizes = [1, 1], strides = [1, 1]} : vector<1x512xf32> to vector<1x1xf32>
    %cst_61 = arith.constant 5.000000e-01 : f32
    %139 = vector.broadcast %cst_61 : f32 to vector<1x1xf32>
    %140 = arith.mulf %139, %138 : vector<1x1xf32>
    %141 = math.tanh %140 : vector<1x1xf32>
    %cst_62 = arith.constant 1.000000e+00 : f32
    %142 = vector.broadcast %cst_62 : f32 to vector<1x1xf32>
    %143 = arith.addf %141, %142 : vector<1x1xf32>
    %cst_63 = arith.constant 5.000000e-01 : f32
    %144 = vector.broadcast %cst_63 : f32 to vector<1x1xf32>
    %145 = arith.mulf %144, %143 : vector<1x1xf32>
    %146 = vector.extract_strided_slice %137 {offsets = [0, 128], sizes = [1, 1], strides = [1, 1]} : vector<1x512xf32> to vector<1x1xf32>
    %cst_64 = arith.constant 5.000000e-01 : f32
    %147 = vector.broadcast %cst_64 : f32 to vector<1x1xf32>
    %148 = arith.mulf %147, %146 : vector<1x1xf32>
    %149 = math.tanh %148 : vector<1x1xf32>
    %cst_65 = arith.constant 1.000000e+00 : f32
    %150 = vector.broadcast %cst_65 : f32 to vector<1x1xf32>
    %151 = arith.addf %149, %150 : vector<1x1xf32>
    %cst_66 = arith.constant 5.000000e-01 : f32
    %152 = vector.broadcast %cst_66 : f32 to vector<1x1xf32>
    %153 = arith.mulf %152, %151 : vector<1x1xf32>
    %154 = vector.extract_strided_slice %137 {offsets = [0, 256], sizes = [1, 1], strides = [1, 1]} : vector<1x512xf32> to vector<1x1xf32>
    %155 = math.tanh %154 : vector<1x1xf32>
    %156 = vector.extract_strided_slice %137 {offsets = [0, 384], sizes = [1, 1], strides = [1, 1]} : vector<1x512xf32> to vector<1x1xf32>
    %cst_67 = arith.constant 5.000000e-01 : f32
    %157 = vector.broadcast %cst_67 : f32 to vector<1x1xf32>
    %158 = arith.mulf %157, %156 : vector<1x1xf32>
    %159 = math.tanh %158 : vector<1x1xf32>
    %cst_68 = arith.constant 1.000000e+00 : f32
    %160 = vector.broadcast %cst_68 : f32 to vector<1x1xf32>
    %161 = arith.addf %159, %160 : vector<1x1xf32>
    %cst_69 = arith.constant 5.000000e-01 : f32
    %162 = vector.broadcast %cst_69 : f32 to vector<1x1xf32>
    %163 = arith.mulf %162, %161 : vector<1x1xf32>
    %164 = arith.mulf %153, %19 : vector<1x1xf32>
    %165 = arith.mulf %145, %155 : vector<1x1xf32>
    %166 = arith.addf %164, %165 : vector<1x1xf32>
    %167 = math.tanh %166 : vector<1x1xf32>
    %168 = arith.mulf %163, %167 : vector<1x1xf32>
    %c0_70 = arith.constant 0 : index
    %c0_71 = arith.constant 0 : index
    %169 = vector.load %arg15[%c0_70, %c0_71] : memref<8x1xf32, #tpu.memory_space<vmem>>, vector<1x1xf32>
    tpu.vector_store %arg15[%c0_70, %c0_71], %168 {strides = array<i32>} : memref<8x1xf32, #tpu.memory_space<vmem>>, vector<1x1xf32>,
    %c8_72 = arith.constant 8 : index
    %c0_73 = arith.constant 0 : index
    %170 = vector.load %arg3[%c8_72, %c0_73] : memref<96x512xf32, #tpu.memory_space<vmem>>, vector<8x512xf32>
    %c1 = arith.constant 1 : index
    %c0_74 = arith.constant 0 : index
    %171 = vector.load %arg14[%c1, %c0_74] : memref<8x512xf32, #tpu.memory_space<vmem>>, vector<1x512xf32>
    %cst_75 = arith.constant dense<0.000000e+00> : vector<1x512xf32>
    %172 = tpu.matmul %54, %170, %cst_75 {dimension_numbers = #tpu.dot_dimension_numbers<[1], [0], [0], [1], [0, 0, 1, 1], [], []>} : vector<1x8xf32>, vector<8x512xf32>, vector<1x512xf32> -> vector<1x512xf32>
    %173 = arith.addf %171, %172 : vector<1x512xf32>
    %174 = vector.extract_strided_slice %173 {offsets = [0, 0], sizes = [1, 8], strides = [1, 1]} : vector<1x512xf32> to vector<1x8xf32>
    %cst_76 = arith.constant 5.000000e-01 : f32
    %175 = vector.broadcast %cst_76 : f32 to vector<1x8xf32>
    %176 = arith.mulf %175, %174 : vector<1x8xf32>
    %177 = math.tanh %176 : vector<1x8xf32>
    %cst_77 = arith.constant 1.000000e+00 : f32
    %178 = vector.broadcast %cst_77 : f32 to vector<1x8xf32>
    %179 = arith.addf %177, %178 : vector<1x8xf32>
    %cst_78 = arith.constant 5.000000e-01 : f32
    %180 = vector.broadcast %cst_78 : f32 to vector<1x8xf32>
    %181 = arith.mulf %180, %179 : vector<1x8xf32>
    %182 = vector.extract_strided_slice %173 {offsets = [0, 128], sizes = [1, 8], strides = [1, 1]} : vector<1x512xf32> to vector<1x8xf32>
    %cst_79 = arith.constant 5.000000e-01 : f32
    %183 = vector.broadcast %cst_79 : f32 to vector<1x8xf32>
    %184 = arith.mulf %183, %182 : vector<1x8xf32>
    %185 = math.tanh %184 : vector<1x8xf32>
    %cst_80 = arith.constant 1.000000e+00 : f32
    %186 = vector.broadcast %cst_80 : f32 to vector<1x8xf32>
    %187 = arith.addf %185, %186 : vector<1x8xf32>
    %cst_81 = arith.constant 5.000000e-01 : f32
    %188 = vector.broadcast %cst_81 : f32 to vector<1x8xf32>
    %189 = arith.mulf %188, %187 : vector<1x8xf32>
    %190 = vector.extract_strided_slice %173 {offsets = [0, 256], sizes = [1, 8], strides = [1, 1]} : vector<1x512xf32> to vector<1x8xf32>
    %191 = math.tanh %190 : vector<1x8xf32>
    %192 = vector.extract_strided_slice %173 {offsets = [0, 384], sizes = [1, 8], strides = [1, 1]} : vector<1x512xf32> to vector<1x8xf32>
    %cst_82 = arith.constant 5.000000e-01 : f32
    %193 = vector.broadcast %cst_82 : f32 to vector<1x8xf32>
    %194 = arith.mulf %193, %192 : vector<1x8xf32>
    %195 = math.tanh %194 : vector<1x8xf32>
    %cst_83 = arith.constant 1.000000e+00 : f32
    %196 = vector.broadcast %cst_83 : f32 to vector<1x8xf32>
    %197 = arith.addf %195, %196 : vector<1x8xf32>
    %cst_84 = arith.constant 5.000000e-01 : f32
    %198 = vector.broadcast %cst_84 : f32 to vector<1x8xf32>
    %199 = arith.mulf %198, %197 : vector<1x8xf32>
    %200 = arith.mulf %189, %52 : vector<1x8xf32>
    %201 = arith.mulf %181, %191 : vector<1x8xf32>
    %202 = arith.addf %200, %201 : vector<1x8xf32>
    %203 = math.tanh %202 : vector<1x8xf32>
    %204 = arith.mulf %199, %203 : vector<1x8xf32>
    %c32_85 = arith.constant 32 : index
    %c0_86 = arith.constant 0 : index
    %205 = vector.load %arg3[%c32_85, %c0_86] : memref<96x512xf32, #tpu.memory_space<vmem>>, vector<8x512xf32>
    %c24_87 = arith.constant 24 : index
    %c0_88 = arith.constant 0 : index
    %206 = vector.load %arg3[%c24_87, %c0_88] : memref<96x512xf32, #tpu.memory_space<vmem>>, vector<8x512xf32>
    %c40_89 = arith.constant 40 : index
    %c0_90 = arith.constant 0 : index
    %207 = vector.load %arg3[%c40_89, %c0_90] : memref<96x512xf32, #tpu.memory_space<vmem>>, vector<1x512xf32>
    %cst_91 = arith.constant dense<0.000000e+00> : vector<1x512xf32>
    %208 = tpu.matmul %204, %206, %cst_91 {dimension_numbers = #tpu.dot_dimension_numbers<[1], [0], [0], [1], [0, 0, 1, 1], [], []>} : vector<1x8xf32>, vector<8x512xf32>, vector<1x512xf32> -> vector<1x512xf32>
    %209 = arith.addf %208, %207 : vector<1x512xf32>
    %cst_92 = arith.constant dense<0.000000e+00> : vector<1x512xf32>
    %210 = tpu.matmul %92, %205, %cst_92 {dimension_numbers = #tpu.dot_dimension_numbers<[1], [0], [0], [1], [0, 0, 1, 1], [], []>} : vector<1x8xf32>, vector<8x512xf32>, vector<1x512xf32> -> vector<1x512xf32>
    %211 = arith.addf %209, %210 : vector<1x512xf32>
    %212 = vector.extract_strided_slice %211 {offsets = [0, 0], sizes = [1, 8], strides = [1, 1]} : vector<1x512xf32> to vector<1x8xf32>
    %cst_93 = arith.constant 5.000000e-01 : f32
    %213 = vector.broadcast %cst_93 : f32 to vector<1x8xf32>
    %214 = arith.mulf %213, %212 : vector<1x8xf32>
    %215 = math.tanh %214 : vector<1x8xf32>
    %cst_94 = arith.constant 1.000000e+00 : f32
    %216 = vector.broadcast %cst_94 : f32 to vector<1x8xf32>
    %217 = arith.addf %215, %216 : vector<1x8xf32>
    %cst_95 = arith.constant 5.000000e-01 : f32
    %218 = vector.broadcast %cst_95 : f32 to vector<1x8xf32>
    %219 = arith.mulf %218, %217 : vector<1x8xf32>
    %220 = vector.extract_strided_slice %211 {offsets = [0, 128], sizes = [1, 8], strides = [1, 1]} : vector<1x512xf32> to vector<1x8xf32>
    %cst_96 = arith.constant 5.000000e-01 : f32
    %221 = vector.broadcast %cst_96 : f32 to vector<1x8xf32>
    %222 = arith.mulf %221, %220 : vector<1x8xf32>
    %223 = math.tanh %222 : vector<1x8xf32>
    %cst_97 = arith.constant 1.000000e+00 : f32
    %224 = vector.broadcast %cst_97 : f32 to vector<1x8xf32>
    %225 = arith.addf %223, %224 : vector<1x8xf32>
    %cst_98 = arith.constant 5.000000e-01 : f32
    %226 = vector.broadcast %cst_98 : f32 to vector<1x8xf32>
    %227 = arith.mulf %226, %225 : vector<1x8xf32>
    %228 = vector.extract_strided_slice %211 {offsets = [0, 256], sizes = [1, 8], strides = [1, 1]} : vector<1x512xf32> to vector<1x8xf32>
    %229 = math.tanh %228 : vector<1x8xf32>
    %230 = vector.extract_strided_slice %211 {offsets = [0, 384], sizes = [1, 8], strides = [1, 1]} : vector<1x512xf32> to vector<1x8xf32>
    %cst_99 = arith.constant 5.000000e-01 : f32
    %231 = vector.broadcast %cst_99 : f32 to vector<1x8xf32>
    %232 = arith.mulf %231, %230 : vector<1x8xf32>
    %233 = math.tanh %232 : vector<1x8xf32>
    %cst_100 = arith.constant 1.000000e+00 : f32
    %234 = vector.broadcast %cst_100 : f32 to vector<1x8xf32>
    %235 = arith.addf %233, %234 : vector<1x8xf32>
    %cst_101 = arith.constant 5.000000e-01 : f32
    %236 = vector.broadcast %cst_101 : f32 to vector<1x8xf32>
    %237 = arith.mulf %236, %235 : vector<1x8xf32>
    %238 = arith.mulf %227, %90 : vector<1x8xf32>
    %239 = arith.mulf %219, %229 : vector<1x8xf32>
    %240 = arith.addf %238, %239 : vector<1x8xf32>
    %241 = math.tanh %240 : vector<1x8xf32>
    %242 = arith.mulf %237, %241 : vector<1x8xf32>
    %c56_102 = arith.constant 56 : index
    %c0_103 = arith.constant 0 : index
    %243 = vector.load %arg3[%c56_102, %c0_103] : memref<96x512xf32, #tpu.memory_space<vmem>>, vector<8x512xf32>
    %c48_104 = arith.constant 48 : index
    %c0_105 = arith.constant 0 : index
    %244 = vector.load %arg3[%c48_104, %c0_105] : memref<96x512xf32, #tpu.memory_space<vmem>>, vector<8x512xf32>
    %c64_106 = arith.constant 64 : index
    %c0_107 = arith.constant 0 : index
    %245 = vector.load %arg3[%c64_106, %c0_107] : memref<96x512xf32, #tpu.memory_space<vmem>>, vector<1x512xf32>
    %cst_108 = arith.constant dense<0.000000e+00> : vector<1x512xf32>
    %246 = tpu.matmul %242, %244, %cst_108 {dimension_numbers = #tpu.dot_dimension_numbers<[1], [0], [0], [1], [0, 0, 1, 1], [], []>} : vector<1x8xf32>, vector<8x512xf32>, vector<1x512xf32> -> vector<1x512xf32>
    %247 = arith.addf %246, %245 : vector<1x512xf32>
    %cst_109 = arith.constant dense<0.000000e+00> : vector<1x512xf32>
    %248 = tpu.matmul %130, %243, %cst_109 {dimension_numbers = #tpu.dot_dimension_numbers<[1], [0], [0], [1], [0, 0, 1, 1], [], []>} : vector<1x8xf32>, vector<8x512xf32>, vector<1x512xf32> -> vector<1x512xf32>
    %249 = arith.addf %247, %248 : vector<1x512xf32>
    %250 = vector.extract_strided_slice %249 {offsets = [0, 0], sizes = [1, 8], strides = [1, 1]} : vector<1x512xf32> to vector<1x8xf32>
    %cst_110 = arith.constant 5.000000e-01 : f32
    %251 = vector.broadcast %cst_110 : f32 to vector<1x8xf32>
    %252 = arith.mulf %251, %250 : vector<1x8xf32>
    %253 = math.tanh %252 : vector<1x8xf32>
    %cst_111 = arith.constant 1.000000e+00 : f32
    %254 = vector.broadcast %cst_111 : f32 to vector<1x8xf32>
    %255 = arith.addf %253, %254 : vector<1x8xf32>
    %cst_112 = arith.constant 5.000000e-01 : f32
    %256 = vector.broadcast %cst_112 : f32 to vector<1x8xf32>
    %257 = arith.mulf %256, %255 : vector<1x8xf32>
    %258 = vector.extract_strided_slice %249 {offsets = [0, 128], sizes = [1, 8], strides = [1, 1]} : vector<1x512xf32> to vector<1x8xf32>
    %cst_113 = arith.constant 5.000000e-01 : f32
    %259 = vector.broadcast %cst_113 : f32 to vector<1x8xf32>
    %260 = arith.mulf %259, %258 : vector<1x8xf32>
    %261 = math.tanh %260 : vector<1x8xf32>
    %cst_114 = arith.constant 1.000000e+00 : f32
    %262 = vector.broadcast %cst_114 : f32 to vector<1x8xf32>
    %263 = arith.addf %261, %262 : vector<1x8xf32>
    %cst_115 = arith.constant 5.000000e-01 : f32
    %264 = vector.broadcast %cst_115 : f32 to vector<1x8xf32>
    %265 = arith.mulf %264, %263 : vector<1x8xf32>
    %266 = vector.extract_strided_slice %249 {offsets = [0, 256], sizes = [1, 8], strides = [1, 1]} : vector<1x512xf32> to vector<1x8xf32>
    %267 = math.tanh %266 : vector<1x8xf32>
    %268 = vector.extract_strided_slice %249 {offsets = [0, 384], sizes = [1, 8], strides = [1, 1]} : vector<1x512xf32> to vector<1x8xf32>
    %cst_116 = arith.constant 5.000000e-01 : f32
    %269 = vector.broadcast %cst_116 : f32 to vector<1x8xf32>
    %270 = arith.mulf %269, %268 : vector<1x8xf32>
    %271 = math.tanh %270 : vector<1x8xf32>
    %cst_117 = arith.constant 1.000000e+00 : f32
    %272 = vector.broadcast %cst_117 : f32 to vector<1x8xf32>
    %273 = arith.addf %271, %272 : vector<1x8xf32>
    %cst_118 = arith.constant 5.000000e-01 : f32
    %274 = vector.broadcast %cst_118 : f32 to vector<1x8xf32>
    %275 = arith.mulf %274, %273 : vector<1x8xf32>
    %276 = arith.mulf %265, %128 : vector<1x8xf32>
    %277 = arith.mulf %257, %267 : vector<1x8xf32>
    %278 = arith.addf %276, %277 : vector<1x8xf32>
    %279 = math.tanh %278 : vector<1x8xf32>
    %280 = arith.mulf %275, %279 : vector<1x8xf32>
    %c80_119 = arith.constant 80 : index
    %c0_120 = arith.constant 0 : index
    %281 = vector.load %arg3[%c80_119, %c0_120] : memref<96x512xf32, #tpu.memory_space<vmem>>, vector<1x512xf32>
    %c72_121 = arith.constant 72 : index
    %c0_122 = arith.constant 0 : index
    %282 = vector.load %arg3[%c72_121, %c0_122] : memref<96x512xf32, #tpu.memory_space<vmem>>, vector<8x512xf32>
    %c88_123 = arith.constant 88 : index
    %c0_124 = arith.constant 0 : index
    %283 = vector.load %arg3[%c88_123, %c0_124] : memref<96x512xf32, #tpu.memory_space<vmem>>, vector<1x512xf32>
    %cst_125 = arith.constant dense<0.000000e+00> : vector<1x512xf32>
    %284 = tpu.matmul %280, %282, %cst_125 {dimension_numbers = #tpu.dot_dimension_numbers<[1], [0], [0], [1], [0, 0, 1, 1], [], []>} : vector<1x8xf32>, vector<8x512xf32>, vector<1x512xf32> -> vector<1x512xf32>
    %285 = arith.addf %284, %283 : vector<1x512xf32>
    %cst_126 = arith.constant dense<0.000000e+00> : vector<1x512xf32>
    %286 = tpu.matmul %168, %281, %cst_126 {dimension_numbers = #tpu.dot_dimension_numbers<[1], [0], [0], [1], [0, 0, 1, 1], [], []>} : vector<1x1xf32>, vector<1x512xf32>, vector<1x512xf32> -> vector<1x512xf32>
    %287 = arith.addf %285, %286 : vector<1x512xf32>
    %288 = vector.extract_strided_slice %287 {offsets = [0, 0], sizes = [1, 1], strides = [1, 1]} : vector<1x512xf32> to vector<1x1xf32>
    %cst_127 = arith.constant 5.000000e-01 : f32
    %289 = vector.broadcast %cst_127 : f32 to vector<1x1xf32>
    %290 = arith.mulf %289, %288 : vector<1x1xf32>
    %291 = math.tanh %290 : vector<1x1xf32>
    %cst_128 = arith.constant 1.000000e+00 : f32
    %292 = vector.broadcast %cst_128 : f32 to vector<1x1xf32>
    %293 = arith.addf %291, %292 : vector<1x1xf32>
    %cst_129 = arith.constant 5.000000e-01 : f32
    %294 = vector.broadcast %cst_129 : f32 to vector<1x1xf32>
    %295 = arith.mulf %294, %293 : vector<1x1xf32>
    %296 = vector.extract_strided_slice %287 {offsets = [0, 128], sizes = [1, 1], strides = [1, 1]} : vector<1x512xf32> to vector<1x1xf32>
    %cst_130 = arith.constant 5.000000e-01 : f32
    %297 = vector.broadcast %cst_130 : f32 to vector<1x1xf32>
    %298 = arith.mulf %297, %296 : vector<1x1xf32>
    %299 = math.tanh %298 : vector<1x1xf32>
    %cst_131 = arith.constant 1.000000e+00 : f32
    %300 = vector.broadcast %cst_131 : f32 to vector<1x1xf32>
    %301 = arith.addf %299, %300 : vector<1x1xf32>
    %cst_132 = arith.constant 5.000000e-01 : f32
    %302 = vector.broadcast %cst_132 : f32 to vector<1x1xf32>
    %303 = arith.mulf %302, %301 : vector<1x1xf32>
    %304 = vector.extract_strided_slice %287 {offsets = [0, 256], sizes = [1, 1], strides = [1, 1]} : vector<1x512xf32> to vector<1x1xf32>
    %305 = math.tanh %304 : vector<1x1xf32>
    %306 = vector.extract_strided_slice %287 {offsets = [0, 384], sizes = [1, 1], strides = [1, 1]} : vector<1x512xf32> to vector<1x1xf32>
    %cst_133 = arith.constant 5.000000e-01 : f32
    %307 = vector.broadcast %cst_133 : f32 to vector<1x1xf32>
    %308 = arith.mulf %307, %306 : vector<1x1xf32>
    %309 = math.tanh %308 : vector<1x1xf32>
    %cst_134 = arith.constant 1.000000e+00 : f32
    %310 = vector.broadcast %cst_134 : f32 to vector<1x1xf32>
    %311 = arith.addf %309, %310 : vector<1x1xf32>
    %cst_135 = arith.constant 5.000000e-01 : f32
    %312 = vector.broadcast %cst_135 : f32 to vector<1x1xf32>
    %313 = arith.mulf %312, %311 : vector<1x1xf32>
    %314 = arith.mulf %303, %166 : vector<1x1xf32>
    %315 = arith.mulf %295, %305 : vector<1x1xf32>
    %316 = arith.addf %314, %315 : vector<1x1xf32>
    %317 = math.tanh %316 : vector<1x1xf32>
    %318 = arith.mulf %313, %317 : vector<1x1xf32>
    %c1_136 = arith.constant 1 : index
    %c0_137 = arith.constant 0 : index
    %319 = vector.load %arg15[%c1_136, %c0_137] : memref<8x1xf32, #tpu.memory_space<vmem>>, vector<1x1xf32>
    tpu.vector_store %arg15[%c1_136, %c0_137], %318 {strides = array<i32>} : memref<8x1xf32, #tpu.memory_space<vmem>>, vector<1x1xf32>,
    %c8_138 = arith.constant 8 : index
    %c0_139 = arith.constant 0 : index
    %320 = vector.load %arg3[%c8_138, %c0_139] : memref<96x512xf32, #tpu.memory_space<vmem>>, vector<8x512xf32>
    %c2 = arith.constant 2 : index
    %c0_140 = arith.constant 0 : index
    %321 = vector.load %arg14[%c2, %c0_140] : memref<8x512xf32, #tpu.memory_space<vmem>>, vector<1x512xf32>
    %cst_141 = arith.constant dense<0.000000e+00> : vector<1x512xf32>
    %322 = tpu.matmul %204, %320, %cst_141 {dimension_numbers = #tpu.dot_dimension_numbers<[1], [0], [0], [1], [0, 0, 1, 1], [], []>} : vector<1x8xf32>, vector<8x512xf32>, vector<1x512xf32> -> vector<1x512xf32>
    %323 = arith.addf %321, %322 : vector<1x512xf32>
    %324 = vector.extract_strided_slice %323 {offsets = [0, 0], sizes = [1, 8], strides = [1, 1]} : vector<1x512xf32> to vector<1x8xf32>
    %cst_142 = arith.constant 5.000000e-01 : f32
    %325 = vector.broadcast %cst_142 : f32 to vector<1x8xf32>
    %326 = arith.mulf %325, %324 : vector<1x8xf32>
    %327 = math.tanh %326 : vector<1x8xf32>
    %cst_143 = arith.constant 1.000000e+00 : f32
    %328 = vector.broadcast %cst_143 : f32 to vector<1x8xf32>
    %329 = arith.addf %327, %328 : vector<1x8xf32>
    %cst_144 = arith.constant 5.000000e-01 : f32
    %330 = vector.broadcast %cst_144 : f32 to vector<1x8xf32>
    %331 = arith.mulf %330, %329 : vector<1x8xf32>
    %332 = vector.extract_strided_slice %323 {offsets = [0, 128], sizes = [1, 8], strides = [1, 1]} : vector<1x512xf32> to vector<1x8xf32>
    %cst_145 = arith.constant 5.000000e-01 : f32
    %333 = vector.broadcast %cst_145 : f32 to vector<1x8xf32>
    %334 = arith.mulf %333, %332 : vector<1x8xf32>
    %335 = math.tanh %334 : vector<1x8xf32>
    %cst_146 = arith.constant 1.000000e+00 : f32
    %336 = vector.broadcast %cst_146 : f32 to vector<1x8xf32>
    %337 = arith.addf %335, %336 : vector<1x8xf32>
    %cst_147 = arith.constant 5.000000e-01 : f32
    %338 = vector.broadcast %cst_147 : f32 to vector<1x8xf32>
    %339 = arith.mulf %338, %337 : vector<1x8xf32>
    %340 = vector.extract_strided_slice %323 {offsets = [0, 256], sizes = [1, 8], strides = [1, 1]} : vector<1x512xf32> to vector<1x8xf32>
    %341 = math.tanh %340 : vector<1x8xf32>
    %342 = vector.extract_strided_slice %323 {offsets = [0, 384], sizes = [1, 8], strides = [1, 1]} : vector<1x512xf32> to vector<1x8xf32>
    %cst_148 = arith.constant 5.000000e-01 : f32
    %343 = vector.broadcast %cst_148 : f32 to vector<1x8xf32>
    %344 = arith.mulf %343, %342 : vector<1x8xf32>
    %345 = math.tanh %344 : vector<1x8xf32>
    %cst_149 = arith.constant 1.000000e+00 : f32
    %346 = vector.broadcast %cst_149 : f32 to vector<1x8xf32>
    %347 = arith.addf %345, %346 : vector<1x8xf32>
    %cst_150 = arith.constant 5.000000e-01 : f32
    %348 = vector.broadcast %cst_150 : f32 to vector<1x8xf32>
    %349 = arith.mulf %348, %347 : vector<1x8xf32>
    %350 = arith.mulf %339, %202 : vector<1x8xf32>
    %351 = arith.mulf %331, %341 : vector<1x8xf32>
    %352 = arith.addf %350, %351 : vector<1x8xf32>
    %353 = math.tanh %352 : vector<1x8xf32>
    %354 = arith.mulf %349, %353 : vector<1x8xf32>
    %c32_151 = arith.constant 32 : index
    %c0_152 = arith.constant 0 : index
    %355 = vector.load %arg3[%c32_151, %c0_152] : memref<96x512xf32, #tpu.memory_space<vmem>>, vector<8x512xf32>
    %c24_153 = arith.constant 24 : index
    %c0_154 = arith.constant 0 : index
    %356 = vector.load %arg3[%c24_153, %c0_154] : memref<96x512xf32, #tpu.memory_space<vmem>>, vector<8x512xf32>
    %c40_155 = arith.constant 40 : index
    %c0_156 = arith.constant 0 : index
    %357 = vector.load %arg3[%c40_155, %c0_156] : memref<96x512xf32, #tpu.memory_space<vmem>>, vector<1x512xf32>
    %cst_157 = arith.constant dense<0.000000e+00> : vector<1x512xf32>
    %358 = tpu.matmul %354, %356, %cst_157 {dimension_numbers = #tpu.dot_dimension_numbers<[1], [0], [0], [1], [0, 0, 1, 1], [], []>} : vector<1x8xf32>, vector<8x512xf32>, vector<1x512xf32> -> vector<1x512xf32>
    %359 = arith.addf %358, %357 : vector<1x512xf32>
    %cst_158 = arith.constant dense<0.000000e+00> : vector<1x512xf32>
    %360 = tpu.matmul %242, %355, %cst_158 {dimension_numbers = #tpu.dot_dimension_numbers<[1], [0], [0], [1], [0, 0, 1, 1], [], []>} : vector<1x8xf32>, vector<8x512xf32>, vector<1x512xf32> -> vector<1x512xf32>
    %361 = arith.addf %359, %360 : vector<1x512xf32>
    %362 = vector.extract_strided_slice %361 {offsets = [0, 0], sizes = [1, 8], strides = [1, 1]} : vector<1x512xf32> to vector<1x8xf32>
    %cst_159 = arith.constant 5.000000e-01 : f32
    %363 = vector.broadcast %cst_159 : f32 to vector<1x8xf32>
    %364 = arith.mulf %363, %362 : vector<1x8xf32>
    %365 = math.tanh %364 : vector<1x8xf32>
    %cst_160 = arith.constant 1.000000e+00 : f32
    %366 = vector.broadcast %cst_160 : f32 to vector<1x8xf32>
    %367 = arith.addf %365, %366 : vector<1x8xf32>
    %cst_161 = arith.constant 5.000000e-01 : f32
    %368 = vector.broadcast %cst_161 : f32 to vector<1x8xf32>
    %369 = arith.mulf %368, %367 : vector<1x8xf32>
    %370 = vector.extract_strided_slice %361 {offsets = [0, 128], sizes = [1, 8], strides = [1, 1]} : vector<1x512xf32> to vector<1x8xf32>
    %cst_162 = arith.constant 5.000000e-01 : f32
    %371 = vector.broadcast %cst_162 : f32 to vector<1x8xf32>
    %372 = arith.mulf %371, %370 : vector<1x8xf32>
    %373 = math.tanh %372 : vector<1x8xf32>
    %cst_163 = arith.constant 1.000000e+00 : f32
    %374 = vector.broadcast %cst_163 : f32 to vector<1x8xf32>
    %375 = arith.addf %373, %374 : vector<1x8xf32>
    %cst_164 = arith.constant 5.000000e-01 : f32
    %376 = vector.broadcast %cst_164 : f32 to vector<1x8xf32>
    %377 = arith.mulf %376, %375 : vector<1x8xf32>
    %378 = vector.extract_strided_slice %361 {offsets = [0, 256], sizes = [1, 8], strides = [1, 1]} : vector<1x512xf32> to vector<1x8xf32>
    %379 = math.tanh %378 : vector<1x8xf32>
    %380 = vector.extract_strided_slice %361 {offsets = [0, 384], sizes = [1, 8], strides = [1, 1]} : vector<1x512xf32> to vector<1x8xf32>
    %cst_165 = arith.constant 5.000000e-01 : f32
    %381 = vector.broadcast %cst_165 : f32 to vector<1x8xf32>
    %382 = arith.mulf %381, %380 : vector<1x8xf32>
    %383 = math.tanh %382 : vector<1x8xf32>
    %cst_166 = arith.constant 1.000000e+00 : f32
    %384 = vector.broadcast %cst_166 : f32 to vector<1x8xf32>
    %385 = arith.addf %383, %384 : vector<1x8xf32>
    %cst_167 = arith.constant 5.000000e-01 : f32
    %386 = vector.broadcast %cst_167 : f32 to vector<1x8xf32>
    %387 = arith.mulf %386, %385 : vector<1x8xf32>
    %388 = arith.mulf %377, %240 : vector<1x8xf32>
    %389 = arith.mulf %369, %379 : vector<1x8xf32>
    %390 = arith.addf %388, %389 : vector<1x8xf32>
    %391 = math.tanh %390 : vector<1x8xf32>
    %392 = arith.mulf %387, %391 : vector<1x8xf32>
    %c56_168 = arith.constant 56 : index
    %c0_169 = arith.constant 0 : index
    %393 = vector.load %arg3[%c56_168, %c0_169] : memref<96x512xf32, #tpu.memory_space<vmem>>, vector<8x512xf32>
    %c48_170 = arith.constant 48 : index
    %c0_171 = arith.constant 0 : index
    %394 = vector.load %arg3[%c48_170, %c0_171] : memref<96x512xf32, #tpu.memory_space<vmem>>, vector<8x512xf32>
    %c64_172 = arith.constant 64 : index
    %c0_173 = arith.constant 0 : index
    %395 = vector.load %arg3[%c64_172, %c0_173] : memref<96x512xf32, #tpu.memory_space<vmem>>, vector<1x512xf32>
    %cst_174 = arith.constant dense<0.000000e+00> : vector<1x512xf32>
    %396 = tpu.matmul %392, %394, %cst_174 {dimension_numbers = #tpu.dot_dimension_numbers<[1], [0], [0], [1], [0, 0, 1, 1], [], []>} : vector<1x8xf32>, vector<8x512xf32>, vector<1x512xf32> -> vector<1x512xf32>
    %397 = arith.addf %396, %395 : vector<1x512xf32>
    %cst_175 = arith.constant dense<0.000000e+00> : vector<1x512xf32>
    %398 = tpu.matmul %280, %393, %cst_175 {dimension_numbers = #tpu.dot_dimension_numbers<[1], [0], [0], [1], [0, 0, 1, 1], [], []>} : vector<1x8xf32>, vector<8x512xf32>, vector<1x512xf32> -> vector<1x512xf32>
    %399 = arith.addf %397, %398 : vector<1x512xf32>
    %400 = vector.extract_strided_slice %399 {offsets = [0, 0], sizes = [1, 8], strides = [1, 1]} : vector<1x512xf32> to vector<1x8xf32>
    %cst_176 = arith.constant 5.000000e-01 : f32
    %401 = vector.broadcast %cst_176 : f32 to vector<1x8xf32>
    %402 = arith.mulf %401, %400 : vector<1x8xf32>
    %403 = math.tanh %402 : vector<1x8xf32>
    %cst_177 = arith.constant 1.000000e+00 : f32
    %404 = vector.broadcast %cst_177 : f32 to vector<1x8xf32>
    %405 = arith.addf %403, %404 : vector<1x8xf32>
    %cst_178 = arith.constant 5.000000e-01 : f32
    %406 = vector.broadcast %cst_178 : f32 to vector<1x8xf32>
    %407 = arith.mulf %406, %405 : vector<1x8xf32>
    %408 = vector.extract_strided_slice %399 {offsets = [0, 128], sizes = [1, 8], strides = [1, 1]} : vector<1x512xf32> to vector<1x8xf32>
    %cst_179 = arith.constant 5.000000e-01 : f32
    %409 = vector.broadcast %cst_179 : f32 to vector<1x8xf32>
    %410 = arith.mulf %409, %408 : vector<1x8xf32>
    %411 = math.tanh %410 : vector<1x8xf32>
    %cst_180 = arith.constant 1.000000e+00 : f32
    %412 = vector.broadcast %cst_180 : f32 to vector<1x8xf32>
    %413 = arith.addf %411, %412 : vector<1x8xf32>
    %cst_181 = arith.constant 5.000000e-01 : f32
    %414 = vector.broadcast %cst_181 : f32 to vector<1x8xf32>
    %415 = arith.mulf %414, %413 : vector<1x8xf32>
    %416 = vector.extract_strided_slice %399 {offsets = [0, 256], sizes = [1, 8], strides = [1, 1]} : vector<1x512xf32> to vector<1x8xf32>
    %417 = math.tanh %416 : vector<1x8xf32>
    %418 = vector.extract_strided_slice %399 {offsets = [0, 384], sizes = [1, 8], strides = [1, 1]} : vector<1x512xf32> to vector<1x8xf32>
    %cst_182 = arith.constant 5.000000e-01 : f32
    %419 = vector.broadcast %cst_182 : f32 to vector<1x8xf32>
    %420 = arith.mulf %419, %418 : vector<1x8xf32>
    %421 = math.tanh %420 : vector<1x8xf32>
    %cst_183 = arith.constant 1.000000e+00 : f32
    %422 = vector.broadcast %cst_183 : f32 to vector<1x8xf32>
    %423 = arith.addf %421, %422 : vector<1x8xf32>
    %cst_184 = arith.constant 5.000000e-01 : f32
    %424 = vector.broadcast %cst_184 : f32 to vector<1x8xf32>
    %425 = arith.mulf %424, %423 : vector<1x8xf32>
    %426 = arith.mulf %415, %278 : vector<1x8xf32>
    %427 = arith.mulf %407, %417 : vector<1x8xf32>
    %428 = arith.addf %426, %427 : vector<1x8xf32>
    %429 = math.tanh %428 : vector<1x8xf32>
    %430 = arith.mulf %425, %429 : vector<1x8xf32>
    %c80_185 = arith.constant 80 : index
    %c0_186 = arith.constant 0 : index
    %431 = vector.load %arg3[%c80_185, %c0_186] : memref<96x512xf32, #tpu.memory_space<vmem>>, vector<1x512xf32>
    %c72_187 = arith.constant 72 : index
    %c0_188 = arith.constant 0 : index
    %432 = vector.load %arg3[%c72_187, %c0_188] : memref<96x512xf32, #tpu.memory_space<vmem>>, vector<8x512xf32>
    %c88_189 = arith.constant 88 : index
    %c0_190 = arith.constant 0 : index
    %433 = vector.load %arg3[%c88_189, %c0_190] : memref<96x512xf32, #tpu.memory_space<vmem>>, vector<1x512xf32>
    %cst_191 = arith.constant dense<0.000000e+00> : vector<1x512xf32>
    %434 = tpu.matmul %430, %432, %cst_191 {dimension_numbers = #tpu.dot_dimension_numbers<[1], [0], [0], [1], [0, 0, 1, 1], [], []>} : vector<1x8xf32>, vector<8x512xf32>, vector<1x512xf32> -> vector<1x512xf32>
    %435 = arith.addf %434, %433 : vector<1x512xf32>
    %cst_192 = arith.constant dense<0.000000e+00> : vector<1x512xf32>
    %436 = tpu.matmul %318, %431, %cst_192 {dimension_numbers = #tpu.dot_dimension_numbers<[1], [0], [0], [1], [0, 0, 1, 1], [], []>} : vector<1x1xf32>, vector<1x512xf32>, vector<1x512xf32> -> vector<1x512xf32>
    %437 = arith.addf %435, %436 : vector<1x512xf32>
    %438 = vector.extract_strided_slice %437 {offsets = [0, 0], sizes = [1, 1], strides = [1, 1]} : vector<1x512xf32> to vector<1x1xf32>
    %cst_193 = arith.constant 5.000000e-01 : f32
    %439 = vector.broadcast %cst_193 : f32 to vector<1x1xf32>
    %440 = arith.mulf %439, %438 : vector<1x1xf32>
    %441 = math.tanh %440 : vector<1x1xf32>
    %cst_194 = arith.constant 1.000000e+00 : f32
    %442 = vector.broadcast %cst_194 : f32 to vector<1x1xf32>
    %443 = arith.addf %441, %442 : vector<1x1xf32>
    %cst_195 = arith.constant 5.000000e-01 : f32
    %444 = vector.broadcast %cst_195 : f32 to vector<1x1xf32>
    %445 = arith.mulf %444, %443 : vector<1x1xf32>
    %446 = vector.extract_strided_slice %437 {offsets = [0, 128], sizes = [1, 1], strides = [1, 1]} : vector<1x512xf32> to vector<1x1xf32>
    %cst_196 = arith.constant 5.000000e-01 : f32
    %447 = vector.broadcast %cst_196 : f32 to vector<1x1xf32>
    %448 = arith.mulf %447, %446 : vector<1x1xf32>
    %449 = math.tanh %448 : vector<1x1xf32>
    %cst_197 = arith.constant 1.000000e+00 : f32
    %450 = vector.broadcast %cst_197 : f32 to vector<1x1xf32>
    %451 = arith.addf %449, %450 : vector<1x1xf32>
    %cst_198 = arith.constant 5.000000e-01 : f32
    %452 = vector.broadcast %cst_198 : f32 to vector<1x1xf32>
    %453 = arith.mulf %452, %451 : vector<1x1xf32>
    %454 = vector.extract_strided_slice %437 {offsets = [0, 256], sizes = [1, 1], strides = [1, 1]} : vector<1x512xf32> to vector<1x1xf32>
    %455 = math.tanh %454 : vector<1x1xf32>
    %456 = vector.extract_strided_slice %437 {offsets = [0, 384], sizes = [1, 1], strides = [1, 1]} : vector<1x512xf32> to vector<1x1xf32>
    %cst_199 = arith.constant 5.000000e-01 : f32
    %457 = vector.broadcast %cst_199 : f32 to vector<1x1xf32>
    %458 = arith.mulf %457, %456 : vector<1x1xf32>
    %459 = math.tanh %458 : vector<1x1xf32>
    %cst_200 = arith.constant 1.000000e+00 : f32
    %460 = vector.broadcast %cst_200 : f32 to vector<1x1xf32>
    %461 = arith.addf %459, %460 : vector<1x1xf32>
    %cst_201 = arith.constant 5.000000e-01 : f32
    %462 = vector.broadcast %cst_201 : f32 to vector<1x1xf32>
    %463 = arith.mulf %462, %461 : vector<1x1xf32>
    %464 = arith.mulf %453, %316 : vector<1x1xf32>
    %465 = arith.mulf %445, %455 : vector<1x1xf32>
    %466 = arith.addf %464, %465 : vector<1x1xf32>
    %467 = math.tanh %466 : vector<1x1xf32>
    %468 = arith.mulf %463, %467 : vector<1x1xf32>
    %c2_202 = arith.constant 2 : index
    %c0_203 = arith.constant 0 : index
    %469 = vector.load %arg15[%c2_202, %c0_203] : memref<8x1xf32, #tpu.memory_space<vmem>>, vector<1x1xf32>
    tpu.vector_store %arg15[%c2_202, %c0_203], %468 {strides = array<i32>} : memref<8x1xf32, #tpu.memory_space<vmem>>, vector<1x1xf32>,
    %c8_204 = arith.constant 8 : index
    %c0_205 = arith.constant 0 : index
    %470 = vector.load %arg3[%c8_204, %c0_205] : memref<96x512xf32, #tpu.memory_space<vmem>>, vector<8x512xf32>
    %c3 = arith.constant 3 : index
    %c0_206 = arith.constant 0 : index
    %471 = vector.load %arg14[%c3, %c0_206] : memref<8x512xf32, #tpu.memory_space<vmem>>, vector<1x512xf32>
    %cst_207 = arith.constant dense<0.000000e+00> : vector<1x512xf32>
    %472 = tpu.matmul %354, %470, %cst_207 {dimension_numbers = #tpu.dot_dimension_numbers<[1], [0], [0], [1], [0, 0, 1, 1], [], []>} : vector<1x8xf32>, vector<8x512xf32>, vector<1x512xf32> -> vector<1x512xf32>
    %473 = arith.addf %471, %472 : vector<1x512xf32>
    %474 = vector.extract_strided_slice %473 {offsets = [0, 0], sizes = [1, 8], strides = [1, 1]} : vector<1x512xf32> to vector<1x8xf32>
    %cst_208 = arith.constant 5.000000e-01 : f32
    %475 = vector.broadcast %cst_208 : f32 to vector<1x8xf32>
    %476 = arith.mulf %475, %474 : vector<1x8xf32>
    %477 = math.tanh %476 : vector<1x8xf32>
    %cst_209 = arith.constant 1.000000e+00 : f32
    %478 = vector.broadcast %cst_209 : f32 to vector<1x8xf32>
    %479 = arith.addf %477, %478 : vector<1x8xf32>
    %cst_210 = arith.constant 5.000000e-01 : f32
    %480 = vector.broadcast %cst_210 : f32 to vector<1x8xf32>
    %481 = arith.mulf %480, %479 : vector<1x8xf32>
    %482 = vector.extract_strided_slice %473 {offsets = [0, 128], sizes = [1, 8], strides = [1, 1]} : vector<1x512xf32> to vector<1x8xf32>
    %cst_211 = arith.constant 5.000000e-01 : f32
    %483 = vector.broadcast %cst_211 : f32 to vector<1x8xf32>
    %484 = arith.mulf %483, %482 : vector<1x8xf32>
    %485 = math.tanh %484 : vector<1x8xf32>
    %cst_212 = arith.constant 1.000000e+00 : f32
    %486 = vector.broadcast %cst_212 : f32 to vector<1x8xf32>
    %487 = arith.addf %485, %486 : vector<1x8xf32>
    %cst_213 = arith.constant 5.000000e-01 : f32
    %488 = vector.broadcast %cst_213 : f32 to vector<1x8xf32>
    %489 = arith.mulf %488, %487 : vector<1x8xf32>
    %490 = vector.extract_strided_slice %473 {offsets = [0, 256], sizes = [1, 8], strides = [1, 1]} : vector<1x512xf32> to vector<1x8xf32>
    %491 = math.tanh %490 : vector<1x8xf32>
    %492 = vector.extract_strided_slice %473 {offsets = [0, 384], sizes = [1, 8], strides = [1, 1]} : vector<1x512xf32> to vector<1x8xf32>
    %cst_214 = arith.constant 5.000000e-01 : f32
    %493 = vector.broadcast %cst_214 : f32 to vector<1x8xf32>
    %494 = arith.mulf %493, %492 : vector<1x8xf32>
    %495 = math.tanh %494 : vector<1x8xf32>
    %cst_215 = arith.constant 1.000000e+00 : f32
    %496 = vector.broadcast %cst_215 : f32 to vector<1x8xf32>
    %497 = arith.addf %495, %496 : vector<1x8xf32>
    %cst_216 = arith.constant 5.000000e-01 : f32
    %498 = vector.broadcast %cst_216 : f32 to vector<1x8xf32>
    %499 = arith.mulf %498, %497 : vector<1x8xf32>
    %500 = arith.mulf %489, %352 : vector<1x8xf32>
    %501 = arith.mulf %481, %491 : vector<1x8xf32>
    %502 = arith.addf %500, %501 : vector<1x8xf32>
    %503 = math.tanh %502 : vector<1x8xf32>
    %504 = arith.mulf %499, %503 : vector<1x8xf32>
    %c32_217 = arith.constant 32 : index
    %c0_218 = arith.constant 0 : index
    %505 = vector.load %arg3[%c32_217, %c0_218] : memref<96x512xf32, #tpu.memory_space<vmem>>, vector<8x512xf32>
    %c24_219 = arith.constant 24 : index
    %c0_220 = arith.constant 0 : index
    %506 = vector.load %arg3[%c24_219, %c0_220] : memref<96x512xf32, #tpu.memory_space<vmem>>, vector<8x512xf32>
    %c40_221 = arith.constant 40 : index
    %c0_222 = arith.constant 0 : index
    %507 = vector.load %arg3[%c40_221, %c0_222] : memref<96x512xf32, #tpu.memory_space<vmem>>, vector<1x512xf32>
    %cst_223 = arith.constant dense<0.000000e+00> : vector<1x512xf32>
    %508 = tpu.matmul %504, %506, %cst_223 {dimension_numbers = #tpu.dot_dimension_numbers<[1], [0], [0], [1], [0, 0, 1, 1], [], []>} : vector<1x8xf32>, vector<8x512xf32>, vector<1x512xf32> -> vector<1x512xf32>
    %509 = arith.addf %508, %507 : vector<1x512xf32>
    %cst_224 = arith.constant dense<0.000000e+00> : vector<1x512xf32>
    %510 = tpu.matmul %392, %505, %cst_224 {dimension_numbers = #tpu.dot_dimension_numbers<[1], [0], [0], [1], [0, 0, 1, 1], [], []>} : vector<1x8xf32>, vector<8x512xf32>, vector<1x512xf32> -> vector<1x512xf32>
    %511 = arith.addf %509, %510 : vector<1x512xf32>
    %512 = vector.extract_strided_slice %511 {offsets = [0, 0], sizes = [1, 8], strides = [1, 1]} : vector<1x512xf32> to vector<1x8xf32>
    %cst_225 = arith.constant 5.000000e-01 : f32
    %513 = vector.broadcast %cst_225 : f32 to vector<1x8xf32>
    %514 = arith.mulf %513, %512 : vector<1x8xf32>
    %515 = math.tanh %514 : vector<1x8xf32>
    %cst_226 = arith.constant 1.000000e+00 : f32
    %516 = vector.broadcast %cst_226 : f32 to vector<1x8xf32>
    %517 = arith.addf %515, %516 : vector<1x8xf32>
    %cst_227 = arith.constant 5.000000e-01 : f32
    %518 = vector.broadcast %cst_227 : f32 to vector<1x8xf32>
    %519 = arith.mulf %518, %517 : vector<1x8xf32>
    %520 = vector.extract_strided_slice %511 {offsets = [0, 128], sizes = [1, 8], strides = [1, 1]} : vector<1x512xf32> to vector<1x8xf32>
    %cst_228 = arith.constant 5.000000e-01 : f32
    %521 = vector.broadcast %cst_228 : f32 to vector<1x8xf32>
    %522 = arith.mulf %521, %520 : vector<1x8xf32>
    %523 = math.tanh %522 : vector<1x8xf32>
    %cst_229 = arith.constant 1.000000e+00 : f32
    %524 = vector.broadcast %cst_229 : f32 to vector<1x8xf32>
    %525 = arith.addf %523, %524 : vector<1x8xf32>
    %cst_230 = arith.constant 5.000000e-01 : f32
    %526 = vector.broadcast %cst_230 : f32 to vector<1x8xf32>
    %527 = arith.mulf %526, %525 : vector<1x8xf32>
    %528 = vector.extract_strided_slice %511 {offsets = [0, 256], sizes = [1, 8], strides = [1, 1]} : vector<1x512xf32> to vector<1x8xf32>
    %529 = math.tanh %528 : vector<1x8xf32>
    %530 = vector.extract_strided_slice %511 {offsets = [0, 384], sizes = [1, 8], strides = [1, 1]} : vector<1x512xf32> to vector<1x8xf32>
    %cst_231 = arith.constant 5.000000e-01 : f32
    %531 = vector.broadcast %cst_231 : f32 to vector<1x8xf32>
    %532 = arith.mulf %531, %530 : vector<1x8xf32>
    %533 = math.tanh %532 : vector<1x8xf32>
    %cst_232 = arith.constant 1.000000e+00 : f32
    %534 = vector.broadcast %cst_232 : f32 to vector<1x8xf32>
    %535 = arith.addf %533, %534 : vector<1x8xf32>
    %cst_233 = arith.constant 5.000000e-01 : f32
    %536 = vector.broadcast %cst_233 : f32 to vector<1x8xf32>
    %537 = arith.mulf %536, %535 : vector<1x8xf32>
    %538 = arith.mulf %527, %390 : vector<1x8xf32>
    %539 = arith.mulf %519, %529 : vector<1x8xf32>
    %540 = arith.addf %538, %539 : vector<1x8xf32>
    %541 = math.tanh %540 : vector<1x8xf32>
    %542 = arith.mulf %537, %541 : vector<1x8xf32>
    %c56_234 = arith.constant 56 : index
    %c0_235 = arith.constant 0 : index
    %543 = vector.load %arg3[%c56_234, %c0_235] : memref<96x512xf32, #tpu.memory_space<vmem>>, vector<8x512xf32>
    %c48_236 = arith.constant 48 : index
    %c0_237 = arith.constant 0 : index
    %544 = vector.load %arg3[%c48_236, %c0_237] : memref<96x512xf32, #tpu.memory_space<vmem>>, vector<8x512xf32>
    %c64_238 = arith.constant 64 : index
    %c0_239 = arith.constant 0 : index
    %545 = vector.load %arg3[%c64_238, %c0_239] : memref<96x512xf32, #tpu.memory_space<vmem>>, vector<1x512xf32>
    %cst_240 = arith.constant dense<0.000000e+00> : vector<1x512xf32>
    %546 = tpu.matmul %542, %544, %cst_240 {dimension_numbers = #tpu.dot_dimension_numbers<[1], [0], [0], [1], [0, 0, 1, 1], [], []>} : vector<1x8xf32>, vector<8x512xf32>, vector<1x512xf32> -> vector<1x512xf32>
    %547 = arith.addf %546, %545 : vector<1x512xf32>
    %cst_241 = arith.constant dense<0.000000e+00> : vector<1x512xf32>
    %548 = tpu.matmul %430, %543, %cst_241 {dimension_numbers = #tpu.dot_dimension_numbers<[1], [0], [0], [1], [0, 0, 1, 1], [], []>} : vector<1x8xf32>, vector<8x512xf32>, vector<1x512xf32> -> vector<1x512xf32>
    %549 = arith.addf %547, %548 : vector<1x512xf32>
    %550 = vector.extract_strided_slice %549 {offsets = [0, 0], sizes = [1, 8], strides = [1, 1]} : vector<1x512xf32> to vector<1x8xf32>
    %cst_242 = arith.constant 5.000000e-01 : f32
    %551 = vector.broadcast %cst_242 : f32 to vector<1x8xf32>
    %552 = arith.mulf %551, %550 : vector<1x8xf32>
    %553 = math.tanh %552 : vector<1x8xf32>
    %cst_243 = arith.constant 1.000000e+00 : f32
    %554 = vector.broadcast %cst_243 : f32 to vector<1x8xf32>
    %555 = arith.addf %553, %554 : vector<1x8xf32>
    %cst_244 = arith.constant 5.000000e-01 : f32
    %556 = vector.broadcast %cst_244 : f32 to vector<1x8xf32>
    %557 = arith.mulf %556, %555 : vector<1x8xf32>
    %558 = vector.extract_strided_slice %549 {offsets = [0, 128], sizes = [1, 8], strides = [1, 1]} : vector<1x512xf32> to vector<1x8xf32>
    %cst_245 = arith.constant 5.000000e-01 : f32
    %559 = vector.broadcast %cst_245 : f32 to vector<1x8xf32>
    %560 = arith.mulf %559, %558 : vector<1x8xf32>
    %561 = math.tanh %560 : vector<1x8xf32>
    %cst_246 = arith.constant 1.000000e+00 : f32
    %562 = vector.broadcast %cst_246 : f32 to vector<1x8xf32>
    %563 = arith.addf %561, %562 : vector<1x8xf32>
    %cst_247 = arith.constant 5.000000e-01 : f32
    %564 = vector.broadcast %cst_247 : f32 to vector<1x8xf32>
    %565 = arith.mulf %564, %563 : vector<1x8xf32>
    %566 = vector.extract_strided_slice %549 {offsets = [0, 256], sizes = [1, 8], strides = [1, 1]} : vector<1x512xf32> to vector<1x8xf32>
    %567 = math.tanh %566 : vector<1x8xf32>
    %568 = vector.extract_strided_slice %549 {offsets = [0, 384], sizes = [1, 8], strides = [1, 1]} : vector<1x512xf32> to vector<1x8xf32>
    %cst_248 = arith.constant 5.000000e-01 : f32
    %569 = vector.broadcast %cst_248 : f32 to vector<1x8xf32>
    %570 = arith.mulf %569, %568 : vector<1x8xf32>
    %571 = math.tanh %570 : vector<1x8xf32>
    %cst_249 = arith.constant 1.000000e+00 : f32
    %572 = vector.broadcast %cst_249 : f32 to vector<1x8xf32>
    %573 = arith.addf %571, %572 : vector<1x8xf32>
    %cst_250 = arith.constant 5.000000e-01 : f32
    %574 = vector.broadcast %cst_250 : f32 to vector<1x8xf32>
    %575 = arith.mulf %574, %573 : vector<1x8xf32>
    %576 = arith.mulf %565, %428 : vector<1x8xf32>
    %577 = arith.mulf %557, %567 : vector<1x8xf32>
    %578 = arith.addf %576, %577 : vector<1x8xf32>
    %579 = math.tanh %578 : vector<1x8xf32>
    %580 = arith.mulf %575, %579 : vector<1x8xf32>
    %c80_251 = arith.constant 80 : index
    %c0_252 = arith.constant 0 : index
    %581 = vector.load %arg3[%c80_251, %c0_252] : memref<96x512xf32, #tpu.memory_space<vmem>>, vector<1x512xf32>
    %c72_253 = arith.constant 72 : index
    %c0_254 = arith.constant 0 : index
    %582 = vector.load %arg3[%c72_253, %c0_254] : memref<96x512xf32, #tpu.memory_space<vmem>>, vector<8x512xf32>
    %c88_255 = arith.constant 88 : index
    %c0_256 = arith.constant 0 : index
    %583 = vector.load %arg3[%c88_255, %c0_256] : memref<96x512xf32, #tpu.memory_space<vmem>>, vector<1x512xf32>
    %cst_257 = arith.constant dense<0.000000e+00> : vector<1x512xf32>
    %584 = tpu.matmul %580, %582, %cst_257 {dimension_numbers = #tpu.dot_dimension_numbers<[1], [0], [0], [1], [0, 0, 1, 1], [], []>} : vector<1x8xf32>, vector<8x512xf32>, vector<1x512xf32> -> vector<1x512xf32>
    %585 = arith.addf %584, %583 : vector<1x512xf32>
    %cst_258 = arith.constant dense<0.000000e+00> : vector<1x512xf32>
    %586 = tpu.matmul %468, %581, %cst_258 {dimension_numbers = #tpu.dot_dimension_numbers<[1], [0], [0], [1], [0, 0, 1, 1], [], []>} : vector<1x1xf32>, vector<1x512xf32>, vector<1x512xf32> -> vector<1x512xf32>
    %587 = arith.addf %585, %586 : vector<1x512xf32>
    %588 = vector.extract_strided_slice %587 {offsets = [0, 0], sizes = [1, 1], strides = [1, 1]} : vector<1x512xf32> to vector<1x1xf32>
    %cst_259 = arith.constant 5.000000e-01 : f32
    %589 = vector.broadcast %cst_259 : f32 to vector<1x1xf32>
    %590 = arith.mulf %589, %588 : vector<1x1xf32>
    %591 = math.tanh %590 : vector<1x1xf32>
    %cst_260 = arith.constant 1.000000e+00 : f32
    %592 = vector.broadcast %cst_260 : f32 to vector<1x1xf32>
    %593 = arith.addf %591, %592 : vector<1x1xf32>
    %cst_261 = arith.constant 5.000000e-01 : f32
    %594 = vector.broadcast %cst_261 : f32 to vector<1x1xf32>
    %595 = arith.mulf %594, %593 : vector<1x1xf32>
    %596 = vector.extract_strided_slice %587 {offsets = [0, 128], sizes = [1, 1], strides = [1, 1]} : vector<1x512xf32> to vector<1x1xf32>
    %cst_262 = arith.constant 5.000000e-01 : f32
    %597 = vector.broadcast %cst_262 : f32 to vector<1x1xf32>
    %598 = arith.mulf %597, %596 : vector<1x1xf32>
    %599 = math.tanh %598 : vector<1x1xf32>
    %cst_263 = arith.constant 1.000000e+00 : f32
    %600 = vector.broadcast %cst_263 : f32 to vector<1x1xf32>
    %601 = arith.addf %599, %600 : vector<1x1xf32>
    %cst_264 = arith.constant 5.000000e-01 : f32
    %602 = vector.broadcast %cst_264 : f32 to vector<1x1xf32>
    %603 = arith.mulf %602, %601 : vector<1x1xf32>
    %604 = vector.extract_strided_slice %587 {offsets = [0, 256], sizes = [1, 1], strides = [1, 1]} : vector<1x512xf32> to vector<1x1xf32>
    %605 = math.tanh %604 : vector<1x1xf32>
    %606 = vector.extract_strided_slice %587 {offsets = [0, 384], sizes = [1, 1], strides = [1, 1]} : vector<1x512xf32> to vector<1x1xf32>
    %cst_265 = arith.constant 5.000000e-01 : f32
    %607 = vector.broadcast %cst_265 : f32 to vector<1x1xf32>
    %608 = arith.mulf %607, %606 : vector<1x1xf32>
    %609 = math.tanh %608 : vector<1x1xf32>
    %cst_266 = arith.constant 1.000000e+00 : f32
    %610 = vector.broadcast %cst_266 : f32 to vector<1x1xf32>
    %611 = arith.addf %609, %610 : vector<1x1xf32>
    %cst_267 = arith.constant 5.000000e-01 : f32
    %612 = vector.broadcast %cst_267 : f32 to vector<1x1xf32>
    %613 = arith.mulf %612, %611 : vector<1x1xf32>
    %614 = arith.mulf %603, %466 : vector<1x1xf32>
    %615 = arith.mulf %595, %605 : vector<1x1xf32>
    %616 = arith.addf %614, %615 : vector<1x1xf32>
    %617 = math.tanh %616 : vector<1x1xf32>
    %618 = arith.mulf %613, %617 : vector<1x1xf32>
    %c3_268 = arith.constant 3 : index
    %c0_269 = arith.constant 0 : index
    %619 = vector.load %arg15[%c3_268, %c0_269] : memref<8x1xf32, #tpu.memory_space<vmem>>, vector<1x1xf32>
    tpu.vector_store %arg15[%c3_268, %c0_269], %618 {strides = array<i32>} : memref<8x1xf32, #tpu.memory_space<vmem>>, vector<1x1xf32>,
    %c8_270 = arith.constant 8 : index
    %c0_271 = arith.constant 0 : index
    %620 = vector.load %arg3[%c8_270, %c0_271] : memref<96x512xf32, #tpu.memory_space<vmem>>, vector<8x512xf32>
    %c4 = arith.constant 4 : index
    %c0_272 = arith.constant 0 : index
    %621 = vector.load %arg14[%c4, %c0_272] : memref<8x512xf32, #tpu.memory_space<vmem>>, vector<1x512xf32>
    %cst_273 = arith.constant dense<0.000000e+00> : vector<1x512xf32>
    %622 = tpu.matmul %504, %620, %cst_273 {dimension_numbers = #tpu.dot_dimension_numbers<[1], [0], [0], [1], [0, 0, 1, 1], [], []>} : vector<1x8xf32>, vector<8x512xf32>, vector<1x512xf32> -> vector<1x512xf32>
    %623 = arith.addf %621, %622 : vector<1x512xf32>
    %624 = vector.extract_strided_slice %623 {offsets = [0, 0], sizes = [1, 8], strides = [1, 1]} : vector<1x512xf32> to vector<1x8xf32>
    %cst_274 = arith.constant 5.000000e-01 : f32
    %625 = vector.broadcast %cst_274 : f32 to vector<1x8xf32>
    %626 = arith.mulf %625, %624 : vector<1x8xf32>
    %627 = math.tanh %626 : vector<1x8xf32>
    %cst_275 = arith.constant 1.000000e+00 : f32
    %628 = vector.broadcast %cst_275 : f32 to vector<1x8xf32>
    %629 = arith.addf %627, %628 : vector<1x8xf32>
    %cst_276 = arith.constant 5.000000e-01 : f32
    %630 = vector.broadcast %cst_276 : f32 to vector<1x8xf32>
    %631 = arith.mulf %630, %629 : vector<1x8xf32>
    %632 = vector.extract_strided_slice %623 {offsets = [0, 128], sizes = [1, 8], strides = [1, 1]} : vector<1x512xf32> to vector<1x8xf32>
    %cst_277 = arith.constant 5.000000e-01 : f32
    %633 = vector.broadcast %cst_277 : f32 to vector<1x8xf32>
    %634 = arith.mulf %633, %632 : vector<1x8xf32>
    %635 = math.tanh %634 : vector<1x8xf32>
    %cst_278 = arith.constant 1.000000e+00 : f32
    %636 = vector.broadcast %cst_278 : f32 to vector<1x8xf32>
    %637 = arith.addf %635, %636 : vector<1x8xf32>
    %cst_279 = arith.constant 5.000000e-01 : f32
    %638 = vector.broadcast %cst_279 : f32 to vector<1x8xf32>
    %639 = arith.mulf %638, %637 : vector<1x8xf32>
    %640 = vector.extract_strided_slice %623 {offsets = [0, 256], sizes = [1, 8], strides = [1, 1]} : vector<1x512xf32> to vector<1x8xf32>
    %641 = math.tanh %640 : vector<1x8xf32>
    %642 = vector.extract_strided_slice %623 {offsets = [0, 384], sizes = [1, 8], strides = [1, 1]} : vector<1x512xf32> to vector<1x8xf32>
    %cst_280 = arith.constant 5.000000e-01 : f32
    %643 = vector.broadcast %cst_280 : f32 to vector<1x8xf32>
    %644 = arith.mulf %643, %642 : vector<1x8xf32>
    %645 = math.tanh %644 : vector<1x8xf32>
    %cst_281 = arith.constant 1.000000e+00 : f32
    %646 = vector.broadcast %cst_281 : f32 to vector<1x8xf32>
    %647 = arith.addf %645, %646 : vector<1x8xf32>
    %cst_282 = arith.constant 5.000000e-01 : f32
    %648 = vector.broadcast %cst_282 : f32 to vector<1x8xf32>
    %649 = arith.mulf %648, %647 : vector<1x8xf32>
    %650 = arith.mulf %639, %502 : vector<1x8xf32>
    %651 = arith.mulf %631, %641 : vector<1x8xf32>
    %652 = arith.addf %650, %651 : vector<1x8xf32>
    %653 = math.tanh %652 : vector<1x8xf32>
    %654 = arith.mulf %649, %653 : vector<1x8xf32>
    %c32_283 = arith.constant 32 : index
    %c0_284 = arith.constant 0 : index
    %655 = vector.load %arg3[%c32_283, %c0_284] : memref<96x512xf32, #tpu.memory_space<vmem>>, vector<8x512xf32>
    %c24_285 = arith.constant 24 : index
    %c0_286 = arith.constant 0 : index
    %656 = vector.load %arg3[%c24_285, %c0_286] : memref<96x512xf32, #tpu.memory_space<vmem>>, vector<8x512xf32>
    %c40_287 = arith.constant 40 : index
    %c0_288 = arith.constant 0 : index
    %657 = vector.load %arg3[%c40_287, %c0_288] : memref<96x512xf32, #tpu.memory_space<vmem>>, vector<1x512xf32>
    %cst_289 = arith.constant dense<0.000000e+00> : vector<1x512xf32>
    %658 = tpu.matmul %654, %656, %cst_289 {dimension_numbers = #tpu.dot_dimension_numbers<[1], [0], [0], [1], [0, 0, 1, 1], [], []>} : vector<1x8xf32>, vector<8x512xf32>, vector<1x512xf32> -> vector<1x512xf32>
    %659 = arith.addf %658, %657 : vector<1x512xf32>
    %cst_290 = arith.constant dense<0.000000e+00> : vector<1x512xf32>
    %660 = tpu.matmul %542, %655, %cst_290 {dimension_numbers = #tpu.dot_dimension_numbers<[1], [0], [0], [1], [0, 0, 1, 1], [], []>} : vector<1x8xf32>, vector<8x512xf32>, vector<1x512xf32> -> vector<1x512xf32>
    %661 = arith.addf %659, %660 : vector<1x512xf32>
    %662 = vector.extract_strided_slice %661 {offsets = [0, 0], sizes = [1, 8], strides = [1, 1]} : vector<1x512xf32> to vector<1x8xf32>
    %cst_291 = arith.constant 5.000000e-01 : f32
    %663 = vector.broadcast %cst_291 : f32 to vector<1x8xf32>
    %664 = arith.mulf %663, %662 : vector<1x8xf32>
    %665 = math.tanh %664 : vector<1x8xf32>
    %cst_292 = arith.constant 1.000000e+00 : f32
    %666 = vector.broadcast %cst_292 : f32 to vector<1x8xf32>
    %667 = arith.addf %665, %666 : vector<1x8xf32>
    %cst_293 = arith.constant 5.000000e-01 : f32
    %668 = vector.broadcast %cst_293 : f32 to vector<1x8xf32>
    %669 = arith.mulf %668, %667 : vector<1x8xf32>
    %670 = vector.extract_strided_slice %661 {offsets = [0, 128], sizes = [1, 8], strides = [1, 1]} : vector<1x512xf32> to vector<1x8xf32>
    %cst_294 = arith.constant 5.000000e-01 : f32
    %671 = vector.broadcast %cst_294 : f32 to vector<1x8xf32>
    %672 = arith.mulf %671, %670 : vector<1x8xf32>
    %673 = math.tanh %672 : vector<1x8xf32>
    %cst_295 = arith.constant 1.000000e+00 : f32
    %674 = vector.broadcast %cst_295 : f32 to vector<1x8xf32>
    %675 = arith.addf %673, %674 : vector<1x8xf32>
    %cst_296 = arith.constant 5.000000e-01 : f32
    %676 = vector.broadcast %cst_296 : f32 to vector<1x8xf32>
    %677 = arith.mulf %676, %675 : vector<1x8xf32>
    %678 = vector.extract_strided_slice %661 {offsets = [0, 256], sizes = [1, 8], strides = [1, 1]} : vector<1x512xf32> to vector<1x8xf32>
    %679 = math.tanh %678 : vector<1x8xf32>
    %680 = vector.extract_strided_slice %661 {offsets = [0, 384], sizes = [1, 8], strides = [1, 1]} : vector<1x512xf32> to vector<1x8xf32>
    %cst_297 = arith.constant 5.000000e-01 : f32
    %681 = vector.broadcast %cst_297 : f32 to vector<1x8xf32>
    %682 = arith.mulf %681, %680 : vector<1x8xf32>
    %683 = math.tanh %682 : vector<1x8xf32>
    %cst_298 = arith.constant 1.000000e+00 : f32
    %684 = vector.broadcast %cst_298 : f32 to vector<1x8xf32>
    %685 = arith.addf %683, %684 : vector<1x8xf32>
    %cst_299 = arith.constant 5.000000e-01 : f32
    %686 = vector.broadcast %cst_299 : f32 to vector<1x8xf32>
    %687 = arith.mulf %686, %685 : vector<1x8xf32>
    %688 = arith.mulf %677, %540 : vector<1x8xf32>
    %689 = arith.mulf %669, %679 : vector<1x8xf32>
    %690 = arith.addf %688, %689 : vector<1x8xf32>
    %691 = math.tanh %690 : vector<1x8xf32>
    %692 = arith.mulf %687, %691 : vector<1x8xf32>
    %c56_300 = arith.constant 56 : index
    %c0_301 = arith.constant 0 : index
    %693 = vector.load %arg3[%c56_300, %c0_301] : memref<96x512xf32, #tpu.memory_space<vmem>>, vector<8x512xf32>
    %c48_302 = arith.constant 48 : index
    %c0_303 = arith.constant 0 : index
    %694 = vector.load %arg3[%c48_302, %c0_303] : memref<96x512xf32, #tpu.memory_space<vmem>>, vector<8x512xf32>
    %c64_304 = arith.constant 64 : index
    %c0_305 = arith.constant 0 : index
    %695 = vector.load %arg3[%c64_304, %c0_305] : memref<96x512xf32, #tpu.memory_space<vmem>>, vector<1x512xf32>
    %cst_306 = arith.constant dense<0.000000e+00> : vector<1x512xf32>
    %696 = tpu.matmul %692, %694, %cst_306 {dimension_numbers = #tpu.dot_dimension_numbers<[1], [0], [0], [1], [0, 0, 1, 1], [], []>} : vector<1x8xf32>, vector<8x512xf32>, vector<1x512xf32> -> vector<1x512xf32>
    %697 = arith.addf %696, %695 : vector<1x512xf32>
    %cst_307 = arith.constant dense<0.000000e+00> : vector<1x512xf32>
    %698 = tpu.matmul %580, %693, %cst_307 {dimension_numbers = #tpu.dot_dimension_numbers<[1], [0], [0], [1], [0, 0, 1, 1], [], []>} : vector<1x8xf32>, vector<8x512xf32>, vector<1x512xf32> -> vector<1x512xf32>
    %699 = arith.addf %697, %698 : vector<1x512xf32>
    %700 = vector.extract_strided_slice %699 {offsets = [0, 0], sizes = [1, 8], strides = [1, 1]} : vector<1x512xf32> to vector<1x8xf32>
    %cst_308 = arith.constant 5.000000e-01 : f32
    %701 = vector.broadcast %cst_308 : f32 to vector<1x8xf32>
    %702 = arith.mulf %701, %700 : vector<1x8xf32>
    %703 = math.tanh %702 : vector<1x8xf32>
    %cst_309 = arith.constant 1.000000e+00 : f32
    %704 = vector.broadcast %cst_309 : f32 to vector<1x8xf32>
    %705 = arith.addf %703, %704 : vector<1x8xf32>
    %cst_310 = arith.constant 5.000000e-01 : f32
    %706 = vector.broadcast %cst_310 : f32 to vector<1x8xf32>
    %707 = arith.mulf %706, %705 : vector<1x8xf32>
    %708 = vector.extract_strided_slice %699 {offsets = [0, 128], sizes = [1, 8], strides = [1, 1]} : vector<1x512xf32> to vector<1x8xf32>
    %cst_311 = arith.constant 5.000000e-01 : f32
    %709 = vector.broadcast %cst_311 : f32 to vector<1x8xf32>
    %710 = arith.mulf %709, %708 : vector<1x8xf32>
    %711 = math.tanh %710 : vector<1x8xf32>
    %cst_312 = arith.constant 1.000000e+00 : f32
    %712 = vector.broadcast %cst_312 : f32 to vector<1x8xf32>
    %713 = arith.addf %711, %712 : vector<1x8xf32>
    %cst_313 = arith.constant 5.000000e-01 : f32
    %714 = vector.broadcast %cst_313 : f32 to vector<1x8xf32>
    %715 = arith.mulf %714, %713 : vector<1x8xf32>
    %716 = vector.extract_strided_slice %699 {offsets = [0, 256], sizes = [1, 8], strides = [1, 1]} : vector<1x512xf32> to vector<1x8xf32>
    %717 = math.tanh %716 : vector<1x8xf32>
    %718 = vector.extract_strided_slice %699 {offsets = [0, 384], sizes = [1, 8], strides = [1, 1]} : vector<1x512xf32> to vector<1x8xf32>
    %cst_314 = arith.constant 5.000000e-01 : f32
    %719 = vector.broadcast %cst_314 : f32 to vector<1x8xf32>
    %720 = arith.mulf %719, %718 : vector<1x8xf32>
    %721 = math.tanh %720 : vector<1x8xf32>
    %cst_315 = arith.constant 1.000000e+00 : f32
    %722 = vector.broadcast %cst_315 : f32 to vector<1x8xf32>
    %723 = arith.addf %721, %722 : vector<1x8xf32>
    %cst_316 = arith.constant 5.000000e-01 : f32
    %724 = vector.broadcast %cst_316 : f32 to vector<1x8xf32>
    %725 = arith.mulf %724, %723 : vector<1x8xf32>
    %726 = arith.mulf %715, %578 : vector<1x8xf32>
    %727 = arith.mulf %707, %717 : vector<1x8xf32>
    %728 = arith.addf %726, %727 : vector<1x8xf32>
    %729 = math.tanh %728 : vector<1x8xf32>
    %730 = arith.mulf %725, %729 : vector<1x8xf32>
    %c80_317 = arith.constant 80 : index
    %c0_318 = arith.constant 0 : index
    %731 = vector.load %arg3[%c80_317, %c0_318] : memref<96x512xf32, #tpu.memory_space<vmem>>, vector<1x512xf32>
    %c72_319 = arith.constant 72 : index
    %c0_320 = arith.constant 0 : index
    %732 = vector.load %arg3[%c72_319, %c0_320] : memref<96x512xf32, #tpu.memory_space<vmem>>, vector<8x512xf32>
    %c88_321 = arith.constant 88 : index
    %c0_322 = arith.constant 0 : index
    %733 = vector.load %arg3[%c88_321, %c0_322] : memref<96x512xf32, #tpu.memory_space<vmem>>, vector<1x512xf32>
    %cst_323 = arith.constant dense<0.000000e+00> : vector<1x512xf32>
    %734 = tpu.matmul %730, %732, %cst_323 {dimension_numbers = #tpu.dot_dimension_numbers<[1], [0], [0], [1], [0, 0, 1, 1], [], []>} : vector<1x8xf32>, vector<8x512xf32>, vector<1x512xf32> -> vector<1x512xf32>
    %735 = arith.addf %734, %733 : vector<1x512xf32>
    %cst_324 = arith.constant dense<0.000000e+00> : vector<1x512xf32>
    %736 = tpu.matmul %618, %731, %cst_324 {dimension_numbers = #tpu.dot_dimension_numbers<[1], [0], [0], [1], [0, 0, 1, 1], [], []>} : vector<1x1xf32>, vector<1x512xf32>, vector<1x512xf32> -> vector<1x512xf32>
    %737 = arith.addf %735, %736 : vector<1x512xf32>
    %738 = vector.extract_strided_slice %737 {offsets = [0, 0], sizes = [1, 1], strides = [1, 1]} : vector<1x512xf32> to vector<1x1xf32>
    %cst_325 = arith.constant 5.000000e-01 : f32
    %739 = vector.broadcast %cst_325 : f32 to vector<1x1xf32>
    %740 = arith.mulf %739, %738 : vector<1x1xf32>
    %741 = math.tanh %740 : vector<1x1xf32>
    %cst_326 = arith.constant 1.000000e+00 : f32
    %742 = vector.broadcast %cst_326 : f32 to vector<1x1xf32>
    %743 = arith.addf %741, %742 : vector<1x1xf32>
    %cst_327 = arith.constant 5.000000e-01 : f32
    %744 = vector.broadcast %cst_327 : f32 to vector<1x1xf32>
    %745 = arith.mulf %744, %743 : vector<1x1xf32>
    %746 = vector.extract_strided_slice %737 {offsets = [0, 128], sizes = [1, 1], strides = [1, 1]} : vector<1x512xf32> to vector<1x1xf32>
    %cst_328 = arith.constant 5.000000e-01 : f32
    %747 = vector.broadcast %cst_328 : f32 to vector<1x1xf32>
    %748 = arith.mulf %747, %746 : vector<1x1xf32>
    %749 = math.tanh %748 : vector<1x1xf32>
    %cst_329 = arith.constant 1.000000e+00 : f32
    %750 = vector.broadcast %cst_329 : f32 to vector<1x1xf32>
    %751 = arith.addf %749, %750 : vector<1x1xf32>
    %cst_330 = arith.constant 5.000000e-01 : f32
    %752 = vector.broadcast %cst_330 : f32 to vector<1x1xf32>
    %753 = arith.mulf %752, %751 : vector<1x1xf32>
    %754 = vector.extract_strided_slice %737 {offsets = [0, 256], sizes = [1, 1], strides = [1, 1]} : vector<1x512xf32> to vector<1x1xf32>
    %755 = math.tanh %754 : vector<1x1xf32>
    %756 = vector.extract_strided_slice %737 {offsets = [0, 384], sizes = [1, 1], strides = [1, 1]} : vector<1x512xf32> to vector<1x1xf32>
    %cst_331 = arith.constant 5.000000e-01 : f32
    %757 = vector.broadcast %cst_331 : f32 to vector<1x1xf32>
    %758 = arith.mulf %757, %756 : vector<1x1xf32>
    %759 = math.tanh %758 : vector<1x1xf32>
    %cst_332 = arith.constant 1.000000e+00 : f32
    %760 = vector.broadcast %cst_332 : f32 to vector<1x1xf32>
    %761 = arith.addf %759, %760 : vector<1x1xf32>
    %cst_333 = arith.constant 5.000000e-01 : f32
    %762 = vector.broadcast %cst_333 : f32 to vector<1x1xf32>
    %763 = arith.mulf %762, %761 : vector<1x1xf32>
    %764 = arith.mulf %753, %616 : vector<1x1xf32>
    %765 = arith.mulf %745, %755 : vector<1x1xf32>
    %766 = arith.addf %764, %765 : vector<1x1xf32>
    %767 = math.tanh %766 : vector<1x1xf32>
    %768 = arith.mulf %763, %767 : vector<1x1xf32>
    %c4_334 = arith.constant 4 : index
    %c0_335 = arith.constant 0 : index
    %769 = vector.load %arg15[%c4_334, %c0_335] : memref<8x1xf32, #tpu.memory_space<vmem>>, vector<1x1xf32>
    tpu.vector_store %arg15[%c4_334, %c0_335], %768 {strides = array<i32>} : memref<8x1xf32, #tpu.memory_space<vmem>>, vector<1x1xf32>,
    %c8_336 = arith.constant 8 : index
    %c0_337 = arith.constant 0 : index
    %770 = vector.load %arg3[%c8_336, %c0_337] : memref<96x512xf32, #tpu.memory_space<vmem>>, vector<8x512xf32>
    %c5 = arith.constant 5 : index
    %c0_338 = arith.constant 0 : index
    %771 = vector.load %arg14[%c5, %c0_338] : memref<8x512xf32, #tpu.memory_space<vmem>>, vector<1x512xf32>
    %cst_339 = arith.constant dense<0.000000e+00> : vector<1x512xf32>
    %772 = tpu.matmul %654, %770, %cst_339 {dimension_numbers = #tpu.dot_dimension_numbers<[1], [0], [0], [1], [0, 0, 1, 1], [], []>} : vector<1x8xf32>, vector<8x512xf32>, vector<1x512xf32> -> vector<1x512xf32>
    %773 = arith.addf %771, %772 : vector<1x512xf32>
    %774 = vector.extract_strided_slice %773 {offsets = [0, 0], sizes = [1, 8], strides = [1, 1]} : vector<1x512xf32> to vector<1x8xf32>
    %cst_340 = arith.constant 5.000000e-01 : f32
    %775 = vector.broadcast %cst_340 : f32 to vector<1x8xf32>
    %776 = arith.mulf %775, %774 : vector<1x8xf32>
    %777 = math.tanh %776 : vector<1x8xf32>
    %cst_341 = arith.constant 1.000000e+00 : f32
    %778 = vector.broadcast %cst_341 : f32 to vector<1x8xf32>
    %779 = arith.addf %777, %778 : vector<1x8xf32>
    %cst_342 = arith.constant 5.000000e-01 : f32
    %780 = vector.broadcast %cst_342 : f32 to vector<1x8xf32>
    %781 = arith.mulf %780, %779 : vector<1x8xf32>
    %782 = vector.extract_strided_slice %773 {offsets = [0, 128], sizes = [1, 8], strides = [1, 1]} : vector<1x512xf32> to vector<1x8xf32>
    %cst_343 = arith.constant 5.000000e-01 : f32
    %783 = vector.broadcast %cst_343 : f32 to vector<1x8xf32>
    %784 = arith.mulf %783, %782 : vector<1x8xf32>
    %785 = math.tanh %784 : vector<1x8xf32>
    %cst_344 = arith.constant 1.000000e+00 : f32
    %786 = vector.broadcast %cst_344 : f32 to vector<1x8xf32>
    %787 = arith.addf %785, %786 : vector<1x8xf32>
    %cst_345 = arith.constant 5.000000e-01 : f32
    %788 = vector.broadcast %cst_345 : f32 to vector<1x8xf32>
    %789 = arith.mulf %788, %787 : vector<1x8xf32>
    %790 = vector.extract_strided_slice %773 {offsets = [0, 256], sizes = [1, 8], strides = [1, 1]} : vector<1x512xf32> to vector<1x8xf32>
    %791 = math.tanh %790 : vector<1x8xf32>
    %792 = vector.extract_strided_slice %773 {offsets = [0, 384], sizes = [1, 8], strides = [1, 1]} : vector<1x512xf32> to vector<1x8xf32>
    %cst_346 = arith.constant 5.000000e-01 : f32
    %793 = vector.broadcast %cst_346 : f32 to vector<1x8xf32>
    %794 = arith.mulf %793, %792 : vector<1x8xf32>
    %795 = math.tanh %794 : vector<1x8xf32>
    %cst_347 = arith.constant 1.000000e+00 : f32
    %796 = vector.broadcast %cst_347 : f32 to vector<1x8xf32>
    %797 = arith.addf %795, %796 : vector<1x8xf32>
    %cst_348 = arith.constant 5.000000e-01 : f32
    %798 = vector.broadcast %cst_348 : f32 to vector<1x8xf32>
    %799 = arith.mulf %798, %797 : vector<1x8xf32>
    %800 = arith.mulf %789, %652 : vector<1x8xf32>
    %801 = arith.mulf %781, %791 : vector<1x8xf32>
    %802 = arith.addf %800, %801 : vector<1x8xf32>
    %803 = math.tanh %802 : vector<1x8xf32>
    %804 = arith.mulf %799, %803 : vector<1x8xf32>
    %c32_349 = arith.constant 32 : index
    %c0_350 = arith.constant 0 : index
    %805 = vector.load %arg3[%c32_349, %c0_350] : memref<96x512xf32, #tpu.memory_space<vmem>>, vector<8x512xf32>
    %c24_351 = arith.constant 24 : index
    %c0_352 = arith.constant 0 : index
    %806 = vector.load %arg3[%c24_351, %c0_352] : memref<96x512xf32, #tpu.memory_space<vmem>>, vector<8x512xf32>
    %c40_353 = arith.constant 40 : index
    %c0_354 = arith.constant 0 : index
    %807 = vector.load %arg3[%c40_353, %c0_354] : memref<96x512xf32, #tpu.memory_space<vmem>>, vector<1x512xf32>
    %cst_355 = arith.constant dense<0.000000e+00> : vector<1x512xf32>
    %808 = tpu.matmul %804, %806, %cst_355 {dimension_numbers = #tpu.dot_dimension_numbers<[1], [0], [0], [1], [0, 0, 1, 1], [], []>} : vector<1x8xf32>, vector<8x512xf32>, vector<1x512xf32> -> vector<1x512xf32>
    %809 = arith.addf %808, %807 : vector<1x512xf32>
    %cst_356 = arith.constant dense<0.000000e+00> : vector<1x512xf32>
    %810 = tpu.matmul %692, %805, %cst_356 {dimension_numbers = #tpu.dot_dimension_numbers<[1], [0], [0], [1], [0, 0, 1, 1], [], []>} : vector<1x8xf32>, vector<8x512xf32>, vector<1x512xf32> -> vector<1x512xf32>
    %811 = arith.addf %809, %810 : vector<1x512xf32>
    %812 = vector.extract_strided_slice %811 {offsets = [0, 0], sizes = [1, 8], strides = [1, 1]} : vector<1x512xf32> to vector<1x8xf32>
    %cst_357 = arith.constant 5.000000e-01 : f32
    %813 = vector.broadcast %cst_357 : f32 to vector<1x8xf32>
    %814 = arith.mulf %813, %812 : vector<1x8xf32>
    %815 = math.tanh %814 : vector<1x8xf32>
    %cst_358 = arith.constant 1.000000e+00 : f32
    %816 = vector.broadcast %cst_358 : f32 to vector<1x8xf32>
    %817 = arith.addf %815, %816 : vector<1x8xf32>
    %cst_359 = arith.constant 5.000000e-01 : f32
    %818 = vector.broadcast %cst_359 : f32 to vector<1x8xf32>
    %819 = arith.mulf %818, %817 : vector<1x8xf32>
    %820 = vector.extract_strided_slice %811 {offsets = [0, 128], sizes = [1, 8], strides = [1, 1]} : vector<1x512xf32> to vector<1x8xf32>
    %cst_360 = arith.constant 5.000000e-01 : f32
    %821 = vector.broadcast %cst_360 : f32 to vector<1x8xf32>
    %822 = arith.mulf %821, %820 : vector<1x8xf32>
    %823 = math.tanh %822 : vector<1x8xf32>
    %cst_361 = arith.constant 1.000000e+00 : f32
    %824 = vector.broadcast %cst_361 : f32 to vector<1x8xf32>
    %825 = arith.addf %823, %824 : vector<1x8xf32>
    %cst_362 = arith.constant 5.000000e-01 : f32
    %826 = vector.broadcast %cst_362 : f32 to vector<1x8xf32>
    %827 = arith.mulf %826, %825 : vector<1x8xf32>
    %828 = vector.extract_strided_slice %811 {offsets = [0, 256], sizes = [1, 8], strides = [1, 1]} : vector<1x512xf32> to vector<1x8xf32>
    %829 = math.tanh %828 : vector<1x8xf32>
    %830 = vector.extract_strided_slice %811 {offsets = [0, 384], sizes = [1, 8], strides = [1, 1]} : vector<1x512xf32> to vector<1x8xf32>
    %cst_363 = arith.constant 5.000000e-01 : f32
    %831 = vector.broadcast %cst_363 : f32 to vector<1x8xf32>
    %832 = arith.mulf %831, %830 : vector<1x8xf32>
    %833 = math.tanh %832 : vector<1x8xf32>
    %cst_364 = arith.constant 1.000000e+00 : f32
    %834 = vector.broadcast %cst_364 : f32 to vector<1x8xf32>
    %835 = arith.addf %833, %834 : vector<1x8xf32>
    %cst_365 = arith.constant 5.000000e-01 : f32
    %836 = vector.broadcast %cst_365 : f32 to vector<1x8xf32>
    %837 = arith.mulf %836, %835 : vector<1x8xf32>
    %838 = arith.mulf %827, %690 : vector<1x8xf32>
    %839 = arith.mulf %819, %829 : vector<1x8xf32>
    %840 = arith.addf %838, %839 : vector<1x8xf32>
    %841 = math.tanh %840 : vector<1x8xf32>
    %842 = arith.mulf %837, %841 : vector<1x8xf32>
    %c56_366 = arith.constant 56 : index
    %c0_367 = arith.constant 0 : index
    %843 = vector.load %arg3[%c56_366, %c0_367] : memref<96x512xf32, #tpu.memory_space<vmem>>, vector<8x512xf32>
    %c48_368 = arith.constant 48 : index
    %c0_369 = arith.constant 0 : index
    %844 = vector.load %arg3[%c48_368, %c0_369] : memref<96x512xf32, #tpu.memory_space<vmem>>, vector<8x512xf32>
    %c64_370 = arith.constant 64 : index
    %c0_371 = arith.constant 0 : index
    %845 = vector.load %arg3[%c64_370, %c0_371] : memref<96x512xf32, #tpu.memory_space<vmem>>, vector<1x512xf32>
    %cst_372 = arith.constant dense<0.000000e+00> : vector<1x512xf32>
    %846 = tpu.matmul %842, %844, %cst_372 {dimension_numbers = #tpu.dot_dimension_numbers<[1], [0], [0], [1], [0, 0, 1, 1], [], []>} : vector<1x8xf32>, vector<8x512xf32>, vector<1x512xf32> -> vector<1x512xf32>
    %847 = arith.addf %846, %845 : vector<1x512xf32>
    %cst_373 = arith.constant dense<0.000000e+00> : vector<1x512xf32>
    %848 = tpu.matmul %730, %843, %cst_373 {dimension_numbers = #tpu.dot_dimension_numbers<[1], [0], [0], [1], [0, 0, 1, 1], [], []>} : vector<1x8xf32>, vector<8x512xf32>, vector<1x512xf32> -> vector<1x512xf32>
    %849 = arith.addf %847, %848 : vector<1x512xf32>
    %850 = vector.extract_strided_slice %849 {offsets = [0, 0], sizes = [1, 8], strides = [1, 1]} : vector<1x512xf32> to vector<1x8xf32>
    %cst_374 = arith.constant 5.000000e-01 : f32
    %851 = vector.broadcast %cst_374 : f32 to vector<1x8xf32>
    %852 = arith.mulf %851, %850 : vector<1x8xf32>
    %853 = math.tanh %852 : vector<1x8xf32>
    %cst_375 = arith.constant 1.000000e+00 : f32
    %854 = vector.broadcast %cst_375 : f32 to vector<1x8xf32>
    %855 = arith.addf %853, %854 : vector<1x8xf32>
    %cst_376 = arith.constant 5.000000e-01 : f32
    %856 = vector.broadcast %cst_376 : f32 to vector<1x8xf32>
    %857 = arith.mulf %856, %855 : vector<1x8xf32>
    %858 = vector.extract_strided_slice %849 {offsets = [0, 128], sizes = [1, 8], strides = [1, 1]} : vector<1x512xf32> to vector<1x8xf32>
    %cst_377 = arith.constant 5.000000e-01 : f32
    %859 = vector.broadcast %cst_377 : f32 to vector<1x8xf32>
    %860 = arith.mulf %859, %858 : vector<1x8xf32>
    %861 = math.tanh %860 : vector<1x8xf32>
    %cst_378 = arith.constant 1.000000e+00 : f32
    %862 = vector.broadcast %cst_378 : f32 to vector<1x8xf32>
    %863 = arith.addf %861, %862 : vector<1x8xf32>
    %cst_379 = arith.constant 5.000000e-01 : f32
    %864 = vector.broadcast %cst_379 : f32 to vector<1x8xf32>
    %865 = arith.mulf %864, %863 : vector<1x8xf32>
    %866 = vector.extract_strided_slice %849 {offsets = [0, 256], sizes = [1, 8], strides = [1, 1]} : vector<1x512xf32> to vector<1x8xf32>
    %867 = math.tanh %866 : vector<1x8xf32>
    %868 = vector.extract_strided_slice %849 {offsets = [0, 384], sizes = [1, 8], strides = [1, 1]} : vector<1x512xf32> to vector<1x8xf32>
    %cst_380 = arith.constant 5.000000e-01 : f32
    %869 = vector.broadcast %cst_380 : f32 to vector<1x8xf32>
    %870 = arith.mulf %869, %868 : vector<1x8xf32>
    %871 = math.tanh %870 : vector<1x8xf32>
    %cst_381 = arith.constant 1.000000e+00 : f32
    %872 = vector.broadcast %cst_381 : f32 to vector<1x8xf32>
    %873 = arith.addf %871, %872 : vector<1x8xf32>
    %cst_382 = arith.constant 5.000000e-01 : f32
    %874 = vector.broadcast %cst_382 : f32 to vector<1x8xf32>
    %875 = arith.mulf %874, %873 : vector<1x8xf32>
    %876 = arith.mulf %865, %728 : vector<1x8xf32>
    %877 = arith.mulf %857, %867 : vector<1x8xf32>
    %878 = arith.addf %876, %877 : vector<1x8xf32>
    %879 = math.tanh %878 : vector<1x8xf32>
    %880 = arith.mulf %875, %879 : vector<1x8xf32>
    %c80_383 = arith.constant 80 : index
    %c0_384 = arith.constant 0 : index
    %881 = vector.load %arg3[%c80_383, %c0_384] : memref<96x512xf32, #tpu.memory_space<vmem>>, vector<1x512xf32>
    %c72_385 = arith.constant 72 : index
    %c0_386 = arith.constant 0 : index
    %882 = vector.load %arg3[%c72_385, %c0_386] : memref<96x512xf32, #tpu.memory_space<vmem>>, vector<8x512xf32>
    %c88_387 = arith.constant 88 : index
    %c0_388 = arith.constant 0 : index
    %883 = vector.load %arg3[%c88_387, %c0_388] : memref<96x512xf32, #tpu.memory_space<vmem>>, vector<1x512xf32>
    %cst_389 = arith.constant dense<0.000000e+00> : vector<1x512xf32>
    %884 = tpu.matmul %880, %882, %cst_389 {dimension_numbers = #tpu.dot_dimension_numbers<[1], [0], [0], [1], [0, 0, 1, 1], [], []>} : vector<1x8xf32>, vector<8x512xf32>, vector<1x512xf32> -> vector<1x512xf32>
    %885 = arith.addf %884, %883 : vector<1x512xf32>
    %cst_390 = arith.constant dense<0.000000e+00> : vector<1x512xf32>
    %886 = tpu.matmul %768, %881, %cst_390 {dimension_numbers = #tpu.dot_dimension_numbers<[1], [0], [0], [1], [0, 0, 1, 1], [], []>} : vector<1x1xf32>, vector<1x512xf32>, vector<1x512xf32> -> vector<1x512xf32>
    %887 = arith.addf %885, %886 : vector<1x512xf32>
    %888 = vector.extract_strided_slice %887 {offsets = [0, 0], sizes = [1, 1], strides = [1, 1]} : vector<1x512xf32> to vector<1x1xf32>
    %cst_391 = arith.constant 5.000000e-01 : f32
    %889 = vector.broadcast %cst_391 : f32 to vector<1x1xf32>
    %890 = arith.mulf %889, %888 : vector<1x1xf32>
    %891 = math.tanh %890 : vector<1x1xf32>
    %cst_392 = arith.constant 1.000000e+00 : f32
    %892 = vector.broadcast %cst_392 : f32 to vector<1x1xf32>
    %893 = arith.addf %891, %892 : vector<1x1xf32>
    %cst_393 = arith.constant 5.000000e-01 : f32
    %894 = vector.broadcast %cst_393 : f32 to vector<1x1xf32>
    %895 = arith.mulf %894, %893 : vector<1x1xf32>
    %896 = vector.extract_strided_slice %887 {offsets = [0, 128], sizes = [1, 1], strides = [1, 1]} : vector<1x512xf32> to vector<1x1xf32>
    %cst_394 = arith.constant 5.000000e-01 : f32
    %897 = vector.broadcast %cst_394 : f32 to vector<1x1xf32>
    %898 = arith.mulf %897, %896 : vector<1x1xf32>
    %899 = math.tanh %898 : vector<1x1xf32>
    %cst_395 = arith.constant 1.000000e+00 : f32
    %900 = vector.broadcast %cst_395 : f32 to vector<1x1xf32>
    %901 = arith.addf %899, %900 : vector<1x1xf32>
    %cst_396 = arith.constant 5.000000e-01 : f32
    %902 = vector.broadcast %cst_396 : f32 to vector<1x1xf32>
    %903 = arith.mulf %902, %901 : vector<1x1xf32>
    %904 = vector.extract_strided_slice %887 {offsets = [0, 256], sizes = [1, 1], strides = [1, 1]} : vector<1x512xf32> to vector<1x1xf32>
    %905 = math.tanh %904 : vector<1x1xf32>
    %906 = vector.extract_strided_slice %887 {offsets = [0, 384], sizes = [1, 1], strides = [1, 1]} : vector<1x512xf32> to vector<1x1xf32>
    %cst_397 = arith.constant 5.000000e-01 : f32
    %907 = vector.broadcast %cst_397 : f32 to vector<1x1xf32>
    %908 = arith.mulf %907, %906 : vector<1x1xf32>
    %909 = math.tanh %908 : vector<1x1xf32>
    %cst_398 = arith.constant 1.000000e+00 : f32
    %910 = vector.broadcast %cst_398 : f32 to vector<1x1xf32>
    %911 = arith.addf %909, %910 : vector<1x1xf32>
    %cst_399 = arith.constant 5.000000e-01 : f32
    %912 = vector.broadcast %cst_399 : f32 to vector<1x1xf32>
    %913 = arith.mulf %912, %911 : vector<1x1xf32>
    %914 = arith.mulf %903, %766 : vector<1x1xf32>
    %915 = arith.mulf %895, %905 : vector<1x1xf32>
    %916 = arith.addf %914, %915 : vector<1x1xf32>
    %917 = math.tanh %916 : vector<1x1xf32>
    %918 = arith.mulf %913, %917 : vector<1x1xf32>
    %c5_400 = arith.constant 5 : index
    %c0_401 = arith.constant 0 : index
    %919 = vector.load %arg15[%c5_400, %c0_401] : memref<8x1xf32, #tpu.memory_space<vmem>>, vector<1x1xf32>
    tpu.vector_store %arg15[%c5_400, %c0_401], %918 {strides = array<i32>} : memref<8x1xf32, #tpu.memory_space<vmem>>, vector<1x1xf32>,
    %c8_402 = arith.constant 8 : index
    %c0_403 = arith.constant 0 : index
    %920 = vector.load %arg3[%c8_402, %c0_403] : memref<96x512xf32, #tpu.memory_space<vmem>>, vector<8x512xf32>
    %c6 = arith.constant 6 : index
    %c0_404 = arith.constant 0 : index
    %921 = vector.load %arg14[%c6, %c0_404] : memref<8x512xf32, #tpu.memory_space<vmem>>, vector<1x512xf32>
    %cst_405 = arith.constant dense<0.000000e+00> : vector<1x512xf32>
    %922 = tpu.matmul %804, %920, %cst_405 {dimension_numbers = #tpu.dot_dimension_numbers<[1], [0], [0], [1], [0, 0, 1, 1], [], []>} : vector<1x8xf32>, vector<8x512xf32>, vector<1x512xf32> -> vector<1x512xf32>
    %923 = arith.addf %921, %922 : vector<1x512xf32>
    %924 = vector.extract_strided_slice %923 {offsets = [0, 0], sizes = [1, 8], strides = [1, 1]} : vector<1x512xf32> to vector<1x8xf32>
    %cst_406 = arith.constant 5.000000e-01 : f32
    %925 = vector.broadcast %cst_406 : f32 to vector<1x8xf32>
    %926 = arith.mulf %925, %924 : vector<1x8xf32>
    %927 = math.tanh %926 : vector<1x8xf32>
    %cst_407 = arith.constant 1.000000e+00 : f32
    %928 = vector.broadcast %cst_407 : f32 to vector<1x8xf32>
    %929 = arith.addf %927, %928 : vector<1x8xf32>
    %cst_408 = arith.constant 5.000000e-01 : f32
    %930 = vector.broadcast %cst_408 : f32 to vector<1x8xf32>
    %931 = arith.mulf %930, %929 : vector<1x8xf32>
    %932 = vector.extract_strided_slice %923 {offsets = [0, 128], sizes = [1, 8], strides = [1, 1]} : vector<1x512xf32> to vector<1x8xf32>
    %cst_409 = arith.constant 5.000000e-01 : f32
    %933 = vector.broadcast %cst_409 : f32 to vector<1x8xf32>
    %934 = arith.mulf %933, %932 : vector<1x8xf32>
    %935 = math.tanh %934 : vector<1x8xf32>
    %cst_410 = arith.constant 1.000000e+00 : f32
    %936 = vector.broadcast %cst_410 : f32 to vector<1x8xf32>
    %937 = arith.addf %935, %936 : vector<1x8xf32>
    %cst_411 = arith.constant 5.000000e-01 : f32
    %938 = vector.broadcast %cst_411 : f32 to vector<1x8xf32>
    %939 = arith.mulf %938, %937 : vector<1x8xf32>
    %940 = vector.extract_strided_slice %923 {offsets = [0, 256], sizes = [1, 8], strides = [1, 1]} : vector<1x512xf32> to vector<1x8xf32>
    %941 = math.tanh %940 : vector<1x8xf32>
    %942 = vector.extract_strided_slice %923 {offsets = [0, 384], sizes = [1, 8], strides = [1, 1]} : vector<1x512xf32> to vector<1x8xf32>
    %cst_412 = arith.constant 5.000000e-01 : f32
    %943 = vector.broadcast %cst_412 : f32 to vector<1x8xf32>
    %944 = arith.mulf %943, %942 : vector<1x8xf32>
    %945 = math.tanh %944 : vector<1x8xf32>
    %cst_413 = arith.constant 1.000000e+00 : f32
    %946 = vector.broadcast %cst_413 : f32 to vector<1x8xf32>
    %947 = arith.addf %945, %946 : vector<1x8xf32>
    %cst_414 = arith.constant 5.000000e-01 : f32
    %948 = vector.broadcast %cst_414 : f32 to vector<1x8xf32>
    %949 = arith.mulf %948, %947 : vector<1x8xf32>
    %950 = arith.mulf %939, %802 : vector<1x8xf32>
    %951 = arith.mulf %931, %941 : vector<1x8xf32>
    %952 = arith.addf %950, %951 : vector<1x8xf32>
    %953 = math.tanh %952 : vector<1x8xf32>
    %954 = arith.mulf %949, %953 : vector<1x8xf32>
    %c32_415 = arith.constant 32 : index
    %c0_416 = arith.constant 0 : index
    %955 = vector.load %arg3[%c32_415, %c0_416] : memref<96x512xf32, #tpu.memory_space<vmem>>, vector<8x512xf32>
    %c24_417 = arith.constant 24 : index
    %c0_418 = arith.constant 0 : index
    %956 = vector.load %arg3[%c24_417, %c0_418] : memref<96x512xf32, #tpu.memory_space<vmem>>, vector<8x512xf32>
    %c40_419 = arith.constant 40 : index
    %c0_420 = arith.constant 0 : index
    %957 = vector.load %arg3[%c40_419, %c0_420] : memref<96x512xf32, #tpu.memory_space<vmem>>, vector<1x512xf32>
    %cst_421 = arith.constant dense<0.000000e+00> : vector<1x512xf32>
    %958 = tpu.matmul %954, %956, %cst_421 {dimension_numbers = #tpu.dot_dimension_numbers<[1], [0], [0], [1], [0, 0, 1, 1], [], []>} : vector<1x8xf32>, vector<8x512xf32>, vector<1x512xf32> -> vector<1x512xf32>
    %959 = arith.addf %958, %957 : vector<1x512xf32>
    %cst_422 = arith.constant dense<0.000000e+00> : vector<1x512xf32>
    %960 = tpu.matmul %842, %955, %cst_422 {dimension_numbers = #tpu.dot_dimension_numbers<[1], [0], [0], [1], [0, 0, 1, 1], [], []>} : vector<1x8xf32>, vector<8x512xf32>, vector<1x512xf32> -> vector<1x512xf32>
    %961 = arith.addf %959, %960 : vector<1x512xf32>
    %962 = vector.extract_strided_slice %961 {offsets = [0, 0], sizes = [1, 8], strides = [1, 1]} : vector<1x512xf32> to vector<1x8xf32>
    %cst_423 = arith.constant 5.000000e-01 : f32
    %963 = vector.broadcast %cst_423 : f32 to vector<1x8xf32>
    %964 = arith.mulf %963, %962 : vector<1x8xf32>
    %965 = math.tanh %964 : vector<1x8xf32>
    %cst_424 = arith.constant 1.000000e+00 : f32
    %966 = vector.broadcast %cst_424 : f32 to vector<1x8xf32>
    %967 = arith.addf %965, %966 : vector<1x8xf32>
    %cst_425 = arith.constant 5.000000e-01 : f32
    %968 = vector.broadcast %cst_425 : f32 to vector<1x8xf32>
    %969 = arith.mulf %968, %967 : vector<1x8xf32>
    %970 = vector.extract_strided_slice %961 {offsets = [0, 128], sizes = [1, 8], strides = [1, 1]} : vector<1x512xf32> to vector<1x8xf32>
    %cst_426 = arith.constant 5.000000e-01 : f32
    %971 = vector.broadcast %cst_426 : f32 to vector<1x8xf32>
    %972 = arith.mulf %971, %970 : vector<1x8xf32>
    %973 = math.tanh %972 : vector<1x8xf32>
    %cst_427 = arith.constant 1.000000e+00 : f32
    %974 = vector.broadcast %cst_427 : f32 to vector<1x8xf32>
    %975 = arith.addf %973, %974 : vector<1x8xf32>
    %cst_428 = arith.constant 5.000000e-01 : f32
    %976 = vector.broadcast %cst_428 : f32 to vector<1x8xf32>
    %977 = arith.mulf %976, %975 : vector<1x8xf32>
    %978 = vector.extract_strided_slice %961 {offsets = [0, 256], sizes = [1, 8], strides = [1, 1]} : vector<1x512xf32> to vector<1x8xf32>
    %979 = math.tanh %978 : vector<1x8xf32>
    %980 = vector.extract_strided_slice %961 {offsets = [0, 384], sizes = [1, 8], strides = [1, 1]} : vector<1x512xf32> to vector<1x8xf32>
    %cst_429 = arith.constant 5.000000e-01 : f32
    %981 = vector.broadcast %cst_429 : f32 to vector<1x8xf32>
    %982 = arith.mulf %981, %980 : vector<1x8xf32>
    %983 = math.tanh %982 : vector<1x8xf32>
    %cst_430 = arith.constant 1.000000e+00 : f32
    %984 = vector.broadcast %cst_430 : f32 to vector<1x8xf32>
    %985 = arith.addf %983, %984 : vector<1x8xf32>
    %cst_431 = arith.constant 5.000000e-01 : f32
    %986 = vector.broadcast %cst_431 : f32 to vector<1x8xf32>
    %987 = arith.mulf %986, %985 : vector<1x8xf32>
    %988 = arith.mulf %977, %840 : vector<1x8xf32>
    %989 = arith.mulf %969, %979 : vector<1x8xf32>
    %990 = arith.addf %988, %989 : vector<1x8xf32>
    %991 = math.tanh %990 : vector<1x8xf32>
    %992 = arith.mulf %987, %991 : vector<1x8xf32>
    %c56_432 = arith.constant 56 : index
    %c0_433 = arith.constant 0 : index
    %993 = vector.load %arg3[%c56_432, %c0_433] : memref<96x512xf32, #tpu.memory_space<vmem>>, vector<8x512xf32>
    %c48_434 = arith.constant 48 : index
    %c0_435 = arith.constant 0 : index
    %994 = vector.load %arg3[%c48_434, %c0_435] : memref<96x512xf32, #tpu.memory_space<vmem>>, vector<8x512xf32>
    %c64_436 = arith.constant 64 : index
    %c0_437 = arith.constant 0 : index
    %995 = vector.load %arg3[%c64_436, %c0_437] : memref<96x512xf32, #tpu.memory_space<vmem>>, vector<1x512xf32>
    %cst_438 = arith.constant dense<0.000000e+00> : vector<1x512xf32>
    %996 = tpu.matmul %992, %994, %cst_438 {dimension_numbers = #tpu.dot_dimension_numbers<[1], [0], [0], [1], [0, 0, 1, 1], [], []>} : vector<1x8xf32>, vector<8x512xf32>, vector<1x512xf32> -> vector<1x512xf32>
    %997 = arith.addf %996, %995 : vector<1x512xf32>
    %cst_439 = arith.constant dense<0.000000e+00> : vector<1x512xf32>
    %998 = tpu.matmul %880, %993, %cst_439 {dimension_numbers = #tpu.dot_dimension_numbers<[1], [0], [0], [1], [0, 0, 1, 1], [], []>} : vector<1x8xf32>, vector<8x512xf32>, vector<1x512xf32> -> vector<1x512xf32>
    %999 = arith.addf %997, %998 : vector<1x512xf32>
    %1000 = vector.extract_strided_slice %999 {offsets = [0, 0], sizes = [1, 8], strides = [1, 1]} : vector<1x512xf32> to vector<1x8xf32>
    %cst_440 = arith.constant 5.000000e-01 : f32
    %1001 = vector.broadcast %cst_440 : f32 to vector<1x8xf32>
    %1002 = arith.mulf %1001, %1000 : vector<1x8xf32>
    %1003 = math.tanh %1002 : vector<1x8xf32>
    %cst_441 = arith.constant 1.000000e+00 : f32
    %1004 = vector.broadcast %cst_441 : f32 to vector<1x8xf32>
    %1005 = arith.addf %1003, %1004 : vector<1x8xf32>
    %cst_442 = arith.constant 5.000000e-01 : f32
    %1006 = vector.broadcast %cst_442 : f32 to vector<1x8xf32>
    %1007 = arith.mulf %1006, %1005 : vector<1x8xf32>
    %1008 = vector.extract_strided_slice %999 {offsets = [0, 128], sizes = [1, 8], strides = [1, 1]} : vector<1x512xf32> to vector<1x8xf32>
    %cst_443 = arith.constant 5.000000e-01 : f32
    %1009 = vector.broadcast %cst_443 : f32 to vector<1x8xf32>
    %1010 = arith.mulf %1009, %1008 : vector<1x8xf32>
    %1011 = math.tanh %1010 : vector<1x8xf32>
    %cst_444 = arith.constant 1.000000e+00 : f32
    %1012 = vector.broadcast %cst_444 : f32 to vector<1x8xf32>
    %1013 = arith.addf %1011, %1012 : vector<1x8xf32>
    %cst_445 = arith.constant 5.000000e-01 : f32
    %1014 = vector.broadcast %cst_445 : f32 to vector<1x8xf32>
    %1015 = arith.mulf %1014, %1013 : vector<1x8xf32>
    %1016 = vector.extract_strided_slice %999 {offsets = [0, 256], sizes = [1, 8], strides = [1, 1]} : vector<1x512xf32> to vector<1x8xf32>
    %1017 = math.tanh %1016 : vector<1x8xf32>
    %1018 = vector.extract_strided_slice %999 {offsets = [0, 384], sizes = [1, 8], strides = [1, 1]} : vector<1x512xf32> to vector<1x8xf32>
    %cst_446 = arith.constant 5.000000e-01 : f32
    %1019 = vector.broadcast %cst_446 : f32 to vector<1x8xf32>
    %1020 = arith.mulf %1019, %1018 : vector<1x8xf32>
    %1021 = math.tanh %1020 : vector<1x8xf32>
    %cst_447 = arith.constant 1.000000e+00 : f32
    %1022 = vector.broadcast %cst_447 : f32 to vector<1x8xf32>
    %1023 = arith.addf %1021, %1022 : vector<1x8xf32>
    %cst_448 = arith.constant 5.000000e-01 : f32
    %1024 = vector.broadcast %cst_448 : f32 to vector<1x8xf32>
    %1025 = arith.mulf %1024, %1023 : vector<1x8xf32>
    %1026 = arith.mulf %1015, %878 : vector<1x8xf32>
    %1027 = arith.mulf %1007, %1017 : vector<1x8xf32>
    %1028 = arith.addf %1026, %1027 : vector<1x8xf32>
    %1029 = math.tanh %1028 : vector<1x8xf32>
    %1030 = arith.mulf %1025, %1029 : vector<1x8xf32>
    %c80_449 = arith.constant 80 : index
    %c0_450 = arith.constant 0 : index
    %1031 = vector.load %arg3[%c80_449, %c0_450] : memref<96x512xf32, #tpu.memory_space<vmem>>, vector<1x512xf32>
    %c72_451 = arith.constant 72 : index
    %c0_452 = arith.constant 0 : index
    %1032 = vector.load %arg3[%c72_451, %c0_452] : memref<96x512xf32, #tpu.memory_space<vmem>>, vector<8x512xf32>
    %c88_453 = arith.constant 88 : index
    %c0_454 = arith.constant 0 : index
    %1033 = vector.load %arg3[%c88_453, %c0_454] : memref<96x512xf32, #tpu.memory_space<vmem>>, vector<1x512xf32>
    %cst_455 = arith.constant dense<0.000000e+00> : vector<1x512xf32>
    %1034 = tpu.matmul %1030, %1032, %cst_455 {dimension_numbers = #tpu.dot_dimension_numbers<[1], [0], [0], [1], [0, 0, 1, 1], [], []>} : vector<1x8xf32>, vector<8x512xf32>, vector<1x512xf32> -> vector<1x512xf32>
    %1035 = arith.addf %1034, %1033 : vector<1x512xf32>
    %cst_456 = arith.constant dense<0.000000e+00> : vector<1x512xf32>
    %1036 = tpu.matmul %918, %1031, %cst_456 {dimension_numbers = #tpu.dot_dimension_numbers<[1], [0], [0], [1], [0, 0, 1, 1], [], []>} : vector<1x1xf32>, vector<1x512xf32>, vector<1x512xf32> -> vector<1x512xf32>
    %1037 = arith.addf %1035, %1036 : vector<1x512xf32>
    %1038 = vector.extract_strided_slice %1037 {offsets = [0, 0], sizes = [1, 1], strides = [1, 1]} : vector<1x512xf32> to vector<1x1xf32>
    %cst_457 = arith.constant 5.000000e-01 : f32
    %1039 = vector.broadcast %cst_457 : f32 to vector<1x1xf32>
    %1040 = arith.mulf %1039, %1038 : vector<1x1xf32>
    %1041 = math.tanh %1040 : vector<1x1xf32>
    %cst_458 = arith.constant 1.000000e+00 : f32
    %1042 = vector.broadcast %cst_458 : f32 to vector<1x1xf32>
    %1043 = arith.addf %1041, %1042 : vector<1x1xf32>
    %cst_459 = arith.constant 5.000000e-01 : f32
    %1044 = vector.broadcast %cst_459 : f32 to vector<1x1xf32>
    %1045 = arith.mulf %1044, %1043 : vector<1x1xf32>
    %1046 = vector.extract_strided_slice %1037 {offsets = [0, 128], sizes = [1, 1], strides = [1, 1]} : vector<1x512xf32> to vector<1x1xf32>
    %cst_460 = arith.constant 5.000000e-01 : f32
    %1047 = vector.broadcast %cst_460 : f32 to vector<1x1xf32>
    %1048 = arith.mulf %1047, %1046 : vector<1x1xf32>
    %1049 = math.tanh %1048 : vector<1x1xf32>
    %cst_461 = arith.constant 1.000000e+00 : f32
    %1050 = vector.broadcast %cst_461 : f32 to vector<1x1xf32>
    %1051 = arith.addf %1049, %1050 : vector<1x1xf32>
    %cst_462 = arith.constant 5.000000e-01 : f32
    %1052 = vector.broadcast %cst_462 : f32 to vector<1x1xf32>
    %1053 = arith.mulf %1052, %1051 : vector<1x1xf32>
    %1054 = vector.extract_strided_slice %1037 {offsets = [0, 256], sizes = [1, 1], strides = [1, 1]} : vector<1x512xf32> to vector<1x1xf32>
    %1055 = math.tanh %1054 : vector<1x1xf32>
    %1056 = vector.extract_strided_slice %1037 {offsets = [0, 384], sizes = [1, 1], strides = [1, 1]} : vector<1x512xf32> to vector<1x1xf32>
    %cst_463 = arith.constant 5.000000e-01 : f32
    %1057 = vector.broadcast %cst_463 : f32 to vector<1x1xf32>
    %1058 = arith.mulf %1057, %1056 : vector<1x1xf32>
    %1059 = math.tanh %1058 : vector<1x1xf32>
    %cst_464 = arith.constant 1.000000e+00 : f32
    %1060 = vector.broadcast %cst_464 : f32 to vector<1x1xf32>
    %1061 = arith.addf %1059, %1060 : vector<1x1xf32>
    %cst_465 = arith.constant 5.000000e-01 : f32
    %1062 = vector.broadcast %cst_465 : f32 to vector<1x1xf32>
    %1063 = arith.mulf %1062, %1061 : vector<1x1xf32>
    %1064 = arith.mulf %1053, %916 : vector<1x1xf32>
    %1065 = arith.mulf %1045, %1055 : vector<1x1xf32>
    %1066 = arith.addf %1064, %1065 : vector<1x1xf32>
    %1067 = math.tanh %1066 : vector<1x1xf32>
    %1068 = arith.mulf %1063, %1067 : vector<1x1xf32>
    %c6_466 = arith.constant 6 : index
    %c0_467 = arith.constant 0 : index
    %1069 = vector.load %arg15[%c6_466, %c0_467] : memref<8x1xf32, #tpu.memory_space<vmem>>, vector<1x1xf32>
    tpu.vector_store %arg15[%c6_466, %c0_467], %1068 {strides = array<i32>} : memref<8x1xf32, #tpu.memory_space<vmem>>, vector<1x1xf32>,
    %c8_468 = arith.constant 8 : index
    %c0_469 = arith.constant 0 : index
    %1070 = vector.load %arg3[%c8_468, %c0_469] : memref<96x512xf32, #tpu.memory_space<vmem>>, vector<8x512xf32>
    %c7 = arith.constant 7 : index
    %c0_470 = arith.constant 0 : index
    %1071 = vector.load %arg14[%c7, %c0_470] : memref<8x512xf32, #tpu.memory_space<vmem>>, vector<1x512xf32>
    %cst_471 = arith.constant dense<0.000000e+00> : vector<1x512xf32>
    %1072 = tpu.matmul %954, %1070, %cst_471 {dimension_numbers = #tpu.dot_dimension_numbers<[1], [0], [0], [1], [0, 0, 1, 1], [], []>} : vector<1x8xf32>, vector<8x512xf32>, vector<1x512xf32> -> vector<1x512xf32>
    %1073 = arith.addf %1071, %1072 : vector<1x512xf32>
    %1074 = vector.extract_strided_slice %1073 {offsets = [0, 0], sizes = [1, 8], strides = [1, 1]} : vector<1x512xf32> to vector<1x8xf32>
    %cst_472 = arith.constant 5.000000e-01 : f32
    %1075 = vector.broadcast %cst_472 : f32 to vector<1x8xf32>
    %1076 = arith.mulf %1075, %1074 : vector<1x8xf32>
    %1077 = math.tanh %1076 : vector<1x8xf32>
    %cst_473 = arith.constant 1.000000e+00 : f32
    %1078 = vector.broadcast %cst_473 : f32 to vector<1x8xf32>
    %1079 = arith.addf %1077, %1078 : vector<1x8xf32>
    %cst_474 = arith.constant 5.000000e-01 : f32
    %1080 = vector.broadcast %cst_474 : f32 to vector<1x8xf32>
    %1081 = arith.mulf %1080, %1079 : vector<1x8xf32>
    %1082 = vector.extract_strided_slice %1073 {offsets = [0, 128], sizes = [1, 8], strides = [1, 1]} : vector<1x512xf32> to vector<1x8xf32>
    %cst_475 = arith.constant 5.000000e-01 : f32
    %1083 = vector.broadcast %cst_475 : f32 to vector<1x8xf32>
    %1084 = arith.mulf %1083, %1082 : vector<1x8xf32>
    %1085 = math.tanh %1084 : vector<1x8xf32>
    %cst_476 = arith.constant 1.000000e+00 : f32
    %1086 = vector.broadcast %cst_476 : f32 to vector<1x8xf32>
    %1087 = arith.addf %1085, %1086 : vector<1x8xf32>
    %cst_477 = arith.constant 5.000000e-01 : f32
    %1088 = vector.broadcast %cst_477 : f32 to vector<1x8xf32>
    %1089 = arith.mulf %1088, %1087 : vector<1x8xf32>
    %1090 = vector.extract_strided_slice %1073 {offsets = [0, 256], sizes = [1, 8], strides = [1, 1]} : vector<1x512xf32> to vector<1x8xf32>
    %1091 = math.tanh %1090 : vector<1x8xf32>
    %1092 = vector.extract_strided_slice %1073 {offsets = [0, 384], sizes = [1, 8], strides = [1, 1]} : vector<1x512xf32> to vector<1x8xf32>
    %cst_478 = arith.constant 5.000000e-01 : f32
    %1093 = vector.broadcast %cst_478 : f32 to vector<1x8xf32>
    %1094 = arith.mulf %1093, %1092 : vector<1x8xf32>
    %1095 = math.tanh %1094 : vector<1x8xf32>
    %cst_479 = arith.constant 1.000000e+00 : f32
    %1096 = vector.broadcast %cst_479 : f32 to vector<1x8xf32>
    %1097 = arith.addf %1095, %1096 : vector<1x8xf32>
    %cst_480 = arith.constant 5.000000e-01 : f32
    %1098 = vector.broadcast %cst_480 : f32 to vector<1x8xf32>
    %1099 = arith.mulf %1098, %1097 : vector<1x8xf32>
    %1100 = arith.mulf %1089, %952 : vector<1x8xf32>
    %1101 = arith.mulf %1081, %1091 : vector<1x8xf32>
    %1102 = arith.addf %1100, %1101 : vector<1x8xf32>
    %1103 = math.tanh %1102 : vector<1x8xf32>
    %1104 = arith.mulf %1099, %1103 : vector<1x8xf32>
    %c32_481 = arith.constant 32 : index
    %c0_482 = arith.constant 0 : index
    %1105 = vector.load %arg3[%c32_481, %c0_482] : memref<96x512xf32, #tpu.memory_space<vmem>>, vector<8x512xf32>
    %c24_483 = arith.constant 24 : index
    %c0_484 = arith.constant 0 : index
    %1106 = vector.load %arg3[%c24_483, %c0_484] : memref<96x512xf32, #tpu.memory_space<vmem>>, vector<8x512xf32>
    %c40_485 = arith.constant 40 : index
    %c0_486 = arith.constant 0 : index
    %1107 = vector.load %arg3[%c40_485, %c0_486] : memref<96x512xf32, #tpu.memory_space<vmem>>, vector<1x512xf32>
    %cst_487 = arith.constant dense<0.000000e+00> : vector<1x512xf32>
    %1108 = tpu.matmul %1104, %1106, %cst_487 {dimension_numbers = #tpu.dot_dimension_numbers<[1], [0], [0], [1], [0, 0, 1, 1], [], []>} : vector<1x8xf32>, vector<8x512xf32>, vector<1x512xf32> -> vector<1x512xf32>
    %1109 = arith.addf %1108, %1107 : vector<1x512xf32>
    %cst_488 = arith.constant dense<0.000000e+00> : vector<1x512xf32>
    %1110 = tpu.matmul %992, %1105, %cst_488 {dimension_numbers = #tpu.dot_dimension_numbers<[1], [0], [0], [1], [0, 0, 1, 1], [], []>} : vector<1x8xf32>, vector<8x512xf32>, vector<1x512xf32> -> vector<1x512xf32>
    %1111 = arith.addf %1109, %1110 : vector<1x512xf32>
    %1112 = vector.extract_strided_slice %1111 {offsets = [0, 0], sizes = [1, 8], strides = [1, 1]} : vector<1x512xf32> to vector<1x8xf32>
    %cst_489 = arith.constant 5.000000e-01 : f32
    %1113 = vector.broadcast %cst_489 : f32 to vector<1x8xf32>
    %1114 = arith.mulf %1113, %1112 : vector<1x8xf32>
    %1115 = math.tanh %1114 : vector<1x8xf32>
    %cst_490 = arith.constant 1.000000e+00 : f32
    %1116 = vector.broadcast %cst_490 : f32 to vector<1x8xf32>
    %1117 = arith.addf %1115, %1116 : vector<1x8xf32>
    %cst_491 = arith.constant 5.000000e-01 : f32
    %1118 = vector.broadcast %cst_491 : f32 to vector<1x8xf32>
    %1119 = arith.mulf %1118, %1117 : vector<1x8xf32>
    %1120 = vector.extract_strided_slice %1111 {offsets = [0, 128], sizes = [1, 8], strides = [1, 1]} : vector<1x512xf32> to vector<1x8xf32>
    %cst_492 = arith.constant 5.000000e-01 : f32
    %1121 = vector.broadcast %cst_492 : f32 to vector<1x8xf32>
    %1122 = arith.mulf %1121, %1120 : vector<1x8xf32>
    %1123 = math.tanh %1122 : vector<1x8xf32>
    %cst_493 = arith.constant 1.000000e+00 : f32
    %1124 = vector.broadcast %cst_493 : f32 to vector<1x8xf32>
    %1125 = arith.addf %1123, %1124 : vector<1x8xf32>
    %cst_494 = arith.constant 5.000000e-01 : f32
    %1126 = vector.broadcast %cst_494 : f32 to vector<1x8xf32>
    %1127 = arith.mulf %1126, %1125 : vector<1x8xf32>
    %1128 = vector.extract_strided_slice %1111 {offsets = [0, 256], sizes = [1, 8], strides = [1, 1]} : vector<1x512xf32> to vector<1x8xf32>
    %1129 = math.tanh %1128 : vector<1x8xf32>
    %1130 = vector.extract_strided_slice %1111 {offsets = [0, 384], sizes = [1, 8], strides = [1, 1]} : vector<1x512xf32> to vector<1x8xf32>
    %cst_495 = arith.constant 5.000000e-01 : f32
    %1131 = vector.broadcast %cst_495 : f32 to vector<1x8xf32>
    %1132 = arith.mulf %1131, %1130 : vector<1x8xf32>
    %1133 = math.tanh %1132 : vector<1x8xf32>
    %cst_496 = arith.constant 1.000000e+00 : f32
    %1134 = vector.broadcast %cst_496 : f32 to vector<1x8xf32>
    %1135 = arith.addf %1133, %1134 : vector<1x8xf32>
    %cst_497 = arith.constant 5.000000e-01 : f32
    %1136 = vector.broadcast %cst_497 : f32 to vector<1x8xf32>
    %1137 = arith.mulf %1136, %1135 : vector<1x8xf32>
    %1138 = arith.mulf %1127, %990 : vector<1x8xf32>
    %1139 = arith.mulf %1119, %1129 : vector<1x8xf32>
    %1140 = arith.addf %1138, %1139 : vector<1x8xf32>
    %1141 = math.tanh %1140 : vector<1x8xf32>
    %1142 = arith.mulf %1137, %1141 : vector<1x8xf32>
    %c56_498 = arith.constant 56 : index
    %c0_499 = arith.constant 0 : index
    %1143 = vector.load %arg3[%c56_498, %c0_499] : memref<96x512xf32, #tpu.memory_space<vmem>>, vector<8x512xf32>
    %c48_500 = arith.constant 48 : index
    %c0_501 = arith.constant 0 : index
    %1144 = vector.load %arg3[%c48_500, %c0_501] : memref<96x512xf32, #tpu.memory_space<vmem>>, vector<8x512xf32>
    %c64_502 = arith.constant 64 : index
    %c0_503 = arith.constant 0 : index
    %1145 = vector.load %arg3[%c64_502, %c0_503] : memref<96x512xf32, #tpu.memory_space<vmem>>, vector<1x512xf32>
    %cst_504 = arith.constant dense<0.000000e+00> : vector<1x512xf32>
    %1146 = tpu.matmul %1142, %1144, %cst_504 {dimension_numbers = #tpu.dot_dimension_numbers<[1], [0], [0], [1], [0, 0, 1, 1], [], []>} : vector<1x8xf32>, vector<8x512xf32>, vector<1x512xf32> -> vector<1x512xf32>
    %1147 = arith.addf %1146, %1145 : vector<1x512xf32>
    %cst_505 = arith.constant dense<0.000000e+00> : vector<1x512xf32>
    %1148 = tpu.matmul %1030, %1143, %cst_505 {dimension_numbers = #tpu.dot_dimension_numbers<[1], [0], [0], [1], [0, 0, 1, 1], [], []>} : vector<1x8xf32>, vector<8x512xf32>, vector<1x512xf32> -> vector<1x512xf32>
    %1149 = arith.addf %1147, %1148 : vector<1x512xf32>
    %1150 = vector.extract_strided_slice %1149 {offsets = [0, 0], sizes = [1, 8], strides = [1, 1]} : vector<1x512xf32> to vector<1x8xf32>
    %cst_506 = arith.constant 5.000000e-01 : f32
    %1151 = vector.broadcast %cst_506 : f32 to vector<1x8xf32>
    %1152 = arith.mulf %1151, %1150 : vector<1x8xf32>
    %1153 = math.tanh %1152 : vector<1x8xf32>
    %cst_507 = arith.constant 1.000000e+00 : f32
    %1154 = vector.broadcast %cst_507 : f32 to vector<1x8xf32>
    %1155 = arith.addf %1153, %1154 : vector<1x8xf32>
    %cst_508 = arith.constant 5.000000e-01 : f32
    %1156 = vector.broadcast %cst_508 : f32 to vector<1x8xf32>
    %1157 = arith.mulf %1156, %1155 : vector<1x8xf32>
    %1158 = vector.extract_strided_slice %1149 {offsets = [0, 128], sizes = [1, 8], strides = [1, 1]} : vector<1x512xf32> to vector<1x8xf32>
    %cst_509 = arith.constant 5.000000e-01 : f32
    %1159 = vector.broadcast %cst_509 : f32 to vector<1x8xf32>
    %1160 = arith.mulf %1159, %1158 : vector<1x8xf32>
    %1161 = math.tanh %1160 : vector<1x8xf32>
    %cst_510 = arith.constant 1.000000e+00 : f32
    %1162 = vector.broadcast %cst_510 : f32 to vector<1x8xf32>
    %1163 = arith.addf %1161, %1162 : vector<1x8xf32>
    %cst_511 = arith.constant 5.000000e-01 : f32
    %1164 = vector.broadcast %cst_511 : f32 to vector<1x8xf32>
    %1165 = arith.mulf %1164, %1163 : vector<1x8xf32>
    %1166 = vector.extract_strided_slice %1149 {offsets = [0, 256], sizes = [1, 8], strides = [1, 1]} : vector<1x512xf32> to vector<1x8xf32>
    %1167 = math.tanh %1166 : vector<1x8xf32>
    %1168 = vector.extract_strided_slice %1149 {offsets = [0, 384], sizes = [1, 8], strides = [1, 1]} : vector<1x512xf32> to vector<1x8xf32>
    %cst_512 = arith.constant 5.000000e-01 : f32
    %1169 = vector.broadcast %cst_512 : f32 to vector<1x8xf32>
    %1170 = arith.mulf %1169, %1168 : vector<1x8xf32>
    %1171 = math.tanh %1170 : vector<1x8xf32>
    %cst_513 = arith.constant 1.000000e+00 : f32
    %1172 = vector.broadcast %cst_513 : f32 to vector<1x8xf32>
    %1173 = arith.addf %1171, %1172 : vector<1x8xf32>
    %cst_514 = arith.constant 5.000000e-01 : f32
    %1174 = vector.broadcast %cst_514 : f32 to vector<1x8xf32>
    %1175 = arith.mulf %1174, %1173 : vector<1x8xf32>
    %1176 = arith.mulf %1165, %1028 : vector<1x8xf32>
    %1177 = arith.mulf %1157, %1167 : vector<1x8xf32>
    %1178 = arith.addf %1176, %1177 : vector<1x8xf32>
    %1179 = math.tanh %1178 : vector<1x8xf32>
    %1180 = arith.mulf %1175, %1179 : vector<1x8xf32>
    %c80_515 = arith.constant 80 : index
    %c0_516 = arith.constant 0 : index
    %1181 = vector.load %arg3[%c80_515, %c0_516] : memref<96x512xf32, #tpu.memory_space<vmem>>, vector<1x512xf32>
    %c72_517 = arith.constant 72 : index
    %c0_518 = arith.constant 0 : index
    %1182 = vector.load %arg3[%c72_517, %c0_518] : memref<96x512xf32, #tpu.memory_space<vmem>>, vector<8x512xf32>
    %c88_519 = arith.constant 88 : index
    %c0_520 = arith.constant 0 : index
    %1183 = vector.load %arg3[%c88_519, %c0_520] : memref<96x512xf32, #tpu.memory_space<vmem>>, vector<1x512xf32>
    %cst_521 = arith.constant dense<0.000000e+00> : vector<1x512xf32>
    %1184 = tpu.matmul %1180, %1182, %cst_521 {dimension_numbers = #tpu.dot_dimension_numbers<[1], [0], [0], [1], [0, 0, 1, 1], [], []>} : vector<1x8xf32>, vector<8x512xf32>, vector<1x512xf32> -> vector<1x512xf32>
    %1185 = arith.addf %1184, %1183 : vector<1x512xf32>
    %cst_522 = arith.constant dense<0.000000e+00> : vector<1x512xf32>
    %1186 = tpu.matmul %1068, %1181, %cst_522 {dimension_numbers = #tpu.dot_dimension_numbers<[1], [0], [0], [1], [0, 0, 1, 1], [], []>} : vector<1x1xf32>, vector<1x512xf32>, vector<1x512xf32> -> vector<1x512xf32>
    %1187 = arith.addf %1185, %1186 : vector<1x512xf32>
    %1188 = vector.extract_strided_slice %1187 {offsets = [0, 0], sizes = [1, 1], strides = [1, 1]} : vector<1x512xf32> to vector<1x1xf32>
    %cst_523 = arith.constant 5.000000e-01 : f32
    %1189 = vector.broadcast %cst_523 : f32 to vector<1x1xf32>
    %1190 = arith.mulf %1189, %1188 : vector<1x1xf32>
    %1191 = math.tanh %1190 : vector<1x1xf32>
    %cst_524 = arith.constant 1.000000e+00 : f32
    %1192 = vector.broadcast %cst_524 : f32 to vector<1x1xf32>
    %1193 = arith.addf %1191, %1192 : vector<1x1xf32>
    %cst_525 = arith.constant 5.000000e-01 : f32
    %1194 = vector.broadcast %cst_525 : f32 to vector<1x1xf32>
    %1195 = arith.mulf %1194, %1193 : vector<1x1xf32>
    %1196 = vector.extract_strided_slice %1187 {offsets = [0, 128], sizes = [1, 1], strides = [1, 1]} : vector<1x512xf32> to vector<1x1xf32>
    %cst_526 = arith.constant 5.000000e-01 : f32
    %1197 = vector.broadcast %cst_526 : f32 to vector<1x1xf32>
    %1198 = arith.mulf %1197, %1196 : vector<1x1xf32>
    %1199 = math.tanh %1198 : vector<1x1xf32>
    %cst_527 = arith.constant 1.000000e+00 : f32
    %1200 = vector.broadcast %cst_527 : f32 to vector<1x1xf32>
    %1201 = arith.addf %1199, %1200 : vector<1x1xf32>
    %cst_528 = arith.constant 5.000000e-01 : f32
    %1202 = vector.broadcast %cst_528 : f32 to vector<1x1xf32>
    %1203 = arith.mulf %1202, %1201 : vector<1x1xf32>
    %1204 = vector.extract_strided_slice %1187 {offsets = [0, 256], sizes = [1, 1], strides = [1, 1]} : vector<1x512xf32> to vector<1x1xf32>
    %1205 = math.tanh %1204 : vector<1x1xf32>
    %1206 = vector.extract_strided_slice %1187 {offsets = [0, 384], sizes = [1, 1], strides = [1, 1]} : vector<1x512xf32> to vector<1x1xf32>
    %cst_529 = arith.constant 5.000000e-01 : f32
    %1207 = vector.broadcast %cst_529 : f32 to vector<1x1xf32>
    %1208 = arith.mulf %1207, %1206 : vector<1x1xf32>
    %1209 = math.tanh %1208 : vector<1x1xf32>
    %cst_530 = arith.constant 1.000000e+00 : f32
    %1210 = vector.broadcast %cst_530 : f32 to vector<1x1xf32>
    %1211 = arith.addf %1209, %1210 : vector<1x1xf32>
    %cst_531 = arith.constant 5.000000e-01 : f32
    %1212 = vector.broadcast %cst_531 : f32 to vector<1x1xf32>
    %1213 = arith.mulf %1212, %1211 : vector<1x1xf32>
    %1214 = arith.mulf %1203, %1066 : vector<1x1xf32>
    %1215 = arith.mulf %1195, %1205 : vector<1x1xf32>
    %1216 = arith.addf %1214, %1215 : vector<1x1xf32>
    %1217 = math.tanh %1216 : vector<1x1xf32>
    %1218 = arith.mulf %1213, %1217 : vector<1x1xf32>
    %c7_532 = arith.constant 7 : index
    %c0_533 = arith.constant 0 : index
    %1219 = vector.load %arg15[%c7_532, %c0_533] : memref<8x1xf32, #tpu.memory_space<vmem>>, vector<1x1xf32>
    tpu.vector_store %arg15[%c7_532, %c0_533], %1218 {strides = array<i32>} : memref<8x1xf32, #tpu.memory_space<vmem>>, vector<1x1xf32>,
    %c0_534 = arith.constant 0 : index
    %c0_535 = arith.constant 0 : index
    %1220 = vector.load %arg15[%c0_534, %c0_535] : memref<8x1xf32, #tpu.memory_space<vmem>>, vector<8x1xf32>
    %c0_536 = arith.constant 0 : index
    %c0_537 = arith.constant 0 : index
    %1221 = vector.load %arg2[%c0_536, %c0_537] : memref<8x56xf32, #tpu.memory_space<vmem>>, vector<8x56xf32>
    %c0_538 = arith.constant 0 : index
    %c0_539 = arith.constant 0 : index
    %1222 = vector.load %arg4[%c0_538, %c0_539] : memref<56x512xf32, #tpu.memory_space<vmem>>, vector<56x512xf32>
    %cst_540 = arith.constant dense<0.000000e+00> : vector<8x512xf32>
    %1223 = tpu.matmul %1221, %1222, %cst_540 {dimension_numbers = #tpu.dot_dimension_numbers<[1], [0], [0], [1], [0, 0, 1, 1], [], []>} : vector<8x56xf32>, vector<56x512xf32>, vector<8x512xf32> -> vector<8x512xf32>
    %c0_541 = arith.constant 0 : index
    %c0_542 = arith.constant 0 : index
    %1224 = vector.load %arg5[%c0_541, %c0_542] : memref<1x512xf32, #tpu.memory_space<vmem>>, vector<1x512xf32>
    %1225 = vector.broadcast %1220 : vector<8x1xf32> to vector<8x512xf32>
    %1226 = vector.broadcast %1224 : vector<1x512xf32> to vector<8x512xf32>
    %1227 = arith.mulf %1225, %1226 : vector<8x512xf32>
    %1228 = arith.addf %1223, %1227 : vector<8x512xf32>
    %c0_543 = arith.constant 0 : index
    %c0_544 = arith.constant 0 : index
    %1229 = vector.load %arg6[%c0_543, %c0_544] : memref<4x512xf32, #tpu.memory_space<vmem>>, vector<1x512xf32>
    %1230 = vector.broadcast %1229 : vector<1x512xf32> to vector<8x512xf32>
    %1231 = arith.addf %1228, %1230 : vector<8x512xf32>
    %cst_545 = arith.constant 0.000000e+00 : f32
    %1232 = vector.broadcast %cst_545 : f32 to vector<8x512xf32>
    %1233 = arith.cmpf oge, %1231, %1232 : vector<8x512xf32>
    %cst_546 = arith.constant 0.00999999977 : f32
    %1234 = vector.broadcast %cst_546 : f32 to vector<8x512xf32>
    %1235 = arith.mulf %1234, %1231 : vector<8x512xf32>
    %1236 = arith.select %1233, %1231, %1235 : vector<8x512xi1>, vector<8x512xf32>
    %c0_i32_547 = arith.constant 0 : i32
    %1237 = tpu.memref_slice %arg13[%c0_i32_547] : memref<2x!tpu.dma_semaphore, #tpu.memory_space<semaphore_mem>> -> memref<1x!tpu.dma_semaphore, #tpu.memory_space<semaphore_mem>>
    %1238 = tpu.memref_squeeze %1237 : memref<1x!tpu.dma_semaphore, #tpu.memory_space<semaphore_mem>> -> memref<!tpu.dma_semaphore, #tpu.memory_space<semaphore_mem>>
    tpu.wait_dma2 semaphore(%1238 : memref<!tpu.dma_semaphore, #tpu.memory_space<semaphore_mem>>) src(%arg8 : memref<512x512xf32, #tpu.memory_space<any>>) dst(%arg11 : memref<512x512xf32, #tpu.memory_space<vmem>>)
    %c0_548 = arith.constant 0 : index
    %c0_549 = arith.constant 0 : index
    %1239 = vector.load %arg11[%c0_548, %c0_549] : memref<512x512xf32, #tpu.memory_space<vmem>>, vector<512x512xf32>
    %cst_550 = arith.constant dense<0.000000e+00> : vector<8x512xf32>
    %1240 = tpu.matmul %1236, %1239, %cst_550 {dimension_numbers = #tpu.dot_dimension_numbers<[1], [0], [0], [1], [0, 0, 1, 1], [], []>} : vector<8x512xf32>, vector<512x512xf32>, vector<8x512xf32> -> vector<8x512xf32>
    %c1_551 = arith.constant 1 : index
    %c0_552 = arith.constant 0 : index
    %1241 = vector.load %arg6[%c1_551, %c0_552] : memref<4x512xf32, #tpu.memory_space<vmem>>, vector<1x512xf32>
    %1242 = vector.broadcast %1241 : vector<1x512xf32> to vector<8x512xf32>
    %1243 = arith.addf %1240, %1242 : vector<8x512xf32>
    %cst_553 = arith.constant 0.000000e+00 : f32
    %1244 = vector.broadcast %cst_553 : f32 to vector<8x512xf32>
    %1245 = arith.cmpf oge, %1243, %1244 : vector<8x512xf32>
    %cst_554 = arith.constant 0.00999999977 : f32
    %1246 = vector.broadcast %cst_554 : f32 to vector<8x512xf32>
    %1247 = arith.mulf %1246, %1243 : vector<8x512xf32>
    %1248 = arith.select %1245, %1243, %1247 : vector<8x512xi1>, vector<8x512xf32>
    %c1_i32_555 = arith.constant 1 : i32
    %1249 = tpu.memref_slice %arg13[%c1_i32_555] : memref<2x!tpu.dma_semaphore, #tpu.memory_space<semaphore_mem>> -> memref<1x!tpu.dma_semaphore, #tpu.memory_space<semaphore_mem>>
    %1250 = tpu.memref_squeeze %1249 : memref<1x!tpu.dma_semaphore, #tpu.memory_space<semaphore_mem>> -> memref<!tpu.dma_semaphore, #tpu.memory_space<semaphore_mem>>
    tpu.wait_dma2 semaphore(%1250 : memref<!tpu.dma_semaphore, #tpu.memory_space<semaphore_mem>>) src(%arg9 : memref<512x512xf32, #tpu.memory_space<any>>) dst(%arg12 : memref<512x512xf32, #tpu.memory_space<vmem>>)
    %c0_556 = arith.constant 0 : index
    %c0_557 = arith.constant 0 : index
    %1251 = vector.load %arg12[%c0_556, %c0_557] : memref<512x512xf32, #tpu.memory_space<vmem>>, vector<512x512xf32>
    %cst_558 = arith.constant dense<0.000000e+00> : vector<8x512xf32>
    %1252 = tpu.matmul %1248, %1251, %cst_558 {dimension_numbers = #tpu.dot_dimension_numbers<[1], [0], [0], [1], [0, 0, 1, 1], [], []>} : vector<8x512xf32>, vector<512x512xf32>, vector<8x512xf32> -> vector<8x512xf32>
    %c2_559 = arith.constant 2 : index
    %c0_560 = arith.constant 0 : index
    %1253 = vector.load %arg6[%c2_559, %c0_560] : memref<4x512xf32, #tpu.memory_space<vmem>>, vector<1x512xf32>
    %1254 = vector.broadcast %1253 : vector<1x512xf32> to vector<8x512xf32>
    %1255 = arith.addf %1252, %1254 : vector<8x512xf32>
    %cst_561 = arith.constant 0.000000e+00 : f32
    %1256 = vector.broadcast %cst_561 : f32 to vector<8x512xf32>
    %1257 = arith.cmpf oge, %1255, %1256 : vector<8x512xf32>
    %cst_562 = arith.constant 0.00999999977 : f32
    %1258 = vector.broadcast %cst_562 : f32 to vector<8x512xf32>
    %1259 = arith.mulf %1258, %1255 : vector<8x512xf32>
    %1260 = arith.select %1257, %1255, %1259 : vector<8x512xi1>, vector<8x512xf32>
    %c0_563 = arith.constant 0 : index
    %c0_564 = arith.constant 0 : index
    %1261 = vector.load %arg7[%c0_563, %c0_564] : memref<512x1xf32, #tpu.memory_space<vmem>>, vector<512x1xf32>
    %cst_565 = arith.constant dense<0.000000e+00> : vector<8x1xf32>
    %1262 = tpu.matmul %1260, %1261, %cst_565 {dimension_numbers = #tpu.dot_dimension_numbers<[1], [0], [0], [1], [0, 0, 1, 1], [], []>} : vector<8x512xf32>, vector<512x1xf32>, vector<8x1xf32> -> vector<8x1xf32>
    %c3_566 = arith.constant 3 : index
    %c0_567 = arith.constant 0 : index
    %1263 = vector.load %arg6[%c3_566, %c0_567] : memref<4x512xf32, #tpu.memory_space<vmem>>, vector<1x1xf32>
    %1264 = vector.broadcast %1263 : vector<1x1xf32> to vector<8x1xf32>
    %1265 = arith.addf %1262, %1264 : vector<8x1xf32>
    %cst_568 = arith.constant 0.000000e+00 : f32
    %1266 = vector.broadcast %cst_568 : f32 to vector<8x1xf32>
    %1267 = arith.maximumf %1265, %1266 : vector<8x1xf32>
    %c0_569 = arith.constant 0 : index
    %c0_570 = arith.constant 0 : index
    %1268 = vector.load %arg10[%c0_569, %c0_570] : memref<8x1xf32, #tpu.memory_space<vmem>>, vector<8x1xf32>
    tpu.vector_store %arg10[%c0_569, %c0_570], %1267 {strides = array<i32>} : memref<8x1xf32, #tpu.memory_space<vmem>>, vector<8x1xf32>,
    return
  }
  func.func @transform_0(%arg0: i32) -> (i32, i32, i32) {
    %c0_i32 = arith.constant 0 : i32
    %c0_i32_0 = arith.constant 0 : i32
    %c0_i32_1 = arith.constant 0 : i32
    %c0_i32_2 = arith.constant 0 : i32
    return %c0_i32, %c0_i32_0, %c0_i32_1 : i32, i32, i32
  }
  func.func @transform_1(%arg0: i32) -> (i32, i32) {
    %c0_i32 = arith.constant 0 : i32
    %c0_i32_0 = arith.constant 0 : i32
    %c0_i32_1 = arith.constant 0 : i32
    return %c0_i32, %c0_i32_0 : i32, i32
  }
  func.func @transform_2(%arg0: i32) -> (i32, i32) {
    %c0_i32 = arith.constant 0 : i32
    %c0_i32_0 = arith.constant 0 : i32
    %c0_i32_1 = arith.constant 0 : i32
    return %c0_i32, %c0_i32_0 : i32, i32
  }
  func.func @transform_3(%arg0: i32) -> (i32, i32) {
    %c0_i32 = arith.constant 0 : i32
    %c0_i32_0 = arith.constant 0 : i32
    %c0_i32_1 = arith.constant 0 : i32
    return %c0_i32, %c0_i32_0 : i32, i32
  }
  func.func @transform_4(%arg0: i32) -> (i32, i32) {
    %c0_i32 = arith.constant 0 : i32
    %c0_i32_0 = arith.constant 0 : i32
    %c0_i32_1 = arith.constant 0 : i32
    return %c0_i32, %c0_i32_0 : i32, i32
  }
  func.func @transform_5(%arg0: i32) -> (i32, i32) {
    %c0_i32 = arith.constant 0 : i32
    %c0_i32_0 = arith.constant 0 : i32
    %c0_i32_1 = arith.constant 0 : i32
    return %c0_i32, %c0_i32_0 : i32, i32
  }
  func.func @transform_6(%arg0: i32) -> (i32, i32) {
    %c0_i32 = arith.constant 0 : i32
    %c0_i32_0 = arith.constant 0 : i32
    %c0_i32_1 = arith.constant 0 : i32
    return %c0_i32, %c0_i32_0 : i32, i32
  }
  func.func @transform_9(%arg0: i32) -> (i32, i32) {
    %c0_i32 = arith.constant 0 : i32
    %c0_i32_0 = arith.constant 0 : i32
    %c0_i32_1 = arith.constant 0 : i32
    return %c0_i32, %c0_i32_0 : i32, i32
  }
}

</mosaic_0001>

<bundles_post_ra>
// kernel: mlp1_forward.1
= control target key start
LH: loop header
LB: loop body
LE: loop exit
PB: predicated region body
PF: predicated region fallthrough
CT: control target
= control target key end

     0   :  { %14 = vsyncpa [#allocation8], 0  ;;  %s12555_s30 = smov [#allocation7]   ;;  %s14293_s0 = inlined_call_operand.vmem [shape: f32[8,1,8], index: 0, kind: input, shape index: {}]   ;;  %s14294_s1 = inlined_call_operand.vmem [shape: f32[8,56], index: 1, kind: input, shape index: {}]   ;;  %s14295_s2 = inlined_call_operand.vmem [shape: f32[96,512], index: 2, kind: input, shape index: {}]   ;;  %s14296_s3 = inlined_call_operand.hbm [shape: f32[56,512], index: 3, kind: input, shape index: {}]   ;;  %s14297_s4 = inlined_call_operand.vmem [shape: f32[1,512], index: 4, kind: input, shape index: {}]   ;;  %s14298_s5 = inlined_call_operand.vmem [shape: f32[4,512], index: 5, kind: input, shape index: {}]   ;;  %s14299_s6 = inlined_call_operand.vmem [shape: f32[512,1], index: 6, kind: input, shape index: {}]   ;;  %s14300_s7 = inlined_call_operand.hbm [shape: f32[512,512], index: 7, kind: input, shape index: {}]   ;;  %s14301_s8 = inlined_call_operand.hbm [shape: f32[512,512], index: 8, kind: input, shape index: {}]   ;;  %s14302_s9 = inlined_call_operand.vmem [shape: f32[8,1], index: 9, kind: output, shape index: {}]  }
   0x1   :  { %s26_s10 = sshll.u32 %s12555_s30, 4  ;;  %s27_s10 = int_to_ptr.vmem [resolvable:$true] %s26_s10 }
   0x2   :  { %s12497_s11 = scalar_lea.vmem %s27_s10, 3584  ;;  %p12502_p1 = scmp.lt.s32.totalorder %s27_s10, %s27_s10 }
   0x3   :  { %p12498_p0 = scmp.ne.s32.totalorder %s27_s10, %s12497_s11  ;;  %p12503_p2 = scmp.lt.s32.totalorder %s12497_s11, %s12497_s11 }
   0x5   :  { %p12504_p3 = por %p12503_p2, %p12502_p1 }
   0x7   :  { %p12505_p4 = pnand %p12504_p3, %p12498_p0 }
   0x9   :  { %12508 = shalt.err (!%p12505_p4)
}
   0xa   :  { %s12556_s12 = smov 512   ;;  %s12557_s13 = smov 32  }
   0xb   :  { %32 = dma.hbm_to_vmem [thread:$0]  %s14296_s3, 3584, %s27_s10, [#allocation8], %s12556_s12, %s12556_s12, %s12557_s13  }
   0xc   :  { %12549 = dma.done.wait [#allocation8], 3584  }
   0xd   :  { %12550 = vsyncadd [#allocation8], 4294963712  ;;  %v80_v0 = vlaneseq  ;;  %v12558_v1 = vmov 0.0   ;;  %v12559_v2 = vmov 1966171168   ;;  %v66_v6 = vld [vmem:[%s14295_s2 + $0x8] sm:$0xff] }
   0xe   :  { %224 = vmatprep.mubr.f32.mxu0 %v12558_v1  ;;  %295 = vmatprep.mubr.f32.mxu1 %v12558_v1  ;;  %v113_v3 = vunpack.c.l.s4 %v12559_v2  ;;  %v68_v7 = vld [vmem:[%s14295_s2 + $0x18] sm:$0xff]  ;;  %v65_v8 = vld [vmem:[%s14295_s2] sm:$0xff]  ;;  %v67_v9 = vld [vmem:[%s14295_s2 + $0x10] sm:$0xff]  ;;  %vm157_vm0 = vcmask 64512   ;;  %vm1385_vm1 = vcmask 1040384   ;;  %vm1558_vm2 = vcmask 0  }
   0xf   :  { %v12618_v4 = vshrl.u32 %v80_v0, 7  ;;  %190 = vmatprep.subr.mxu0 %v66_v6  ;;  %261 = vmatprep.subr.mxu1 %v68_v7  ;;  %v12635_v10 = vld [vmem:[%s14295_s2 + $0x28] sm:$0xff]  ;;  %v12640_v11 = vld [vmem:[%s14295_s2 + $0x38] sm:$0xff]  ;;  %v71_v13 = vld [vmem:[%s14293_s0] sm:$0x1]  ;;  %vm1382_vm3 = vcmask 7168  }
  0x10   :  { %v114_v5 = vunpack.c.0.s8 %v113_v3  ;;  %191 = vmatpush1.msra.mxu0 %v65_v8  ;;  %262 = vmatpush1.msra.mxu1 %v67_v9  ;;  %v72_v14 = vld [vmem:[%s14293_s0 + $0x1] sm:$0x1]  ;;  %v73_v15 = vld [vmem:[%s14293_s0 + $0x2] sm:$0x1]  ;;  %v74_v16 = vld [vmem:[%s14293_s0 + $0x3] sm:$0x1] }
  0x11   :  { %344 = vmatprep.subr.mxu0 %v12635_v10  ;;  %415 = vmatprep.subr.mxu1 %v12640_v11  ;;  %v75_v17 = vld [vmem:[%s14293_s0 + $0x4] sm:$0x1]  ;;  %v76_v18 = vld [vmem:[%s14293_s0 + $0x5] sm:$0x1]  ;;  %v108_v19 = vcombine.low %v71_v13, %v72_v14  ;;  %v77_v20 = vld [vmem:[%s14293_s0 + $0x6] sm:$0x1]  ;;  %v109_v22 = vcombine.low %v73_v15, %v74_v16 }
  0x12   :  { %v12643_v12 = vsub.s32 %v114_v5, %v12618_v4  ;;  %v78_v21 = vld [vmem:[%s14293_s0 + $0x7] sm:$0x1]  ;;  %v110_v23 = vcombine.low %v75_v17, %v76_v18  ;;  %v12685_v35 = vld [vmem:[%s14295_s2 + $0x30] sm:$0xff]  ;;  %v12700_v36 = vld [vmem:[%s14295_s2 + $0x68] sm:$0xff]  ;;  %v12734_v42 = vsub.s32 0, %v12618_v4  ;;  %v12737_v43 = vsub.s32 2, %v12618_v4 }
  0x13   :  { %v111_v24 = vcombine.low %v77_v20, %v78_v21  ;;  %v12680_v34 = vld [vmem:[%s14295_s2 + $0x20] sm:$0xff]  ;;  %v12710_v38 = vld [vmem:[%s14295_s2 + $0x78] sm:$0xff]  ;;  %v12717_v39 = vld [vmem:[%s14295_s2 + $0x70] sm:$0xff]  ;;  %v12743_v45 = vsub.s32 1, %v12618_v4  ;;  %v12746_v46 = vsub.s32 3, %v12618_v4  ;;  %vm10343_vm4 = vcmask 457728  }
  0x14   :  { %v118_v25 = vrot.slane %v108_v19, %v12643_v12  ;;  %v125_v26 = vrot.slane %v109_v22, %v12643_v12  ;;  %v132_v27 = vrot.slane %v110_v23, %v12643_v12  ;;  %v12705_v37 = vld [vmem:[%s14295_s2 + $0x60] sm:$0xff]  ;;  %v12722_v40 = vld [vmem:[%s14295_s2 + $0x88] sm:$0xff]  ;;  %v12730_v41 = vld [vmem:[%s14295_s2 + $0x98] sm:$0xff]  ;;  %s12562_s21 = smov [#allocation3]  }
  0x15   :  { %v139_v28 = vrot.slane %v111_v24, %v12643_v12  ;;  %v11912_v44 = vld [vmem:[%s14295_s2 + $0x40] ss:$8 sm:$0xf]  ;;  %s61_s22 = sshll.u32 %s12562_s21, 4  ;;  %s62_s22 = int_to_ptr.vmem [resolvable:$true] %s61_s22 }
  0x16   :  { %v140_v29 = vcombine.low %v118_v25, %v125_v26  ;;  %v83_v47 = vrot.slane %v11912_v44, %v12734_v42  ;;  %v91_v48 = vrot.slane %v11912_v44, %v12737_v43  ;;  %v87_v49 = vrot.slane %v11912_v44, %v12743_v45 }
  0x17   :  { %v141_v30 = vcombine.low %v132_v27, %v139_v28  ;;  %v95_v50 = vrot.slane %v11912_v44, %v12746_v46  ;;  %v12785_v44 = vld [vmem:[%s14295_s2 + $0xc8] sm:$0xff] }
  0x18   :  { %v148_v31 = vrot.slane %v140_v29, %v12643_v12 }
  0x19   :  { %v155_v32 = vrot.slane %v141_v30, %v12643_v12 }
  0x1b   :  { %v156_v33 = vcombine.low %v148_v31, %v155_v32  ;;  %v12763_v32 = vld [vmem:[%s14295_s2 + $0x80] sm:$0xff] }
  0x1d   :  { %11913 = vmatmul.mubr.msk.f32.vlgmr.msra.gmra.mxu0 %vm157_vm0, %v156_v33  ;;  %11914 = vmatmul.mubr.msk.f32.vlgmr.msra.gmra.mxu1 %vm157_vm0, %v156_v33  ;;  %v12768_v33 = vld [vmem:[%s14295_s2 + $0x90] sm:$0xff] }
  0x1e   :  { %345 = vmatpush1.msra.mxu0 %v12680_v34  ;;  %416 = vmatpush1.msra.mxu1 %v12685_v35 }
  0x1f   :  { %378 = vmatprep.mubr.f32.mxu0 %v12558_v1  ;;  %449 = vmatprep.mubr.f32.mxu1 %v12558_v1 }
  0x20   :  { %575 = vmatprep.subr.mxu0 %v12700_v36  ;;  %646 = vmatprep.subr.mxu1 %v12710_v38 }
  0x21   :  { %379 = vmatmul.mubr.f32.vlgmr.msra.gmra.mxu0 %v12558_v1  ;;  %450 = vmatmul.mubr.f32.vlgmr.msra.gmra.mxu1 %v12558_v1 }
  0x22   :  { %609 = vmatprep.mubr.f32.mxu0 %v12558_v1  ;;  %680 = vmatprep.mubr.f32.mxu1 %v12558_v1 }
  0x23   :  { %576 = vmatpush1.msra.mxu0 %v12705_v37  ;;  %647 = vmatpush1.msra.mxu1 %v12717_v39 }
  0x24   :  { %717 = vmatprep.subr.mxu0 %v12722_v40  ;;  %788 = vmatprep.subr.mxu1 %v12730_v41 }
  0xdd   :  { %v226_v51 = vpop.f32.mrf.mxu0  ;;  %v297_v52 = vpop.f32.mrf.mxu1 }
  0xde   :  { %v227_v53 = vadd.f32 %v226_v51, %v83_v47  ;;  %v298_v54 = vadd.f32 %v297_v52, %v91_v48  ;;  %v12790_v47 = vld [vmem:[%s14295_s2 + $0xc0] sm:$0xff]  ;;  %v12795_v48 = vld [vmem:[%s14295_s2 + $0xd8] sm:$0xff] }
  0xdf   :  { %v228_v55 = vpop.f32.mrf.mxu0  ;;  %v299_v56 = vpop.f32.mrf.mxu1  ;;  %v12815_v51 = vld [vmem:[%s14295_s2 + $0xf8] sm:$0xff] }
  0xe0   :  { %302 = vst [vmem:[#allocation5] sm:$0xff] %v227_v53  ;;  %304 = vst [vmem:[#allocation5 + $0x10] sm:$0xff] %v298_v54  ;;  %v229_v57 = vadd.f32 %v228_v55, %v87_v49  ;;  %v300_v58 = vadd.f32 %v299_v56, %v95_v50  ;;  %v12802_v49 = vld [vmem:[%s14295_s2 + $0xd0] sm:$0xff]  ;;  %v12807_v50 = vld [vmem:[%s14295_s2 + $0xe8] sm:$0xff] }
  0xe1   :  { %v380_v59 = vpop.f32.mrf.mxu0  ;;  %v451_v60 = vpop.f32.mrf.mxu1  ;;  %v11915_v52 = vld [vmem:[%s14295_s2 + $0xa0] ss:$8 sm:$0xf] }
  0xe2   :  { %303 = vst [vmem:[#allocation5 + $0x8] sm:$0xff] %v229_v57  ;;  %305 = vst [vmem:[#allocation5 + $0x18] sm:$0xff] %v300_v58  ;;  %v525_v53 = vrot.slane %v11915_v52, %v12734_v42  ;;  %v529_v56 = vrot.slane %v11915_v52, %v12743_v45 }
  0xe3   :  { %v382_v61 = vpop.f32.mrf.mxu0  ;;  %v453_v62 = vpop.f32.mrf.mxu1 }
  0xe4   :  { %v460_v63 = vcombine.low %v380_v59, %v382_v61  ;;  %v461_v0 = vcombine.low %v451_v60, %v453_v62  ;;  %v533_v61 = vrot.slane %v11915_v52, %v12737_v43 }
  0xe6   :  { %v468_v2 = vrot.slane %v460_v63, %v12643_v12  ;;  %v475_v3 = vrot.slane %v461_v0, %v12643_v12 }
  0xe8   :  { %v476_v4 = vcombine.low %v468_v2, %v475_v3 }
  0xe9   :  { %v310_v6 = vld [vmem:[#allocation5] ss:$8 sm:$0xf] }
  0xea   :  { %v483_v5 = vrot.slane %v476_v4, %v12643_v12 }
  0xec   :  { %v485_v7 = vadd.f32 %v483_v5, %v310_v6 }
  0xee   :  { %v486_v8 = vmul.f32 0.5, %v485_v7  ;;  %v491_v9 = vrot.slane %v485_v7, 1  ;;  %v497_v14 = vrot.slane %v485_v7, 2  ;;  %v500_v15 = vrot.slane %v485_v7, 3 }
  0xef   :  { %v537_v7 = vrot.slane %v11915_v52, %v12746_v46 }
  0xf0   :  { %12169 = vtanh.f32 %v486_v8  ;;  %v493_v13 = vmul.f32 0.5, %v491_v9  ;;  %v502_v16 = vmul.f32 0.5, %v500_v15 }
  0xf2   :  { %12171 = vtanh.f32 %v493_v13 }
  0xf3   :  { %12173 = vtanh.f32 %v497_v14 }
  0xf4   :  { %12175 = vtanh.f32 %v502_v16 }
  0xfd   :  { %v12170_v17 = vpop.eup %12169 }
  0xfe   :  { %v488_v18 = vadd.f32 1.0, %v12170_v17 }
  0xff   :  { %v12172_v19 = vpop.eup %12171 }
 0x100   :  { %v489_v20 = vmul.f32 0.5, %v488_v18  ;;  %v495_v21 = vadd.f32 1.0, %v12172_v19  ;;  %v12174_v23 = vpop.eup %12173 }
 0x101   :  { %v12176_v27 = vpop.eup %12175 }
 0x102   :  { %v496_v22 = vmul.f32 0.5, %v495_v21  ;;  %v507_v25 = vmul.f32 %v12174_v23, %v489_v20  ;;  %v504_v28 = vadd.f32 1.0, %v12176_v27 }
 0x104   :  { %v506_v24 = vmul.f32 0.0, %v496_v22  ;;  %v505_v29 = vmul.f32 0.5, %v504_v28 }
 0x106   :  { %v12755_v26 = vadd.f32 %v507_v25, %v506_v24 }
 0x108   :  { %12177 = vtanh.f32 %v12755_v26 }
 0x115   :  { %v12178_v30 = vpop.eup %12177 }
 0x116   :  { %v12758_v31 = vmul.f32 %v12178_v30, %v505_v29 }
 0x118   :  { %11916 = vmatmul.mubr.msk.f32.vlgmr.msra.gmra.mxu0 %vm157_vm0, %v12758_v31  ;;  %11917 = vmatmul.mubr.msk.f32.vlgmr.msra.gmra.mxu1 %vm157_vm0, %v12758_v31 }
 0x119   :  { %718 = vmatpush1.msra.mxu0 %v12763_v32  ;;  %751 = vmatprep.mubr.f32.mxu0 %v12558_v1 }
 0x11a   :  { %789 = vmatpush1.msra.mxu1 %v12768_v33  ;;  %822 = vmatprep.mubr.f32.mxu1 %v12558_v1 }
 0x11b   :  { %915 = vmatprep.subr.mxu0 %v12785_v44  ;;  %986 = vmatprep.subr.mxu1 %v12795_v48 }
 0x11c   :  { %752 = vmatmul.mubr.f32.vlgmr.msra.gmra.mxu0 %v12558_v1  ;;  %823 = vmatmul.mubr.f32.vlgmr.msra.gmra.mxu1 %v12558_v1 }
 0x11d   :  { %949 = vmatprep.mubr.f32.mxu0 %v12558_v1  ;;  %1020 = vmatprep.mubr.f32.mxu1 %v12558_v1 }
 0x11e   :  { %916 = vmatpush1.msra.mxu0 %v12790_v47  ;;  %987 = vmatpush1.msra.mxu1 %v12802_v49 }
 0x11f   :  { %1057 = vmatprep.subr.mxu0 %v12807_v50  ;;  %1128 = vmatprep.subr.mxu1 %v12815_v51 }
 0x1d8   :  { %v611_v54 = vpop.f32.mrf.mxu0  ;;  %v682_v55 = vpop.f32.mrf.mxu1 }
 0x1d9   :  { %v612_v58 = vadd.f32 %v611_v54, %v525_v53  ;;  %v683_v5 = vadd.f32 %v682_v55, %v533_v61  ;;  %v12833_v53 = vld [vmem:[%s14295_s2 + $0xe0] sm:$0xff]  ;;  %v12838_v54 = vld [vmem:[%s14295_s2 + $0xf0] sm:$0xff]  ;;  %v12855_v55 = vld [vmem:[%s14295_s2 + $0x128] sm:$0xff] }
 0x1da   :  { %v613_v57 = vpop.f32.mrf.mxu0  ;;  %v684_v59 = vpop.f32.mrf.mxu1 }
 0x1db   :  { %v614_v62 = vadd.f32 %v613_v57, %v529_v56  ;;  %v685_v13 = vadd.f32 %v684_v59, %v537_v7  ;;  %v12860_v56 = vld [vmem:[%s14295_s2 + $0x138] sm:$0xff]  ;;  %v12865_v57 = vld [vmem:[%s14295_s2 + $0x120] sm:$0xff] }
 0x1dc   :  { %v753_v60 = vpop.f32.mrf.mxu0  ;;  %v824_v4 = vpop.f32.mrf.mxu1  ;;  %v11921_v59 = vld [vmem:[%s14295_s2 + $0x140] ss:$8 sm:$0xf] }
 0x1dd   :  { %v829_v63 = vadd.f32 %v753_v60, %v612_v58  ;;  %v831_v8 = vadd.f32 %v824_v4, %v683_v5  ;;  %v12872_v58 = vld [vmem:[%s14295_s2 + $0x130] sm:$0xff]  ;;  %v1373_v60 = vrot.slane %v11921_v59, %v12743_v45  ;;  %v1381_v61 = vrot.slane %v11921_v59, %v12746_v46 }
 0x1de   :  { %v755_v0 = vpop.f32.mrf.mxu0  ;;  %v826_v9 = vpop.f32.mrf.mxu1 }
 0x1df   :  { %v833_v2 = vmul.f32 0.5, %v829_v63  ;;  %v830_v3 = vadd.f32 %v755_v0, %v614_v62  ;;  %v832_v14 = vadd.f32 %v826_v9, %v685_v13  ;;  %v11918_v62 = vld [vmem:[%s14295_s2 + $0x100] ss:$8 sm:$0xf] }
 0x1e0   :  { %v865_v63 = vrot.slane %v11918_v62, %v12734_v42 }
 0x1e1   :  { %12179 = vtanh.f32 %v833_v2  ;;  %v837_v6 = vmul.f32 0.5, %v830_v3  ;;  %v842_v15 = vmul.f32 0.5, %v832_v14  ;;  %v869_v3 = vrot.slane %v11918_v62, %v12743_v45 }
 0x1e3   :  { %12181 = vtanh.f32 %v837_v6 }
 0x1e4   :  { %12183 = vtanh.f32 %v831_v8  ;;  %v873_v8 = vrot.slane %v11918_v62, %v12737_v43 }
 0x1e5   :  { %12185 = vtanh.f32 %v842_v15 }
 0x1ee   :  { %v12180_v16 = vpop.eup %12179 }
 0x1ef   :  { %v835_v17 = vadd.f32 1.0, %v12180_v16 }
 0x1f0   :  { %v12182_v18 = vpop.eup %12181 }
 0x1f1   :  { %v836_v19 = vmul.f32 0.5, %v835_v17  ;;  %v839_v20 = vadd.f32 1.0, %v12182_v18  ;;  %v12184_v22 = vpop.eup %12183 }
 0x1f2   :  { %v12186_v27 = vpop.eup %12185 }
 0x1f3   :  { %v840_v21 = vmul.f32 0.5, %v839_v20  ;;  %v847_v24 = vmul.f32 %v12184_v22, %v836_v19  ;;  %v844_v28 = vadd.f32 1.0, %v12186_v27  ;;  %v877_v20 = vrot.slane %v11918_v62, %v12746_v46 }
 0x1f5   :  { %v846_v23 = vmul.f32 0.0, %v840_v21  ;;  %v845_v29 = vmul.f32 0.5, %v844_v28 }
 0x1f7   :  { %v12825_v25 = vadd.f32 %v847_v24, %v846_v23 }
 0x1f9   :  { %12187 = vtanh.f32 %v12825_v25 }
 0x206   :  { %v12188_v30 = vpop.eup %12187 }
 0x207   :  { %v12828_v52 = vmul.f32 %v12188_v30, %v845_v29 }
 0x209   :  { %11919 = vmatmul.mubr.msk.f32.vlgmr.msra.gmra.mxu0 %vm157_vm0, %v12828_v52  ;;  %11920 = vmatmul.mubr.msk.f32.vlgmr.msra.gmra.mxu1 %vm157_vm0, %v12828_v52 }
 0x20a   :  { %1058 = vmatpush1.msra.mxu0 %v12833_v53  ;;  %1091 = vmatprep.mubr.f32.mxu0 %v12558_v1 }
 0x20b   :  { %1129 = vmatpush1.msra.mxu1 %v12838_v54  ;;  %1162 = vmatprep.mubr.f32.mxu1 %v12558_v1 }
 0x20c   :  { %1253 = vmatprep.subr.mxu0 %v12855_v55  ;;  %1324 = vmatprep.subr.mxu1 %v12860_v56 }
 0x20d   :  { %1092 = vmatmul.mubr.f32.vlgmr.msra.gmra.mxu0 %v12558_v1  ;;  %1163 = vmatmul.mubr.f32.vlgmr.msra.gmra.mxu1 %v12558_v1 }
 0x20e   :  { %1287 = vmatprep.mubr.f32.mxu0 %v12558_v1  ;;  %1358 = vmatprep.mubr.f32.mxu1 %v12558_v1 }
 0x20f   :  { %1254 = vmatpush1.msra.mxu0 %v12865_v57  ;;  %1325 = vmatpush1.msra.mxu1 %v12872_v58 }
 0x210   :  { %11925 = vmatprep.subr.msk.mxu0 %vm1385_vm1, %v1373_v60  ;;  %11927 = vmatprep.subr.msk.mxu1 %vm1385_vm1, %v1381_v61 }
 0x2c9   :  { %v951_v0 = vpop.f32.mrf.mxu0  ;;  %v1022_v2 = vpop.f32.mrf.mxu1 }
 0x2ca   :  { %v952_v5 = vadd.f32 %v951_v0, %v865_v63  ;;  %v1023_v18 = vadd.f32 %v1022_v2, %v873_v8  ;;  %v1369_v8 = vrot.slane %v11921_v59, %v12734_v42 }
 0x2cb   :  { %v953_v4 = vpop.f32.mrf.mxu0  ;;  %v1024_v6 = vpop.f32.mrf.mxu1 }
 0x2cc   :  { %v954_v9 = vadd.f32 %v953_v4, %v869_v3  ;;  %v1025_v23 = vadd.f32 %v1024_v6, %v877_v20 }
 0x2cd   :  { %v1093_v7 = vpop.f32.mrf.mxu0  ;;  %v1164_v17 = vpop.f32.mrf.mxu1 }
 0x2ce   :  { %v1169_v13 = vadd.f32 %v1093_v7, %v952_v5  ;;  %v1171_v21 = vadd.f32 %v1164_v17, %v1023_v18 }
 0x2cf   :  { %v1095_v14 = vpop.f32.mrf.mxu0  ;;  %v1166_v22 = vpop.f32.mrf.mxu1 }
 0x2d0   :  { %v1173_v15 = vmul.f32 0.5, %v1169_v13  ;;  %v1170_v16 = vadd.f32 %v1095_v14, %v954_v9  ;;  %v1172_v24 = vadd.f32 %v1166_v22, %v1025_v23  ;;  %v1377_v9 = vrot.slane %v11921_v59, %v12737_v43  ;;  %v11922_v59 = vld [vmem:[%s14295_s2 + $0x160] ss:$8 sm:$0xf] }
 0x2d1   :  { %v1203_v14 = vrot.slane %v11922_v59, %v12734_v42  ;;  %v1211_v22 = vrot.slane %v11922_v59, %v12737_v43 }
 0x2d2   :  { %12189 = vtanh.f32 %v1173_v15  ;;  %v1177_v19 = vmul.f32 0.5, %v1170_v16  ;;  %v1182_v27 = vmul.f32 0.5, %v1172_v24  ;;  %v1207_v16 = vrot.slane %v11922_v59, %v12743_v45 }
 0x2d4   :  { %12191 = vtanh.f32 %v1177_v19 }
 0x2d5   :  { %12193 = vtanh.f32 %v1171_v21 }
 0x2d6   :  { %12195 = vtanh.f32 %v1182_v27 }
 0x2df   :  { %v12190_v28 = vpop.eup %12189 }
 0x2e0   :  { %v1175_v29 = vadd.f32 1.0, %v12190_v28 }
 0x2e1   :  { %v12192_v30 = vpop.eup %12191 }
 0x2e2   :  { %v1176_v60 = vmul.f32 0.5, %v1175_v29  ;;  %v1179_v61 = vadd.f32 1.0, %v12192_v30  ;;  %v12194_v0 = vpop.eup %12193 }
 0x2e3   :  { %v12196_v62 = vpop.eup %12195 }
 0x2e4   :  { %v1180_v63 = vmul.f32 0.5, %v1179_v61  ;;  %v1187_v3 = vmul.f32 %v12194_v0, %v1176_v60  ;;  %v1184_v5 = vadd.f32 1.0, %v12196_v62 }
 0x2e6   :  { %v1186_v2 = vmul.f32 0.0, %v1180_v63  ;;  %v1185_v6 = vmul.f32 0.5, %v1184_v5 }
 0x2e8   :  { %v12890_v4 = vadd.f32 %v1187_v3, %v1186_v2  ;;  %v1215_v2 = vrot.slane %v11922_v59, %v12746_v46 }
 0x2ea   :  { %12197 = vtanh.f32 %v12890_v4 }
 0x2f7   :  { %v12198_v7 = vpop.eup %12197 }
 0x2f8   :  { %v12895_v13 = vmul.f32 %v12198_v7, %v1185_v6 }
 0x2fa   :  { %11923 = vmatmul.mubr.msk.f32.vlgmr.msra.gmra.mxu0 %vm157_vm0, %v12895_v13  ;;  %11924 = vmatmul.mubr.msk.f32.vlgmr.msra.gmra.mxu1 %vm157_vm0, %v12895_v13 }
 0x2fb   :  { %11926 = vmatpush1.msk.msra.mxu0 %vm1385_vm1, %v1369_v8  ;;  %11928 = vmatpush1.msk.msra.mxu1 %vm1385_vm1, %v1377_v9 }
 0x2fc   :  { %1458 = vmatprep.mubr.f32.mxu0 %v12558_v1  ;;  %1529 = vmatprep.mubr.f32.mxu1 %v12558_v1 }
 0x2fd   :  { %1596 = vmatprep.subr.mxu0 %v12635_v10  ;;  %1667 = vmatprep.subr.mxu1 %v12640_v11 }
 0x2fe   :  { %1459 = vmatmul.mubr.f32.vlgmr.msra.gmra.mxu0 %v12558_v1  ;;  %1530 = vmatmul.mubr.f32.vlgmr.msra.gmra.mxu1 %v12558_v1 }
 0x2ff   :  { %1597 = vmatpush1.msra.mxu0 %v12680_v34  ;;  %1668 = vmatpush1.msra.mxu1 %v12685_v35 }
 0x300   :  { %1630 = vmatprep.mubr.f32.mxu0 %v12558_v1  ;;  %1701 = vmatprep.mubr.f32.mxu1 %v12558_v1 }
 0x301   :  { %1826 = vmatprep.subr.mxu0 %v12700_v36  ;;  %1897 = vmatprep.subr.mxu1 %v12710_v38 }
 0x302   :  { %11929 = vmatmul.mubr.msk.f32.vlgmr.msra.gmra.mxu0 %vm157_vm0, %v12758_v31  ;;  %11930 = vmatmul.mubr.msk.f32.vlgmr.msra.gmra.mxu1 %vm157_vm0, %v12758_v31 }
 0x303   :  { %1827 = vmatpush1.msra.mxu0 %v12705_v37  ;;  %1860 = vmatprep.mubr.f32.mxu0 %v12558_v1 }
 0x304   :  { %1898 = vmatpush1.msra.mxu1 %v12717_v39  ;;  %1931 = vmatprep.mubr.f32.mxu1 %v12558_v1 }
 0x305   :  { %1968 = vmatprep.subr.mxu0 %v12722_v40  ;;  %2039 = vmatprep.subr.mxu1 %v12730_v41 }
 0x3ba   :  { %v1289_v15 = vpop.f32.mrf.mxu0  ;;  %v1360_v31 = vpop.f32.mrf.mxu1 }
 0x3bb   :  { %v1290_v19 = vadd.f32 %v1289_v15, %v1203_v14  ;;  %v1361_v63 = vadd.f32 %v1360_v31, %v1211_v22 }
 0x3bc   :  { %v1291_v17 = vpop.f32.mrf.mxu0  ;;  %v1362_v18 = vpop.f32.mrf.mxu1 }
 0x3bd   :  { %v1292_v23 = vadd.f32 %v1291_v17, %v1207_v16  ;;  %v1363_v14 = vadd.f32 %v1362_v18, %v1215_v2  ;;  %v1565_v17 = vld [vmem:[#allocation5 + $0x1] ss:$8 sm:$0xf] }
 0x3be   :  { %v1460_v20 = vpop.f32.mrf.mxu0  ;;  %v1531_v21 = vpop.f32.mrf.mxu1 }
 0x3bf   :  { %v1536_v24 = vadd.f32 %v1460_v20, %v1290_v19  ;;  %v1538_v5 = vadd.f32 %v1531_v21, %v1361_v63 }
 0x3c0   :  { %v1462_v27 = vpop.f32.mrf.mxu0  ;;  %v1533_v28 = vpop.f32.mrf.mxu1 }
 0x3c1   :  { %v1540_v29 = vmul.f32 0.5, %v1536_v24  ;;  %v1537_v30 = vadd.f32 %v1462_v27, %v1292_v23  ;;  %v1539_v16 = vadd.f32 %v1533_v28, %v1363_v14 }
 0x3c2   :  { %v1632_v60 = vpop.f32.mrf.mxu0  ;;  %v1703_v61 = vpop.f32.mrf.mxu1 }
 0x3c3   :  { %12199 = vtanh.f32 %v1540_v29  ;;  %v1544_v0 = vmul.f32 0.5, %v1537_v30  ;;  %v1549_v20 = vmul.f32 0.5, %v1539_v16 }
 0x3c4   :  { %v1634_v3 = vpop.f32.mrf.mxu0  ;;  %v1705_v62 = vpop.f32.mrf.mxu1 }
 0x3c5   :  { %12201 = vtanh.f32 %v1544_v0  ;;  %v1712_v6 = vcombine.low %v1632_v60, %v1634_v3  ;;  %v1713_v7 = vcombine.low %v1703_v61, %v1705_v62 }
 0x3c6   :  { %12203 = vtanh.f32 %v1538_v5 }
 0x3c7   :  { %v1720_v8 = vrot.slane %v1712_v6, %v12643_v12  ;;  %v1727_v9 = vrot.slane %v1713_v7, %v12643_v12 }
 0x3c9   :  { %v1728_v15 = vcombine.low %v1720_v8, %v1727_v9 }
 0x3cb   :  { %v1735_v31 = vrot.slane %v1728_v15, %v12643_v12 }
 0x3cd   :  { %v1737_v19 = vadd.f32 %v1735_v31, %v1565_v17 }
 0x3cf   :  { %v1738_v59 = vmul.f32 0.5, %v1737_v19  ;;  %v1743_v22 = vrot.slane %v1737_v19, 1  ;;  %v1749_v18 = vrot.slane %v1737_v19, 2  ;;  %v1752_v2 = vrot.slane %v1737_v19, 3 }
 0x3d0   :  { %v12200_v23 = vpop.eup %12199 }
 0x3d1   :  { %v1542_v21 = vadd.f32 1.0, %v12200_v23  ;;  %12205 = vtanh.f32 %v1738_v59  ;;  %v1745_v24 = vmul.f32 0.5, %v1743_v22  ;;  %v1754_v3 = vmul.f32 0.5, %v1752_v2 }
 0x3d2   :  { %v12202_v27 = vpop.eup %12201  ;;  %12207 = vtanh.f32 %v1549_v20 }
 0x3d3   :  { %v1543_v29 = vmul.f32 0.5, %v1542_v21  ;;  %v1546_v30 = vadd.f32 1.0, %v12202_v27  ;;  %12209 = vtanh.f32 %v1745_v24  ;;  %v12204_v61 = vpop.eup %12203 }
 0x3d4   :  { %12211 = vtanh.f32 %v1749_v18 }
 0x3d5   :  { %v1547_v60 = vmul.f32 0.5, %v1546_v30  ;;  %v1554_v63 = vmul.f32 %v12204_v61, %v1543_v29 }
 0x3d7   :  { %v1553_v28 = vmul.f32 0.0, %v1547_v60 }
 0x3d9   :  { %v12935_v0 = vadd.f32 %v1554_v63, %v1553_v28 }
 0x3db   :  { %12213 = vtanh.f32 %v12935_v0 }
 0x3dc   :  { %12215 = vtanh.f32 %v1754_v3 }
 0x3de   :  { %v12206_v62 = vpop.eup %12205 }
 0x3df   :  { %v12208_v5 = vpop.eup %12207  ;;  %v1740_v6 = vadd.f32 1.0, %v12206_v62 }
 0x3e0   :  { %v12210_v7 = vpop.eup %12209  ;;  %v1551_v14 = vadd.f32 1.0, %v12208_v5 }
 0x3e1   :  { %v1741_v8 = vmul.f32 0.5, %v1740_v6  ;;  %v1747_v9 = vadd.f32 1.0, %v12210_v7  ;;  %v12212_v16 = vpop.eup %12211 }
 0x3e2   :  { %v1552_v20 = vmul.f32 0.5, %v1551_v14 }
 0x3e3   :  { %v1748_v15 = vmul.f32 0.5, %v1747_v9  ;;  %v1759_v17 = vmul.f32 %v12212_v16, %v1741_v8 }
 0x3e5   :  { %v1758_v31 = vmul.f32 %v1748_v15, %v12755_v26  ;;  %v11931_v26 = vld [vmem:[%s14295_s2 + $0xa0] ss:$8 sm:$0xf] }
 0x3e6   :  { %v1776_v30 = vrot.slane %v11931_v26, %v12734_v42  ;;  %v1780_v60 = vrot.slane %v11931_v26, %v12743_v45  ;;  %v1784_v3 = vrot.slane %v11931_v26, %v12737_v43  ;;  %v1788_v16 = vrot.slane %v11931_v26, %v12746_v46 }
 0x3e7   :  { %v12939_v59 = vadd.f32 %v1759_v17, %v1758_v31 }
 0x3e8   :  { %v12214_v19 = vpop.eup %12213 }
 0x3e9   :  { %v12941_v22 = vmul.f32 %v12214_v19, %v1552_v20  ;;  %12217 = vtanh.f32 %v12939_v59  ;;  %v12216_v23 = vpop.eup %12215 }
 0x3ea   :  { %v1756_v21 = vadd.f32 1.0, %v12216_v23 }
 0x3eb   :  { %1559 = vst.msk [vmem:[#allocation6] sm:$0x1] %vm1558_vm2, %v12941_v22 }
 0x3ec   :  { %v1757_v24 = vmul.f32 0.5, %v1756_v21 }
 0x3f6   :  { %v12218_v27 = vpop.eup %12217 }
 0x3f7   :  { %v12946_v29 = vmul.f32 %v12218_v27, %v1757_v24 }
 0x3f9   :  { %11932 = vmatmul.mubr.msk.f32.vlgmr.msra.gmra.mxu0 %vm157_vm0, %v12946_v29  ;;  %11933 = vmatmul.mubr.msk.f32.vlgmr.msra.gmra.mxu1 %vm157_vm0, %v12946_v29 }
 0x3fa   :  { %1969 = vmatpush1.msra.mxu0 %v12763_v32  ;;  %2002 = vmatprep.mubr.f32.mxu0 %v12558_v1 }
 0x3fb   :  { %2040 = vmatpush1.msra.mxu1 %v12768_v33  ;;  %2073 = vmatprep.mubr.f32.mxu1 %v12558_v1 }
 0x3fc   :  { %2165 = vmatprep.subr.mxu0 %v12785_v44  ;;  %2236 = vmatprep.subr.mxu1 %v12795_v48 }
 0x3fd   :  { %11934 = vmatmul.mubr.msk.f32.vlgmr.msra.gmra.mxu0 %vm157_vm0, %v12828_v52  ;;  %11935 = vmatmul.mubr.msk.f32.vlgmr.msra.gmra.mxu1 %vm157_vm0, %v12828_v52 }
 0x3fe   :  { %2166 = vmatpush1.msra.mxu0 %v12790_v47  ;;  %2199 = vmatprep.mubr.f32.mxu0 %v12558_v1 }
 0x3ff   :  { %2237 = vmatpush1.msra.mxu1 %v12802_v49  ;;  %2270 = vmatprep.mubr.f32.mxu1 %v12558_v1 }
 0x400   :  { %2307 = vmatprep.subr.mxu0 %v12807_v50  ;;  %2378 = vmatprep.subr.mxu1 %v12815_v51 }
 0x4b9   :  { %v1862_v18 = vpop.f32.mrf.mxu0  ;;  %v1933_v52 = vpop.f32.mrf.mxu1 }
 0x4ba   :  { %v1863_v28 = vadd.f32 %v1862_v18, %v1776_v30  ;;  %v1934_v14 = vadd.f32 %v1933_v52, %v1784_v3 }
 0x4bb   :  { %v1864_v61 = vpop.f32.mrf.mxu0  ;;  %v1935_v63 = vpop.f32.mrf.mxu1 }
 0x4bc   :  { %v1865_v62 = vadd.f32 %v1864_v61, %v1780_v60  ;;  %v1936_v20 = vadd.f32 %v1935_v63, %v1788_v16 }
 0x4bd   :  { %v2004_v2 = vpop.f32.mrf.mxu0  ;;  %v2075_v9 = vpop.f32.mrf.mxu1 }
 0x4be   :  { %v2080_v5 = vadd.f32 %v2004_v2, %v1863_v28  ;;  %v2082_v31 = vadd.f32 %v2075_v9, %v1934_v14 }
 0x4bf   :  { %v2006_v6 = vpop.f32.mrf.mxu0  ;;  %v2077_v17 = vpop.f32.mrf.mxu1 }
 0x4c0   :  { %v2084_v7 = vmul.f32 0.5, %v2080_v5  ;;  %v2081_v8 = vadd.f32 %v2006_v6, %v1865_v62  ;;  %v2083_v19 = vadd.f32 %v2077_v17, %v1936_v20 }
 0x4c2   :  { %12219 = vtanh.f32 %v2084_v7  ;;  %v2088_v15 = vmul.f32 0.5, %v2081_v8  ;;  %v2093_v23 = vmul.f32 0.5, %v2083_v19 }
 0x4c4   :  { %12221 = vtanh.f32 %v2088_v15 }
 0x4c5   :  { %12223 = vtanh.f32 %v2082_v31 }
 0x4c6   :  { %12225 = vtanh.f32 %v2093_v23 }
 0x4cf   :  { %v12220_v21 = vpop.eup %12219 }
 0x4d0   :  { %v2086_v24 = vadd.f32 1.0, %v12220_v21 }
 0x4d1   :  { %v12222_v27 = vpop.eup %12221 }
 0x4d2   :  { %v2087_v30 = vmul.f32 0.5, %v2086_v24  ;;  %v2090_v18 = vadd.f32 1.0, %v12222_v27  ;;  %v12224_v61 = vpop.eup %12223 }
 0x4d3   :  { %v12226_v26 = vpop.eup %12225 }
 0x4d4   :  { %v2091_v60 = vmul.f32 0.5, %v2090_v18  ;;  %v2098_v28 = vmul.f32 %v12224_v61, %v2087_v30  ;;  %v2095_v63 = vadd.f32 1.0, %v12226_v26 }
 0x4d6   :  { %v2097_v52 = vmul.f32 %v2091_v60, %v12825_v25  ;;  %v2096_v3 = vmul.f32 0.5, %v2095_v63  ;;  %v11941_v25 = vld [vmem:[%s14295_s2 + $0x140] ss:$8 sm:$0xf] }
 0x4d7   :  { %v2621_v6 = vrot.slane %v11941_v25, %v12743_v45  ;;  %v2629_v7 = vrot.slane %v11941_v25, %v12746_v46 }
 0x4d8   :  { %v12976_v2 = vadd.f32 %v2098_v28, %v2097_v52 }
 0x4da   :  { %12227 = vtanh.f32 %v12976_v2 }
 0x4e7   :  { %v12228_v62 = vpop.eup %12227 }
 0x4e8   :  { %v12979_v5 = vmul.f32 %v12228_v62, %v2096_v3 }
 0x4ea   :  { %11937 = vmatmul.mubr.msk.f32.vlgmr.msra.gmra.mxu0 %vm157_vm0, %v12979_v5  ;;  %11938 = vmatmul.mubr.msk.f32.vlgmr.msra.gmra.mxu1 %vm157_vm0, %v12979_v5 }
 0x4eb   :  { %2308 = vmatpush1.msra.mxu0 %v12833_v53  ;;  %2341 = vmatprep.mubr.f32.mxu0 %v12558_v1 }
 0x4ec   :  { %2379 = vmatpush1.msra.mxu1 %v12838_v54  ;;  %2412 = vmatprep.mubr.f32.mxu1 %v12558_v1 }
 0x4ed   :  { %2501 = vmatprep.subr.mxu0 %v12855_v55  ;;  %2572 = vmatprep.subr.mxu1 %v12860_v56 }
 0x4ee   :  { %11939 = vmatmul.mubr.msk.f32.vlgmr.msra.gmra.mxu0 %vm157_vm0, %v12895_v13  ;;  %11940 = vmatmul.mubr.msk.f32.vlgmr.msra.gmra.mxu1 %vm157_vm0, %v12895_v13  ;;  %v11936_v13 = vld [vmem:[%s14295_s2 + $0x100] ss:$8 sm:$0xf] }
 0x4ef   :  { %2502 = vmatpush1.msra.mxu0 %v12865_v57  ;;  %2573 = vmatpush1.msra.mxu1 %v12872_v58  ;;  %v2115_v8 = vrot.slane %v11936_v13, %v12734_v42  ;;  %v2119_v15 = vrot.slane %v11936_v13, %v12743_v45  ;;  %v2123_v19 = vrot.slane %v11936_v13, %v12737_v43 }
 0x4f0   :  { %2535 = vmatprep.mubr.f32.mxu0 %v12558_v1  ;;  %2606 = vmatprep.mubr.f32.mxu1 %v12558_v1  ;;  %v2127_v52 = vrot.slane %v11936_v13, %v12746_v46 }
 0x4f1   :  { %11945 = vmatprep.subr.msk.mxu0 %vm1385_vm1, %v2621_v6  ;;  %11948 = vmatprep.subr.msk.mxu1 %vm1385_vm1, %v2629_v7 }
 0x5aa   :  { %v2201_v9 = vpop.f32.mrf.mxu0  ;;  %v2272_v14 = vpop.f32.mrf.mxu1 }
 0x5ab   :  { %v2202_v31 = vadd.f32 %v2201_v9, %v2115_v8  ;;  %v2273_v60 = vadd.f32 %v2272_v14, %v2123_v19 }
 0x5ac   :  { %v2203_v16 = vpop.f32.mrf.mxu0  ;;  %v2274_v17 = vpop.f32.mrf.mxu1 }
 0x5ad   :  { %v2204_v23 = vadd.f32 %v2203_v16, %v2119_v15  ;;  %v2275_v63 = vadd.f32 %v2274_v17, %v2127_v52 }
 0x5ae   :  { %v2343_v20 = vpop.f32.mrf.mxu0  ;;  %v2414_v18 = vpop.f32.mrf.mxu1 }
 0x5af   :  { %v2419_v21 = vadd.f32 %v2343_v20, %v2202_v31  ;;  %v2421_v28 = vadd.f32 %v2414_v18, %v2273_v60 }
 0x5b0   :  { %v2345_v24 = vpop.f32.mrf.mxu0  ;;  %v2416_v26 = vpop.f32.mrf.mxu1 }
 0x5b1   :  { %v2423_v27 = vmul.f32 0.5, %v2419_v21  ;;  %v2420_v30 = vadd.f32 %v2345_v24, %v2204_v23  ;;  %v2422_v3 = vadd.f32 %v2416_v26, %v2275_v63  ;;  %v2617_v24 = vrot.slane %v11941_v25, %v12734_v42 }
 0x5b3   :  { %12229 = vtanh.f32 %v2423_v27  ;;  %v2427_v61 = vmul.f32 0.5, %v2420_v30  ;;  %v2432_v62 = vmul.f32 0.5, %v2422_v3  ;;  %v2625_v27 = vrot.slane %v11941_v25, %v12737_v43 }
 0x5b5   :  { %12231 = vtanh.f32 %v2427_v61 }
 0x5b6   :  { %12233 = vtanh.f32 %v2421_v28 }
 0x5b7   :  { %12235 = vtanh.f32 %v2432_v62 }
 0x5c0   :  { %v12230_v6 = vpop.eup %12229 }
 0x5c1   :  { %v2425_v7 = vadd.f32 1.0, %v12230_v6 }
 0x5c2   :  { %v12232_v8 = vpop.eup %12231 }
 0x5c3   :  { %v2426_v9 = vmul.f32 0.5, %v2425_v7  ;;  %v2429_v15 = vadd.f32 1.0, %v12232_v8  ;;  %v12234_v31 = vpop.eup %12233 }
 0x5c4   :  { %v12236_v13 = vpop.eup %12235 }
 0x5c5   :  { %v2430_v16 = vmul.f32 0.5, %v2429_v15  ;;  %v2437_v20 = vmul.f32 %v12234_v31, %v2426_v9  ;;  %v2434_v17 = vadd.f32 1.0, %v12236_v13 }
 0x5c7   :  { %v2436_v14 = vmul.f32 %v2430_v16, %v12890_v4  ;;  %v2435_v23 = vmul.f32 0.5, %v2434_v17  ;;  %v2811_v17 = vld [vmem:[#allocation5 + $0x2] ss:$8 sm:$0xf] }
 0x5c9   :  { %v13014_v19 = vadd.f32 %v2437_v20, %v2436_v14 }
 0x5cb   :  { %12237 = vtanh.f32 %v13014_v19 }
 0x5d8   :  { %v12238_v21 = vpop.eup %12237 }
 0x5d9   :  { %v13019_v30 = vmul.f32 %v12238_v21, %v2435_v23 }
 0x5db   :  { %11943 = vmatmul.mubr.msk.f32.vlgmr.msra.gmra.mxu0 %vm157_vm0, %v13019_v30  ;;  %11944 = vmatmul.mubr.msk.f32.vlgmr.msra.gmra.mxu1 %vm157_vm0, %v13019_v30 }
 0x5dc   :  { %11946 = vmatpush1.msk.msra.mxu0 %vm1385_vm1, %v2617_v24  ;;  %11949 = vmatpush1.msk.msra.mxu1 %vm1385_vm1, %v2625_v27 }
 0x5dd   :  { %2705 = vmatprep.mubr.f32.mxu0 %v12558_v1  ;;  %2776 = vmatprep.mubr.f32.mxu1 %v12558_v1 }
 0x5de   :  { %2842 = vmatprep.subr.mxu0 %v12635_v10  ;;  %2913 = vmatprep.subr.mxu1 %v12640_v11  ;;  %v11942_v10 = vld [vmem:[%s14295_s2 + $0x160] ss:$8 sm:$0xf] }
 0x5df   :  { %11947 = vmatmul.mubr.msk.f32.vlgmr.msra.gmra.mxu0 %vm1382_vm3, %v12941_v22  ;;  %11950 = vmatmul.mubr.msk.f32.vlgmr.msra.gmra.mxu1 %vm1382_vm3, %v12941_v22  ;;  %v2451_v11 = vrot.slane %v11942_v10, %v12734_v42  ;;  %v2463_v3 = vrot.slane %v11942_v10, %v12746_v46 }
 0x5e0   :  { %2843 = vmatpush1.msra.mxu0 %v12680_v34  ;;  %2914 = vmatpush1.msra.mxu1 %v12685_v35 }
 0x5e1   :  { %2876 = vmatprep.mubr.f32.mxu0 %v12558_v1  ;;  %2947 = vmatprep.mubr.f32.mxu1 %v12558_v1 }
 0x5e2   :  { %3072 = vmatprep.subr.mxu0 %v12700_v36  ;;  %3143 = vmatprep.subr.mxu1 %v12710_v38  ;;  %v2455_v36 = vrot.slane %v11942_v10, %v12743_v45 }
 0x5e3   :  { %11951 = vmatmul.mubr.msk.f32.vlgmr.msra.gmra.mxu0 %vm157_vm0, %v12946_v29  ;;  %11952 = vmatmul.mubr.msk.f32.vlgmr.msra.gmra.mxu1 %vm157_vm0, %v12946_v29  ;;  %v2459_v29 = vrot.slane %v11942_v10, %v12737_v43 }
 0x5e4   :  { %3073 = vmatpush1.msra.mxu0 %v12705_v37  ;;  %3106 = vmatprep.mubr.f32.mxu0 %v12558_v1 }
 0x5e5   :  { %3144 = vmatpush1.msra.mxu1 %v12717_v39  ;;  %3177 = vmatprep.mubr.f32.mxu1 %v12558_v1 }
 0x5e6   :  { %3214 = vmatprep.subr.mxu0 %v12722_v40  ;;  %3285 = vmatprep.subr.mxu1 %v12730_v41 }
 0x69b   :  { %v2537_v34 = vpop.f32.mrf.mxu0  ;;  %v2608_v35 = vpop.f32.mrf.mxu1 }
 0x69c   :  { %v2538_v4 = vadd.f32 %v2537_v34, %v2451_v11  ;;  %v2609_v26 = vadd.f32 %v2608_v35, %v2459_v29 }
 0x69d   :  { %v2539_v37 = vpop.f32.mrf.mxu0  ;;  %v2610_v38 = vpop.f32.mrf.mxu1 }
 0x69e   :  { %v2540_v40 = vadd.f32 %v2539_v37, %v2455_v36  ;;  %v2611_v31 = vadd.f32 %v2610_v38, %v2463_v3 }
 0x69f   :  { %v2707_v39 = vpop.f32.mrf.mxu0  ;;  %v2778_v22 = vpop.f32.mrf.mxu1 }
 0x6a0   :  { %v2783_v25 = vadd.f32 %v2707_v39, %v2538_v4  ;;  %v2785_v7 = vadd.f32 %v2778_v22, %v2609_v26 }
 0x6a1   :  { %v2709_v41 = vpop.f32.mrf.mxu0  ;;  %v2780_v18 = vpop.f32.mrf.mxu1 }
 0x6a2   :  { %v2787_v60 = vmul.f32 0.5, %v2783_v25  ;;  %v2784_v61 = vadd.f32 %v2709_v41, %v2540_v40  ;;  %v2786_v20 = vadd.f32 %v2780_v18, %v2611_v31 }
 0x6a3   :  { %v2878_v52 = vpop.f32.mrf.mxu0  ;;  %v2949_v28 = vpop.f32.mrf.mxu1 }
 0x6a4   :  { %12239 = vtanh.f32 %v2787_v60  ;;  %v2791_v63 = vmul.f32 0.5, %v2784_v61  ;;  %v2796_v21 = vmul.f32 0.5, %v2786_v20 }
 0x6a5   :  { %v2880_v62 = vpop.f32.mrf.mxu0  ;;  %v2951_v6 = vpop.f32.mrf.mxu1 }
 0x6a6   :  { %12241 = vtanh.f32 %v2791_v63  ;;  %v2958_v8 = vcombine.low %v2878_v52, %v2880_v62  ;;  %v2959_v9 = vcombine.low %v2949_v28, %v2951_v6 }
 0x6a7   :  { %12243 = vtanh.f32 %v2785_v7 }
 0x6a8   :  { %v2966_v15 = vrot.slane %v2958_v8, %v12643_v12  ;;  %v2973_v16 = vrot.slane %v2959_v9, %v12643_v12 }
 0x6aa   :  { %v2974_v14 = vcombine.low %v2966_v15, %v2973_v16 }
 0x6ac   :  { %v2981_v13 = vrot.slane %v2974_v14, %v12643_v12 }
 0x6ae   :  { %v2983_v23 = vadd.f32 %v2981_v13, %v2811_v17 }
 0x6b0   :  { %v2984_v24 = vmul.f32 0.5, %v2983_v23  ;;  %v2989_v27 = vrot.slane %v2983_v23, 1  ;;  %v2995_v38 = vrot.slane %v2983_v23, 2  ;;  %v2998_v25 = vrot.slane %v2983_v23, 3 }
 0x6b1   :  { %v12240_v10 = vpop.eup %12239 }
 0x6b2   :  { %v2789_v11 = vadd.f32 1.0, %v12240_v10  ;;  %12245 = vtanh.f32 %v2984_v24  ;;  %v2991_v34 = vmul.f32 0.5, %v2989_v27  ;;  %v3000_v41 = vmul.f32 0.5, %v2998_v25 }
 0x6b3   :  { %v12242_v35 = vpop.eup %12241  ;;  %12247 = vtanh.f32 %v2796_v21 }
 0x6b4   :  { %v2790_v36 = vmul.f32 0.5, %v2789_v11  ;;  %v2793_v37 = vadd.f32 1.0, %v12242_v35  ;;  %12249 = vtanh.f32 %v2991_v34  ;;  %v12244_v39 = vpop.eup %12243 }
 0x6b5   :  { %12251 = vtanh.f32 %v2995_v38 }
 0x6b6   :  { %v2794_v4 = vmul.f32 0.5, %v2793_v37  ;;  %v2801_v29 = vmul.f32 %v12244_v39, %v2790_v36 }
 0x6b8   :  { %v2800_v22 = vmul.f32 %v2794_v4, %v12935_v0 }
 0x6ba   :  { %v13062_v40 = vadd.f32 %v2801_v29, %v2800_v22 }
 0x6bc   :  { %12253 = vtanh.f32 %v13062_v40 }
 0x6bd   :  { %12255 = vtanh.f32 %v3000_v41 }
 0x6bf   :  { %v12246_v18 = vpop.eup %12245 }
 0x6c0   :  { %v12248_v60 = vpop.eup %12247  ;;  %v2986_v61 = vadd.f32 1.0, %v12246_v18 }
 0x6c1   :  { %v12250_v52 = vpop.eup %12249  ;;  %v2798_v63 = vadd.f32 1.0, %v12248_v60 }
 0x6c2   :  { %v2987_v28 = vmul.f32 0.5, %v2986_v61  ;;  %v2993_v26 = vadd.f32 1.0, %v12250_v52  ;;  %v12252_v62 = vpop.eup %12251 }
 0x6c3   :  { %v2799_v7 = vmul.f32 0.5, %v2798_v63 }
 0x6c4   :  { %v2994_v3 = vmul.f32 0.5, %v2993_v26  ;;  %v3005_v6 = vmul.f32 %v12252_v62, %v2987_v28 }
 0x6c6   :  { %v3004_v0 = vmul.f32 %v2994_v3, %v12939_v59 }
 0x6c8   :  { %v13066_v8 = vadd.f32 %v3005_v6, %v3004_v0 }
 0x6c9   :  { %v12254_v9 = vpop.eup %12253 }
 0x6ca   :  { %v13068_v15 = vmul.f32 %v12254_v9, %v2799_v7  ;;  %12257 = vtanh.f32 %v13066_v8  ;;  %v12256_v16 = vpop.eup %12255 }
 0x6cb   :  { %v3002_v31 = vadd.f32 1.0, %v12256_v16 }
 0x6cc   :  { %2805 = vst.msk [vmem:[#allocation6 + $0x1] sm:$0x1] %vm1558_vm2, %v13068_v15 }
 0x6cd   :  { %v3003_v14 = vmul.f32 0.5, %v3002_v31 }
 0x6d7   :  { %v12258_v20 = vpop.eup %12257 }
 0x6d8   :  { %v13073_v13 = vmul.f32 %v12258_v20, %v3003_v14 }
 0x6da   :  { %11954 = vmatmul.mubr.msk.f32.vlgmr.msra.gmra.mxu0 %vm157_vm0, %v13073_v13  ;;  %11955 = vmatmul.mubr.msk.f32.vlgmr.msra.gmra.mxu1 %vm157_vm0, %v13073_v13 }
 0x6db   :  { %3215 = vmatpush1.msra.mxu0 %v12763_v32  ;;  %3248 = vmatprep.mubr.f32.mxu0 %v12558_v1  ;;  %v11953_v32 = vld [vmem:[%s14295_s2 + $0xa0] ss:$8 sm:$0xf] }
 0x6dc   :  { %3286 = vmatpush1.msra.mxu1 %v12768_v33  ;;  %3319 = vmatprep.mubr.f32.mxu1 %v12558_v1  ;;  %v3022_v33 = vrot.slane %v11953_v32, %v12734_v42  ;;  %v3030_v23 = vrot.slane %v11953_v32, %v12737_v43  ;;  %v3034_v35 = vrot.slane %v11953_v32, %v12746_v46 }
 0x6dd   :  { %3411 = vmatprep.subr.mxu0 %v12785_v44  ;;  %3482 = vmatprep.subr.mxu1 %v12795_v48 }
 0x6de   :  { %11956 = vmatmul.mubr.msk.f32.vlgmr.msra.gmra.mxu0 %vm157_vm0, %v12979_v5  ;;  %11957 = vmatmul.mubr.msk.f32.vlgmr.msra.gmra.mxu1 %vm157_vm0, %v12979_v5 }
 0x6df   :  { %3412 = vmatpush1.msra.mxu0 %v12790_v47  ;;  %3445 = vmatprep.mubr.f32.mxu0 %v12558_v1  ;;  %v3026_v47 = vrot.slane %v11953_v32, %v12743_v45 }
 0x6e0   :  { %3483 = vmatpush1.msra.mxu1 %v12802_v49  ;;  %3516 = vmatprep.mubr.f32.mxu1 %v12558_v1 }
 0x6e1   :  { %3553 = vmatprep.subr.mxu0 %v12807_v50  ;;  %3624 = vmatprep.subr.mxu1 %v12815_v51 }
 0x79a   :  { %v3108_v44 = vpop.f32.mrf.mxu0  ;;  %v3179_v48 = vpop.f32.mrf.mxu1 }
 0x79b   :  { %v3109_v5 = vadd.f32 %v3108_v44, %v3022_v33  ;;  %v3180_v11 = vadd.f32 %v3179_v48, %v3030_v23 }
 0x79c   :  { %v3110_v59 = vpop.f32.mrf.mxu0  ;;  %v3181_v17 = vpop.f32.mrf.mxu1 }
 0x79d   :  { %v3111_v21 = vadd.f32 %v3110_v59, %v3026_v47  ;;  %v3182_v38 = vadd.f32 %v3181_v17, %v3034_v35 }
 0x79e   :  { %v3250_v49 = vpop.f32.mrf.mxu0  ;;  %v3321_v10 = vpop.f32.mrf.mxu1 }
 0x79f   :  { %v3326_v50 = vadd.f32 %v3250_v49, %v3109_v5  ;;  %v3328_v36 = vadd.f32 %v3321_v10, %v3180_v11 }
 0x7a0   :  { %v3252_v24 = vpop.f32.mrf.mxu0  ;;  %v3323_v37 = vpop.f32.mrf.mxu1 }
 0x7a1   :  { %v3330_v51 = vmul.f32 0.5, %v3326_v50  ;;  %v3327_v27 = vadd.f32 %v3252_v24, %v3111_v21  ;;  %v3329_v4 = vadd.f32 %v3323_v37, %v3182_v38 }
 0x7a3   :  { %12259 = vtanh.f32 %v3330_v51  ;;  %v3334_v34 = vmul.f32 0.5, %v3327_v27  ;;  %v3339_v39 = vmul.f32 0.5, %v3329_v4 }
 0x7a5   :  { %12261 = vtanh.f32 %v3334_v34 }
 0x7a6   :  { %12263 = vtanh.f32 %v3328_v36 }
 0x7a7   :  { %12265 = vtanh.f32 %v3339_v39 }
 0x7b0   :  { %v12260_v22 = vpop.eup %12259 }
 0x7b1   :  { %v3332_v29 = vadd.f32 1.0, %v12260_v22 }
 0x7b2   :  { %v12262_v25 = vpop.eup %12261 }
 0x7b3   :  { %v3333_v41 = vmul.f32 0.5, %v3332_v29  ;;  %v3336_v18 = vadd.f32 1.0, %v12262_v25  ;;  %v12264_v61 = vpop.eup %12263 }
 0x7b4   :  { %v12266_v63 = vpop.eup %12265 }
 0x7b5   :  { %v3337_v60 = vmul.f32 0.5, %v3336_v18  ;;  %v3344_v28 = vmul.f32 %v12264_v61, %v3333_v41  ;;  %v3341_v3 = vadd.f32 1.0, %v12266_v63  ;;  %v13160_v61 = vld [vmem:[%s14295_s2 + $0x38] sm:$0xff]  ;;  %v13200_v63 = vld [vmem:[%s14295_s2 + $0x60] sm:$0xff] }
 0x7b7   :  { %v3343_v52 = vmul.f32 %v3337_v60, %v12976_v2  ;;  %v3342_v62 = vmul.f32 0.5, %v3341_v3  ;;  %v13205_v3 = vld [vmem:[%s14295_s2 + $0x78] sm:$0xff] }
 0x7b9   :  { %v13103_v26 = vadd.f32 %v3344_v28, %v3343_v52  ;;  %v13169_v52 = vld [vmem:[%s14295_s2 + $0x20] sm:$0xff]  ;;  %v13174_v28 = vld [vmem:[%s14295_s2 + $0x30] sm:$0xff] }
 0x7bb   :  { %12267 = vtanh.f32 %v13103_v26 }
 0x7c8   :  { %v12268_v0 = vpop.eup %12267 }
 0x7c9   :  { %v13106_v6 = vmul.f32 %v12268_v0, %v3342_v62  ;;  %v13217_v62 = vld [vmem:[%s14295_s2 + $0x88] sm:$0xff]  ;;  %v13225_v0 = vld [vmem:[%s14295_s2 + $0x98] sm:$0xff] }
 0x7cb   :  { %11959 = vmatmul.mubr.msk.f32.vlgmr.msra.gmra.mxu0 %vm157_vm0, %v13106_v6  ;;  %11960 = vmatmul.mubr.msk.f32.vlgmr.msra.gmra.mxu1 %vm157_vm0, %v13106_v6 }
 0x7cc   :  { %3554 = vmatpush1.msra.mxu0 %v12833_v53  ;;  %3587 = vmatprep.mubr.f32.mxu0 %v12558_v1  ;;  %v11963_v53 = vld [vmem:[%s14295_s2 + $0x140] ss:$8 sm:$0xf] }
 0x7cd   :  { %3625 = vmatpush1.msra.mxu1 %v12838_v54  ;;  %3658 = vmatprep.mubr.f32.mxu1 %v12558_v1  ;;  %v3867_v54 = vrot.slane %v11963_v53, %v12743_v45  ;;  %v3863_v41 = vrot.slane %v11963_v53, %v12734_v42  ;;  %v3871_v18 = vrot.slane %v11963_v53, %v12737_v43 }
 0x7ce   :  { %3747 = vmatprep.subr.mxu0 %v12855_v55  ;;  %3818 = vmatprep.subr.mxu1 %v12860_v56  ;;  %v3875_v55 = vrot.slane %v11963_v53, %v12746_v46  ;;  %v11958_v56 = vld [vmem:[%s14295_s2 + $0x100] ss:$8 sm:$0xf] }
 0x7cf   :  { %11961 = vmatmul.mubr.msk.f32.vlgmr.msra.gmra.mxu0 %vm157_vm0, %v13019_v30  ;;  %11962 = vmatmul.mubr.msk.f32.vlgmr.msra.gmra.mxu1 %vm157_vm0, %v13019_v30  ;;  %v3365_v30 = vrot.slane %v11958_v56, %v12743_v45  ;;  %v3369_v14 = vrot.slane %v11958_v56, %v12737_v43  ;;  %v3373_v17 = vrot.slane %v11958_v56, %v12746_v46  ;;  %v11964_v53 = vld [vmem:[%s14295_s2 + $0x160] ss:$8 sm:$0xf] }
 0x7d0   :  { %3748 = vmatpush1.msra.mxu0 %v12865_v57  ;;  %3819 = vmatpush1.msra.mxu1 %v12872_v58  ;;  %v3361_v57 = vrot.slane %v11958_v56, %v12734_v42 }
 0x7d1   :  { %3781 = vmatprep.mubr.f32.mxu0 %v12558_v1  ;;  %3852 = vmatprep.mubr.f32.mxu1 %v12558_v1 }
 0x7d2   :  { %11967 = vmatprep.subr.msk.mxu0 %vm1385_vm1, %v3867_v54  ;;  %11970 = vmatprep.subr.msk.mxu1 %vm1385_vm1, %v3875_v55  ;;  %v3697_v54 = vrot.slane %v11964_v53, %v12734_v42 }
 0x88b   :  { %v3447_v58 = vpop.f32.mrf.mxu0  ;;  %v3518_v2 = vpop.f32.mrf.mxu1 }
 0x88c   :  { %v3448_v9 = vadd.f32 %v3447_v58, %v3361_v57  ;;  %v3519_v59 = vadd.f32 %v3518_v2, %v3369_v14  ;;  %v3701_v57 = vrot.slane %v11964_v53, %v12743_v45 }
 0x88d   :  { %v3449_v7 = vpop.f32.mrf.mxu0  ;;  %v3520_v16 = vpop.f32.mrf.mxu1 }
 0x88e   :  { %v3450_v20 = vadd.f32 %v3449_v7, %v3365_v30  ;;  %v3521_v21 = vadd.f32 %v3520_v16, %v3373_v17  ;;  %v3705_v16 = vrot.slane %v11964_v53, %v12737_v43  ;;  %v3709_v17 = vrot.slane %v11964_v53, %v12746_v46 }
 0x88f   :  { %v3589_v31 = vpop.f32.mrf.mxu0  ;;  %v3660_v47 = vpop.f32.mrf.mxu1 }
 0x890   :  { %v3665_v32 = vadd.f32 %v3589_v31, %v3448_v9  ;;  %v3667_v49 = vadd.f32 %v3660_v47, %v3519_v59 }
 0x891   :  { %v3591_v33 = vpop.f32.mrf.mxu0  ;;  %v3662_v23 = vpop.f32.mrf.mxu1 }
 0x892   :  { %v3669_v44 = vmul.f32 0.5, %v3665_v32  ;;  %v3666_v48 = vadd.f32 %v3591_v33, %v3450_v20  ;;  %v3668_v50 = vadd.f32 %v3662_v23, %v3521_v21 }
 0x894   :  { %12269 = vtanh.f32 %v3669_v44  ;;  %v3673_v5 = vmul.f32 0.5, %v3666_v48  ;;  %v3678_v24 = vmul.f32 0.5, %v3668_v50 }
 0x896   :  { %12271 = vtanh.f32 %v3673_v5 }
 0x897   :  { %12273 = vtanh.f32 %v3667_v49 }
 0x898   :  { %12275 = vtanh.f32 %v3678_v24 }
 0x8a1   :  { %v12270_v51 = vpop.eup %12269 }
 0x8a2   :  { %v3671_v27 = vadd.f32 1.0, %v12270_v51 }
 0x8a3   :  { %v12272_v10 = vpop.eup %12271 }
 0x8a4   :  { %v3672_v11 = vmul.f32 0.5, %v3671_v27  ;;  %v3675_v34 = vadd.f32 1.0, %v12272_v10  ;;  %v12274_v36 = vpop.eup %12273 }
 0x8a5   :  { %v12276_v39 = vpop.eup %12275 }
 0x8a6   :  { %v3676_v35 = vmul.f32 0.5, %v3675_v34  ;;  %v3683_v38 = vmul.f32 %v12274_v36, %v3672_v11  ;;  %v3680_v22 = vadd.f32 1.0, %v12276_v39  ;;  %v4057_v36 = vld [vmem:[#allocation5 + $0x3] ss:$8 sm:$0xf] }
 0x8a8   :  { %v3682_v37 = vmul.f32 %v3676_v35, %v13014_v19  ;;  %v3681_v29 = vmul.f32 0.5, %v3680_v22  ;;  %v13155_v19 = vld [vmem:[%s14295_s2 + $0x28] sm:$0xff] }
 0x8aa   :  { %v13141_v4 = vadd.f32 %v3683_v38, %v3682_v37 }
 0x8ac   :  { %12277 = vtanh.f32 %v13141_v4 }
 0x8b9   :  { %v12278_v25 = vpop.eup %12277 }
 0x8ba   :  { %v13146_v60 = vmul.f32 %v12278_v25, %v3681_v29 }
 0x8bc   :  { %11965 = vmatmul.mubr.msk.f32.vlgmr.msra.gmra.mxu0 %vm157_vm0, %v13146_v60  ;;  %11966 = vmatmul.mubr.msk.f32.vlgmr.msra.gmra.mxu1 %vm157_vm0, %v13146_v60 }
 0x8bd   :  { %11968 = vmatpush1.msk.msra.mxu0 %vm1385_vm1, %v3863_v41  ;;  %11971 = vmatpush1.msk.msra.mxu1 %vm1385_vm1, %v3871_v18 }
 0x8be   :  { %3951 = vmatprep.mubr.f32.mxu0 %v12558_v1  ;;  %4022 = vmatprep.mubr.f32.mxu1 %v12558_v1 }
 0x8bf   :  { %4088 = vmatprep.subr.mxu0 %v13155_v19  ;;  %4159 = vmatprep.subr.mxu1 %v13160_v61 }
 0x8c0   :  { %11969 = vmatmul.mubr.msk.f32.vlgmr.msra.gmra.mxu0 %vm1382_vm3, %v13068_v15  ;;  %11972 = vmatmul.mubr.msk.f32.vlgmr.msra.gmra.mxu1 %vm1382_vm3, %v13068_v15  ;;  %v13195_v15 = vld [vmem:[%s14295_s2 + $0x68] sm:$0xff] }
 0x8c1   :  { %4089 = vmatpush1.msra.mxu0 %v13169_v52  ;;  %4160 = vmatpush1.msra.mxu1 %v13174_v28 }
 0x8c2   :  { %4122 = vmatprep.mubr.f32.mxu0 %v12558_v1  ;;  %4193 = vmatprep.mubr.f32.mxu1 %v12558_v1 }
 0x8c3   :  { %4318 = vmatprep.subr.mxu0 %v13195_v15  ;;  %4389 = vmatprep.subr.mxu1 %v13205_v3 }
 0x8c4   :  { %11973 = vmatmul.mubr.msk.f32.vlgmr.msra.gmra.mxu0 %vm157_vm0, %v13073_v13  ;;  %11974 = vmatmul.mubr.msk.f32.vlgmr.msra.gmra.mxu1 %vm157_vm0, %v13073_v13  ;;  %v13212_v13 = vld [vmem:[%s14295_s2 + $0x70] sm:$0xff] }
 0x8c5   :  { %4352 = vmatprep.mubr.f32.mxu0 %v12558_v1  ;;  %4423 = vmatprep.mubr.f32.mxu1 %v12558_v1 }
 0x8c6   :  { %4319 = vmatpush1.msra.mxu0 %v13200_v63  ;;  %4390 = vmatpush1.msra.mxu1 %v13212_v13 }
 0x8c7   :  { %4460 = vmatprep.subr.mxu0 %v13217_v62  ;;  %4531 = vmatprep.subr.mxu1 %v13225_v0 }
 0x97c   :  { %v3783_v55 = vpop.f32.mrf.mxu0  ;;  %v3854_v56 = vpop.f32.mrf.mxu1 }
 0x97d   :  { %v3784_v30 = vadd.f32 %v3783_v55, %v3697_v54  ;;  %v3855_v59 = vadd.f32 %v3854_v56, %v3705_v16 }
 0x97e   :  { %v3785_v58 = vpop.f32.mrf.mxu0  ;;  %v3856_v2 = vpop.f32.mrf.mxu1 }
 0x97f   :  { %v3786_v31 = vadd.f32 %v3785_v58, %v3701_v57  ;;  %v3857_v10 = vadd.f32 %v3856_v2, %v3709_v17 }
 0x980   :  { %v3953_v7 = vpop.f32.mrf.mxu0  ;;  %v4024_v9 = vpop.f32.mrf.mxu1 }
 0x981   :  { %v4029_v14 = vadd.f32 %v3953_v7, %v3784_v30  ;;  %v4031_v21 = vadd.f32 %v4024_v9, %v3855_v59 }
 0x982   :  { %v3955_v20 = vpop.f32.mrf.mxu0  ;;  %v4026_v32 = vpop.f32.mrf.mxu1 }
 0x983   :  { %v4033_v33 = vmul.f32 0.5, %v4029_v14  ;;  %v4030_v44 = vadd.f32 %v3955_v20, %v3786_v31  ;;  %v4032_v34 = vadd.f32 %v4026_v32, %v3857_v10  ;;  %v13260_v10 = vld [vmem:[%s14295_s2 + $0x90] sm:$0xff] }
 0x984   :  { %v4124_v48 = vpop.f32.mrf.mxu0  ;;  %v4195_v47 = vpop.f32.mrf.mxu1 }
 0x985   :  { %12279 = vtanh.f32 %v4033_v33  ;;  %v4037_v5 = vmul.f32 0.5, %v4030_v44  ;;  %v4042_v38 = vmul.f32 0.5, %v4032_v34  ;;  %v13284_v34 = vld [vmem:[%s14295_s2 + $0xc0] sm:$0xff] }
 0x986   :  { %v4126_v49 = vpop.f32.mrf.mxu0  ;;  %v4197_v23 = vpop.f32.mrf.mxu1 }
 0x987   :  { %12281 = vtanh.f32 %v4037_v5  ;;  %v4204_v50 = vcombine.low %v4124_v48, %v4126_v49  ;;  %v4205_v24 = vcombine.low %v4195_v47, %v4197_v23 }
 0x988   :  { %12283 = vtanh.f32 %v4031_v21 }
 0x989   :  { %v4212_v51 = vrot.slane %v4204_v50, %v12643_v12  ;;  %v4219_v27 = vrot.slane %v4205_v24, %v12643_v12 }
 0x98b   :  { %v4220_v11 = vcombine.low %v4212_v51, %v4219_v27 }
 0x98d   :  { %v4227_v35 = vrot.slane %v4220_v11, %v12643_v12  ;;  %v13279_v11 = vld [vmem:[%s14295_s2 + $0xc8] sm:$0xff] }
 0x98f   :  { %v4229_v37 = vadd.f32 %v4227_v35, %v4057_v36  ;;  %v13289_v35 = vld [vmem:[%s14295_s2 + $0xd8] sm:$0xff]  ;;  %v13301_v36 = vld [vmem:[%s14295_s2 + $0xe8] sm:$0xff] }
 0x991   :  { %v4230_v39 = vmul.f32 0.5, %v4229_v37  ;;  %v4235_v22 = vrot.slane %v4229_v37, 1  ;;  %v4241_v55 = vrot.slane %v4229_v37, 2  ;;  %v4244_v7 = vrot.slane %v4229_v37, 3  ;;  %v13309_v37 = vld [vmem:[%s14295_s2 + $0xf8] sm:$0xff] }
 0x992   :  { %v12280_v29 = vpop.eup %12279 }
 0x993   :  { %v4035_v25 = vadd.f32 1.0, %v12280_v29  ;;  %12285 = vtanh.f32 %v4230_v39  ;;  %v4237_v41 = vmul.f32 0.5, %v4235_v22  ;;  %v4246_v9 = vmul.f32 0.5, %v4244_v7 }
 0x994   :  { %v12282_v18 = vpop.eup %12281  ;;  %12287 = vtanh.f32 %v4042_v38  ;;  %v11975_v38 = vld [vmem:[%s14295_s2 + $0xa0] ss:$8 sm:$0xf] }
 0x995   :  { %v4036_v53 = vmul.f32 0.5, %v4035_v25  ;;  %v4039_v54 = vadd.f32 1.0, %v12282_v18  ;;  %12289 = vtanh.f32 %v4237_v41  ;;  %v12284_v57 = vpop.eup %12283  ;;  %v4268_v39 = vrot.slane %v11975_v38, %v12734_v42 }
 0x996   :  { %12291 = vtanh.f32 %v4241_v55  ;;  %v4272_v25 = vrot.slane %v11975_v38, %v12743_v45  ;;  %v4276_v55 = vrot.slane %v11975_v38, %v12737_v43 }
 0x997   :  { %v4040_v56 = vmul.f32 0.5, %v4039_v54  ;;  %v4047_v2 = vmul.f32 %v12284_v57, %v4036_v53 }
 0x999   :  { %v4046_v58 = vmul.f32 %v4040_v56, %v13062_v40 }
 0x99b   :  { %v13239_v30 = vadd.f32 %v4047_v2, %v4046_v58 }
 0x99d   :  { %12293 = vtanh.f32 %v13239_v30 }
 0x99e   :  { %12295 = vtanh.f32 %v4246_v9 }
 0x9a0   :  { %v12286_v16 = vpop.eup %12285 }
 0x9a1   :  { %v12288_v31 = vpop.eup %12287  ;;  %v4232_v14 = vadd.f32 1.0, %v12286_v16 }
 0x9a2   :  { %v12290_v20 = vpop.eup %12289  ;;  %v4044_v44 = vadd.f32 1.0, %v12288_v31 }
 0x9a3   :  { %v4233_v32 = vmul.f32 0.5, %v4232_v14  ;;  %v4239_v33 = vadd.f32 1.0, %v12290_v20  ;;  %v12292_v47 = vpop.eup %12291  ;;  %v4280_v14 = vrot.slane %v11975_v38, %v12746_v46 }
 0x9a4   :  { %v4045_v5 = vmul.f32 0.5, %v4044_v44 }
 0x9a5   :  { %v4240_v48 = vmul.f32 0.5, %v4239_v33  ;;  %v4251_v59 = vmul.f32 %v12292_v47, %v4233_v32 }
 0x9a7   :  { %v4250_v40 = vmul.f32 %v4240_v48, %v13066_v8  ;;  %v13255_v8 = vld [vmem:[%s14295_s2 + $0x80] sm:$0xff] }
 0x9a9   :  { %v13243_v17 = vadd.f32 %v4251_v59, %v4250_v40 }
 0x9aa   :  { %v12294_v49 = vpop.eup %12293 }
 0x9ab   :  { %v13245_v23 = vmul.f32 %v12294_v49, %v4045_v5  ;;  %12297 = vtanh.f32 %v13243_v17  ;;  %v12296_v21 = vpop.eup %12295 }
 0x9ac   :  { %v4248_v50 = vadd.f32 1.0, %v12296_v21 }
 0x9ad   :  { %4051 = vst.msk [vmem:[#allocation6 + $0x2] sm:$0x1] %vm1558_vm2, %v13245_v23 }
 0x9ae   :  { %v4249_v24 = vmul.f32 0.5, %v4248_v50 }
 0x9b8   :  { %v12298_v51 = vpop.eup %12297 }
 0x9b9   :  { %v13250_v27 = vmul.f32 %v12298_v51, %v4249_v24 }
 0x9bb   :  { %11976 = vmatmul.mubr.msk.f32.vlgmr.msra.gmra.mxu0 %vm157_vm0, %v13250_v27  ;;  %11977 = vmatmul.mubr.msk.f32.vlgmr.msra.gmra.mxu1 %vm157_vm0, %v13250_v27 }
 0x9bc   :  { %4461 = vmatpush1.msra.mxu0 %v13255_v8  ;;  %4494 = vmatprep.mubr.f32.mxu0 %v12558_v1 }
 0x9bd   :  { %4532 = vmatpush1.msra.mxu1 %v13260_v10  ;;  %4565 = vmatprep.mubr.f32.mxu1 %v12558_v1 }
 0x9be   :  { %4657 = vmatprep.subr.mxu0 %v13279_v11  ;;  %4728 = vmatprep.subr.mxu1 %v13289_v35 }
 0x9bf   :  { %11978 = vmatmul.mubr.msk.f32.vlgmr.msra.gmra.mxu0 %vm157_vm0, %v13106_v6  ;;  %11979 = vmatmul.mubr.msk.f32.vlgmr.msra.gmra.mxu1 %vm157_vm0, %v13106_v6  ;;  %v13296_v6 = vld [vmem:[%s14295_s2 + $0xd0] sm:$0xff] }
 0x9c0   :  { %4691 = vmatprep.mubr.f32.mxu0 %v12558_v1  ;;  %4762 = vmatprep.mubr.f32.mxu1 %v12558_v1 }
 0x9c1   :  { %4658 = vmatpush1.msra.mxu0 %v13284_v34  ;;  %4729 = vmatpush1.msra.mxu1 %v13296_v6 }
 0x9c2   :  { %4799 = vmatprep.subr.mxu0 %v13301_v36  ;;  %4870 = vmatprep.subr.mxu1 %v13309_v37 }
 0xa7b   :  { %v4354_v22 = vpop.f32.mrf.mxu0  ;;  %v4425_v29 = vpop.f32.mrf.mxu1 }
 0xa7c   :  { %v4355_v18 = vadd.f32 %v4354_v22, %v4268_v39  ;;  %v4426_v16 = vadd.f32 %v4425_v29, %v4276_v55  ;;  %v13362_v55 = vld [vmem:[%s14295_s2 + $0x120] sm:$0xff] }
 0xa7d   :  { %v4356_v41 = vpop.f32.mrf.mxu0  ;;  %v4427_v53 = vpop.f32.mrf.mxu1 }
 0xa7e   :  { %v4357_v56 = vadd.f32 %v4356_v41, %v4272_v25  ;;  %v4428_v33 = vadd.f32 %v4427_v53, %v4280_v14  ;;  %v13352_v53 = vld [vmem:[%s14295_s2 + $0x128] sm:$0xff] }
 0xa7f   :  { %v4496_v54 = vpop.f32.mrf.mxu0  ;;  %v4567_v9 = vpop.f32.mrf.mxu1 }
 0xa80   :  { %v4572_v57 = vadd.f32 %v4496_v54, %v4355_v18  ;;  %v4574_v20 = vadd.f32 %v4567_v9, %v4426_v16  ;;  %v13328_v18 = vld [vmem:[%s14295_s2 + $0xe0] sm:$0xff]  ;;  %v13357_v54 = vld [vmem:[%s14295_s2 + $0x138] sm:$0xff] }
 0xa81   :  { %v4498_v58 = vpop.f32.mrf.mxu0  ;;  %v4569_v32 = vpop.f32.mrf.mxu1 }
 0xa82   :  { %v4576_v2 = vmul.f32 0.5, %v4572_v57  ;;  %v4573_v7 = vadd.f32 %v4498_v58, %v4357_v56  ;;  %v4575_v44 = vadd.f32 %v4569_v32, %v4428_v33  ;;  %v11985_v56 = vld [vmem:[%s14295_s2 + $0x140] ss:$8 sm:$0xf] }
 0xa83   :  { %v5113_v57 = vrot.slane %v11985_v56, %v12743_v45  ;;  %v5121_v58 = vrot.slane %v11985_v56, %v12746_v46 }
 0xa84   :  { %12299 = vtanh.f32 %v4576_v2  ;;  %v4580_v31 = vmul.f32 0.5, %v4573_v7  ;;  %v4585_v48 = vmul.f32 0.5, %v4575_v44  ;;  %v11980_v2 = vld [vmem:[%s14295_s2 + $0x100] ss:$8 sm:$0xf] }
 0xa85   :  { %v4607_v7 = vrot.slane %v11980_v2, %v12734_v42  ;;  %v4615_v44 = vrot.slane %v11980_v2, %v12737_v43 }
 0xa86   :  { %12301 = vtanh.f32 %v4580_v31  ;;  %v4611_v31 = vrot.slane %v11980_v2, %v12743_v45 }
 0xa87   :  { %12303 = vtanh.f32 %v4574_v20 }
 0xa88   :  { %12305 = vtanh.f32 %v4585_v48 }
 0xa91   :  { %v12300_v47 = vpop.eup %12299 }
 0xa92   :  { %v4578_v40 = vadd.f32 1.0, %v12300_v47 }
 0xa93   :  { %v12302_v59 = vpop.eup %12301 }
 0xa94   :  { %v4579_v5 = vmul.f32 0.5, %v4578_v40  ;;  %v4582_v49 = vadd.f32 1.0, %v12302_v59  ;;  %v12304_v50 = vpop.eup %12303 }
 0xa95   :  { %v12306_v38 = vpop.eup %12305 }
 0xa96   :  { %v4583_v21 = vmul.f32 0.5, %v4582_v49  ;;  %v4590_v51 = vmul.f32 %v12304_v50, %v4579_v5  ;;  %v4587_v22 = vadd.f32 1.0, %v12306_v38 }
 0xa98   :  { %v4589_v24 = vmul.f32 %v4583_v21, %v13103_v26  ;;  %v4588_v29 = vmul.f32 0.5, %v4587_v22  ;;  %v13333_v26 = vld [vmem:[%s14295_s2 + $0xf0] sm:$0xff] }
 0xa9a   :  { %v13320_v39 = vadd.f32 %v4590_v51, %v4589_v24  ;;  %v4619_v24 = vrot.slane %v11980_v2, %v12746_v46 }
 0xa9c   :  { %12307 = vtanh.f32 %v13320_v39 }
 0xaa9   :  { %v12308_v25 = vpop.eup %12307 }
 0xaaa   :  { %v13323_v41 = vmul.f32 %v12308_v25, %v4588_v29 }
 0xaac   :  { %11981 = vmatmul.mubr.msk.f32.vlgmr.msra.gmra.mxu0 %vm157_vm0, %v13323_v41  ;;  %11982 = vmatmul.mubr.msk.f32.vlgmr.msra.gmra.mxu1 %vm157_vm0, %v13323_v41 }
 0xaad   :  { %4800 = vmatpush1.msra.mxu0 %v13328_v18  ;;  %4833 = vmatprep.mubr.f32.mxu0 %v12558_v1 }
 0xaae   :  { %4871 = vmatpush1.msra.mxu1 %v13333_v26  ;;  %4904 = vmatprep.mubr.f32.mxu1 %v12558_v1 }
 0xaaf   :  { %4993 = vmatprep.subr.mxu0 %v13352_v53  ;;  %5064 = vmatprep.subr.mxu1 %v13357_v54 }
 0xab0   :  { %11983 = vmatmul.mubr.msk.f32.vlgmr.msra.gmra.mxu0 %vm157_vm0, %v13146_v60  ;;  %11984 = vmatmul.mubr.msk.f32.vlgmr.msra.gmra.mxu1 %vm157_vm0, %v13146_v60  ;;  %v13369_v60 = vld [vmem:[%s14295_s2 + $0x130] sm:$0xff] }
 0xab1   :  { %5027 = vmatprep.mubr.f32.mxu0 %v12558_v1  ;;  %5098 = vmatprep.mubr.f32.mxu1 %v12558_v1 }
 0xab2   :  { %4994 = vmatpush1.msra.mxu0 %v13362_v55  ;;  %5065 = vmatpush1.msra.mxu1 %v13369_v60 }
 0xab3   :  { %11989 = vmatprep.subr.msk.mxu0 %vm1385_vm1, %v5113_v57  ;;  %11992 = vmatprep.subr.msk.mxu1 %vm1385_vm1, %v5121_v58 }
 0xb6c   :  { %v4693_v9 = vpop.f32.mrf.mxu0  ;;  %v4764_v16 = vpop.f32.mrf.mxu1 }
 0xb6d   :  { %v4694_v20 = vadd.f32 %v4693_v9, %v4607_v7  ;;  %v4765_v21 = vadd.f32 %v4764_v16, %v4615_v44 }
 0xb6e   :  { %v4695_v14 = vpop.f32.mrf.mxu0  ;;  %v4766_v32 = vpop.f32.mrf.mxu1 }
 0xb6f   :  { %v4696_v48 = vadd.f32 %v4695_v14, %v4611_v31  ;;  %v4767_v22 = vadd.f32 %v4766_v32, %v4619_v24 }
 0xb70   :  { %v4835_v33 = vpop.f32.mrf.mxu0  ;;  %v4906_v49 = vpop.f32.mrf.mxu1 }
 0xb71   :  { %v4911_v47 = vadd.f32 %v4835_v33, %v4694_v20  ;;  %v4913_v51 = vadd.f32 %v4906_v49, %v4765_v21 }
 0xb72   :  { %v4837_v40 = vpop.f32.mrf.mxu0  ;;  %v4908_v38 = vpop.f32.mrf.mxu1 }
 0xb73   :  { %v4915_v59 = vmul.f32 0.5, %v4911_v47  ;;  %v4912_v5 = vadd.f32 %v4837_v40, %v4696_v48  ;;  %v4914_v29 = vadd.f32 %v4908_v38, %v4767_v22  ;;  %v5109_v40 = vrot.slane %v11985_v56, %v12734_v42 }
 0xb75   :  { %12309 = vtanh.f32 %v4915_v59  ;;  %v4919_v50 = vmul.f32 0.5, %v4912_v5  ;;  %v4924_v25 = vmul.f32 0.5, %v4914_v29  ;;  %v5117_v59 = vrot.slane %v11985_v56, %v12737_v43 }
 0xb77   :  { %12311 = vtanh.f32 %v4919_v50 }
 0xb78   :  { %12313 = vtanh.f32 %v4913_v51 }
 0xb79   :  { %12315 = vtanh.f32 %v4924_v25 }
 0xb82   :  { %v12310_v57 = vpop.eup %12309 }
 0xb83   :  { %v4917_v58 = vadd.f32 1.0, %v12310_v57 }
 0xb84   :  { %v12312_v7 = vpop.eup %12311 }
 0xb85   :  { %v4918_v9 = vmul.f32 0.5, %v4917_v58  ;;  %v4921_v31 = vadd.f32 1.0, %v12312_v7  ;;  %v12314_v20 = vpop.eup %12313 }
 0xb86   :  { %v12316_v2 = vpop.eup %12315 }
 0xb87   :  { %v4922_v14 = vmul.f32 0.5, %v4921_v31  ;;  %v4929_v33 = vmul.f32 %v12314_v20, %v4918_v9  ;;  %v4926_v32 = vadd.f32 1.0, %v12316_v2 }
 0xb89   :  { %v4928_v16 = vmul.f32 %v4922_v14, %v13141_v4  ;;  %v4927_v48 = vmul.f32 0.5, %v4926_v32  ;;  %v11986_v4 = vld [vmem:[%s14295_s2 + $0x160] ss:$8 sm:$0xf] }
 0xb8a   :  { %v4947_v49 = vrot.slane %v11986_v4, %v12743_v45  ;;  %v4951_v22 = vrot.slane %v11986_v4, %v12737_v43 }
 0xb8b   :  { %v13388_v44 = vadd.f32 %v4929_v33, %v4928_v16  ;;  %v4955_v33 = vrot.slane %v11986_v4, %v12746_v46 }
 0xb8d   :  { %12317 = vtanh.f32 %v13388_v44 }
 0xb9a   :  { %v12318_v47 = vpop.eup %12317 }
 0xb9b   :  { %v13393_v5 = vmul.f32 %v12318_v47, %v4927_v48 }
 0xb9d   :  { %11987 = vmatmul.mubr.msk.f32.vlgmr.msra.gmra.mxu0 %vm157_vm0, %v13393_v5  ;;  %11988 = vmatmul.mubr.msk.f32.vlgmr.msra.gmra.mxu1 %vm157_vm0, %v13393_v5 }
 0xb9e   :  { %11990 = vmatpush1.msk.msra.mxu0 %vm1385_vm1, %v5109_v40  ;;  %11993 = vmatpush1.msk.msra.mxu1 %vm1385_vm1, %v5117_v59 }
 0xb9f   :  { %5197 = vmatprep.mubr.f32.mxu0 %v12558_v1  ;;  %5268 = vmatprep.mubr.f32.mxu1 %v12558_v1 }
 0xba0   :  { %5334 = vmatprep.subr.mxu0 %v13155_v19  ;;  %5405 = vmatprep.subr.mxu1 %v13160_v61 }
 0xba1   :  { %11991 = vmatmul.mubr.msk.f32.vlgmr.msra.gmra.mxu0 %vm1382_vm3, %v13245_v23  ;;  %11994 = vmatmul.mubr.msk.f32.vlgmr.msra.gmra.mxu1 %vm1382_vm3, %v13245_v23  ;;  %v4943_v23 = vrot.slane %v11986_v4, %v12734_v42 }
 0xba2   :  { %5335 = vmatpush1.msra.mxu0 %v13169_v52  ;;  %5406 = vmatpush1.msra.mxu1 %v13174_v28 }
 0xba3   :  { %5368 = vmatprep.mubr.f32.mxu0 %v12558_v1  ;;  %5439 = vmatprep.mubr.f32.mxu1 %v12558_v1 }
 0xba4   :  { %5564 = vmatprep.subr.mxu0 %v13195_v15  ;;  %5635 = vmatprep.subr.mxu1 %v13205_v3 }
 0xba5   :  { %11995 = vmatmul.mubr.msk.f32.vlgmr.msra.gmra.mxu0 %vm157_vm0, %v13250_v27  ;;  %11996 = vmatmul.mubr.msk.f32.vlgmr.msra.gmra.mxu1 %vm157_vm0, %v13250_v27 }
 0xba6   :  { %5565 = vmatpush1.msra.mxu0 %v13200_v63  ;;  %5598 = vmatprep.mubr.f32.mxu0 %v12558_v1 }
 0xba7   :  { %5636 = vmatpush1.msra.mxu1 %v13212_v13  ;;  %5669 = vmatprep.mubr.f32.mxu1 %v12558_v1 }
 0xba8   :  { %5706 = vmatprep.subr.mxu0 %v13217_v62  ;;  %5777 = vmatprep.subr.mxu1 %v13225_v0 }
 0xc5d   :  { %v5029_v56 = vpop.f32.mrf.mxu0  ;;  %v5100_v27 = vpop.f32.mrf.mxu1 }
 0xc5e   :  { %v5030_v24 = vadd.f32 %v5029_v56, %v4943_v23  ;;  %v5101_v20 = vadd.f32 %v5100_v27, %v4951_v22 }
 0xc5f   :  { %v5031_v21 = vpop.f32.mrf.mxu0  ;;  %v5102_v50 = vpop.f32.mrf.mxu1 }
 0xc60   :  { %v5032_v29 = vadd.f32 %v5031_v21, %v4947_v49  ;;  %v5103_v56 = vadd.f32 %v5102_v50, %v4955_v33 }
 0xc61   :  { %v5199_v51 = vpop.f32.mrf.mxu0  ;;  %v5270_v38 = vpop.f32.mrf.mxu1 }
 0xc62   :  { %v5275_v25 = vadd.f32 %v5199_v51, %v5030_v24  ;;  %v5277_v48 = vadd.f32 %v5270_v38, %v5101_v20  ;;  %v5303_v24 = vld [vmem:[#allocation5 + $0x4] ss:$8 sm:$0xf] }
 0xc63   :  { %v5201_v57 = vpop.f32.mrf.mxu0  ;;  %v5272_v58 = vpop.f32.mrf.mxu1 }
 0xc64   :  { %v5279_v7 = vmul.f32 0.5, %v5275_v25  ;;  %v5276_v9 = vadd.f32 %v5201_v57, %v5032_v29  ;;  %v5278_v21 = vadd.f32 %v5272_v58, %v5103_v56 }
 0xc65   :  { %v5370_v31 = vpop.f32.mrf.mxu0  ;;  %v5441_v14 = vpop.f32.mrf.mxu1 }
 0xc66   :  { %12319 = vtanh.f32 %v5279_v7  ;;  %v5283_v16 = vmul.f32 0.5, %v5276_v9  ;;  %v5288_v22 = vmul.f32 0.5, %v5278_v21 }
 0xc67   :  { %v5372_v2 = vpop.f32.mrf.mxu0  ;;  %v5443_v32 = vpop.f32.mrf.mxu1 }
 0xc68   :  { %12321 = vtanh.f32 %v5283_v16  ;;  %v5450_v47 = vcombine.low %v5370_v31, %v5372_v2  ;;  %v5451_v40 = vcombine.low %v5441_v14, %v5443_v32 }
 0xc69   :  { %12323 = vtanh.f32 %v5277_v48 }
 0xc6a   :  { %v5458_v59 = vrot.slane %v5450_v47, %v12643_v12  ;;  %v5465_v23 = vrot.slane %v5451_v40, %v12643_v12 }
 0xc6c   :  { %v5466_v49 = vcombine.low %v5458_v59, %v5465_v23 }
 0xc6e   :  { %v5473_v27 = vrot.slane %v5466_v49, %v12643_v12 }
 0xc70   :  { %v5475_v51 = vadd.f32 %v5473_v27, %v5303_v24 }
 0xc72   :  { %v5476_v4 = vmul.f32 0.5, %v5475_v51  ;;  %v5481_v29 = vrot.slane %v5475_v51, 1  ;;  %v5487_v50 = vrot.slane %v5475_v51, 2  ;;  %v5490_v2 = vrot.slane %v5475_v51, 3 }
 0xc73   :  { %v12320_v25 = vpop.eup %12319 }
 0xc74   :  { %v5281_v38 = vadd.f32 1.0, %v12320_v25  ;;  %12325 = vtanh.f32 %v5476_v4  ;;  %v5483_v57 = vmul.f32 0.5, %v5481_v29  ;;  %v5492_v32 = vmul.f32 0.5, %v5490_v2 }
 0xc75   :  { %v12322_v7 = vpop.eup %12321  ;;  %12327 = vtanh.f32 %v5288_v22 }
 0xc76   :  { %v5282_v9 = vmul.f32 0.5, %v5281_v38  ;;  %v5285_v31 = vadd.f32 1.0, %v12322_v7  ;;  %12329 = vtanh.f32 %v5483_v57  ;;  %v12324_v20 = vpop.eup %12323 }
 0xc77   :  { %12331 = vtanh.f32 %v5487_v50 }
 0xc78   :  { %v5286_v14 = vmul.f32 0.5, %v5285_v31  ;;  %v5293_v16 = vmul.f32 %v12324_v20, %v5282_v9 }
 0xc7a   :  { %v5292_v58 = vmul.f32 %v5286_v14, %v13239_v30 }
 0xc7c   :  { %v13436_v33 = vadd.f32 %v5293_v16, %v5292_v58 }
 0xc7e   :  { %12333 = vtanh.f32 %v13436_v33 }
 0xc7f   :  { %12335 = vtanh.f32 %v5492_v32 }
 0xc81   :  { %v12326_v48 = vpop.eup %12325 }
 0xc82   :  { %v12328_v47 = vpop.eup %12327  ;;  %v5478_v40 = vadd.f32 1.0, %v12326_v48 }
 0xc83   :  { %v12330_v59 = vpop.eup %12329  ;;  %v5290_v49 = vadd.f32 1.0, %v12328_v47 }
 0xc84   :  { %v5479_v23 = vmul.f32 0.5, %v5478_v40  ;;  %v5485_v56 = vadd.f32 1.0, %v12330_v59  ;;  %v12332_v27 = vpop.eup %12331 }
 0xc85   :  { %v5291_v22 = vmul.f32 0.5, %v5290_v49 }
 0xc86   :  { %v5486_v21 = vmul.f32 0.5, %v5485_v56  ;;  %v5497_v24 = vmul.f32 %v12332_v27, %v5479_v23 }
 0xc88   :  { %v5496_v30 = vmul.f32 %v5486_v21, %v13243_v17  ;;  %v11997_v17 = vld [vmem:[%s14295_s2 + $0xa0] ss:$8 sm:$0xf] }
 0xc89   :  { %v5514_v31 = vrot.slane %v11997_v17, %v12734_v42  ;;  %v5518_v14 = vrot.slane %v11997_v17, %v12743_v45  ;;  %v5522_v32 = vrot.slane %v11997_v17, %v12737_v43  ;;  %v5526_v27 = vrot.slane %v11997_v17, %v12746_v46 }
 0xc8a   :  { %v13440_v4 = vadd.f32 %v5497_v24, %v5496_v30 }
 0xc8b   :  { %v12334_v51 = vpop.eup %12333 }
 0xc8c   :  { %v13442_v29 = vmul.f32 %v12334_v51, %v5291_v22  ;;  %12337 = vtanh.f32 %v13440_v4  ;;  %v12336_v25 = vpop.eup %12335 }
 0xc8d   :  { %v5494_v38 = vadd.f32 1.0, %v12336_v25 }
 0xc8e   :  { %5297 = vst.msk [vmem:[#allocation6 + $0x3] sm:$0x1] %vm1558_vm2, %v13442_v29 }
 0xc8f   :  { %v5495_v57 = vmul.f32 0.5, %v5494_v38 }
 0xc99   :  { %v12338_v7 = vpop.eup %12337 }
 0xc9a   :  { %v13447_v9 = vmul.f32 %v12338_v7, %v5495_v57 }
 0xc9c   :  { %11998 = vmatmul.mubr.msk.f32.vlgmr.msra.gmra.mxu0 %vm157_vm0, %v13447_v9  ;;  %11999 = vmatmul.mubr.msk.f32.vlgmr.msra.gmra.mxu1 %vm157_vm0, %v13447_v9 }
 0xc9d   :  { %5707 = vmatpush1.msra.mxu0 %v13255_v8  ;;  %5740 = vmatprep.mubr.f32.mxu0 %v12558_v1 }
 0xc9e   :  { %5778 = vmatpush1.msra.mxu1 %v13260_v10  ;;  %5811 = vmatprep.mubr.f32.mxu1 %v12558_v1 }
 0xc9f   :  { %5903 = vmatprep.subr.mxu0 %v13279_v11  ;;  %5974 = vmatprep.subr.mxu1 %v13289_v35 }
 0xca0   :  { %12000 = vmatmul.mubr.msk.f32.vlgmr.msra.gmra.mxu0 %vm157_vm0, %v13323_v41  ;;  %12001 = vmatmul.mubr.msk.f32.vlgmr.msra.gmra.mxu1 %vm157_vm0, %v13323_v41 }
 0xca1   :  { %5904 = vmatpush1.msra.mxu0 %v13284_v34  ;;  %5937 = vmatprep.mubr.f32.mxu0 %v12558_v1 }
 0xca2   :  { %5975 = vmatpush1.msra.mxu1 %v13296_v6  ;;  %6008 = vmatprep.mubr.f32.mxu1 %v12558_v1 }
 0xca3   :  { %6045 = vmatprep.subr.mxu0 %v13301_v36  ;;  %6116 = vmatprep.subr.mxu1 %v13309_v37 }
 0xd5c   :  { %v5600_v50 = vpop.f32.mrf.mxu0  ;;  %v5671_v41 = vpop.f32.mrf.mxu1 }
 0xd5d   :  { %v5601_v58 = vadd.f32 %v5600_v50, %v5514_v31  ;;  %v5672_v49 = vadd.f32 %v5671_v41, %v5522_v32 }
 0xd5e   :  { %v5602_v20 = vpop.f32.mrf.mxu0  ;;  %v5673_v16 = vpop.f32.mrf.mxu1 }
 0xd5f   :  { %v5603_v48 = vadd.f32 %v5602_v20, %v5518_v14  ;;  %v5674_v22 = vadd.f32 %v5673_v16, %v5526_v27 }
 0xd60   :  { %v5742_v2 = vpop.f32.mrf.mxu0  ;;  %v5813_v56 = vpop.f32.mrf.mxu1 }
 0xd61   :  { %v5818_v47 = vadd.f32 %v5742_v2, %v5601_v58  ;;  %v5820_v30 = vadd.f32 %v5813_v56, %v5672_v49 }
 0xd62   :  { %v5744_v40 = vpop.f32.mrf.mxu0  ;;  %v5815_v24 = vpop.f32.mrf.mxu1 }
 0xd63   :  { %v5822_v59 = vmul.f32 0.5, %v5818_v47  ;;  %v5819_v23 = vadd.f32 %v5744_v40, %v5603_v48  ;;  %v5821_v51 = vadd.f32 %v5815_v24, %v5674_v22 }
 0xd65   :  { %12339 = vtanh.f32 %v5822_v59  ;;  %v5826_v21 = vmul.f32 0.5, %v5819_v23  ;;  %v5831_v25 = vmul.f32 0.5, %v5821_v51 }
 0xd67   :  { %12341 = vtanh.f32 %v5826_v21 }
 0xd68   :  { %12343 = vtanh.f32 %v5820_v30 }
 0xd69   :  { %12345 = vtanh.f32 %v5831_v25 }
 0xd72   :  { %v12340_v38 = vpop.eup %12339 }
 0xd73   :  { %v5824_v57 = vadd.f32 1.0, %v12340_v38 }
 0xd74   :  { %v12342_v7 = vpop.eup %12341 }
 0xd75   :  { %v5825_v31 = vmul.f32 0.5, %v5824_v57  ;;  %v5828_v50 = vadd.f32 1.0, %v12342_v7  ;;  %v12344_v20 = vpop.eup %12343 }
 0xd76   :  { %v12346_v17 = vpop.eup %12345 }
 0xd77   :  { %v5829_v14 = vmul.f32 0.5, %v5828_v50  ;;  %v5836_v58 = vmul.f32 %v12344_v20, %v5825_v31  ;;  %v5833_v16 = vadd.f32 1.0, %v12346_v17 }
 0xd79   :  { %v5835_v41 = vmul.f32 %v5829_v14, %v13320_v39  ;;  %v5834_v32 = vmul.f32 0.5, %v5833_v16  ;;  %v12007_v39 = vld [vmem:[%s14295_s2 + $0x140] ss:$8 sm:$0xf] }
 0xd7a   :  { %v6359_v40 = vrot.slane %v12007_v39, %v12743_v45  ;;  %v6367_v59 = vrot.slane %v12007_v39, %v12746_v46 }
 0xd7b   :  { %v13477_v2 = vadd.f32 %v5836_v58, %v5835_v41 }
 0xd7d   :  { %12347 = vtanh.f32 %v13477_v2 }
 0xd8a   :  { %v12348_v48 = vpop.eup %12347 }
 0xd8b   :  { %v13480_v47 = vmul.f32 %v12348_v48, %v5834_v32 }
 0xd8d   :  { %12003 = vmatmul.mubr.msk.f32.vlgmr.msra.gmra.mxu0 %vm157_vm0, %v13480_v47  ;;  %12004 = vmatmul.mubr.msk.f32.vlgmr.msra.gmra.mxu1 %vm157_vm0, %v13480_v47 }
 0xd8e   :  { %6046 = vmatpush1.msra.mxu0 %v13328_v18  ;;  %6079 = vmatprep.mubr.f32.mxu0 %v12558_v1 }
 0xd8f   :  { %6117 = vmatpush1.msra.mxu1 %v13333_v26  ;;  %6150 = vmatprep.mubr.f32.mxu1 %v12558_v1 }
 0xd90   :  { %6239 = vmatprep.subr.mxu0 %v13352_v53  ;;  %6310 = vmatprep.subr.mxu1 %v13357_v54 }
 0xd91   :  { %12005 = vmatmul.mubr.msk.f32.vlgmr.msra.gmra.mxu0 %vm157_vm0, %v13393_v5  ;;  %12006 = vmatmul.mubr.msk.f32.vlgmr.msra.gmra.mxu1 %vm157_vm0, %v13393_v5  ;;  %v12002_v5 = vld [vmem:[%s14295_s2 + $0x100] ss:$8 sm:$0xf] }
 0xd92   :  { %6240 = vmatpush1.msra.mxu0 %v13362_v55  ;;  %6311 = vmatpush1.msra.mxu1 %v13369_v60  ;;  %v5853_v23 = vrot.slane %v12002_v5, %v12734_v42  ;;  %v5857_v21 = vrot.slane %v12002_v5, %v12743_v45  ;;  %v5861_v51 = vrot.slane %v12002_v5, %v12737_v43 }
 0xd93   :  { %6273 = vmatprep.mubr.f32.mxu0 %v12558_v1  ;;  %6344 = vmatprep.mubr.f32.mxu1 %v12558_v1  ;;  %v5865_v41 = vrot.slane %v12002_v5, %v12746_v46 }
 0xd94   :  { %12011 = vmatprep.subr.msk.mxu0 %vm1385_vm1, %v6359_v40  ;;  %12014 = vmatprep.subr.msk.mxu1 %vm1385_vm1, %v6367_v59 }
 0xe4d   :  { %v5939_v56 = vpop.f32.mrf.mxu0  ;;  %v6010_v49 = vpop.f32.mrf.mxu1 }
 0xe4e   :  { %v5940_v30 = vadd.f32 %v5939_v56, %v5853_v23  ;;  %v6011_v14 = vadd.f32 %v6010_v49, %v5861_v51 }
 0xe4f   :  { %v5941_v27 = vpop.f32.mrf.mxu0  ;;  %v6012_v24 = vpop.f32.mrf.mxu1 }
 0xe50   :  { %v5942_v25 = vadd.f32 %v5941_v27, %v5857_v21  ;;  %v6013_v16 = vadd.f32 %v6012_v24, %v5865_v41 }
 0xe51   :  { %v6081_v22 = vpop.f32.mrf.mxu0  ;;  %v6152_v50 = vpop.f32.mrf.mxu1 }
 0xe52   :  { %v6157_v38 = vadd.f32 %v6081_v22, %v5940_v30  ;;  %v6159_v58 = vadd.f32 %v6152_v50, %v6011_v14 }
 0xe53   :  { %v6083_v57 = vpop.f32.mrf.mxu0  ;;  %v6154_v17 = vpop.f32.mrf.mxu1 }
 0xe54   :  { %v6161_v7 = vmul.f32 0.5, %v6157_v38  ;;  %v6158_v31 = vadd.f32 %v6083_v57, %v5942_v25  ;;  %v6160_v32 = vadd.f32 %v6154_v17, %v6013_v16  ;;  %v6355_v57 = vrot.slane %v12007_v39, %v12734_v42 }
 0xe56   :  { %12349 = vtanh.f32 %v6161_v7  ;;  %v6165_v20 = vmul.f32 0.5, %v6158_v31  ;;  %v6170_v48 = vmul.f32 0.5, %v6160_v32  ;;  %v6363_v7 = vrot.slane %v12007_v39, %v12737_v43 }
 0xe58   :  { %12351 = vtanh.f32 %v6165_v20 }
 0xe59   :  { %12353 = vtanh.f32 %v6159_v58 }
 0xe5a   :  { %12355 = vtanh.f32 %v6170_v48 }
 0xe63   :  { %v12350_v40 = vpop.eup %12349 }
 0xe64   :  { %v6163_v59 = vadd.f32 1.0, %v12350_v40 }
 0xe65   :  { %v12352_v23 = vpop.eup %12351 }
 0xe66   :  { %v6164_v56 = vmul.f32 0.5, %v6163_v59  ;;  %v6167_v21 = vadd.f32 1.0, %v12352_v23  ;;  %v12354_v30 = vpop.eup %12353 }
 0xe67   :  { %v12356_v5 = vpop.eup %12355 }
 0xe68   :  { %v6168_v27 = vmul.f32 0.5, %v6167_v21  ;;  %v6175_v22 = vmul.f32 %v12354_v30, %v6164_v56  ;;  %v6172_v24 = vadd.f32 1.0, %v12356_v5 }
 0xe6a   :  { %v6174_v49 = vmul.f32 %v6168_v27, %v13388_v44  ;;  %v6173_v25 = vmul.f32 0.5, %v6172_v24  ;;  %v6549_v24 = vld [vmem:[#allocation5 + $0x5] ss:$8 sm:$0xf] }
 0xe6c   :  { %v13515_v51 = vadd.f32 %v6175_v22, %v6174_v49 }
 0xe6e   :  { %12357 = vtanh.f32 %v13515_v51 }
 0xe7b   :  { %v12358_v38 = vpop.eup %12357 }
 0xe7c   :  { %v13520_v31 = vmul.f32 %v12358_v38, %v6173_v25 }
 0xe7e   :  { %12009 = vmatmul.mubr.msk.f32.vlgmr.msra.gmra.mxu0 %vm157_vm0, %v13520_v31  ;;  %12010 = vmatmul.mubr.msk.f32.vlgmr.msra.gmra.mxu1 %vm157_vm0, %v13520_v31 }
 0xe7f   :  { %12012 = vmatpush1.msk.msra.mxu0 %vm1385_vm1, %v6355_v57  ;;  %12015 = vmatpush1.msk.msra.mxu1 %vm1385_vm1, %v6363_v7 }
 0xe80   :  { %6443 = vmatprep.mubr.f32.mxu0 %v12558_v1  ;;  %6514 = vmatprep.mubr.f32.mxu1 %v12558_v1 }
 0xe81   :  { %6580 = vmatprep.subr.mxu0 %v13155_v19  ;;  %6651 = vmatprep.subr.mxu1 %v13160_v61  ;;  %v12008_v19 = vld [vmem:[%s14295_s2 + $0x160] ss:$8 sm:$0xf] }
 0xe82   :  { %12013 = vmatmul.mubr.msk.f32.vlgmr.msra.gmra.mxu0 %vm1382_vm3, %v13442_v29  ;;  %12016 = vmatmul.mubr.msk.f32.vlgmr.msra.gmra.mxu1 %vm1382_vm3, %v13442_v29  ;;  %v6189_v61 = vrot.slane %v12008_v19, %v12734_v42  ;;  %v6201_v32 = vrot.slane %v12008_v19, %v12746_v46 }
 0xe83   :  { %6581 = vmatpush1.msra.mxu0 %v13169_v52  ;;  %6652 = vmatpush1.msra.mxu1 %v13174_v28 }
 0xe84   :  { %6614 = vmatprep.mubr.f32.mxu0 %v12558_v1  ;;  %6685 = vmatprep.mubr.f32.mxu1 %v12558_v1 }
 0xe85   :  { %6810 = vmatprep.subr.mxu0 %v13195_v15  ;;  %6881 = vmatprep.subr.mxu1 %v13205_v3  ;;  %v6193_v15 = vrot.slane %v12008_v19, %v12743_v45 }
 0xe86   :  { %12017 = vmatmul.mubr.msk.f32.vlgmr.msra.gmra.mxu0 %vm157_vm0, %v13447_v9  ;;  %12018 = vmatmul.mubr.msk.f32.vlgmr.msra.gmra.mxu1 %vm157_vm0, %v13447_v9  ;;  %v6197_v9 = vrot.slane %v12008_v19, %v12737_v43 }
 0xe87   :  { %6811 = vmatpush1.msra.mxu0 %v13200_v63  ;;  %6844 = vmatprep.mubr.f32.mxu0 %v12558_v1 }
 0xe88   :  { %6882 = vmatpush1.msra.mxu1 %v13212_v13  ;;  %6915 = vmatprep.mubr.f32.mxu1 %v12558_v1 }
 0xe89   :  { %6952 = vmatprep.subr.mxu0 %v13217_v62  ;;  %7023 = vmatprep.subr.mxu1 %v13225_v0 }
 0xf3e   :  { %v6275_v52 = vpop.f32.mrf.mxu0  ;;  %v6346_v28 = vpop.f32.mrf.mxu1 }
 0xf3f   :  { %v6276_v44 = vadd.f32 %v6275_v52, %v6189_v61  ;;  %v6347_v17 = vadd.f32 %v6346_v28, %v6197_v9 }
 0xf40   :  { %v6277_v63 = vpop.f32.mrf.mxu0  ;;  %v6348_v3 = vpop.f32.mrf.mxu1 }
 0xf41   :  { %v6278_v62 = vadd.f32 %v6277_v63, %v6193_v15  ;;  %v6349_v30 = vadd.f32 %v6348_v3, %v6201_v32 }
 0xf42   :  { %v6445_v13 = vpop.f32.mrf.mxu0  ;;  %v6516_v29 = vpop.f32.mrf.mxu1 }
 0xf43   :  { %v6521_v39 = vadd.f32 %v6445_v13, %v6276_v44  ;;  %v6523_v59 = vadd.f32 %v6516_v29, %v6347_v17 }
 0xf44   :  { %v6447_v0 = vpop.f32.mrf.mxu0  ;;  %v6518_v50 = vpop.f32.mrf.mxu1 }
 0xf45   :  { %v6525_v14 = vmul.f32 0.5, %v6521_v39  ;;  %v6522_v20 = vadd.f32 %v6447_v0, %v6278_v62  ;;  %v6524_v22 = vadd.f32 %v6518_v50, %v6349_v30 }
 0xf46   :  { %v6616_v41 = vpop.f32.mrf.mxu0  ;;  %v6687_v58 = vpop.f32.mrf.mxu1 }
 0xf47   :  { %12359 = vtanh.f32 %v6525_v14  ;;  %v6529_v16 = vmul.f32 0.5, %v6522_v20  ;;  %v6534_v38 = vmul.f32 0.5, %v6524_v22 }
 0xf48   :  { %v6618_v48 = vpop.f32.mrf.mxu0  ;;  %v6689_v40 = vpop.f32.mrf.mxu1 }
 0xf49   :  { %12361 = vtanh.f32 %v6529_v16  ;;  %v6696_v23 = vcombine.low %v6616_v41, %v6618_v48  ;;  %v6697_v56 = vcombine.low %v6687_v58, %v6689_v40 }
 0xf4a   :  { %12363 = vtanh.f32 %v6523_v59 }
 0xf4b   :  { %v6704_v21 = vrot.slane %v6696_v23, %v12643_v12  ;;  %v6711_v27 = vrot.slane %v6697_v56, %v12643_v12 }
 0xf4d   :  { %v6712_v49 = vcombine.low %v6704_v21, %v6711_v27 }
 0xf4f   :  { %v6719_v5 = vrot.slane %v6712_v49, %v12643_v12 }
 0xf51   :  { %v6721_v25 = vadd.f32 %v6719_v5, %v6549_v24 }
 0xf53   :  { %v6722_v57 = vmul.f32 0.5, %v6721_v25  ;;  %v6727_v7 = vrot.slane %v6721_v25, 1  ;;  %v6733_v3 = vrot.slane %v6721_v25, 2  ;;  %v6736_v39 = vrot.slane %v6721_v25, 3 }
 0xf54   :  { %v12360_v19 = vpop.eup %12359 }
 0xf55   :  { %v6527_v61 = vadd.f32 1.0, %v12360_v19  ;;  %12365 = vtanh.f32 %v6722_v57  ;;  %v6729_v52 = vmul.f32 0.5, %v6727_v7  ;;  %v6738_v0 = vmul.f32 0.5, %v6736_v39 }
 0xf56   :  { %v12362_v28 = vpop.eup %12361  ;;  %12367 = vtanh.f32 %v6534_v38 }
 0xf57   :  { %v6528_v15 = vmul.f32 0.5, %v6527_v61  ;;  %v6531_v63 = vadd.f32 1.0, %v12362_v28  ;;  %12369 = vtanh.f32 %v6729_v52  ;;  %v12364_v13 = vpop.eup %12363 }
 0xf58   :  { %12371 = vtanh.f32 %v6733_v3 }
 0xf59   :  { %v6532_v44 = vmul.f32 0.5, %v6531_v63  ;;  %v6539_v9 = vmul.f32 %v12364_v13, %v6528_v15 }
 0xf5b   :  { %v6538_v29 = vmul.f32 %v6532_v44, %v13436_v33 }
 0xf5d   :  { %v13563_v62 = vadd.f32 %v6539_v9, %v6538_v29 }
 0xf5f   :  { %12373 = vtanh.f32 %v13563_v62 }
 0xf60   :  { %12375 = vtanh.f32 %v6738_v0 }
 0xf62   :  { %v12366_v50 = vpop.eup %12365 }
 0xf63   :  { %v12368_v14 = vpop.eup %12367  ;;  %v6724_v20 = vadd.f32 1.0, %v12366_v50 }
 0xf64   :  { %v12370_v41 = vpop.eup %12369  ;;  %v6536_v16 = vadd.f32 1.0, %v12368_v14 }
 0xf65   :  { %v6725_v58 = vmul.f32 0.5, %v6724_v20  ;;  %v6731_v17 = vadd.f32 1.0, %v12370_v41  ;;  %v12372_v48 = vpop.eup %12371 }
 0xf66   :  { %v6537_v59 = vmul.f32 0.5, %v6536_v16 }
 0xf67   :  { %v6732_v32 = vmul.f32 0.5, %v6731_v17  ;;  %v6743_v40 = vmul.f32 %v12372_v48, %v6725_v58 }
 0xf69   :  { %v6742_v33 = vmul.f32 %v6732_v32, %v13440_v4 }
 0xf6b   :  { %v13567_v23 = vadd.f32 %v6743_v40, %v6742_v33 }
 0xf6c   :  { %v12374_v56 = vpop.eup %12373 }
 0xf6d   :  { %v13569_v21 = vmul.f32 %v12374_v56, %v6537_v59  ;;  %12377 = vtanh.f32 %v13567_v23  ;;  %v12376_v27 = vpop.eup %12375 }
 0xf6e   :  { %v6740_v30 = vadd.f32 1.0, %v12376_v27 }
 0xf6f   :  { %6543 = vst.msk [vmem:[#allocation6 + $0x4] sm:$0x1] %vm1558_vm2, %v13569_v21 }
 0xf70   :  { %v6741_v49 = vmul.f32 0.5, %v6740_v30 }
 0xf7a   :  { %v12378_v22 = vpop.eup %12377 }
 0xf7b   :  { %v13574_v5 = vmul.f32 %v12378_v22, %v6741_v49 }
 0xf7d   :  { %12020 = vmatmul.mubr.msk.f32.vlgmr.msra.gmra.mxu0 %vm157_vm0, %v13574_v5  ;;  %12021 = vmatmul.mubr.msk.f32.vlgmr.msra.gmra.mxu1 %vm157_vm0, %v13574_v5 }
 0xf7e   :  { %6953 = vmatpush1.msra.mxu0 %v13255_v8  ;;  %6986 = vmatprep.mubr.f32.mxu0 %v12558_v1  ;;  %v12019_v8 = vld [vmem:[%s14295_s2 + $0xa0] ss:$8 sm:$0xf] }
 0xf7f   :  { %7024 = vmatpush1.msra.mxu1 %v13260_v10  ;;  %7057 = vmatprep.mubr.f32.mxu1 %v12558_v1  ;;  %v6760_v10 = vrot.slane %v12019_v8, %v12734_v42  ;;  %v6768_v25 = vrot.slane %v12019_v8, %v12737_v43  ;;  %v6772_v28 = vrot.slane %v12019_v8, %v12746_v46 }
 0xf80   :  { %7149 = vmatprep.subr.mxu0 %v13279_v11  ;;  %7220 = vmatprep.subr.mxu1 %v13289_v35 }
 0xf81   :  { %12022 = vmatmul.mubr.msk.f32.vlgmr.msra.gmra.mxu0 %vm157_vm0, %v13480_v47  ;;  %12023 = vmatmul.mubr.msk.f32.vlgmr.msra.gmra.mxu1 %vm157_vm0, %v13480_v47 }
 0xf82   :  { %7150 = vmatpush1.msra.mxu0 %v13284_v34  ;;  %7183 = vmatprep.mubr.f32.mxu0 %v12558_v1  ;;  %v6764_v34 = vrot.slane %v12019_v8, %v12743_v45 }
 0xf83   :  { %7221 = vmatpush1.msra.mxu1 %v13296_v6  ;;  %7254 = vmatprep.mubr.f32.mxu1 %v12558_v1 }
 0xf84   :  { %7291 = vmatprep.subr.mxu0 %v13301_v36  ;;  %7362 = vmatprep.subr.mxu1 %v13309_v37 }
0x103d   :  { %v6846_v11 = vpop.f32.mrf.mxu0  ;;  %v6917_v35 = vpop.f32.mrf.mxu1 }
0x103e   :  { %v6847_v47 = vadd.f32 %v6846_v11, %v6760_v10  ;;  %v6918_v61 = vadd.f32 %v6917_v35, %v6768_v25 }
0x103f   :  { %v6848_v4 = vpop.f32.mrf.mxu0  ;;  %v6919_v24 = vpop.f32.mrf.mxu1 }
0x1040   :  { %v6849_v38 = vadd.f32 %v6848_v4, %v6764_v34  ;;  %v6920_v3 = vadd.f32 %v6919_v24, %v6772_v28 }
0x1041   :  { %v6988_v6 = vpop.f32.mrf.mxu0  ;;  %v7059_v19 = vpop.f32.mrf.mxu1 }
0x1042   :  { %v7064_v36 = vadd.f32 %v6988_v6, %v6847_v47  ;;  %v7066_v15 = vadd.f32 %v7059_v19, %v6918_v61 }
0x1043   :  { %v6990_v57 = vpop.f32.mrf.mxu0  ;;  %v7061_v63 = vpop.f32.mrf.mxu1 }
0x1044   :  { %v7068_v37 = vmul.f32 0.5, %v7064_v36  ;;  %v7065_v7 = vadd.f32 %v6990_v57, %v6849_v38  ;;  %v7067_v44 = vadd.f32 %v7061_v63, %v6920_v3 }
0x1046   :  { %12379 = vtanh.f32 %v7068_v37  ;;  %v7072_v52 = vmul.f32 0.5, %v7065_v7  ;;  %v7077_v13 = vmul.f32 0.5, %v7067_v44 }
0x1048   :  { %12381 = vtanh.f32 %v7072_v52 }
0x1049   :  { %12383 = vtanh.f32 %v7066_v15 }
0x104a   :  { %12385 = vtanh.f32 %v7077_v13 }
0x1053   :  { %v12380_v29 = vpop.eup %12379 }
0x1054   :  { %v7070_v9 = vadd.f32 1.0, %v12380_v29 }
0x1055   :  { %v12382_v39 = vpop.eup %12381 }
0x1056   :  { %v7071_v0 = vmul.f32 0.5, %v7070_v9  ;;  %v7074_v50 = vadd.f32 1.0, %v12382_v39  ;;  %v12384_v20 = vpop.eup %12383 }
0x1057   :  { %v12386_v16 = vpop.eup %12385 }
0x1058   :  { %v7075_v14 = vmul.f32 0.5, %v7074_v50  ;;  %v7082_v58 = vmul.f32 %v12384_v20, %v7071_v0  ;;  %v7079_v32 = vadd.f32 1.0, %v12386_v16  ;;  %v13661_v20 = vld [vmem:[%s14295_s2 + $0x38] sm:$0xff]  ;;  %v13701_v16 = vld [vmem:[%s14295_s2 + $0x60] sm:$0xff] }
0x105a   :  { %v7081_v41 = vmul.f32 %v7075_v14, %v13477_v2  ;;  %v7080_v48 = vmul.f32 0.5, %v7079_v32  ;;  %v13706_v32 = vld [vmem:[%s14295_s2 + $0x78] sm:$0xff] }
0x105c   :  { %v13604_v17 = vadd.f32 %v7082_v58, %v7081_v41  ;;  %v13670_v41 = vld [vmem:[%s14295_s2 + $0x20] sm:$0xff]  ;;  %v13675_v58 = vld [vmem:[%s14295_s2 + $0x30] sm:$0xff] }
0x105e   :  { %12387 = vtanh.f32 %v13604_v17 }
0x106b   :  { %v12388_v33 = vpop.eup %12387 }
0x106c   :  { %v13607_v40 = vmul.f32 %v12388_v33, %v7080_v48  ;;  %v13718_v48 = vld [vmem:[%s14295_s2 + $0x88] sm:$0xff]  ;;  %v13726_v33 = vld [vmem:[%s14295_s2 + $0x98] sm:$0xff] }
0x106e   :  { %12025 = vmatmul.mubr.msk.f32.vlgmr.msra.gmra.mxu0 %vm157_vm0, %v13607_v40  ;;  %12026 = vmatmul.mubr.msk.f32.vlgmr.msra.gmra.mxu1 %vm157_vm0, %v13607_v40 }
0x106f   :  { %7292 = vmatpush1.msra.mxu0 %v13328_v18  ;;  %7325 = vmatprep.mubr.f32.mxu0 %v12558_v1  ;;  %v12029_v18 = vld [vmem:[%s14295_s2 + $0x140] ss:$8 sm:$0xf] }
0x1070   :  { %7363 = vmatpush1.msra.mxu1 %v13333_v26  ;;  %7396 = vmatprep.mubr.f32.mxu1 %v12558_v1  ;;  %v7605_v26 = vrot.slane %v12029_v18, %v12743_v45  ;;  %v7601_v0 = vrot.slane %v12029_v18, %v12734_v42  ;;  %v7609_v50 = vrot.slane %v12029_v18, %v12737_v43 }
0x1071   :  { %7485 = vmatprep.subr.mxu0 %v13352_v53  ;;  %7556 = vmatprep.subr.mxu1 %v13357_v54  ;;  %v7613_v53 = vrot.slane %v12029_v18, %v12746_v46  ;;  %v12024_v54 = vld [vmem:[%s14295_s2 + $0x100] ss:$8 sm:$0xf] }
0x1072   :  { %12027 = vmatmul.mubr.msk.f32.vlgmr.msra.gmra.mxu0 %vm157_vm0, %v13520_v31  ;;  %12028 = vmatmul.mubr.msk.f32.vlgmr.msra.gmra.mxu1 %vm157_vm0, %v13520_v31  ;;  %v7103_v31 = vrot.slane %v12024_v54, %v12743_v45  ;;  %v7107_v49 = vrot.slane %v12024_v54, %v12737_v43  ;;  %v7111_v24 = vrot.slane %v12024_v54, %v12746_v46  ;;  %v12030_v18 = vld [vmem:[%s14295_s2 + $0x160] ss:$8 sm:$0xf] }
0x1073   :  { %7486 = vmatpush1.msra.mxu0 %v13362_v55  ;;  %7557 = vmatpush1.msra.mxu1 %v13369_v60  ;;  %v7099_v55 = vrot.slane %v12024_v54, %v12734_v42 }
0x1074   :  { %7519 = vmatprep.mubr.f32.mxu0 %v12558_v1  ;;  %7590 = vmatprep.mubr.f32.mxu1 %v12558_v1 }
0x1075   :  { %12033 = vmatprep.subr.msk.mxu0 %vm1385_vm1, %v7605_v26  ;;  %12036 = vmatprep.subr.msk.mxu1 %vm1385_vm1, %v7613_v53  ;;  %v7435_v26 = vrot.slane %v12030_v18, %v12734_v42 }
0x112e   :  { %v7185_v60 = vpop.f32.mrf.mxu0  ;;  %v7256_v2 = vpop.f32.mrf.mxu1 }
0x112f   :  { %v7186_v56 = vadd.f32 %v7185_v60, %v7099_v55  ;;  %v7257_v4 = vadd.f32 %v7256_v2, %v7107_v49  ;;  %v7439_v55 = vrot.slane %v12030_v18, %v12743_v45 }
0x1130   :  { %v7187_v59 = vpop.f32.mrf.mxu0  ;;  %v7258_v27 = vpop.f32.mrf.mxu1 }
0x1131   :  { %v7188_v22 = vadd.f32 %v7187_v59, %v7103_v31  ;;  %v7259_v38 = vadd.f32 %v7258_v27, %v7111_v24  ;;  %v7443_v27 = vrot.slane %v12030_v18, %v12737_v43  ;;  %v7447_v24 = vrot.slane %v12030_v18, %v12746_v46 }
0x1132   :  { %v7327_v30 = vpop.f32.mrf.mxu0  ;;  %v7398_v34 = vpop.f32.mrf.mxu1 }
0x1133   :  { %v7403_v8 = vadd.f32 %v7327_v30, %v7186_v56  ;;  %v7405_v6 = vadd.f32 %v7398_v34, %v7257_v4 }
0x1134   :  { %v7329_v10 = vpop.f32.mrf.mxu0  ;;  %v7400_v25 = vpop.f32.mrf.mxu1 }
0x1135   :  { %v7407_v11 = vmul.f32 0.5, %v7403_v8  ;;  %v7404_v35 = vadd.f32 %v7329_v10, %v7188_v22  ;;  %v7406_v36 = vadd.f32 %v7400_v25, %v7259_v38 }
0x1137   :  { %12389 = vtanh.f32 %v7407_v11  ;;  %v7411_v47 = vmul.f32 0.5, %v7404_v35  ;;  %v7416_v57 = vmul.f32 0.5, %v7406_v36 }
0x1139   :  { %12391 = vtanh.f32 %v7411_v47 }
0x113a   :  { %12393 = vtanh.f32 %v7405_v6 }
0x113b   :  { %12395 = vtanh.f32 %v7416_v57 }
0x1144   :  { %v12390_v37 = vpop.eup %12389 }
0x1145   :  { %v7409_v7 = vadd.f32 1.0, %v12390_v37 }
0x1146   :  { %v12392_v19 = vpop.eup %12391 }
0x1147   :  { %v7410_v61 = vmul.f32 0.5, %v7409_v7  ;;  %v7413_v52 = vadd.f32 1.0, %v12392_v19  ;;  %v12394_v15 = vpop.eup %12393 }
0x1148   :  { %v12396_v13 = vpop.eup %12395 }
0x1149   :  { %v7414_v28 = vmul.f32 0.5, %v7413_v52  ;;  %v7421_v3 = vmul.f32 %v12394_v15, %v7410_v61  ;;  %v7418_v29 = vadd.f32 1.0, %v12396_v13  ;;  %v7795_v15 = vld [vmem:[#allocation5 + $0x6] ss:$8 sm:$0xf] }
0x114b   :  { %v7420_v63 = vmul.f32 %v7414_v28, %v13515_v51  ;;  %v7419_v9 = vmul.f32 0.5, %v7418_v29  ;;  %v13656_v51 = vld [vmem:[%s14295_s2 + $0x28] sm:$0xff] }
0x114d   :  { %v13642_v44 = vadd.f32 %v7421_v3, %v7420_v63 }
0x114f   :  { %12397 = vtanh.f32 %v13642_v44 }
0x115c   :  { %v12398_v39 = vpop.eup %12397 }
0x115d   :  { %v13647_v14 = vmul.f32 %v12398_v39, %v7419_v9 }
0x115f   :  { %12031 = vmatmul.mubr.msk.f32.vlgmr.msra.gmra.mxu0 %vm157_vm0, %v13647_v14  ;;  %12032 = vmatmul.mubr.msk.f32.vlgmr.msra.gmra.mxu1 %vm157_vm0, %v13647_v14 }
0x1160   :  { %12034 = vmatpush1.msk.msra.mxu0 %vm1385_vm1, %v7601_v0  ;;  %12037 = vmatpush1.msk.msra.mxu1 %vm1385_vm1, %v7609_v50 }
0x1161   :  { %7689 = vmatprep.mubr.f32.mxu0 %v12558_v1  ;;  %7760 = vmatprep.mubr.f32.mxu1 %v12558_v1 }
0x1162   :  { %7826 = vmatprep.subr.mxu0 %v13656_v51  ;;  %7897 = vmatprep.subr.mxu1 %v13661_v20 }
0x1163   :  { %12035 = vmatmul.mubr.msk.f32.vlgmr.msra.gmra.mxu0 %vm1382_vm3, %v13569_v21  ;;  %12038 = vmatmul.mubr.msk.f32.vlgmr.msra.gmra.mxu1 %vm1382_vm3, %v13569_v21  ;;  %v13696_v21 = vld [vmem:[%s14295_s2 + $0x68] sm:$0xff] }
0x1164   :  { %7827 = vmatpush1.msra.mxu0 %v13670_v41  ;;  %7898 = vmatpush1.msra.mxu1 %v13675_v58 }
0x1165   :  { %7860 = vmatprep.mubr.f32.mxu0 %v12558_v1  ;;  %7931 = vmatprep.mubr.f32.mxu1 %v12558_v1 }
0x1166   :  { %8056 = vmatprep.subr.mxu0 %v13696_v21  ;;  %8127 = vmatprep.subr.mxu1 %v13706_v32 }
0x1167   :  { %12039 = vmatmul.mubr.msk.f32.vlgmr.msra.gmra.mxu0 %vm157_vm0, %v13574_v5  ;;  %12040 = vmatmul.mubr.msk.f32.vlgmr.msra.gmra.mxu1 %vm157_vm0, %v13574_v5  ;;  %v13713_v5 = vld [vmem:[%s14295_s2 + $0x70] sm:$0xff] }
0x1168   :  { %8090 = vmatprep.mubr.f32.mxu0 %v12558_v1  ;;  %8161 = vmatprep.mubr.f32.mxu1 %v12558_v1 }
0x1169   :  { %8057 = vmatpush1.msra.mxu0 %v13701_v16  ;;  %8128 = vmatpush1.msra.mxu1 %v13713_v5 }
0x116a   :  { %8198 = vmatprep.subr.mxu0 %v13718_v48  ;;  %8269 = vmatprep.subr.mxu1 %v13726_v33 }
0x121f   :  { %v7521_v53 = vpop.f32.mrf.mxu0  ;;  %v7592_v54 = vpop.f32.mrf.mxu1 }
0x1220   :  { %v7522_v31 = vadd.f32 %v7521_v53, %v7435_v26  ;;  %v7593_v4 = vadd.f32 %v7592_v54, %v7443_v27 }
0x1221   :  { %v7523_v60 = vpop.f32.mrf.mxu0  ;;  %v7594_v2 = vpop.f32.mrf.mxu1 }
0x1222   :  { %v7524_v30 = vadd.f32 %v7523_v60, %v7439_v55  ;;  %v7595_v19 = vadd.f32 %v7594_v2, %v7447_v24 }
0x1223   :  { %v7691_v59 = vpop.f32.mrf.mxu0  ;;  %v7762_v56 = vpop.f32.mrf.mxu1 }
0x1224   :  { %v7767_v49 = vadd.f32 %v7691_v59, %v7522_v31  ;;  %v7769_v38 = vadd.f32 %v7762_v56, %v7593_v4 }
0x1225   :  { %v7693_v22 = vpop.f32.mrf.mxu0  ;;  %v7764_v8 = vpop.f32.mrf.mxu1 }
0x1226   :  { %v7771_v10 = vmul.f32 0.5, %v7767_v49  ;;  %v7768_v11 = vadd.f32 %v7693_v22, %v7524_v30  ;;  %v7770_v52 = vadd.f32 %v7764_v8, %v7595_v19  ;;  %v13761_v19 = vld [vmem:[%s14295_s2 + $0x90] sm:$0xff] }
0x1227   :  { %v7862_v35 = vpop.f32.mrf.mxu0  ;;  %v7933_v34 = vpop.f32.mrf.mxu1 }
0x1228   :  { %12399 = vtanh.f32 %v7771_v10  ;;  %v7775_v47 = vmul.f32 0.5, %v7768_v11  ;;  %v7780_v3 = vmul.f32 0.5, %v7770_v52  ;;  %v13785_v52 = vld [vmem:[%s14295_s2 + $0xc0] sm:$0xff] }
0x1229   :  { %v7864_v6 = vpop.f32.mrf.mxu0  ;;  %v7935_v25 = vpop.f32.mrf.mxu1 }
0x122a   :  { %12401 = vtanh.f32 %v7775_v47  ;;  %v7942_v36 = vcombine.low %v7862_v35, %v7864_v6  ;;  %v7943_v57 = vcombine.low %v7933_v34, %v7935_v25 }
0x122b   :  { %12403 = vtanh.f32 %v7769_v38 }
0x122c   :  { %v7950_v37 = vrot.slane %v7942_v36, %v12643_v12  ;;  %v7957_v7 = vrot.slane %v7943_v57, %v12643_v12 }
0x122e   :  { %v7958_v61 = vcombine.low %v7950_v37, %v7957_v7 }
0x1230   :  { %v7965_v28 = vrot.slane %v7958_v61, %v12643_v12  ;;  %v13780_v61 = vld [vmem:[%s14295_s2 + $0xc8] sm:$0xff] }
0x1232   :  { %v7967_v63 = vadd.f32 %v7965_v28, %v7795_v15  ;;  %v13790_v28 = vld [vmem:[%s14295_s2 + $0xd8] sm:$0xff]  ;;  %v13802_v15 = vld [vmem:[%s14295_s2 + $0xe8] sm:$0xff] }
0x1234   :  { %v7968_v13 = vmul.f32 0.5, %v7967_v63  ;;  %v7973_v29 = vrot.slane %v7967_v63, 1  ;;  %v7979_v53 = vrot.slane %v7967_v63, 2  ;;  %v7982_v59 = vrot.slane %v7967_v63, 3  ;;  %v13810_v63 = vld [vmem:[%s14295_s2 + $0xf8] sm:$0xff] }
0x1235   :  { %v12400_v9 = vpop.eup %12399 }
0x1236   :  { %v7773_v39 = vadd.f32 1.0, %v12400_v9  ;;  %12405 = vtanh.f32 %v7968_v13  ;;  %v7975_v0 = vmul.f32 0.5, %v7973_v29  ;;  %v7984_v56 = vmul.f32 0.5, %v7982_v59 }
0x1237   :  { %v12402_v50 = vpop.eup %12401  ;;  %12407 = vtanh.f32 %v7780_v3  ;;  %v12041_v3 = vld [vmem:[%s14295_s2 + $0xa0] ss:$8 sm:$0xf] }
0x1238   :  { %v7774_v18 = vmul.f32 0.5, %v7773_v39  ;;  %v7777_v26 = vadd.f32 1.0, %v12402_v50  ;;  %12409 = vtanh.f32 %v7975_v0  ;;  %v12404_v55 = vpop.eup %12403  ;;  %v8006_v13 = vrot.slane %v12041_v3, %v12734_v42 }
0x1239   :  { %12411 = vtanh.f32 %v7979_v53  ;;  %v8010_v39 = vrot.slane %v12041_v3, %v12743_v45  ;;  %v8014_v53 = vrot.slane %v12041_v3, %v12737_v43 }
0x123a   :  { %v7778_v54 = vmul.f32 0.5, %v7777_v26  ;;  %v7785_v2 = vmul.f32 %v12404_v55, %v7774_v18 }
0x123c   :  { %v7784_v60 = vmul.f32 %v7778_v54, %v13563_v62 }
0x123e   :  { %v13740_v31 = vadd.f32 %v7785_v2, %v7784_v60 }
0x1240   :  { %12413 = vtanh.f32 %v13740_v31 }
0x1241   :  { %12415 = vtanh.f32 %v7984_v56 }
0x1243   :  { %v12406_v27 = vpop.eup %12405 }
0x1244   :  { %v12408_v30 = vpop.eup %12407  ;;  %v7970_v49 = vadd.f32 1.0, %v12406_v27 }
0x1245   :  { %v12410_v22 = vpop.eup %12409  ;;  %v7782_v11 = vadd.f32 1.0, %v12408_v30 }
0x1246   :  { %v7971_v8 = vmul.f32 0.5, %v7970_v49  ;;  %v7977_v10 = vadd.f32 1.0, %v12410_v22  ;;  %v12412_v34 = vpop.eup %12411  ;;  %v8018_v49 = vrot.slane %v12041_v3, %v12746_v46 }
0x1247   :  { %v7783_v47 = vmul.f32 0.5, %v7782_v11 }
0x1248   :  { %v7978_v35 = vmul.f32 0.5, %v7977_v10  ;;  %v7989_v4 = vmul.f32 %v12412_v34, %v7971_v8 }
0x124a   :  { %v7988_v62 = vmul.f32 %v7978_v35, %v13567_v23  ;;  %v13756_v23 = vld [vmem:[%s14295_s2 + $0x80] sm:$0xff] }
0x124c   :  { %v13744_v24 = vadd.f32 %v7989_v4, %v7988_v62 }
0x124d   :  { %v12414_v6 = vpop.eup %12413 }
0x124e   :  { %v13746_v25 = vmul.f32 %v12414_v6, %v7783_v47  ;;  %12417 = vtanh.f32 %v13744_v24  ;;  %v12416_v38 = vpop.eup %12415 }
0x124f   :  { %v7986_v36 = vadd.f32 1.0, %v12416_v38 }
0x1250   :  { %7789 = vst.msk [vmem:[#allocation6 + $0x5] sm:$0x1] %vm1558_vm2, %v13746_v25 }
0x1251   :  { %v7987_v57 = vmul.f32 0.5, %v7986_v36 }
0x125b   :  { %v12418_v37 = vpop.eup %12417 }
0x125c   :  { %v13751_v7 = vmul.f32 %v12418_v37, %v7987_v57 }
0x125e   :  { %12042 = vmatmul.mubr.msk.f32.vlgmr.msra.gmra.mxu0 %vm157_vm0, %v13751_v7  ;;  %12043 = vmatmul.mubr.msk.f32.vlgmr.msra.gmra.mxu1 %vm157_vm0, %v13751_v7 }
0x125f   :  { %8199 = vmatpush1.msra.mxu0 %v13756_v23  ;;  %8232 = vmatprep.mubr.f32.mxu0 %v12558_v1 }
0x1260   :  { %8270 = vmatpush1.msra.mxu1 %v13761_v19  ;;  %8303 = vmatprep.mubr.f32.mxu1 %v12558_v1 }
0x1261   :  { %8395 = vmatprep.subr.mxu0 %v13780_v61  ;;  %8466 = vmatprep.subr.mxu1 %v13790_v28 }
0x1262   :  { %12044 = vmatmul.mubr.msk.f32.vlgmr.msra.gmra.mxu0 %vm157_vm0, %v13607_v40  ;;  %12045 = vmatmul.mubr.msk.f32.vlgmr.msra.gmra.mxu1 %vm157_vm0, %v13607_v40  ;;  %v13797_v40 = vld [vmem:[%s14295_s2 + $0xd0] sm:$0xff] }
0x1263   :  { %8429 = vmatprep.mubr.f32.mxu0 %v12558_v1  ;;  %8500 = vmatprep.mubr.f32.mxu1 %v12558_v1 }
0x1264   :  { %8396 = vmatpush1.msra.mxu0 %v13785_v52  ;;  %8467 = vmatpush1.msra.mxu1 %v13797_v40 }
0x1265   :  { %8537 = vmatprep.subr.mxu0 %v13802_v15  ;;  %8608 = vmatprep.subr.mxu1 %v13810_v63 }
0x131e   :  { %v8092_v29 = vpop.f32.mrf.mxu0  ;;  %v8163_v9 = vpop.f32.mrf.mxu1 }
0x131f   :  { %v8093_v50 = vadd.f32 %v8092_v29, %v8006_v13  ;;  %v8164_v27 = vadd.f32 %v8163_v9, %v8014_v53  ;;  %v13863_v53 = vld [vmem:[%s14295_s2 + $0x120] sm:$0xff] }
0x1320   :  { %v8094_v0 = vpop.f32.mrf.mxu0  ;;  %v8165_v18 = vpop.f32.mrf.mxu1 }
0x1321   :  { %v8095_v54 = vadd.f32 %v8094_v0, %v8010_v39  ;;  %v8166_v10 = vadd.f32 %v8165_v18, %v8018_v49  ;;  %v13853_v18 = vld [vmem:[%s14295_s2 + $0x128] sm:$0xff] }
0x1322   :  { %v8234_v26 = vpop.f32.mrf.mxu0  ;;  %v8305_v56 = vpop.f32.mrf.mxu1 }
0x1323   :  { %v8310_v55 = vadd.f32 %v8234_v26, %v8093_v50  ;;  %v8312_v22 = vadd.f32 %v8305_v56, %v8164_v27  ;;  %v13829_v50 = vld [vmem:[%s14295_s2 + $0xe0] sm:$0xff]  ;;  %v13858_v26 = vld [vmem:[%s14295_s2 + $0x138] sm:$0xff] }
0x1324   :  { %v8236_v60 = vpop.f32.mrf.mxu0  ;;  %v8307_v8 = vpop.f32.mrf.mxu1 }
0x1325   :  { %v8314_v2 = vmul.f32 0.5, %v8310_v55  ;;  %v8311_v59 = vadd.f32 %v8236_v60, %v8095_v54  ;;  %v8313_v11 = vadd.f32 %v8307_v8, %v8166_v10  ;;  %v12051_v54 = vld [vmem:[%s14295_s2 + $0x140] ss:$8 sm:$0xf] }
0x1326   :  { %v8851_v55 = vrot.slane %v12051_v54, %v12743_v45  ;;  %v8859_v60 = vrot.slane %v12051_v54, %v12746_v46 }
0x1327   :  { %12419 = vtanh.f32 %v8314_v2  ;;  %v8318_v30 = vmul.f32 0.5, %v8311_v59  ;;  %v8323_v35 = vmul.f32 0.5, %v8313_v11  ;;  %v12046_v2 = vld [vmem:[%s14295_s2 + $0x100] ss:$8 sm:$0xf] }
0x1328   :  { %v8345_v59 = vrot.slane %v12046_v2, %v12734_v42  ;;  %v8353_v11 = vrot.slane %v12046_v2, %v12737_v43 }
0x1329   :  { %12421 = vtanh.f32 %v8318_v30  ;;  %v8349_v30 = vrot.slane %v12046_v2, %v12743_v45 }
0x132a   :  { %12423 = vtanh.f32 %v8312_v22 }
0x132b   :  { %12425 = vtanh.f32 %v8323_v35 }
0x1334   :  { %v12420_v34 = vpop.eup %12419 }
0x1335   :  { %v8316_v62 = vadd.f32 1.0, %v12420_v34 }
0x1336   :  { %v12422_v4 = vpop.eup %12421 }
0x1337   :  { %v8317_v47 = vmul.f32 0.5, %v8316_v62  ;;  %v8320_v6 = vadd.f32 1.0, %v12422_v4  ;;  %v12424_v36 = vpop.eup %12423 }
0x1338   :  { %v12426_v3 = vpop.eup %12425 }
0x1339   :  { %v8321_v38 = vmul.f32 0.5, %v8320_v6  ;;  %v8328_v37 = vmul.f32 %v12424_v36, %v8317_v47  ;;  %v8325_v29 = vadd.f32 1.0, %v12426_v3 }
0x133b   :  { %v8327_v57 = vmul.f32 %v8321_v38, %v13604_v17  ;;  %v8326_v9 = vmul.f32 0.5, %v8325_v29  ;;  %v13834_v17 = vld [vmem:[%s14295_s2 + $0xf0] sm:$0xff] }
0x133d   :  { %v13821_v13 = vadd.f32 %v8328_v37, %v8327_v57  ;;  %v8357_v57 = vrot.slane %v12046_v2, %v12746_v46 }
0x133f   :  { %12427 = vtanh.f32 %v13821_v13 }
0x134c   :  { %v12428_v39 = vpop.eup %12427 }
0x134d   :  { %v13824_v0 = vmul.f32 %v12428_v39, %v8326_v9 }
0x134f   :  { %12047 = vmatmul.mubr.msk.f32.vlgmr.msra.gmra.mxu0 %vm157_vm0, %v13824_v0  ;;  %12048 = vmatmul.mubr.msk.f32.vlgmr.msra.gmra.mxu1 %vm157_vm0, %v13824_v0 }
0x1350   :  { %8538 = vmatpush1.msra.mxu0 %v13829_v50  ;;  %8571 = vmatprep.mubr.f32.mxu0 %v12558_v1 }
0x1351   :  { %8609 = vmatpush1.msra.mxu1 %v13834_v17  ;;  %8642 = vmatprep.mubr.f32.mxu1 %v12558_v1 }
0x1352   :  { %8731 = vmatprep.subr.mxu0 %v13853_v18  ;;  %8802 = vmatprep.subr.mxu1 %v13858_v26 }
0x1353   :  { %12049 = vmatmul.mubr.msk.f32.vlgmr.msra.gmra.mxu0 %vm157_vm0, %v13647_v14  ;;  %12050 = vmatmul.mubr.msk.f32.vlgmr.msra.gmra.mxu1 %vm157_vm0, %v13647_v14  ;;  %v13870_v14 = vld [vmem:[%s14295_s2 + $0x130] sm:$0xff] }
0x1354   :  { %8765 = vmatprep.mubr.f32.mxu0 %v12558_v1  ;;  %8836 = vmatprep.mubr.f32.mxu1 %v12558_v1 }
0x1355   :  { %8732 = vmatpush1.msra.mxu0 %v13863_v53  ;;  %8803 = vmatpush1.msra.mxu1 %v13870_v14 }
0x1356   :  { %12055 = vmatprep.subr.msk.mxu0 %vm1385_vm1, %v8851_v55  ;;  %12058 = vmatprep.subr.msk.mxu1 %vm1385_vm1, %v8859_v60 }
0x140f   :  { %v8431_v56 = vpop.f32.mrf.mxu0  ;;  %v8502_v27 = vpop.f32.mrf.mxu1 }
0x1410   :  { %v8432_v22 = vadd.f32 %v8431_v56, %v8345_v59  ;;  %v8503_v38 = vadd.f32 %v8502_v27, %v8353_v11 }
0x1411   :  { %v8433_v49 = vpop.f32.mrf.mxu0  ;;  %v8504_v8 = vpop.f32.mrf.mxu1 }
0x1412   :  { %v8434_v35 = vadd.f32 %v8433_v49, %v8349_v30  ;;  %v8505_v29 = vadd.f32 %v8504_v8, %v8357_v57 }
0x1413   :  { %v8573_v10 = vpop.f32.mrf.mxu0  ;;  %v8644_v6 = vpop.f32.mrf.mxu1 }
0x1414   :  { %v8649_v34 = vadd.f32 %v8573_v10, %v8432_v22  ;;  %v8651_v37 = vadd.f32 %v8644_v6, %v8503_v38 }
0x1415   :  { %v8575_v62 = vpop.f32.mrf.mxu0  ;;  %v8646_v3 = vpop.f32.mrf.mxu1 }
0x1416   :  { %v8653_v4 = vmul.f32 0.5, %v8649_v34  ;;  %v8650_v47 = vadd.f32 %v8575_v62, %v8434_v35  ;;  %v8652_v9 = vadd.f32 %v8646_v3, %v8505_v29  ;;  %v8847_v62 = vrot.slane %v12051_v54, %v12734_v42 }
0x1418   :  { %12429 = vtanh.f32 %v8653_v4  ;;  %v8657_v36 = vmul.f32 0.5, %v8650_v47  ;;  %v8662_v39 = vmul.f32 0.5, %v8652_v9  ;;  %v8855_v4 = vrot.slane %v12051_v54, %v12737_v43 }
0x141a   :  { %12431 = vtanh.f32 %v8657_v36 }
0x141b   :  { %12433 = vtanh.f32 %v8651_v37 }
0x141c   :  { %12435 = vtanh.f32 %v8662_v39 }
0x1425   :  { %v12430_v55 = vpop.eup %12429 }
0x1426   :  { %v8655_v60 = vadd.f32 1.0, %v12430_v55 }
0x1427   :  { %v12432_v59 = vpop.eup %12431 }
0x1428   :  { %v8656_v56 = vmul.f32 0.5, %v8655_v60  ;;  %v8659_v30 = vadd.f32 1.0, %v12432_v59  ;;  %v12434_v22 = vpop.eup %12433 }
0x1429   :  { %v12436_v2 = vpop.eup %12435 }
0x142a   :  { %v8660_v49 = vmul.f32 0.5, %v8659_v30  ;;  %v8667_v10 = vmul.f32 %v12434_v22, %v8656_v56  ;;  %v8664_v8 = vadd.f32 1.0, %v12436_v2 }
0x142c   :  { %v8666_v27 = vmul.f32 %v8660_v49, %v13642_v44  ;;  %v8665_v35 = vmul.f32 0.5, %v8664_v8  ;;  %v12052_v44 = vld [vmem:[%s14295_s2 + $0x160] ss:$8 sm:$0xf] }
0x142d   :  { %v8693_v9 = vrot.slane %v12052_v44, %v12746_v46  ;;  %v9041_v8 = vld [vmem:[#allocation5 + $0x7] ss:$8 sm:$0xf] }
0x142e   :  { %v13889_v11 = vadd.f32 %v8667_v10, %v8666_v27 }
0x1430   :  { %12437 = vtanh.f32 %v13889_v11 }
0x143d   :  { %v12438_v34 = vpop.eup %12437 }
0x143e   :  { %v13894_v47 = vmul.f32 %v12438_v34, %v8665_v35 }
0x1440   :  { %12053 = vmatmul.mubr.msk.f32.vlgmr.msra.gmra.mxu0 %vm157_vm0, %v13894_v47  ;;  %12054 = vmatmul.mubr.msk.f32.vlgmr.msra.gmra.mxu1 %vm157_vm0, %v13894_v47 }
0x1441   :  { %12056 = vmatpush1.msk.msra.mxu0 %vm1385_vm1, %v8847_v62  ;;  %12059 = vmatpush1.msk.msra.mxu1 %vm1385_vm1, %v8855_v4 }
0x1442   :  { %8935 = vmatprep.mubr.f32.mxu0 %v12558_v1  ;;  %9006 = vmatprep.mubr.f32.mxu1 %v12558_v1 }
0x1443   :  { %9072 = vmatprep.subr.mxu0 %v13656_v51  ;;  %9143 = vmatprep.subr.mxu1 %v13661_v20  ;;  %v8681_v51 = vrot.slane %v12052_v44, %v12734_v42 }
0x1444   :  { %12057 = vmatmul.mubr.msk.f32.vlgmr.msra.gmra.mxu0 %vm1382_vm3, %v13746_v25  ;;  %12060 = vmatmul.mubr.msk.f32.vlgmr.msra.gmra.mxu1 %vm1382_vm3, %v13746_v25 }
0x1445   :  { %9073 = vmatpush1.msra.mxu0 %v13670_v41  ;;  %9144 = vmatpush1.msra.mxu1 %v13675_v58  ;;  %v8685_v58 = vrot.slane %v12052_v44, %v12743_v45 }
0x1446   :  { %9106 = vmatprep.mubr.f32.mxu0 %v12558_v1  ;;  %9177 = vmatprep.mubr.f32.mxu1 %v12558_v1 }
0x1447   :  { %9302 = vmatprep.subr.mxu0 %v13696_v21  ;;  %9373 = vmatprep.subr.mxu1 %v13706_v32 }
0x1448   :  { %12061 = vmatmul.mubr.msk.f32.vlgmr.msra.gmra.mxu0 %vm157_vm0, %v13751_v7  ;;  %12062 = vmatmul.mubr.msk.f32.vlgmr.msra.gmra.mxu1 %vm157_vm0, %v13751_v7  ;;  %v8689_v7 = vrot.slane %v12052_v44, %v12737_v43 }
0x1449   :  { %9303 = vmatpush1.msra.mxu0 %v13701_v16  ;;  %9336 = vmatprep.mubr.f32.mxu0 %v12558_v1 }
0x144a   :  { %9374 = vmatpush1.msra.mxu1 %v13713_v5  ;;  %9407 = vmatprep.mubr.f32.mxu1 %v12558_v1 }
0x144b   :  { %9444 = vmatprep.subr.mxu0 %v13718_v48  ;;  %9515 = vmatprep.subr.mxu1 %v13726_v33 }
0x1500   :  { %v8767_v20 = vpop.f32.mrf.mxu0  ;;  %v8838_v41 = vpop.f32.mrf.mxu1 }
0x1501   :  { %v8768_v32 = vadd.f32 %v8767_v20, %v8681_v51  ;;  %v8839_v3 = vadd.f32 %v8838_v41, %v8689_v7 }
0x1502   :  { %v8769_v21 = vpop.f32.mrf.mxu0  ;;  %v8840_v16 = vpop.f32.mrf.mxu1 }
0x1503   :  { %v8770_v48 = vadd.f32 %v8769_v21, %v8685_v58  ;;  %v8841_v22 = vadd.f32 %v8840_v16, %v8693_v9 }
0x1504   :  { %v8937_v5 = vpop.f32.mrf.mxu0  ;;  %v9008_v25 = vpop.f32.mrf.mxu1 }
0x1505   :  { %v9013_v54 = vadd.f32 %v8937_v5, %v8768_v32  ;;  %v9015_v60 = vadd.f32 %v9008_v25, %v8839_v3 }
0x1506   :  { %v8939_v33 = vpop.f32.mrf.mxu0  ;;  %v9010_v6 = vpop.f32.mrf.mxu1 }
0x1507   :  { %v9017_v38 = vmul.f32 0.5, %v9013_v54  ;;  %v9014_v36 = vadd.f32 %v8939_v33, %v8770_v48  ;;  %v9016_v10 = vadd.f32 %v9010_v6, %v8841_v22 }
0x1508   :  { %v9108_v57 = vpop.f32.mrf.mxu0  ;;  %v9179_v37 = vpop.f32.mrf.mxu1 }
0x1509   :  { %12439 = vtanh.f32 %v9017_v38  ;;  %v9021_v29 = vmul.f32 0.5, %v9014_v36  ;;  %v9026_v34 = vmul.f32 0.5, %v9016_v10 }
0x150a   :  { %v9110_v39 = vpop.f32.mrf.mxu0  ;;  %v9181_v55 = vpop.f32.mrf.mxu1 }
0x150b   :  { %12441 = vtanh.f32 %v9021_v29  ;;  %v9188_v59 = vcombine.low %v9108_v57, %v9110_v39  ;;  %v9189_v56 = vcombine.low %v9179_v37, %v9181_v55 }
0x150c   :  { %12443 = vtanh.f32 %v9015_v60 }
0x150d   :  { %v9196_v30 = vrot.slane %v9188_v59, %v12643_v12  ;;  %v9203_v49 = vrot.slane %v9189_v56, %v12643_v12 }
0x150f   :  { %v9204_v27 = vcombine.low %v9196_v30, %v9203_v49 }
0x1511   :  { %v9211_v2 = vrot.slane %v9204_v27, %v12643_v12 }
0x1513   :  { %v9213_v35 = vadd.f32 %v9211_v2, %v9041_v8 }
0x1515   :  { %v9214_v62 = vmul.f32 0.5, %v9213_v35  ;;  %v9219_v4 = vrot.slane %v9213_v35, 1  ;;  %v9225_v16 = vrot.slane %v9213_v35, 2  ;;  %v9228_v48 = vrot.slane %v9213_v35, 3 }
0x1516   :  { %v12440_v44 = vpop.eup %12439 }
0x1517   :  { %v9019_v51 = vadd.f32 1.0, %v12440_v44  ;;  %12445 = vtanh.f32 %v9214_v62  ;;  %v9221_v20 = vmul.f32 0.5, %v9219_v4  ;;  %v9230_v54 = vmul.f32 0.5, %v9228_v48 }
0x1518   :  { %v12442_v41 = vpop.eup %12441  ;;  %12447 = vtanh.f32 %v9026_v34 }
0x1519   :  { %v9020_v58 = vmul.f32 0.5, %v9019_v51  ;;  %v9023_v21 = vadd.f32 1.0, %v12442_v41  ;;  %12449 = vtanh.f32 %v9221_v20  ;;  %v12444_v5 = vpop.eup %12443 }
0x151a   :  { %12451 = vtanh.f32 %v9225_v16 }
0x151b   :  { %v9024_v32 = vmul.f32 0.5, %v9023_v21  ;;  %v9031_v12 = vmul.f32 %v12444_v5, %v9020_v58 }
0x151d   :  { %v9030_v25 = vmul.f32 %v9024_v32, %v13740_v31 }
0x151f   :  { %v13937_v7 = vadd.f32 %v9031_v12, %v9030_v25 }
0x1521   :  { %12453 = vtanh.f32 %v13937_v7 }
0x1522   :  { %12455 = vtanh.f32 %v9230_v54 }
0x1524   :  { %v12446_v33 = vpop.eup %12445 }
0x1525   :  { %v12448_v6 = vpop.eup %12447  ;;  %v9216_v38 = vadd.f32 1.0, %v12446_v33 }
0x1526   :  { %v12450_v36 = vpop.eup %12449  ;;  %v9028_v3 = vadd.f32 1.0, %v12448_v6 }
0x1527   :  { %v9217_v57 = vmul.f32 0.5, %v9216_v38  ;;  %v9223_v37 = vadd.f32 1.0, %v12450_v36  ;;  %v12452_v9 = vpop.eup %12451 }
0x1528   :  { %v9029_v55 = vmul.f32 0.5, %v9028_v3 }
0x1529   :  { %v9224_v29 = vmul.f32 0.5, %v9223_v37  ;;  %v9235_v39 = vmul.f32 %v12452_v9, %v9217_v57 }
0x152b   :  { %v9234_v31 = vmul.f32 %v9224_v29, %v13744_v24  ;;  %v12063_v24 = vld [vmem:[%s14295_s2 + $0xa0] ss:$8 sm:$0xf] }
0x152c   :  { %v9260_v8 = vrot.slane %v12063_v24, %v12737_v43  ;;  %v9264_v20 = vrot.slane %v12063_v24, %v12746_v46 }
0x152d   :  { %v9236_v60 = vadd.f32 %v9235_v39, %v9234_v31 }
0x152e   :  { %v12454_v59 = vpop.eup %12453 }
0x152f   :  { %v13941_v56 = vmul.f32 %v12454_v59, %v9029_v55  ;;  %12457 = vtanh.f32 %v9236_v60  ;;  %v12456_v30 = vpop.eup %12455 }
0x1530   :  { %v9232_v49 = vadd.f32 1.0, %v12456_v30 }
0x1531   :  { %9035 = vst.msk [vmem:[#allocation6 + $0x6] sm:$0x1] %vm1558_vm2, %v13941_v56 }
0x1532   :  { %v9233_v22 = vmul.f32 0.5, %v9232_v49 }
0x153c   :  { %v12458_v27 = vpop.eup %12457 }
0x153d   :  { %v9238_v10 = vmul.f32 %v12458_v27, %v9233_v22 }
0x153f   :  { %12064 = vmatmul.mubr.msk.f32.vlgmr.msra.gmra.mxu0 %vm157_vm0, %v9238_v10  ;;  %12065 = vmatmul.mubr.msk.f32.vlgmr.msra.gmra.mxu1 %vm157_vm0, %v9238_v10 }
0x1540   :  { %9445 = vmatpush1.msra.mxu0 %v13756_v23  ;;  %9478 = vmatprep.mubr.f32.mxu0 %v12558_v1  ;;  %v9252_v23 = vrot.slane %v12063_v24, %v12734_v42 }
0x1541   :  { %9516 = vmatpush1.msra.mxu1 %v13761_v19  ;;  %9549 = vmatprep.mubr.f32.mxu1 %v12558_v1 }
0x1542   :  { %9641 = vmatprep.subr.mxu0 %v13780_v61  ;;  %9712 = vmatprep.subr.mxu1 %v13790_v28 }
0x1543   :  { %12066 = vmatmul.mubr.msk.f32.vlgmr.msra.gmra.mxu0 %vm157_vm0, %v13824_v0  ;;  %12067 = vmatmul.mubr.msk.f32.vlgmr.msra.gmra.mxu1 %vm157_vm0, %v13824_v0 }
0x1544   :  { %9642 = vmatpush1.msra.mxu0 %v13785_v52  ;;  %9675 = vmatprep.mubr.f32.mxu0 %v12558_v1  ;;  %v9256_v52 = vrot.slane %v12063_v24, %v12743_v45 }
0x1545   :  { %9713 = vmatpush1.msra.mxu1 %v13797_v40  ;;  %9746 = vmatprep.mubr.f32.mxu1 %v12558_v1 }
0x1546   :  { %9783 = vmatprep.subr.mxu0 %v13802_v15  ;;  %9854 = vmatprep.subr.mxu1 %v13810_v63 }
0x15ff   :  { %v9338_v19 = vpop.f32.mrf.mxu0  ;;  %v9409_v61 = vpop.f32.mrf.mxu1 }
0x1600   :  { %v9339_v0 = vadd.f32 %v9338_v19, %v9252_v23  ;;  %v9410_v44 = vadd.f32 %v9409_v61, %v9260_v8 }
0x1601   :  { %v9340_v28 = vpop.f32.mrf.mxu0  ;;  %v9411_v2 = vpop.f32.mrf.mxu1 }
0x1602   :  { %v9341_v35 = vadd.f32 %v9340_v28, %v9256_v52  ;;  %v9412_v21 = vadd.f32 %v9411_v2, %v9264_v20 }
0x1603   :  { %v9480_v40 = vpop.f32.mrf.mxu0  ;;  %v9551_v4 = vpop.f32.mrf.mxu1 }
0x1604   :  { %v9556_v15 = vadd.f32 %v9480_v40, %v9339_v0  ;;  %v9558_v41 = vadd.f32 %v9551_v4, %v9410_v44 }
0x1605   :  { %v9482_v34 = vpop.f32.mrf.mxu0  ;;  %v9553_v58 = vpop.f32.mrf.mxu1 }
0x1606   :  { %v9560_v63 = vmul.f32 0.5, %v9556_v15  ;;  %v9557_v62 = vadd.f32 %v9482_v34, %v9341_v35  ;;  %v9559_v16 = vadd.f32 %v9553_v58, %v9412_v21 }
0x1608   :  { %12459 = vtanh.f32 %v9560_v63  ;;  %v9564_v51 = vmul.f32 0.5, %v9557_v62  ;;  %v9569_v32 = vmul.f32 0.5, %v9559_v16 }
0x160a   :  { %12461 = vtanh.f32 %v9564_v51 }
0x160b   :  { %12463 = vtanh.f32 %v9558_v41 }
0x160c   :  { %12465 = vtanh.f32 %v9569_v32 }
0x1615   :  { %v12460_v5 = vpop.eup %12459 }
0x1616   :  { %v9562_v25 = vadd.f32 1.0, %v12460_v5 }
0x1617   :  { %v12462_v12 = vpop.eup %12461 }
0x1618   :  { %v9563_v48 = vmul.f32 0.5, %v9562_v25  ;;  %v9566_v54 = vadd.f32 1.0, %v12462_v12  ;;  %v12464_v6 = vpop.eup %12463 }
0x1619   :  { %v12466_v37 = vpop.eup %12465 }
0x161a   :  { %v9567_v33 = vmul.f32 0.5, %v9566_v54  ;;  %v9574_v36 = vmul.f32 %v12464_v6, %v9563_v48  ;;  %v9571_v3 = vadd.f32 1.0, %v12466_v37  ;;  %v10309_v48 = vld [vmem:[#allocation7 + $0xc8] sm:$0xff]  ;;  %v10311_v54 = vld [vmem:[#allocation7 + $0xd8] sm:$0xff] }
0x161b   :  { %v10305_v6 = vld [vmem:[#allocation7 + $0xa8] sm:$0xff] }
0x161c   :  { %v9573_v38 = vmul.f32 %v9567_v33, %v13821_v13  ;;  %v9572_v29 = vmul.f32 0.5, %v9571_v3  ;;  %v12073_v13 = vld [vmem:[%s14295_s2 + $0x140] ss:$8 sm:$0xf] }
0x161d   :  { %v10093_v5 = vrot.slane %v12073_v13, %v12734_v42  ;;  %v10101_v12 = vrot.slane %v12073_v13, %v12737_v43  ;;  %v10310_v33 = vld [vmem:[#allocation7 + $0xd0] sm:$0xff]  ;;  %v10301_v37 = vld [vmem:[#allocation7 + $0x88] sm:$0xff]  ;;  %v10303_v3 = vld [vmem:[#allocation7 + $0x98] sm:$0xff] }
0x161e   :  { %v9575_v57 = vadd.f32 %v9574_v36, %v9573_v38  ;;  %v10307_v38 = vld [vmem:[#allocation7 + $0xb8] sm:$0xff]  ;;  %v10304_v36 = vld [vmem:[#allocation7 + $0xa0] sm:$0xff] }
0x1620   :  { %12467 = vtanh.f32 %v9575_v57  ;;  %v10306_v57 = vld [vmem:[#allocation7 + $0xb0] sm:$0xff] }
0x162d   :  { %v12468_v9 = vpop.eup %12467 }
0x162e   :  { %v9577_v31 = vmul.f32 %v12468_v9, %v9572_v29  ;;  %v10300_v29 = vld [vmem:[#allocation7 + $0x80] sm:$0xff]  ;;  %v10302_v9 = vld [vmem:[#allocation7 + $0x90] sm:$0xff] }
0x1630   :  { %12069 = vmatmul.mubr.msk.f32.vlgmr.msra.gmra.mxu0 %vm157_vm0, %v9577_v31  ;;  %12070 = vmatmul.mubr.msk.f32.vlgmr.msra.gmra.mxu1 %vm157_vm0, %v9577_v31  ;;  %v10297_v31 = vld [vmem:[#allocation7 + $0x68] sm:$0xff] }
0x1631   :  { %9784 = vmatpush1.msra.mxu0 %v13829_v50  ;;  %9817 = vmatprep.mubr.f32.mxu0 %v12558_v1  ;;  %v10097_v50 = vrot.slane %v12073_v13, %v12743_v45 }
0x1632   :  { %9855 = vmatpush1.msra.mxu1 %v13834_v17  ;;  %9888 = vmatprep.mubr.f32.mxu1 %v12558_v1  ;;  %v10105_v17 = vrot.slane %v12073_v13, %v12746_v46  ;;  %v10299_v13 = vld [vmem:[#allocation7 + $0x78] sm:$0xff] }
0x1633   :  { %9977 = vmatprep.subr.mxu0 %v13853_v18  ;;  %10048 = vmatprep.subr.mxu1 %v13858_v26  ;;  %v12068_v18 = vld [vmem:[%s14295_s2 + $0x100] ss:$8 sm:$0xf] }
0x1634   :  { %12071 = vmatmul.mubr.msk.f32.vlgmr.msra.gmra.mxu0 %vm157_vm0, %v13894_v47  ;;  %12072 = vmatmul.mubr.msk.f32.vlgmr.msra.gmra.mxu1 %vm157_vm0, %v13894_v47  ;;  %v9591_v26 = vrot.slane %v12068_v18, %v12734_v42  ;;  %v9595_v47 = vrot.slane %v12068_v18, %v12743_v45  ;;  %v9599_v30 = vrot.slane %v12068_v18, %v12737_v43 }
0x1635   :  { %9978 = vmatpush1.msra.mxu0 %v13863_v53  ;;  %10011 = vmatprep.mubr.f32.mxu0 %v12558_v1  ;;  %v9603_v52 = vrot.slane %v12068_v18, %v12746_v46  ;;  %v10295_v18 = vld [vmem:[#allocation7 + $0x58] sm:$0xff] }
0x1636   :  { %10049 = vmatpush1.msra.mxu1 %v13870_v14  ;;  %10082 = vmatprep.mubr.f32.mxu1 %v12558_v1 }
0x1637   :  { %12077 = vmatprep.subr.msk.mxu0 %vm1385_vm1, %v10097_v50  ;;  %12080 = vmatprep.subr.msk.mxu1 %vm1385_vm1, %v10105_v17  ;;  %v10296_v50 = vld [vmem:[#allocation7 + $0x60] sm:$0xff]  ;;  %v10298_v17 = vld [vmem:[#allocation7 + $0x70] sm:$0xff] }
0x16f0   :  { %v9677_v53 = vpop.f32.mrf.mxu0  ;;  %v9748_v14 = vpop.f32.mrf.mxu1 }
0x16f1   :  { %v9678_v55 = vadd.f32 %v9677_v53, %v9591_v26  ;;  %v9749_v19 = vadd.f32 %v9748_v14, %v9599_v30  ;;  %v10292_v26 = vld [vmem:[#allocation7 + $0x40] sm:$0xff]  ;;  %v10294_v53 = vld [vmem:[#allocation7 + $0x50] sm:$0xff]  ;;  %v10289_v14 = vld [vmem:[#allocation7 + $0x28] sm:$0xff] }
0x16f2   :  { %v9679_v39 = vpop.f32.mrf.mxu0  ;;  %v9750_v60 = vpop.f32.mrf.mxu1  ;;  %v10284_v30 = vld [vmem:[#allocation7] sm:$0xff] }
0x16f3   :  { %v9680_v49 = vadd.f32 %v9679_v39, %v9595_v47  ;;  %v9751_v2 = vadd.f32 %v9750_v60, %v9603_v52  ;;  %v10291_v47 = vld [vmem:[#allocation7 + $0x38] sm:$0xff]  ;;  %v10288_v39 = vld [vmem:[#allocation7 + $0x20] sm:$0xff]  ;;  %v10285_v60 = vld [vmem:[#allocation7 + $0x8] sm:$0xff] }
0x16f4   :  { %v9819_v59 = vpop.f32.mrf.mxu0  ;;  %v9890_v23 = vpop.f32.mrf.mxu1 }
0x16f5   :  { %v9895_v22 = vadd.f32 %v9819_v59, %v9678_v55  ;;  %v9897_v28 = vadd.f32 %v9890_v23, %v9749_v19  ;;  %v10290_v55 = vld [vmem:[#allocation7 + $0x30] sm:$0xff]  ;;  %v10287_v59 = vld [vmem:[#allocation7 + $0x18] sm:$0xff] }
0x16f6   :  { %v9821_v27 = vpop.f32.mrf.mxu0  ;;  %v9892_v0 = vpop.f32.mrf.mxu1 }
0x16f7   :  { %v9899_v10 = vmul.f32 0.5, %v9895_v22  ;;  %v9896_v24 = vadd.f32 %v9821_v27, %v9680_v49  ;;  %v9898_v40 = vadd.f32 %v9892_v0, %v9751_v2  ;;  %v10286_v49 = vld [vmem:[#allocation7 + $0x10] sm:$0xff]  ;;  %v10283_v22 = vld [vmem:[%s14294_s1] sm:$0xff]  ;;  %v12560_v27 = vmov 0   ;;  %s12561_s1 = smov [#allocation2]  }
0x16f8   :  { %12168 = vset.pattern.permute.xlu0 %v12560_v27 }
0x16f9   :  { %12469 = vtanh.f32 %v9899_v10  ;;  %v9903_v61 = vmul.f32 0.5, %v9896_v24  ;;  %v9908_v8 = vmul.f32 0.5, %v9898_v40  ;;  %v12074_v10 = vld [vmem:[%s14295_s2 + $0x160] ss:$8 sm:$0xf]  ;;  %s49_s2 = sshll.u32 %s12561_s1, 4  ;;  %s50_s2 = int_to_ptr.vmem [resolvable:$true] %s49_s2 }
0x16fa   :  { %v9927_v24 = vrot.slane %v12074_v10, %v12734_v42  ;;  %s12517_s23 = scalar_lea.vmem %s50_s2, 32768  ;;  %p12522_p6 = scmp.lt.s32.totalorder %s50_s2, %s50_s2 }
0x16fb   :  { %12471 = vtanh.f32 %v9903_v61  ;;  %v9931_v61 = vrot.slane %v12074_v10, %v12743_v45  ;;  %p12518_p5 = scmp.ne.s32.totalorder %s50_s2, %s12517_s23  ;;  %p12523_p7 = scmp.lt.s32.totalorder %s12517_s23, %s12517_s23 }
0x16fc   :  { %12473 = vtanh.f32 %v9897_v28 }
0x16fd   :  { %12475 = vtanh.f32 %v9908_v8  ;;  %p12524_p8 = por %p12523_p7, %p12522_p6 }
0x16ff   :  { %p12525_p9 = pnand %p12524_p8, %p12518_p5 }
0x1706   :  { %v12470_v35 = vpop.eup %12469 }
0x1707   :  { %v9901_v15 = vadd.f32 1.0, %v12470_v35 }
0x1708   :  { %v12472_v34 = vpop.eup %12471 }
0x1709   :  { %v9902_v63 = vmul.f32 0.5, %v9901_v15  ;;  %v9905_v62 = vadd.f32 1.0, %v12472_v34  ;;  %v12474_v44 = vpop.eup %12473 }
0x170a   :  { %v12476_v58 = vpop.eup %12475 }
0x170b   :  { %v9906_v4 = vmul.f32 0.5, %v9905_v62  ;;  %v9913_v20 = vmul.f32 %v12474_v44, %v9902_v63  ;;  %v9910_v21 = vadd.f32 1.0, %v12476_v58  ;;  %v9939_v44 = vrot.slane %v12074_v10, %v12746_v46 }
0x170d   :  { %v9912_v51 = vmul.f32 %v9906_v4, %v13889_v11  ;;  %v9911_v16 = vmul.f32 0.5, %v9910_v21  ;;  %v10308_v11 = vld [vmem:[#allocation7 + $0xc0] sm:$0xff] }
0x170f   :  { %v9914_v41 = vadd.f32 %v9913_v20, %v9912_v51 }
0x1711   :  { %12477 = vtanh.f32 %v9914_v41 }
0x171e   :  { %v12478_v32 = vpop.eup %12477 }
0x171f   :  { %v9916_v25 = vmul.f32 %v12478_v32, %v9911_v16 }
0x1721   :  { %12075 = vmatmul.mubr.msk.f32.vlgmr.msra.gmra.mxu0 %vm157_vm0, %v9916_v25  ;;  %12076 = vmatmul.mubr.msk.f32.vlgmr.msra.gmra.mxu1 %vm157_vm0, %v9916_v25 }
0x1722   :  { %12078 = vmatpush1.msk.msra.mxu0 %vm1385_vm1, %v10093_v5  ;;  %10181 = vmatprep.mubr.f32.mxu0 %v12558_v1 }
0x1723   :  { %12081 = vmatpush1.msk.msra.mxu1 %vm1385_vm1, %v10101_v12  ;;  %10252 = vmatprep.mubr.f32.mxu1 %v12558_v1 }
0x1724   :  { %10365 = vmatprep.subr.mxu0 %v10309_v48  ;;  %10436 = vmatprep.subr.mxu1 %v10311_v54 }
0x1725   :  { %12079 = vmatmul.mubr.msk.f32.vlgmr.msra.gmra.mxu0 %vm1382_vm3, %v13941_v56  ;;  %12082 = vmatmul.mubr.msk.f32.vlgmr.msra.gmra.mxu1 %vm1382_vm3, %v13941_v56  ;;  %v10293_v56 = vld [vmem:[#allocation7 + $0x48] sm:$0xff] }
0x1726   :  { %10366 = vmatpush1.msra.mxu0 %v10308_v11  ;;  %10437 = vmatpush1.msra.mxu1 %v10310_v33 }
0x1727   :  { %10367 = vmatprep.subr.mxu0 %v10305_v6  ;;  %10438 = vmatprep.subr.mxu1 %v10307_v38 }
0x1728   :  { %10368 = vmatpush1.msra.mxu0 %v10304_v36  ;;  %10439 = vmatpush1.msra.mxu1 %v10306_v57 }
0x1729   :  { %10369 = vmatprep.subr.mxu0 %v10301_v37  ;;  %10440 = vmatprep.subr.mxu1 %v10303_v3 }
0x172a   :  { %10370 = vmatpush1.msra.mxu0 %v10300_v29  ;;  %10441 = vmatpush1.msra.mxu1 %v10302_v9 }
0x172b   :  { %10371 = vmatprep.subr.mxu0 %v10297_v31  ;;  %10442 = vmatprep.subr.mxu1 %v10299_v13 }
0x172c   :  { %10372 = vmatpush1.msra.mxu0 %v10296_v50  ;;  %10443 = vmatpush1.msra.mxu1 %v10298_v17 }
0x172d   :  { %10373 = vmatprep.subr.mxu0 %v10293_v56  ;;  %10444 = vmatprep.subr.mxu1 %v10295_v18 }
0x172e   :  { %10374 = vmatpush1.msra.mxu0 %v10292_v26  ;;  %10445 = vmatpush1.msra.mxu1 %v10294_v53 }
0x172f   :  { %10375 = vmatprep.subr.mxu0 %v10289_v14  ;;  %10446 = vmatprep.subr.mxu1 %v10291_v47 }
0x1730   :  { %10376 = vmatpush1.msra.mxu0 %v10288_v39  ;;  %10447 = vmatpush1.msra.mxu1 %v10290_v55 }
0x1731   :  { %10377 = vmatprep.subr.mxu0 %v10285_v60  ;;  %10448 = vmatprep.subr.mxu1 %v10287_v59 }
0x1732   :  { %10378 = vmatpush1.msra.mxu0 %v10284_v30  ;;  %10411 = vmatprep.mubr.f32.mxu0 %v12558_v1 }
0x1733   :  { %10449 = vmatpush1.msra.mxu1 %v10286_v49  ;;  %10482 = vmatprep.mubr.f32.mxu1 %v12558_v1  ;;  %v9935_v1 = vrot.slane %v12074_v10, %v12737_v43 }
0x1734   :  { %12083 = vmatmul.mubr.msk.f32.vlgmr.msra.gmra.mxu0 %vm10343_vm4, %v10283_v22  ;;  %12084 = vmatmul.mubr.msk.f32.vlgmr.msra.gmra.mxu1 %vm10343_vm4, %v10283_v22 }
0x17e1   :  { %v10013_v23 = vpop.f32.mrf.mxu0  ;;  %v10084_v19 = vpop.f32.mrf.mxu1 }
0x17e2   :  { %v10014_v28 = vadd.f32 %v10013_v23, %v9927_v24  ;;  %v10085_v62 = vadd.f32 %v10084_v19, %v9935_v1 }
0x17e3   :  { %v10015_v52 = vpop.f32.mrf.mxu0  ;;  %v10086_v0 = vpop.f32.mrf.mxu1 }
0x17e4   :  { %v10016_v40 = vadd.f32 %v10015_v52, %v9931_v61  ;;  %v10087_v41 = vadd.f32 %v10086_v0, %v9939_v44 }
0x17e5   :  { %v10183_v2 = vpop.f32.mrf.mxu0  ;;  %v10254_v63 = vpop.f32.mrf.mxu1 }
0x17e6   :  { %v10259_v8 = vadd.f32 %v10183_v2, %v10014_v28  ;;  %v10261_v51 = vadd.f32 %v10254_v63, %v10085_v62 }
0x17e7   :  { %v10185_v35 = vpop.f32.mrf.mxu0  ;;  %v10256_v20 = vpop.f32.mrf.mxu1 }
0x17e8   :  { %v10263_v15 = vmul.f32 0.5, %v10259_v8  ;;  %v10260_v34 = vadd.f32 %v10185_v35, %v10016_v40  ;;  %v10262_v58 = vadd.f32 %v10256_v20, %v10087_v41 }
0x17ea   :  { %12479 = vtanh.f32 %v10263_v15  ;;  %v10267_v4 = vmul.f32 0.5, %v10260_v34  ;;  %v10272_v21 = vmul.f32 0.5, %v10262_v58 }
0x17ec   :  { %12481 = vtanh.f32 %v10267_v4 }
0x17ed   :  { %12483 = vtanh.f32 %v10261_v51 }
0x17ee   :  { %12485 = vtanh.f32 %v10272_v21 }
0x17f7   :  { %v12480_v16 = vpop.eup %12479 }
0x17f8   :  { %v10265_v32 = vadd.f32 1.0, %v12480_v16 }
0x17f9   :  { %v12482_v5 = vpop.eup %12481 }
0x17fa   :  { %v10266_v25 = vmul.f32 0.5, %v10265_v32  ;;  %v10269_v12 = vadd.f32 1.0, %v12482_v5  ;;  %v12484_v54 = vpop.eup %12483 }
0x17fb   :  { %v12486_v38 = vpop.eup %12485 }
0x17fc   :  { %v10270_v48 = vmul.f32 0.5, %v10269_v12  ;;  %v10277_v33 = vmul.f32 %v12484_v54, %v10266_v25  ;;  %v10274_v36 = vadd.f32 1.0, %v12486_v38 }
0x17fe   :  { %v10276_v11 = vmul.f32 %v10270_v48, %v13937_v7  ;;  %v10275_v57 = vmul.f32 0.5, %v10274_v36 }
0x1800   :  { %v10278_v6 = vadd.f32 %v10277_v33, %v10276_v11 }
0x1802   :  { %12487 = vtanh.f32 %v10278_v6 }
0x180f   :  { %v12488_v37 = vpop.eup %12487 }
0x1810   :  { %v10280_v3 = vmul.f32 %v12488_v37, %v10275_v57 }
0x1812   :  { %10281 = vst.msk [vmem:[#allocation6 + $0x7] sm:$0x1] %vm1558_vm2, %v10280_v3 }
0x1819   :  { %v10282_v29 = vld [vmem:[#allocation6] sm:$0xff] }
0x181a   :  { %10315 = vperm.xlu0 %12168, %v10282_v29  }
0x181b   :  { %12528 = shalt.err (!%p12525_p9)  }
0x181c   :  { %52 = dma.hbm_to_vmem [thread:$0]  %s14300_s7, 32768, %s50_s2, [#allocation4] }
0x181d   :  { %s12537_s26 = scalar_lea.vmem %s62_s22, 32768  ;;  %p12542_p11 = scmp.lt.s32.totalorder %s62_s22, %s62_s22 }
0x181e   :  { %p12538_p10 = scmp.ne.s32.totalorder %s62_s22, %s12537_s26  ;;  %p12543_p12 = scmp.lt.s32.totalorder %s12537_s26, %s12537_s26 }
0x1820   :  { %p12544_p13 = por %p12543_p12, %p12542_p11 }
0x1822   :  { %p12545_p0 = pnand %p12544_p13, %p12538_p10 }
0x1824   :  { %12548 = shalt.err (!%p12545_p0)  }
0x1825   :  { %64 = dma.hbm_to_vmem [thread:$0]  %s14301_s8, 32768, %s62_s22, [#allocation4 + $0x1]  ;;  %v10312_v7 = vld [vmem:[%s14297_s4] sm:$0xf]  ;;  %v10413_v56 = vpop.f32.mrf.mxu0  ;;  %v10484_v18 = vpop.f32.mrf.mxu1 }
0x1826   :  { %v10322_v9 = vrot.slane %v10312_v7, %v12734_v42  ;;  %v10326_v31 = vrot.slane %v10312_v7, %v12743_v45  ;;  %v10330_v13 = vrot.slane %v10312_v7, %v12737_v43  ;;  %v10334_v50 = vrot.slane %v10312_v7, %v12746_v46  ;;  %v10489_v17 = vld [vmem:[%s14298_s5] ss:$4 sm:$0xf] }
0x1827   :  { %v10494_v26 = vrot.slane %v10489_v17, %v12734_v42  ;;  %v10498_v53 = vrot.slane %v10489_v17, %v12743_v45  ;;  %v10502_v14 = vrot.slane %v10489_v17, %v12737_v43  ;;  %v10506_v47 = vrot.slane %v10489_v17, %v12746_v46  ;;  %v10415_v49 = vpop.f32.mrf.mxu0  ;;  %v10486_v22 = vpop.f32.mrf.mxu1 }
0x1895   :  { %v10316_v39 = vpop.permute.xlu0 %10315 }
0x1896   :  { %v10339_v55 = vmul.f32 %v10322_v9, %v10316_v39  ;;  %v10340_v60 = vmul.f32 %v10326_v31, %v10316_v39  ;;  %v10341_v59 = vmul.f32 %v10330_v13, %v10316_v39  ;;  %v10342_v30 = vmul.f32 %v10334_v50, %v10316_v39 }
0x1898   :  { %v10414_v27 = vadd.f32 %v10413_v56, %v10339_v55  ;;  %v10416_v10 = vadd.f32 %v10415_v49, %v10340_v60  ;;  %v10485_v24 = vadd.f32 %v10484_v18, %v10341_v59  ;;  %v10487_v23 = vadd.f32 %v10486_v22, %v10342_v30 }
0x189a   :  { %v10511_v19 = vadd.f32 %v10494_v26, %v10414_v27  ;;  %v10512_v61 = vadd.f32 %v10498_v53, %v10416_v10  ;;  %v10513_v52 = vadd.f32 %v10502_v14, %v10485_v24  ;;  %v10514_v28 = vadd.f32 %v10506_v47, %v10487_v23 }
0x189c   :  { %vm10515_vm5 = vcmp.ge.f32.partialorder %v10511_v19, 0.0  ;;  %vm10516_vm6 = vcmp.ge.f32.partialorder %v10512_v61, 0.0  ;;  %vm10517_vm7 = vcmp.ge.f32.partialorder %v10513_v52, 0.0  ;;  %vm10518_vm8 = vcmp.ge.f32.partialorder %v10514_v28, 0.0 }
0x189d   :  { %v10519_v0 = vmul.f32 0.01, %v10511_v19  ;;  %v10520_v2 = vmul.f32 0.01, %v10512_v61  ;;  %v10521_v1 = vmul.f32 0.01, %v10513_v52 }
0x189e   :  { %v10522_v40 = vmul.f32 0.01, %v10514_v28 }
0x189f   :  { %v14048_v8 = vsel %vm10515_vm5, %v10511_v19, %v10519_v0  ;;  %v14050_v35 = vsel %vm10516_vm6, %v10512_v61, %v10520_v2  ;;  %v14052_v15 = vsel %vm10517_vm7, %v10513_v52, %v10521_v1 }
0x18a0   :  { %v14054_v34 = vsel %vm10518_vm8, %v10514_v28, %v10522_v40 }
0x18a1   :  { %12551 = dma.done.wait [#allocation4], 32768 }
0x18a2   :  { %12552 = vsyncadd [#allocation4], 4294934528  ;;  %10874 = vmatprep.mubr.f32.mxu0 %v14050_v35  ;;  %10945 = vmatprep.mubr.f32.mxu1 %v14054_v34  ;;  %v10592_v63 = vld [vmem:[#allocation2 + $0x1e8] sm:$0xff]  ;;  %v10591_v4 = vld [vmem:[#allocation2 + $0x1e0] sm:$0xff] }
0x18a3   :  { %v10720_v62 = vld [vmem:[#allocation2 + $0x5e8] sm:$0xff]  ;;  %10810 = vmatprep.subr.mxu0 %v10592_v63  ;;  %v10719_v44 = vld [vmem:[#allocation2 + $0x5e0] sm:$0xff] }
0x18a4   :  { %10881 = vmatprep.subr.mxu1 %v10720_v62  ;;  %v10588_v51 = vld [vmem:[#allocation2 + $0x1c8] sm:$0xff]  ;;  %10811 = vmatpush1.msra.mxu0 %v10591_v4  ;;  %v10587_v41 = vld [vmem:[#allocation2 + $0x1c0] sm:$0xff] }
0x18a5   :  { %v10716_v20 = vld [vmem:[#allocation2 + $0x5c8] sm:$0xff]  ;;  %10882 = vmatpush1.msra.mxu1 %v10719_v44  ;;  %v10715_v58 = vld [vmem:[#allocation2 + $0x5c0] sm:$0xff]  ;;  %10812 = vmatprep.subr.mxu0 %v10588_v51 }
0x18a6   :  { %v10584_v21 = vld [vmem:[#allocation2 + $0x1a8] sm:$0xff]  ;;  %10883 = vmatprep.subr.mxu1 %v10716_v20  ;;  %v10583_v32 = vld [vmem:[#allocation2 + $0x1a0] sm:$0xff]  ;;  %10813 = vmatpush1.msra.mxu0 %v10587_v41 }
0x18a7   :  { %v10712_v16 = vld [vmem:[#allocation2 + $0x5a8] sm:$0xff]  ;;  %v10711_v5 = vld [vmem:[#allocation2 + $0x5a0] sm:$0xff]  ;;  %10884 = vmatpush1.msra.mxu1 %v10715_v58  ;;  %10814 = vmatprep.subr.mxu0 %v10584_v21 }
0x18a8   :  { %v10580_v25 = vld [vmem:[#allocation2 + $0x188] sm:$0xff]  ;;  %10885 = vmatprep.subr.mxu1 %v10712_v16  ;;  %v10579_v48 = vld [vmem:[#allocation2 + $0x180] sm:$0xff]  ;;  %10815 = vmatpush1.msra.mxu0 %v10583_v32 }
0x18a9   :  { %v10708_v12 = vld [vmem:[#allocation2 + $0x588] sm:$0xff]  ;;  %v10707_v54 = vld [vmem:[#allocation2 + $0x580] sm:$0xff]  ;;  %10886 = vmatpush1.msra.mxu1 %v10711_v5  ;;  %10816 = vmatprep.subr.mxu0 %v10580_v25 }
0x18aa   :  { %v10576_v11 = vld [vmem:[#allocation2 + $0x168] sm:$0xff]  ;;  %10887 = vmatprep.subr.mxu1 %v10708_v12  ;;  %v10575_v6 = vld [vmem:[#allocation2 + $0x160] sm:$0xff]  ;;  %10817 = vmatpush1.msra.mxu0 %v10579_v48 }
0x18ab   :  { %v10704_v33 = vld [vmem:[#allocation2 + $0x568] sm:$0xff]  ;;  %v10703_v38 = vld [vmem:[#allocation2 + $0x560] sm:$0xff]  ;;  %10888 = vmatpush1.msra.mxu1 %v10707_v54  ;;  %10818 = vmatprep.subr.mxu0 %v10576_v11 }
0x18ac   :  { %v10572_v36 = vld [vmem:[#allocation2 + $0x148] sm:$0xff]  ;;  %10889 = vmatprep.subr.mxu1 %v10704_v33  ;;  %v10571_v37 = vld [vmem:[#allocation2 + $0x140] sm:$0xff]  ;;  %10819 = vmatpush1.msra.mxu0 %v10575_v6 }
0x18ad   :  { %v10700_v57 = vld [vmem:[#allocation2 + $0x548] sm:$0xff]  ;;  %v10699_v3 = vld [vmem:[#allocation2 + $0x540] sm:$0xff]  ;;  %10890 = vmatpush1.msra.mxu1 %v10703_v38  ;;  %10820 = vmatprep.subr.mxu0 %v10572_v36 }
0x18ae   :  { %v10568_v29 = vld [vmem:[#allocation2 + $0x128] sm:$0xff]  ;;  %10891 = vmatprep.subr.mxu1 %v10700_v57  ;;  %v10567_v9 = vld [vmem:[#allocation2 + $0x120] sm:$0xff]  ;;  %10821 = vmatpush1.msra.mxu0 %v10571_v37 }
0x18af   :  { %v10696_v7 = vld [vmem:[#allocation2 + $0x528] sm:$0xff]  ;;  %v10695_v31 = vld [vmem:[#allocation2 + $0x520] sm:$0xff]  ;;  %10892 = vmatpush1.msra.mxu1 %v10699_v3  ;;  %10822 = vmatprep.subr.mxu0 %v10568_v29 }
0x18b0   :  { %v10564_v13 = vld [vmem:[#allocation2 + $0x108] sm:$0xff]  ;;  %10893 = vmatprep.subr.mxu1 %v10696_v7  ;;  %v10563_v17 = vld [vmem:[#allocation2 + $0x100] sm:$0xff]  ;;  %10823 = vmatpush1.msra.mxu0 %v10567_v9 }
0x18b1   :  { %v10692_v50 = vld [vmem:[#allocation2 + $0x508] sm:$0xff]  ;;  %v10691_v56 = vld [vmem:[#allocation2 + $0x500] sm:$0xff]  ;;  %10894 = vmatpush1.msra.mxu1 %v10695_v31  ;;  %10824 = vmatprep.subr.mxu0 %v10564_v13 }
0x18b2   :  { %v10560_v18 = vld [vmem:[#allocation2 + $0xe8] sm:$0xff]  ;;  %10895 = vmatprep.subr.mxu1 %v10692_v50  ;;  %v10559_v53 = vld [vmem:[#allocation2 + $0xe0] sm:$0xff]  ;;  %10825 = vmatpush1.msra.mxu0 %v10563_v17 }
0x18b3   :  { %v10688_v26 = vld [vmem:[#allocation2 + $0x4e8] sm:$0xff]  ;;  %v10687_v14 = vld [vmem:[#allocation2 + $0x4e0] sm:$0xff]  ;;  %10896 = vmatpush1.msra.mxu1 %v10691_v56  ;;  %10826 = vmatprep.subr.mxu0 %v10560_v18 }
0x18b4   :  { %v10556_v47 = vld [vmem:[#allocation2 + $0xc8] sm:$0xff]  ;;  %10897 = vmatprep.subr.mxu1 %v10688_v26  ;;  %v10555_v55 = vld [vmem:[#allocation2 + $0xc0] sm:$0xff]  ;;  %10827 = vmatpush1.msra.mxu0 %v10559_v53 }
0x18b5   :  { %v10684_v39 = vld [vmem:[#allocation2 + $0x4c8] sm:$0xff]  ;;  %v10683_v60 = vld [vmem:[#allocation2 + $0x4c0] sm:$0xff]  ;;  %10898 = vmatpush1.msra.mxu1 %v10687_v14  ;;  %10828 = vmatprep.subr.mxu0 %v10556_v47 }
0x18b6   :  { %v10552_v59 = vld [vmem:[#allocation2 + $0xa8] sm:$0xff]  ;;  %10899 = vmatprep.subr.mxu1 %v10684_v39  ;;  %v10551_v49 = vld [vmem:[#allocation2 + $0xa0] sm:$0xff]  ;;  %10829 = vmatpush1.msra.mxu0 %v10555_v55 }
0x18b7   :  { %v10680_v30 = vld [vmem:[#allocation2 + $0x4a8] sm:$0xff]  ;;  %v10679_v22 = vld [vmem:[#allocation2 + $0x4a0] sm:$0xff]  ;;  %10900 = vmatpush1.msra.mxu1 %v10683_v60  ;;  %10830 = vmatprep.subr.mxu0 %v10552_v59 }
0x18b8   :  { %v10548_v27 = vld [vmem:[#allocation2 + $0x88] sm:$0xff]  ;;  %10901 = vmatprep.subr.mxu1 %v10680_v30  ;;  %v10547_v24 = vld [vmem:[#allocation2 + $0x80] sm:$0xff]  ;;  %10831 = vmatpush1.msra.mxu0 %v10551_v49 }
0x18b9   :  { %v10676_v10 = vld [vmem:[#allocation2 + $0x488] sm:$0xff]  ;;  %v10675_v23 = vld [vmem:[#allocation2 + $0x480] sm:$0xff]  ;;  %10902 = vmatpush1.msra.mxu1 %v10679_v22  ;;  %10832 = vmatprep.subr.mxu0 %v10548_v27 }
0x18ba   :  { %v10544_v19 = vld [vmem:[#allocation2 + $0x68] sm:$0xff]  ;;  %10903 = vmatprep.subr.mxu1 %v10676_v10  ;;  %v10543_v52 = vld [vmem:[#allocation2 + $0x60] sm:$0xff]  ;;  %10833 = vmatpush1.msra.mxu0 %v10547_v24 }
0x18bb   :  { %v10672_v61 = vld [vmem:[#allocation2 + $0x468] sm:$0xff]  ;;  %v10671_v28 = vld [vmem:[#allocation2 + $0x460] sm:$0xff]  ;;  %10904 = vmatpush1.msra.mxu1 %v10675_v23  ;;  %10834 = vmatprep.subr.mxu0 %v10544_v19 }
0x18bc   :  { %v10540_v0 = vld [vmem:[#allocation2 + $0x48] sm:$0xff]  ;;  %10905 = vmatprep.subr.mxu1 %v10672_v61  ;;  %v10539_v1 = vld [vmem:[#allocation2 + $0x40] sm:$0xff]  ;;  %10835 = vmatpush1.msra.mxu0 %v10543_v52 }
0x18bd   :  { %v10668_v2 = vld [vmem:[#allocation2 + $0x448] sm:$0xff]  ;;  %v10667_v40 = vld [vmem:[#allocation2 + $0x440] sm:$0xff]  ;;  %10906 = vmatpush1.msra.mxu1 %v10671_v28  ;;  %10836 = vmatprep.subr.mxu0 %v10540_v0 }
0x18be   :  { %v10536_v63 = vld [vmem:[#allocation2 + $0x28] sm:$0xff]  ;;  %10907 = vmatprep.subr.mxu1 %v10668_v2  ;;  %v10535_v4 = vld [vmem:[#allocation2 + $0x20] sm:$0xff]  ;;  %10837 = vmatpush1.msra.mxu0 %v10539_v1 }
0x18bf   :  { %v10664_v62 = vld [vmem:[#allocation2 + $0x428] sm:$0xff]  ;;  %v10663_v44 = vld [vmem:[#allocation2 + $0x420] sm:$0xff]  ;;  %10908 = vmatpush1.msra.mxu1 %v10667_v40  ;;  %10838 = vmatprep.subr.mxu0 %v10536_v63 }
0x18c0   :  { %v10532_v51 = vld [vmem:[#allocation2 + $0x8] sm:$0xff]  ;;  %10909 = vmatprep.subr.mxu1 %v10664_v62  ;;  %v10531_v41 = vld [vmem:[#allocation2] sm:$0xff]  ;;  %10839 = vmatpush1.msra.mxu0 %v10535_v4 }
0x18c1   :  { %v10660_v20 = vld [vmem:[#allocation2 + $0x408] sm:$0xff]  ;;  %v10659_v58 = vld [vmem:[#allocation2 + $0x400] sm:$0xff]  ;;  %10910 = vmatpush1.msra.mxu1 %v10663_v44  ;;  %10840 = vmatprep.subr.mxu0 %v10532_v51 }
0x18c2   :  { %v10656_v21 = vld [vmem:[#allocation2 + $0x3e8] sm:$0xff]  ;;  %10911 = vmatprep.subr.mxu1 %v10660_v20  ;;  %v10655_v32 = vld [vmem:[#allocation2 + $0x3e0] sm:$0xff]  ;;  %10841 = vmatpush1.msra.mxu0 %v10531_v41 }
0x18c3   :  { %v10784_v16 = vld [vmem:[#allocation2 + $0x7e8] sm:$0xff]  ;;  %v10783_v5 = vld [vmem:[#allocation2 + $0x7e0] sm:$0xff]  ;;  %10912 = vmatpush1.msra.mxu1 %v10659_v58  ;;  %10842 = vmatprep.subr.mxu0 %v10656_v21 }
0x18c4   :  { %v10652_v25 = vld [vmem:[#allocation2 + $0x3c8] sm:$0xff]  ;;  %10913 = vmatprep.subr.mxu1 %v10784_v16  ;;  %v10651_v48 = vld [vmem:[#allocation2 + $0x3c0] sm:$0xff]  ;;  %10843 = vmatpush2.msra.mxu0 %v10655_v32 }
0x18c5   :  { %v10780_v12 = vld [vmem:[#allocation2 + $0x7c8] sm:$0xff]  ;;  %v10779_v54 = vld [vmem:[#allocation2 + $0x7c0] sm:$0xff]  ;;  %10914 = vmatpush2.msra.mxu1 %v10783_v5  ;;  %10844 = vmatprep.subr.mxu0 %v10652_v25 }
0x18c6   :  { %v10648_v11 = vld [vmem:[#allocation2 + $0x3a8] sm:$0xff]  ;;  %10915 = vmatprep.subr.mxu1 %v10780_v12  ;;  %v10647_v6 = vld [vmem:[#allocation2 + $0x3a0] sm:$0xff]  ;;  %10845 = vmatpush2.msra.mxu0 %v10651_v48 }
0x18c7   :  { %v10776_v33 = vld [vmem:[#allocation2 + $0x7a8] sm:$0xff]  ;;  %v10775_v38 = vld [vmem:[#allocation2 + $0x7a0] sm:$0xff]  ;;  %10916 = vmatpush2.msra.mxu1 %v10779_v54  ;;  %10846 = vmatprep.subr.mxu0 %v10648_v11  ;;  %v10594_v11 = vld [vmem:[#allocation2 + $0x1f8] sm:$0xff] }
0x18c8   :  { %v10644_v36 = vld [vmem:[#allocation2 + $0x388] sm:$0xff]  ;;  %10917 = vmatprep.subr.mxu1 %v10776_v33  ;;  %v10643_v37 = vld [vmem:[#allocation2 + $0x380] sm:$0xff]  ;;  %10847 = vmatpush2.msra.mxu0 %v10647_v6  ;;  %v10722_v33 = vld [vmem:[#allocation2 + $0x5f8] sm:$0xff] }
0x18c9   :  { %v10772_v57 = vld [vmem:[#allocation2 + $0x788] sm:$0xff]  ;;  %v10771_v3 = vld [vmem:[#allocation2 + $0x780] sm:$0xff]  ;;  %10918 = vmatpush2.msra.mxu1 %v10775_v38  ;;  %10848 = vmatprep.subr.mxu0 %v10644_v36  ;;  %v10593_v6 = vld [vmem:[#allocation2 + $0x1f0] sm:$0xff] }
0x18ca   :  { %v10640_v29 = vld [vmem:[#allocation2 + $0x368] sm:$0xff]  ;;  %10919 = vmatprep.subr.mxu1 %v10772_v57  ;;  %v10639_v9 = vld [vmem:[#allocation2 + $0x360] sm:$0xff]  ;;  %10849 = vmatpush2.msra.mxu0 %v10643_v37  ;;  %v10721_v38 = vld [vmem:[#allocation2 + $0x5f0] sm:$0xff] }
0x18cb   :  { %v10768_v7 = vld [vmem:[#allocation2 + $0x768] sm:$0xff]  ;;  %v10767_v31 = vld [vmem:[#allocation2 + $0x760] sm:$0xff]  ;;  %10920 = vmatpush2.msra.mxu1 %v10771_v3  ;;  %10850 = vmatprep.subr.mxu0 %v10640_v29  ;;  %v10590_v36 = vld [vmem:[#allocation2 + $0x1d8] sm:$0xff] }
0x18cc   :  { %v10636_v13 = vld [vmem:[#allocation2 + $0x348] sm:$0xff]  ;;  %10921 = vmatprep.subr.mxu1 %v10768_v7  ;;  %v10635_v17 = vld [vmem:[#allocation2 + $0x340] sm:$0xff]  ;;  %10851 = vmatpush2.msra.mxu0 %v10639_v9  ;;  %v10718_v57 = vld [vmem:[#allocation2 + $0x5d8] sm:$0xff] }
0x18cd   :  { %v10764_v50 = vld [vmem:[#allocation2 + $0x748] sm:$0xff]  ;;  %v10763_v56 = vld [vmem:[#allocation2 + $0x740] sm:$0xff]  ;;  %10922 = vmatpush2.msra.mxu1 %v10767_v31  ;;  %10852 = vmatprep.subr.mxu0 %v10636_v13  ;;  %v10589_v37 = vld [vmem:[#allocation2 + $0x1d0] sm:$0xff] }
0x18ce   :  { %v10632_v18 = vld [vmem:[#allocation2 + $0x328] sm:$0xff]  ;;  %10923 = vmatprep.subr.mxu1 %v10764_v50  ;;  %v10631_v53 = vld [vmem:[#allocation2 + $0x320] sm:$0xff]  ;;  %10853 = vmatpush2.msra.mxu0 %v10635_v17  ;;  %v10717_v3 = vld [vmem:[#allocation2 + $0x5d0] sm:$0xff] }
0x18cf   :  { %v10760_v26 = vld [vmem:[#allocation2 + $0x728] sm:$0xff]  ;;  %v10759_v14 = vld [vmem:[#allocation2 + $0x720] sm:$0xff]  ;;  %10924 = vmatpush2.msra.mxu1 %v10763_v56  ;;  %10854 = vmatprep.subr.mxu0 %v10632_v18  ;;  %v10586_v29 = vld [vmem:[#allocation2 + $0x1b8] sm:$0xff] }
0x18d0   :  { %v10628_v47 = vld [vmem:[#allocation2 + $0x308] sm:$0xff]  ;;  %10925 = vmatprep.subr.mxu1 %v10760_v26  ;;  %v10627_v55 = vld [vmem:[#allocation2 + $0x300] sm:$0xff]  ;;  %10855 = vmatpush2.msra.mxu0 %v10631_v53  ;;  %v10714_v7 = vld [vmem:[#allocation2 + $0x5b8] sm:$0xff] }
0x18d1   :  { %v10756_v39 = vld [vmem:[#allocation2 + $0x708] sm:$0xff]  ;;  %v10755_v60 = vld [vmem:[#allocation2 + $0x700] sm:$0xff]  ;;  %10926 = vmatpush2.msra.mxu1 %v10759_v14  ;;  %10856 = vmatprep.subr.mxu0 %v10628_v47  ;;  %v10585_v9 = vld [vmem:[#allocation2 + $0x1b0] sm:$0xff] }
0x18d2   :  { %v10624_v59 = vld [vmem:[#allocation2 + $0x2e8] sm:$0xff]  ;;  %10927 = vmatprep.subr.mxu1 %v10756_v39  ;;  %v10623_v49 = vld [vmem:[#allocation2 + $0x2e0] sm:$0xff]  ;;  %10857 = vmatpush2.msra.mxu0 %v10627_v55  ;;  %v10713_v31 = vld [vmem:[#allocation2 + $0x5b0] sm:$0xff] }
0x18d3   :  { %v10752_v30 = vld [vmem:[#allocation2 + $0x6e8] sm:$0xff]  ;;  %v10751_v22 = vld [vmem:[#allocation2 + $0x6e0] sm:$0xff]  ;;  %10928 = vmatpush2.msra.mxu1 %v10755_v60  ;;  %10858 = vmatprep.subr.mxu0 %v10624_v59  ;;  %v10582_v13 = vld [vmem:[#allocation2 + $0x198] sm:$0xff] }
0x18d4   :  { %v10620_v27 = vld [vmem:[#allocation2 + $0x2c8] sm:$0xff]  ;;  %10929 = vmatprep.subr.mxu1 %v10752_v30  ;;  %v10619_v24 = vld [vmem:[#allocation2 + $0x2c0] sm:$0xff]  ;;  %10859 = vmatpush2.msra.mxu0 %v10623_v49  ;;  %v10710_v50 = vld [vmem:[#allocation2 + $0x598] sm:$0xff] }
0x18d5   :  { %v10748_v10 = vld [vmem:[#allocation2 + $0x6c8] sm:$0xff]  ;;  %v10747_v23 = vld [vmem:[#allocation2 + $0x6c0] sm:$0xff]  ;;  %10930 = vmatpush2.msra.mxu1 %v10751_v22  ;;  %10860 = vmatprep.subr.mxu0 %v10620_v27  ;;  %v10581_v17 = vld [vmem:[#allocation2 + $0x190] sm:$0xff] }
0x18d6   :  { %v10616_v19 = vld [vmem:[#allocation2 + $0x2a8] sm:$0xff]  ;;  %10931 = vmatprep.subr.mxu1 %v10748_v10  ;;  %v10615_v52 = vld [vmem:[#allocation2 + $0x2a0] sm:$0xff]  ;;  %10861 = vmatpush2.msra.mxu0 %v10619_v24  ;;  %v10709_v56 = vld [vmem:[#allocation2 + $0x590] sm:$0xff] }
0x18d7   :  { %v10744_v61 = vld [vmem:[#allocation2 + $0x6a8] sm:$0xff]  ;;  %v10743_v28 = vld [vmem:[#allocation2 + $0x6a0] sm:$0xff]  ;;  %10932 = vmatpush2.msra.mxu1 %v10747_v23  ;;  %10862 = vmatprep.subr.mxu0 %v10616_v19  ;;  %v10578_v18 = vld [vmem:[#allocation2 + $0x178] sm:$0xff] }
0x18d8   :  { %v10612_v0 = vld [vmem:[#allocation2 + $0x288] sm:$0xff]  ;;  %10933 = vmatprep.subr.mxu1 %v10744_v61  ;;  %v10611_v1 = vld [vmem:[#allocation2 + $0x280] sm:$0xff]  ;;  %10863 = vmatpush2.msra.mxu0 %v10615_v52  ;;  %v10706_v26 = vld [vmem:[#allocation2 + $0x578] sm:$0xff] }
0x18d9   :  { %v10740_v2 = vld [vmem:[#allocation2 + $0x688] sm:$0xff]  ;;  %v10739_v40 = vld [vmem:[#allocation2 + $0x680] sm:$0xff]  ;;  %10934 = vmatpush2.msra.mxu1 %v10743_v28  ;;  %10864 = vmatprep.subr.mxu0 %v10612_v0  ;;  %v10577_v53 = vld [vmem:[#allocation2 + $0x170] sm:$0xff] }
0x18da   :  { %v10608_v63 = vld [vmem:[#allocation2 + $0x268] sm:$0xff]  ;;  %10935 = vmatprep.subr.mxu1 %v10740_v2  ;;  %v10607_v4 = vld [vmem:[#allocation2 + $0x260] sm:$0xff]  ;;  %10865 = vmatpush2.msra.mxu0 %v10611_v1  ;;  %v10705_v14 = vld [vmem:[#allocation2 + $0x570] sm:$0xff] }
0x18db   :  { %v10736_v62 = vld [vmem:[#allocation2 + $0x668] sm:$0xff]  ;;  %v10735_v44 = vld [vmem:[#allocation2 + $0x660] sm:$0xff]  ;;  %10936 = vmatpush2.msra.mxu1 %v10739_v40  ;;  %10866 = vmatprep.subr.mxu0 %v10608_v63  ;;  %v10574_v47 = vld [vmem:[#allocation2 + $0x158] sm:$0xff] }
0x18dc   :  { %v10604_v51 = vld [vmem:[#allocation2 + $0x248] sm:$0xff]  ;;  %10937 = vmatprep.subr.mxu1 %v10736_v62  ;;  %v10603_v41 = vld [vmem:[#allocation2 + $0x240] sm:$0xff]  ;;  %10867 = vmatpush2.msra.mxu0 %v10607_v4  ;;  %v10702_v39 = vld [vmem:[#allocation2 + $0x558] sm:$0xff] }
0x18dd   :  { %v10732_v20 = vld [vmem:[#allocation2 + $0x648] sm:$0xff]  ;;  %v10731_v58 = vld [vmem:[#allocation2 + $0x640] sm:$0xff]  ;;  %10938 = vmatpush2.msra.mxu1 %v10735_v44  ;;  %10868 = vmatprep.subr.mxu0 %v10604_v51  ;;  %v10573_v55 = vld [vmem:[#allocation2 + $0x150] sm:$0xff] }
0x18de   :  { %v10600_v21 = vld [vmem:[#allocation2 + $0x228] sm:$0xff]  ;;  %10939 = vmatprep.subr.mxu1 %v10732_v20  ;;  %v10599_v32 = vld [vmem:[#allocation2 + $0x220] sm:$0xff]  ;;  %10869 = vmatpush2.msra.mxu0 %v10603_v41  ;;  %v10701_v60 = vld [vmem:[#allocation2 + $0x550] sm:$0xff] }
0x18df   :  { %v10728_v16 = vld [vmem:[#allocation2 + $0x628] sm:$0xff]  ;;  %v10727_v5 = vld [vmem:[#allocation2 + $0x620] sm:$0xff]  ;;  %10940 = vmatpush2.msra.mxu1 %v10731_v58  ;;  %10870 = vmatprep.subr.mxu0 %v10600_v21  ;;  %v10570_v59 = vld [vmem:[#allocation2 + $0x138] sm:$0xff] }
0x18e0   :  { %v10596_v25 = vld [vmem:[#allocation2 + $0x208] sm:$0xff]  ;;  %10941 = vmatprep.subr.mxu1 %v10728_v16  ;;  %v10595_v48 = vld [vmem:[#allocation2 + $0x200] sm:$0xff]  ;;  %10871 = vmatpush2.msra.mxu0 %v10599_v32  ;;  %v10698_v30 = vld [vmem:[#allocation2 + $0x538] sm:$0xff] }
0x18e1   :  { %v10724_v12 = vld [vmem:[#allocation2 + $0x608] sm:$0xff]  ;;  %v10723_v54 = vld [vmem:[#allocation2 + $0x600] sm:$0xff]  ;;  %10942 = vmatpush2.msra.mxu1 %v10727_v5  ;;  %10872 = vmatprep.subr.mxu0 %v10596_v25  ;;  %v10569_v49 = vld [vmem:[#allocation2 + $0x130] sm:$0xff] }
0x18e2   :  { %10943 = vmatprep.subr.mxu1 %v10724_v12  ;;  %10873 = vmatpush2.msra.mxu0 %v10595_v48  ;;  %v10697_v22 = vld [vmem:[#allocation2 + $0x530] sm:$0xff]  ;;  %v10566_v27 = vld [vmem:[#allocation2 + $0x118] sm:$0xff] }
0x18e3   :  { %10944 = vmatpush2.msra.mxu1 %v10723_v54  ;;  %10875 = vmatmul.mubr.f32.vlgmr.msra.gmra.mxu0 %v14048_v8  ;;  %v10694_v10 = vld [vmem:[#allocation2 + $0x518] sm:$0xff]  ;;  %v10565_v24 = vld [vmem:[#allocation2 + $0x110] sm:$0xff] }
0x18e4   :  { %10952 = vmatprep.subr.mxu0 %v10594_v11  ;;  %11023 = vmatprep.subr.mxu1 %v10722_v33  ;;  %v10693_v23 = vld [vmem:[#allocation2 + $0x510] sm:$0xff]  ;;  %v10562_v19 = vld [vmem:[#allocation2 + $0xf8] sm:$0xff] }
0x18e5   :  { %10946 = vmatmul.mubr.f32.vlgmr.msra.gmra.mxu1 %v14052_v15  ;;  %10953 = vmatpush1.msra.mxu0 %v10593_v6  ;;  %v10690_v61 = vld [vmem:[#allocation2 + $0x4f8] sm:$0xff]  ;;  %v10561_v52 = vld [vmem:[#allocation2 + $0xf0] sm:$0xff] }
0x18e6   :  { %11024 = vmatpush1.msra.mxu1 %v10721_v38  ;;  %10954 = vmatprep.subr.mxu0 %v10590_v36  ;;  %v10689_v28 = vld [vmem:[#allocation2 + $0x4f0] sm:$0xff]  ;;  %v10558_v0 = vld [vmem:[#allocation2 + $0xd8] sm:$0xff] }
0x18e7   :  { %11025 = vmatprep.subr.mxu1 %v10718_v57  ;;  %10955 = vmatpush1.msra.mxu0 %v10589_v37  ;;  %v10686_v2 = vld [vmem:[#allocation2 + $0x4d8] sm:$0xff]  ;;  %v10557_v1 = vld [vmem:[#allocation2 + $0xd0] sm:$0xff] }
0x18e8   :  { %11026 = vmatpush1.msra.mxu1 %v10717_v3  ;;  %10956 = vmatprep.subr.mxu0 %v10586_v29  ;;  %v10685_v40 = vld [vmem:[#allocation2 + $0x4d0] sm:$0xff]  ;;  %v10554_v63 = vld [vmem:[#allocation2 + $0xb8] sm:$0xff] }
0x18e9   :  { %11027 = vmatprep.subr.mxu1 %v10714_v7  ;;  %10957 = vmatpush1.msra.mxu0 %v10585_v9  ;;  %v10682_v62 = vld [vmem:[#allocation2 + $0x4b8] sm:$0xff]  ;;  %v10553_v4 = vld [vmem:[#allocation2 + $0xb0] sm:$0xff] }
0x18ea   :  { %11028 = vmatpush1.msra.mxu1 %v10713_v31  ;;  %10958 = vmatprep.subr.mxu0 %v10582_v13  ;;  %v10681_v44 = vld [vmem:[#allocation2 + $0x4b0] sm:$0xff]  ;;  %v10550_v51 = vld [vmem:[#allocation2 + $0x98] sm:$0xff] }
0x18eb   :  { %11029 = vmatprep.subr.mxu1 %v10710_v50  ;;  %10959 = vmatpush1.msra.mxu0 %v10581_v17  ;;  %v10678_v20 = vld [vmem:[#allocation2 + $0x498] sm:$0xff]  ;;  %v10549_v41 = vld [vmem:[#allocation2 + $0x90] sm:$0xff] }
0x18ec   :  { %11030 = vmatpush1.msra.mxu1 %v10709_v56  ;;  %10960 = vmatprep.subr.mxu0 %v10578_v18  ;;  %v10677_v58 = vld [vmem:[#allocation2 + $0x490] sm:$0xff]  ;;  %v10546_v21 = vld [vmem:[#allocation2 + $0x78] sm:$0xff] }
0x18ed   :  { %11031 = vmatprep.subr.mxu1 %v10706_v26  ;;  %10961 = vmatpush1.msra.mxu0 %v10577_v53  ;;  %v10674_v16 = vld [vmem:[#allocation2 + $0x478] sm:$0xff]  ;;  %v10545_v32 = vld [vmem:[#allocation2 + $0x70] sm:$0xff] }
0x18ee   :  { %11032 = vmatpush1.msra.mxu1 %v10705_v14  ;;  %10962 = vmatprep.subr.mxu0 %v10574_v47  ;;  %v10673_v5 = vld [vmem:[#allocation2 + $0x470] sm:$0xff]  ;;  %v10542_v25 = vld [vmem:[#allocation2 + $0x58] sm:$0xff] }
0x18ef   :  { %11033 = vmatprep.subr.mxu1 %v10702_v39  ;;  %10963 = vmatpush1.msra.mxu0 %v10573_v55  ;;  %v10670_v12 = vld [vmem:[#allocation2 + $0x458] sm:$0xff]  ;;  %v10541_v48 = vld [vmem:[#allocation2 + $0x50] sm:$0xff] }
0x18f0   :  { %11034 = vmatpush1.msra.mxu1 %v10701_v60  ;;  %10964 = vmatprep.subr.mxu0 %v10570_v59  ;;  %v10669_v54 = vld [vmem:[#allocation2 + $0x450] sm:$0xff]  ;;  %v10538_v11 = vld [vmem:[#allocation2 + $0x38] sm:$0xff] }
0x18f1   :  { %11035 = vmatprep.subr.mxu1 %v10698_v30  ;;  %10965 = vmatpush1.msra.mxu0 %v10569_v49  ;;  %v10666_v33 = vld [vmem:[#allocation2 + $0x438] sm:$0xff]  ;;  %v10537_v6 = vld [vmem:[#allocation2 + $0x30] sm:$0xff] }
0x18f2   :  { %11036 = vmatpush1.msra.mxu1 %v10697_v22  ;;  %10966 = vmatprep.subr.mxu0 %v10566_v27  ;;  %v10665_v38 = vld [vmem:[#allocation2 + $0x430] sm:$0xff]  ;;  %v10534_v36 = vld [vmem:[#allocation2 + $0x18] sm:$0xff] }
0x18f3   :  { %11037 = vmatprep.subr.mxu1 %v10694_v10  ;;  %10967 = vmatpush1.msra.mxu0 %v10565_v24  ;;  %v10662_v57 = vld [vmem:[#allocation2 + $0x418] sm:$0xff]  ;;  %v10533_v37 = vld [vmem:[#allocation2 + $0x10] sm:$0xff] }
0x18f4   :  { %11038 = vmatpush1.msra.mxu1 %v10693_v23  ;;  %10968 = vmatprep.subr.mxu0 %v10562_v19  ;;  %v10661_v3 = vld [vmem:[#allocation2 + $0x410] sm:$0xff]  ;;  %v10658_v29 = vld [vmem:[#allocation2 + $0x3f8] sm:$0xff] }
0x18f5   :  { %11039 = vmatprep.subr.mxu1 %v10690_v61  ;;  %10969 = vmatpush1.msra.mxu0 %v10561_v52  ;;  %v10786_v7 = vld [vmem:[#allocation2 + $0x7f8] sm:$0xff]  ;;  %v10657_v9 = vld [vmem:[#allocation2 + $0x3f0] sm:$0xff] }
0x18f6   :  { %11040 = vmatpush1.msra.mxu1 %v10689_v28  ;;  %10970 = vmatprep.subr.mxu0 %v10558_v0  ;;  %v10785_v31 = vld [vmem:[#allocation2 + $0x7f0] sm:$0xff]  ;;  %v10654_v13 = vld [vmem:[#allocation2 + $0x3d8] sm:$0xff] }
0x18f7   :  { %11041 = vmatprep.subr.mxu1 %v10686_v2  ;;  %10971 = vmatpush1.msra.mxu0 %v10557_v1  ;;  %v10782_v50 = vld [vmem:[#allocation2 + $0x7d8] sm:$0xff]  ;;  %v10653_v17 = vld [vmem:[#allocation2 + $0x3d0] sm:$0xff] }
0x18f8   :  { %11042 = vmatpush1.msra.mxu1 %v10685_v40  ;;  %10972 = vmatprep.subr.mxu0 %v10554_v63  ;;  %v10781_v56 = vld [vmem:[#allocation2 + $0x7d0] sm:$0xff]  ;;  %v10650_v18 = vld [vmem:[#allocation2 + $0x3b8] sm:$0xff] }
0x18f9   :  { %11043 = vmatprep.subr.mxu1 %v10682_v62  ;;  %10973 = vmatpush1.msra.mxu0 %v10553_v4  ;;  %v10778_v26 = vld [vmem:[#allocation2 + $0x7b8] sm:$0xff]  ;;  %v10649_v53 = vld [vmem:[#allocation2 + $0x3b0] sm:$0xff] }
0x18fa   :  { %11044 = vmatpush1.msra.mxu1 %v10681_v44  ;;  %10974 = vmatprep.subr.mxu0 %v10550_v51  ;;  %v10777_v14 = vld [vmem:[#allocation2 + $0x7b0] sm:$0xff]  ;;  %v10646_v47 = vld [vmem:[#allocation2 + $0x398] sm:$0xff] }
0x18fb   :  { %11045 = vmatprep.subr.mxu1 %v10678_v20  ;;  %10975 = vmatpush1.msra.mxu0 %v10549_v41  ;;  %v10774_v39 = vld [vmem:[#allocation2 + $0x798] sm:$0xff]  ;;  %v10645_v55 = vld [vmem:[#allocation2 + $0x390] sm:$0xff] }
0x18fc   :  { %11046 = vmatpush1.msra.mxu1 %v10677_v58  ;;  %10976 = vmatprep.subr.mxu0 %v10546_v21  ;;  %v10773_v60 = vld [vmem:[#allocation2 + $0x790] sm:$0xff]  ;;  %v10642_v59 = vld [vmem:[#allocation2 + $0x378] sm:$0xff] }
0x18fd   :  { %11047 = vmatprep.subr.mxu1 %v10674_v16  ;;  %10977 = vmatpush1.msra.mxu0 %v10545_v32  ;;  %v10770_v30 = vld [vmem:[#allocation2 + $0x778] sm:$0xff]  ;;  %v10641_v49 = vld [vmem:[#allocation2 + $0x370] sm:$0xff] }
0x18fe   :  { %11048 = vmatpush1.msra.mxu1 %v10673_v5  ;;  %10978 = vmatprep.subr.mxu0 %v10542_v25  ;;  %v10769_v22 = vld [vmem:[#allocation2 + $0x770] sm:$0xff]  ;;  %v10638_v27 = vld [vmem:[#allocation2 + $0x358] sm:$0xff] }
0x18ff   :  { %11049 = vmatprep.subr.mxu1 %v10670_v12  ;;  %10979 = vmatpush1.msra.mxu0 %v10541_v48  ;;  %v10766_v10 = vld [vmem:[#allocation2 + $0x758] sm:$0xff]  ;;  %v10637_v24 = vld [vmem:[#allocation2 + $0x350] sm:$0xff] }
0x1900   :  { %11050 = vmatpush1.msra.mxu1 %v10669_v54  ;;  %10980 = vmatprep.subr.mxu0 %v10538_v11  ;;  %v10765_v23 = vld [vmem:[#allocation2 + $0x750] sm:$0xff]  ;;  %v10634_v19 = vld [vmem:[#allocation2 + $0x338] sm:$0xff] }
0x1901   :  { %11051 = vmatprep.subr.mxu1 %v10666_v33  ;;  %10981 = vmatpush1.msra.mxu0 %v10537_v6  ;;  %v10762_v61 = vld [vmem:[#allocation2 + $0x738] sm:$0xff]  ;;  %v10633_v52 = vld [vmem:[#allocation2 + $0x330] sm:$0xff] }
0x1902   :  { %11052 = vmatpush1.msra.mxu1 %v10665_v38  ;;  %10982 = vmatprep.subr.mxu0 %v10534_v36  ;;  %v10761_v28 = vld [vmem:[#allocation2 + $0x730] sm:$0xff]  ;;  %v10630_v0 = vld [vmem:[#allocation2 + $0x318] sm:$0xff] }
0x1903   :  { %11053 = vmatprep.subr.mxu1 %v10662_v57  ;;  %10983 = vmatpush1.msra.mxu0 %v10533_v37  ;;  %v10758_v2 = vld [vmem:[#allocation2 + $0x718] sm:$0xff]  ;;  %v10629_v1 = vld [vmem:[#allocation2 + $0x310] sm:$0xff] }
0x1904   :  { %11054 = vmatpush1.msra.mxu1 %v10661_v3  ;;  %10984 = vmatprep.subr.mxu0 %v10658_v29  ;;  %v10757_v40 = vld [vmem:[#allocation2 + $0x710] sm:$0xff]  ;;  %v10626_v63 = vld [vmem:[#allocation2 + $0x2f8] sm:$0xff] }
0x1905   :  { %11055 = vmatprep.subr.mxu1 %v10786_v7  ;;  %10985 = vmatpush2.msra.mxu0 %v10657_v9  ;;  %v10754_v62 = vld [vmem:[#allocation2 + $0x6f8] sm:$0xff]  ;;  %v10625_v4 = vld [vmem:[#allocation2 + $0x2f0] sm:$0xff] }
0x1906   :  { %11056 = vmatpush2.msra.mxu1 %v10785_v31  ;;  %10986 = vmatprep.subr.mxu0 %v10654_v13  ;;  %v10753_v44 = vld [vmem:[#allocation2 + $0x6f0] sm:$0xff]  ;;  %v10622_v51 = vld [vmem:[#allocation2 + $0x2d8] sm:$0xff] }
0x1907   :  { %11057 = vmatprep.subr.mxu1 %v10782_v50  ;;  %10987 = vmatpush2.msra.mxu0 %v10653_v17  ;;  %v10750_v20 = vld [vmem:[#allocation2 + $0x6d8] sm:$0xff]  ;;  %v10621_v41 = vld [vmem:[#allocation2 + $0x2d0] sm:$0xff] }
0x1908   :  { %11058 = vmatpush2.msra.mxu1 %v10781_v56  ;;  %10988 = vmatprep.subr.mxu0 %v10650_v18  ;;  %v10749_v58 = vld [vmem:[#allocation2 + $0x6d0] sm:$0xff]  ;;  %v10618_v21 = vld [vmem:[#allocation2 + $0x2b8] sm:$0xff]  ;;  %v12085_v18 = vld [vmem:[%s14298_s5 + $0x1] ss:$4 sm:$0xf] }
0x1909   :  { %11059 = vmatprep.subr.mxu1 %v10778_v26  ;;  %10989 = vmatpush2.msra.mxu0 %v10649_v53  ;;  %v10746_v16 = vld [vmem:[#allocation2 + $0x6b8] sm:$0xff]  ;;  %v10617_v32 = vld [vmem:[#allocation2 + $0x2b0] sm:$0xff]  ;;  %v10793_v26 = vrot.slane %v12085_v18, %v12734_v42  ;;  %v10797_v53 = vrot.slane %v12085_v18, %v12743_v45 }
0x190a   :  { %11060 = vmatpush2.msra.mxu1 %v10777_v14  ;;  %10990 = vmatprep.subr.mxu0 %v10646_v47  ;;  %v10745_v5 = vld [vmem:[#allocation2 + $0x6b0] sm:$0xff]  ;;  %v10614_v25 = vld [vmem:[#allocation2 + $0x298] sm:$0xff] }
0x190b   :  { %11061 = vmatprep.subr.mxu1 %v10774_v39  ;;  %10991 = vmatpush2.msra.mxu0 %v10645_v55  ;;  %v10742_v12 = vld [vmem:[#allocation2 + $0x698] sm:$0xff]  ;;  %v10613_v48 = vld [vmem:[#allocation2 + $0x290] sm:$0xff] }
0x190c   :  { %11062 = vmatpush2.msra.mxu1 %v10773_v60  ;;  %10992 = vmatprep.subr.mxu0 %v10642_v59  ;;  %v10741_v54 = vld [vmem:[#allocation2 + $0x690] sm:$0xff]  ;;  %v10610_v11 = vld [vmem:[#allocation2 + $0x278] sm:$0xff] }
0x190d   :  { %11063 = vmatprep.subr.mxu1 %v10770_v30  ;;  %10993 = vmatpush2.msra.mxu0 %v10641_v49  ;;  %v10738_v33 = vld [vmem:[#allocation2 + $0x678] sm:$0xff]  ;;  %v10609_v6 = vld [vmem:[#allocation2 + $0x270] sm:$0xff] }
0x190e   :  { %11064 = vmatpush2.msra.mxu1 %v10769_v22  ;;  %10994 = vmatprep.subr.mxu0 %v10638_v27  ;;  %v10737_v38 = vld [vmem:[#allocation2 + $0x670] sm:$0xff]  ;;  %v10606_v36 = vld [vmem:[#allocation2 + $0x258] sm:$0xff]  ;;  %v10801_v22 = vrot.slane %v12085_v18, %v12737_v43  ;;  %v10805_v27 = vrot.slane %v12085_v18, %v12746_v46 }
0x190f   :  { %11065 = vmatprep.subr.mxu1 %v10766_v10  ;;  %10995 = vmatpush2.msra.mxu0 %v10637_v24  ;;  %v10734_v57 = vld [vmem:[#allocation2 + $0x658] sm:$0xff]  ;;  %v10605_v37 = vld [vmem:[#allocation2 + $0x250] sm:$0xff] }
0x1910   :  { %11066 = vmatpush2.msra.mxu1 %v10765_v23  ;;  %10996 = vmatprep.subr.mxu0 %v10634_v19  ;;  %v10733_v3 = vld [vmem:[#allocation2 + $0x650] sm:$0xff]  ;;  %v10602_v29 = vld [vmem:[#allocation2 + $0x238] sm:$0xff] }
0x1911   :  { %11067 = vmatprep.subr.mxu1 %v10762_v61  ;;  %10997 = vmatpush2.msra.mxu0 %v10633_v52  ;;  %v10730_v7 = vld [vmem:[#allocation2 + $0x638] sm:$0xff]  ;;  %v10601_v9 = vld [vmem:[#allocation2 + $0x230] sm:$0xff] }
0x1912   :  { %11068 = vmatpush2.msra.mxu1 %v10761_v28  ;;  %10998 = vmatprep.subr.mxu0 %v10630_v0  ;;  %v10729_v31 = vld [vmem:[#allocation2 + $0x630] sm:$0xff]  ;;  %v10598_v13 = vld [vmem:[#allocation2 + $0x218] sm:$0xff] }
0x1913   :  { %11069 = vmatprep.subr.mxu1 %v10758_v2  ;;  %10999 = vmatpush2.msra.mxu0 %v10629_v1  ;;  %v10726_v50 = vld [vmem:[#allocation2 + $0x618] sm:$0xff]  ;;  %v10597_v17 = vld [vmem:[#allocation2 + $0x210] sm:$0xff] }
0x1914   :  { %11070 = vmatpush2.msra.mxu1 %v10757_v40  ;;  %11000 = vmatprep.subr.mxu0 %v10626_v63  ;;  %v10725_v56 = vld [vmem:[#allocation2 + $0x610] sm:$0xff] }
0x1915   :  { %11071 = vmatprep.subr.mxu1 %v10754_v62  ;;  %11001 = vmatpush2.msra.mxu0 %v10625_v4 }
0x1916   :  { %11072 = vmatpush2.msra.mxu1 %v10753_v44  ;;  %11002 = vmatprep.subr.mxu0 %v10622_v51 }
0x1917   :  { %11073 = vmatprep.subr.mxu1 %v10750_v20  ;;  %11003 = vmatpush2.msra.mxu0 %v10621_v41 }
0x1918   :  { %11074 = vmatpush2.msra.mxu1 %v10749_v58  ;;  %11004 = vmatprep.subr.mxu0 %v10618_v21 }
0x1919   :  { %11075 = vmatprep.subr.mxu1 %v10746_v16  ;;  %11005 = vmatpush2.msra.mxu0 %v10617_v32 }
0x191a   :  { %11076 = vmatpush2.msra.mxu1 %v10745_v5  ;;  %11006 = vmatprep.subr.mxu0 %v10614_v25 }
0x191b   :  { %11077 = vmatprep.subr.mxu1 %v10742_v12  ;;  %11007 = vmatpush2.msra.mxu0 %v10613_v48 }
0x191c   :  { %11078 = vmatpush2.msra.mxu1 %v10741_v54  ;;  %11008 = vmatprep.subr.mxu0 %v10610_v11 }
0x191d   :  { %11079 = vmatprep.subr.mxu1 %v10738_v33  ;;  %11009 = vmatpush2.msra.mxu0 %v10609_v6 }
0x191e   :  { %11080 = vmatpush2.msra.mxu1 %v10737_v38  ;;  %11010 = vmatprep.subr.mxu0 %v10606_v36 }
0x191f   :  { %11081 = vmatprep.subr.mxu1 %v10734_v57  ;;  %11011 = vmatpush2.msra.mxu0 %v10605_v37 }
0x1920   :  { %11082 = vmatpush2.msra.mxu1 %v10733_v3  ;;  %11012 = vmatprep.subr.mxu0 %v10602_v29 }
0x1921   :  { %11083 = vmatprep.subr.mxu1 %v10730_v7  ;;  %11013 = vmatpush2.msra.mxu0 %v10601_v9 }
0x1922   :  { %11084 = vmatpush2.msra.mxu1 %v10729_v31  ;;  %11014 = vmatprep.subr.mxu0 %v10598_v13 }
0x1923   :  { %11085 = vmatprep.subr.mxu1 %v10726_v50  ;;  %11015 = vmatpush2.msra.mxu0 %v10597_v17 }
0x1924   :  { %11016 = vmatprep.mubr.f32.mxu0 %v14050_v35  ;;  %11086 = vmatpush2.msra.mxu1 %v10725_v56 }
0x1925   :  { %11087 = vmatprep.mubr.f32.mxu1 %v14054_v34  ;;  %11017 = vmatmul.mubr.f32.vlgmr.msra.gmra.mxu0 %v14048_v8 }
0x1926   :  { %11088 = vmatmul.mubr.f32.vlgmr.msra.gmra.mxu1 %v14052_v15 }
0x19a3   :  { %v10876_v14 = vpop.f32.mrf.mxu0 }
0x19a4   :  { %v10877_v47 = vadd.f32 %v10876_v14, %v10793_v26 }
0x19a5   :  { %v10947_v39 = vpop.f32.mrf.mxu1  ;;  %v10878_v55 = vpop.f32.mrf.mxu0 }
0x19a6   :  { %v10948_v35 = vadd.f32 %v10947_v39, %v10877_v47  ;;  %v10879_v60 = vadd.f32 %v10878_v55, %v10797_v53 }
0x19a7   :  { %v10949_v59 = vpop.f32.mrf.mxu1 }
0x19a8   :  { %vm11094_vm9 = vcmp.ge.f32.partialorder %v10948_v35, 0.0  ;;  %v11098_v34 = vmul.f32 0.01, %v10948_v35  ;;  %v10950_v8 = vadd.f32 %v10949_v59, %v10879_v60 }
0x19aa   :  { %v14069_v30 = vsel %vm11094_vm9, %v10948_v35, %v11098_v34  ;;  %vm11095_vm10 = vcmp.ge.f32.partialorder %v10950_v8, 0.0  ;;  %v11099_v15 = vmul.f32 0.01, %v10950_v8 }
0x19ac   :  { %v14071_v49 = vsel %vm11095_vm10, %v10950_v8, %v11099_v15 }
0x19e5   :  { %v11018_v10 = vpop.f32.mrf.mxu0 }
0x19e6   :  { %v11089_v24 = vpop.f32.mrf.mxu1  ;;  %v11019_v23 = vadd.f32 %v11018_v10, %v10801_v22 }
0x19e7   :  { %v11020_v19 = vpop.f32.mrf.mxu0 }
0x19e8   :  { %v11090_v61 = vadd.f32 %v11089_v24, %v11019_v23  ;;  %v11021_v52 = vadd.f32 %v11020_v19, %v10805_v27  ;;  %v11091_v28 = vpop.f32.mrf.mxu1 }
0x19ea   :  { %vm11096_vm11 = vcmp.ge.f32.partialorder %v11090_v61, 0.0  ;;  %v11100_v0 = vmul.f32 0.01, %v11090_v61  ;;  %v11092_v2 = vadd.f32 %v11091_v28, %v11021_v52 }
0x19ec   :  { %v14075_v1 = vsel %vm11096_vm11, %v11090_v61, %v11100_v0  ;;  %vm11097_vm12 = vcmp.ge.f32.partialorder %v11092_v2, 0.0  ;;  %v11101_v40 = vmul.f32 0.01, %v11092_v2 }
0x19ee   :  { %v14077_v63 = vsel %vm11097_vm12, %v11092_v2, %v11101_v40 }
0x19ef   :  { %12553 = dma.done.wait [#allocation4 + $0x1], 32768 }
0x19f0   :  { %12554 = vsyncadd [#allocation4 + $0x1], 4294934528  ;;  %11451 = vmatprep.mubr.f32.mxu0 %v14071_v49  ;;  %11522 = vmatprep.mubr.f32.mxu1 %v14077_v63  ;;  %v11169_v62 = vld [vmem:[#allocation3 + $0x1e8] sm:$0xff]  ;;  %v11168_v44 = vld [vmem:[#allocation3 + $0x1e0] sm:$0xff] }
0x19f1   :  { %v11297_v4 = vld [vmem:[#allocation3 + $0x5e8] sm:$0xff]  ;;  %11387 = vmatprep.subr.mxu0 %v11169_v62  ;;  %v11296_v51 = vld [vmem:[#allocation3 + $0x5e0] sm:$0xff] }
0x19f2   :  { %11458 = vmatprep.subr.mxu1 %v11297_v4  ;;  %v11165_v20 = vld [vmem:[#allocation3 + $0x1c8] sm:$0xff]  ;;  %11388 = vmatpush1.msra.mxu0 %v11168_v44  ;;  %v11164_v58 = vld [vmem:[#allocation3 + $0x1c0] sm:$0xff] }
0x19f3   :  { %v11293_v41 = vld [vmem:[#allocation3 + $0x5c8] sm:$0xff]  ;;  %11459 = vmatpush1.msra.mxu1 %v11296_v51  ;;  %v11292_v21 = vld [vmem:[#allocation3 + $0x5c0] sm:$0xff]  ;;  %11389 = vmatprep.subr.mxu0 %v11165_v20 }
0x19f4   :  { %v11161_v16 = vld [vmem:[#allocation3 + $0x1a8] sm:$0xff]  ;;  %11460 = vmatprep.subr.mxu1 %v11293_v41  ;;  %v11160_v5 = vld [vmem:[#allocation3 + $0x1a0] sm:$0xff]  ;;  %11390 = vmatpush1.msra.mxu0 %v11164_v58 }
0x19f5   :  { %v11289_v32 = vld [vmem:[#allocation3 + $0x5a8] sm:$0xff]  ;;  %v11288_v25 = vld [vmem:[#allocation3 + $0x5a0] sm:$0xff]  ;;  %11461 = vmatpush1.msra.mxu1 %v11292_v21  ;;  %11391 = vmatprep.subr.mxu0 %v11161_v16 }
0x19f6   :  { %v11157_v12 = vld [vmem:[#allocation3 + $0x188] sm:$0xff]  ;;  %11462 = vmatprep.subr.mxu1 %v11289_v32  ;;  %v11156_v54 = vld [vmem:[#allocation3 + $0x180] sm:$0xff]  ;;  %11392 = vmatpush1.msra.mxu0 %v11160_v5 }
0x19f7   :  { %v11285_v48 = vld [vmem:[#allocation3 + $0x588] sm:$0xff]  ;;  %v11284_v11 = vld [vmem:[#allocation3 + $0x580] sm:$0xff]  ;;  %11463 = vmatpush1.msra.mxu1 %v11288_v25  ;;  %11393 = vmatprep.subr.mxu0 %v11157_v12 }
0x19f8   :  { %v11153_v33 = vld [vmem:[#allocation3 + $0x168] sm:$0xff]  ;;  %11464 = vmatprep.subr.mxu1 %v11285_v48  ;;  %v11152_v38 = vld [vmem:[#allocation3 + $0x160] sm:$0xff]  ;;  %11394 = vmatpush1.msra.mxu0 %v11156_v54 }
0x19f9   :  { %v11281_v6 = vld [vmem:[#allocation3 + $0x568] sm:$0xff]  ;;  %v11280_v36 = vld [vmem:[#allocation3 + $0x560] sm:$0xff]  ;;  %11465 = vmatpush1.msra.mxu1 %v11284_v11  ;;  %11395 = vmatprep.subr.mxu0 %v11153_v33 }
0x19fa   :  { %v11149_v57 = vld [vmem:[#allocation3 + $0x148] sm:$0xff]  ;;  %11466 = vmatprep.subr.mxu1 %v11281_v6  ;;  %v11148_v3 = vld [vmem:[#allocation3 + $0x140] sm:$0xff]  ;;  %11396 = vmatpush1.msra.mxu0 %v11152_v38 }
0x19fb   :  { %v11277_v37 = vld [vmem:[#allocation3 + $0x548] sm:$0xff]  ;;  %v11276_v29 = vld [vmem:[#allocation3 + $0x540] sm:$0xff]  ;;  %11467 = vmatpush1.msra.mxu1 %v11280_v36  ;;  %11397 = vmatprep.subr.mxu0 %v11149_v57 }
0x19fc   :  { %v11145_v7 = vld [vmem:[#allocation3 + $0x128] sm:$0xff]  ;;  %11468 = vmatprep.subr.mxu1 %v11277_v37  ;;  %v11144_v31 = vld [vmem:[#allocation3 + $0x120] sm:$0xff]  ;;  %11398 = vmatpush1.msra.mxu0 %v11148_v3 }
0x19fd   :  { %v11273_v9 = vld [vmem:[#allocation3 + $0x528] sm:$0xff]  ;;  %v11272_v13 = vld [vmem:[#allocation3 + $0x520] sm:$0xff]  ;;  %11469 = vmatpush1.msra.mxu1 %v11276_v29  ;;  %11399 = vmatprep.subr.mxu0 %v11145_v7 }
0x19fe   :  { %v11141_v50 = vld [vmem:[#allocation3 + $0x108] sm:$0xff]  ;;  %11470 = vmatprep.subr.mxu1 %v11273_v9  ;;  %v11140_v56 = vld [vmem:[#allocation3 + $0x100] sm:$0xff]  ;;  %11400 = vmatpush1.msra.mxu0 %v11144_v31 }
0x19ff   :  { %v11269_v17 = vld [vmem:[#allocation3 + $0x508] sm:$0xff]  ;;  %v11268_v18 = vld [vmem:[#allocation3 + $0x500] sm:$0xff]  ;;  %11471 = vmatpush1.msra.mxu1 %v11272_v13  ;;  %11401 = vmatprep.subr.mxu0 %v11141_v50 }
0x1a00   :  { %v11137_v26 = vld [vmem:[#allocation3 + $0xe8] sm:$0xff]  ;;  %11472 = vmatprep.subr.mxu1 %v11269_v17  ;;  %v11136_v14 = vld [vmem:[#allocation3 + $0xe0] sm:$0xff]  ;;  %11402 = vmatpush1.msra.mxu0 %v11140_v56 }
0x1a01   :  { %v11265_v53 = vld [vmem:[#allocation3 + $0x4e8] sm:$0xff]  ;;  %v11264_v47 = vld [vmem:[#allocation3 + $0x4e0] sm:$0xff]  ;;  %11473 = vmatpush1.msra.mxu1 %v11268_v18  ;;  %11403 = vmatprep.subr.mxu0 %v11137_v26 }
0x1a02   :  { %v11133_v39 = vld [vmem:[#allocation3 + $0xc8] sm:$0xff]  ;;  %11474 = vmatprep.subr.mxu1 %v11265_v53  ;;  %v11132_v35 = vld [vmem:[#allocation3 + $0xc0] sm:$0xff]  ;;  %11404 = vmatpush1.msra.mxu0 %v11136_v14 }
0x1a03   :  { %v11261_v55 = vld [vmem:[#allocation3 + $0x4c8] sm:$0xff]  ;;  %v11260_v60 = vld [vmem:[#allocation3 + $0x4c0] sm:$0xff]  ;;  %11475 = vmatpush1.msra.mxu1 %v11264_v47  ;;  %11405 = vmatprep.subr.mxu0 %v11133_v39 }
0x1a04   :  { %v11129_v59 = vld [vmem:[#allocation3 + $0xa8] sm:$0xff]  ;;  %11476 = vmatprep.subr.mxu1 %v11261_v55  ;;  %v11128_v8 = vld [vmem:[#allocation3 + $0xa0] sm:$0xff]  ;;  %11406 = vmatpush1.msra.mxu0 %v11132_v35 }
0x1a05   :  { %v11257_v34 = vld [vmem:[#allocation3 + $0x4a8] sm:$0xff]  ;;  %v11256_v15 = vld [vmem:[#allocation3 + $0x4a0] sm:$0xff]  ;;  %11477 = vmatpush1.msra.mxu1 %v11260_v60  ;;  %11407 = vmatprep.subr.mxu0 %v11129_v59 }
0x1a06   :  { %v11125_v22 = vld [vmem:[#allocation3 + $0x88] sm:$0xff]  ;;  %11478 = vmatprep.subr.mxu1 %v11257_v34  ;;  %v11124_v10 = vld [vmem:[#allocation3 + $0x80] sm:$0xff]  ;;  %11408 = vmatpush1.msra.mxu0 %v11128_v8 }
0x1a07   :  { %v11253_v27 = vld [vmem:[#allocation3 + $0x488] sm:$0xff]  ;;  %v11252_v24 = vld [vmem:[#allocation3 + $0x480] sm:$0xff]  ;;  %11479 = vmatpush1.msra.mxu1 %v11256_v15  ;;  %11409 = vmatprep.subr.mxu0 %v11125_v22 }
0x1a08   :  { %v11121_v23 = vld [vmem:[#allocation3 + $0x68] sm:$0xff]  ;;  %11480 = vmatprep.subr.mxu1 %v11253_v27  ;;  %v11120_v61 = vld [vmem:[#allocation3 + $0x60] sm:$0xff]  ;;  %11410 = vmatpush1.msra.mxu0 %v11124_v10 }
0x1a09   :  { %v11249_v19 = vld [vmem:[#allocation3 + $0x468] sm:$0xff]  ;;  %v11248_v52 = vld [vmem:[#allocation3 + $0x460] sm:$0xff]  ;;  %11481 = vmatpush1.msra.mxu1 %v11252_v24  ;;  %11411 = vmatprep.subr.mxu0 %v11121_v23 }
0x1a0a   :  { %v11117_v28 = vld [vmem:[#allocation3 + $0x48] sm:$0xff]  ;;  %11482 = vmatprep.subr.mxu1 %v11249_v19  ;;  %v11116_v2 = vld [vmem:[#allocation3 + $0x40] sm:$0xff]  ;;  %11412 = vmatpush1.msra.mxu0 %v11120_v61 }
0x1a0b   :  { %v11245_v0 = vld [vmem:[#allocation3 + $0x448] sm:$0xff]  ;;  %v11244_v40 = vld [vmem:[#allocation3 + $0x440] sm:$0xff]  ;;  %11483 = vmatpush1.msra.mxu1 %v11248_v52  ;;  %11413 = vmatprep.subr.mxu0 %v11117_v28 }
0x1a0c   :  { %v11113_v62 = vld [vmem:[#allocation3 + $0x28] sm:$0xff]  ;;  %11484 = vmatprep.subr.mxu1 %v11245_v0  ;;  %v11112_v44 = vld [vmem:[#allocation3 + $0x20] sm:$0xff]  ;;  %11414 = vmatpush1.msra.mxu0 %v11116_v2 }
0x1a0d   :  { %v11241_v4 = vld [vmem:[#allocation3 + $0x428] sm:$0xff]  ;;  %v11240_v51 = vld [vmem:[#allocation3 + $0x420] sm:$0xff]  ;;  %11485 = vmatpush1.msra.mxu1 %v11244_v40  ;;  %11415 = vmatprep.subr.mxu0 %v11113_v62 }
0x1a0e   :  { %v11109_v20 = vld [vmem:[#allocation3 + $0x8] sm:$0xff]  ;;  %11486 = vmatprep.subr.mxu1 %v11241_v4  ;;  %v11108_v58 = vld [vmem:[#allocation3] sm:$0xff]  ;;  %11416 = vmatpush1.msra.mxu0 %v11112_v44 }
0x1a0f   :  { %v11237_v41 = vld [vmem:[#allocation3 + $0x408] sm:$0xff]  ;;  %v11236_v21 = vld [vmem:[#allocation3 + $0x400] sm:$0xff]  ;;  %11487 = vmatpush1.msra.mxu1 %v11240_v51  ;;  %11417 = vmatprep.subr.mxu0 %v11109_v20 }
0x1a10   :  { %v11233_v16 = vld [vmem:[#allocation3 + $0x3e8] sm:$0xff]  ;;  %11488 = vmatprep.subr.mxu1 %v11237_v41  ;;  %v11232_v5 = vld [vmem:[#allocation3 + $0x3e0] sm:$0xff]  ;;  %11418 = vmatpush1.msra.mxu0 %v11108_v58 }
0x1a11   :  { %v11361_v32 = vld [vmem:[#allocation3 + $0x7e8] sm:$0xff]  ;;  %v11360_v25 = vld [vmem:[#allocation3 + $0x7e0] sm:$0xff]  ;;  %11489 = vmatpush1.msra.mxu1 %v11236_v21  ;;  %11419 = vmatprep.subr.mxu0 %v11233_v16 }
0x1a12   :  { %v11229_v12 = vld [vmem:[#allocation3 + $0x3c8] sm:$0xff]  ;;  %11490 = vmatprep.subr.mxu1 %v11361_v32  ;;  %v11228_v54 = vld [vmem:[#allocation3 + $0x3c0] sm:$0xff]  ;;  %11420 = vmatpush2.msra.mxu0 %v11232_v5 }
0x1a13   :  { %v11357_v48 = vld [vmem:[#allocation3 + $0x7c8] sm:$0xff]  ;;  %v11356_v11 = vld [vmem:[#allocation3 + $0x7c0] sm:$0xff]  ;;  %11491 = vmatpush2.msra.mxu1 %v11360_v25  ;;  %11421 = vmatprep.subr.mxu0 %v11229_v12 }
0x1a14   :  { %v11225_v33 = vld [vmem:[#allocation3 + $0x3a8] sm:$0xff]  ;;  %11492 = vmatprep.subr.mxu1 %v11357_v48  ;;  %v11224_v38 = vld [vmem:[#allocation3 + $0x3a0] sm:$0xff]  ;;  %11422 = vmatpush2.msra.mxu0 %v11228_v54 }
0x1a15   :  { %v11353_v6 = vld [vmem:[#allocation3 + $0x7a8] sm:$0xff]  ;;  %v11352_v36 = vld [vmem:[#allocation3 + $0x7a0] sm:$0xff]  ;;  %11493 = vmatpush2.msra.mxu1 %v11356_v11  ;;  %11423 = vmatprep.subr.mxu0 %v11225_v33  ;;  %v11171_v33 = vld [vmem:[#allocation3 + $0x1f8] sm:$0xff] }
0x1a16   :  { %v11221_v57 = vld [vmem:[#allocation3 + $0x388] sm:$0xff]  ;;  %11494 = vmatprep.subr.mxu1 %v11353_v6  ;;  %v11220_v3 = vld [vmem:[#allocation3 + $0x380] sm:$0xff]  ;;  %11424 = vmatpush2.msra.mxu0 %v11224_v38  ;;  %v11299_v6 = vld [vmem:[#allocation3 + $0x5f8] sm:$0xff] }
0x1a17   :  { %v11349_v37 = vld [vmem:[#allocation3 + $0x788] sm:$0xff]  ;;  %v11348_v29 = vld [vmem:[#allocation3 + $0x780] sm:$0xff]  ;;  %11495 = vmatpush2.msra.mxu1 %v11352_v36  ;;  %11425 = vmatprep.subr.mxu0 %v11221_v57  ;;  %v11170_v38 = vld [vmem:[#allocation3 + $0x1f0] sm:$0xff] }
0x1a18   :  { %v11217_v7 = vld [vmem:[#allocation3 + $0x368] sm:$0xff]  ;;  %11496 = vmatprep.subr.mxu1 %v11349_v37  ;;  %v11216_v31 = vld [vmem:[#allocation3 + $0x360] sm:$0xff]  ;;  %11426 = vmatpush2.msra.mxu0 %v11220_v3  ;;  %v11298_v36 = vld [vmem:[#allocation3 + $0x5f0] sm:$0xff] }
0x1a19   :  { %v11345_v9 = vld [vmem:[#allocation3 + $0x768] sm:$0xff]  ;;  %v11344_v13 = vld [vmem:[#allocation3 + $0x760] sm:$0xff]  ;;  %11497 = vmatpush2.msra.mxu1 %v11348_v29  ;;  %11427 = vmatprep.subr.mxu0 %v11217_v7  ;;  %v11167_v57 = vld [vmem:[#allocation3 + $0x1d8] sm:$0xff] }
0x1a1a   :  { %v11213_v50 = vld [vmem:[#allocation3 + $0x348] sm:$0xff]  ;;  %11498 = vmatprep.subr.mxu1 %v11345_v9  ;;  %v11212_v56 = vld [vmem:[#allocation3 + $0x340] sm:$0xff]  ;;  %11428 = vmatpush2.msra.mxu0 %v11216_v31  ;;  %v11295_v37 = vld [vmem:[#allocation3 + $0x5d8] sm:$0xff] }
0x1a1b   :  { %v11341_v17 = vld [vmem:[#allocation3 + $0x748] sm:$0xff]  ;;  %v11340_v18 = vld [vmem:[#allocation3 + $0x740] sm:$0xff]  ;;  %11499 = vmatpush2.msra.mxu1 %v11344_v13  ;;  %11429 = vmatprep.subr.mxu0 %v11213_v50  ;;  %v11166_v3 = vld [vmem:[#allocation3 + $0x1d0] sm:$0xff] }
0x1a1c   :  { %v11209_v26 = vld [vmem:[#allocation3 + $0x328] sm:$0xff]  ;;  %11500 = vmatprep.subr.mxu1 %v11341_v17  ;;  %v11208_v14 = vld [vmem:[#allocation3 + $0x320] sm:$0xff]  ;;  %11430 = vmatpush2.msra.mxu0 %v11212_v56  ;;  %v11294_v29 = vld [vmem:[#allocation3 + $0x5d0] sm:$0xff] }
0x1a1d   :  { %v11337_v53 = vld [vmem:[#allocation3 + $0x728] sm:$0xff]  ;;  %v11336_v47 = vld [vmem:[#allocation3 + $0x720] sm:$0xff]  ;;  %11501 = vmatpush2.msra.mxu1 %v11340_v18  ;;  %11431 = vmatprep.subr.mxu0 %v11209_v26  ;;  %v11163_v7 = vld [vmem:[#allocation3 + $0x1b8] sm:$0xff] }
0x1a1e   :  { %v11205_v39 = vld [vmem:[#allocation3 + $0x308] sm:$0xff]  ;;  %11502 = vmatprep.subr.mxu1 %v11337_v53  ;;  %v11204_v35 = vld [vmem:[#allocation3 + $0x300] sm:$0xff]  ;;  %11432 = vmatpush2.msra.mxu0 %v11208_v14  ;;  %v11291_v9 = vld [vmem:[#allocation3 + $0x5b8] sm:$0xff] }
0x1a1f   :  { %v11333_v55 = vld [vmem:[#allocation3 + $0x708] sm:$0xff]  ;;  %v11332_v60 = vld [vmem:[#allocation3 + $0x700] sm:$0xff]  ;;  %11503 = vmatpush2.msra.mxu1 %v11336_v47  ;;  %11433 = vmatprep.subr.mxu0 %v11205_v39  ;;  %v11162_v31 = vld [vmem:[#allocation3 + $0x1b0] sm:$0xff] }
0x1a20   :  { %v11201_v59 = vld [vmem:[#allocation3 + $0x2e8] sm:$0xff]  ;;  %11504 = vmatprep.subr.mxu1 %v11333_v55  ;;  %v11200_v8 = vld [vmem:[#allocation3 + $0x2e0] sm:$0xff]  ;;  %11434 = vmatpush2.msra.mxu0 %v11204_v35  ;;  %v11290_v13 = vld [vmem:[#allocation3 + $0x5b0] sm:$0xff] }
0x1a21   :  { %v11329_v34 = vld [vmem:[#allocation3 + $0x6e8] sm:$0xff]  ;;  %v11328_v15 = vld [vmem:[#allocation3 + $0x6e0] sm:$0xff]  ;;  %11505 = vmatpush2.msra.mxu1 %v11332_v60  ;;  %11435 = vmatprep.subr.mxu0 %v11201_v59  ;;  %v11159_v50 = vld [vmem:[#allocation3 + $0x198] sm:$0xff] }
0x1a22   :  { %v11197_v22 = vld [vmem:[#allocation3 + $0x2c8] sm:$0xff]  ;;  %11506 = vmatprep.subr.mxu1 %v11329_v34  ;;  %v11196_v10 = vld [vmem:[#allocation3 + $0x2c0] sm:$0xff]  ;;  %11436 = vmatpush2.msra.mxu0 %v11200_v8  ;;  %v11287_v17 = vld [vmem:[#allocation3 + $0x598] sm:$0xff] }
0x1a23   :  { %v11325_v27 = vld [vmem:[#allocation3 + $0x6c8] sm:$0xff]  ;;  %v11324_v24 = vld [vmem:[#allocation3 + $0x6c0] sm:$0xff]  ;;  %11507 = vmatpush2.msra.mxu1 %v11328_v15  ;;  %11437 = vmatprep.subr.mxu0 %v11197_v22  ;;  %v11158_v56 = vld [vmem:[#allocation3 + $0x190] sm:$0xff] }
0x1a24   :  { %v11193_v23 = vld [vmem:[#allocation3 + $0x2a8] sm:$0xff]  ;;  %11508 = vmatprep.subr.mxu1 %v11325_v27  ;;  %v11192_v61 = vld [vmem:[#allocation3 + $0x2a0] sm:$0xff]  ;;  %11438 = vmatpush2.msra.mxu0 %v11196_v10  ;;  %v11286_v18 = vld [vmem:[#allocation3 + $0x590] sm:$0xff] }
0x1a25   :  { %v11321_v19 = vld [vmem:[#allocation3 + $0x6a8] sm:$0xff]  ;;  %v11320_v52 = vld [vmem:[#allocation3 + $0x6a0] sm:$0xff]  ;;  %11509 = vmatpush2.msra.mxu1 %v11324_v24  ;;  %11439 = vmatprep.subr.mxu0 %v11193_v23  ;;  %v11155_v26 = vld [vmem:[#allocation3 + $0x178] sm:$0xff] }
0x1a26   :  { %v11189_v28 = vld [vmem:[#allocation3 + $0x288] sm:$0xff]  ;;  %11510 = vmatprep.subr.mxu1 %v11321_v19  ;;  %v11188_v2 = vld [vmem:[#allocation3 + $0x280] sm:$0xff]  ;;  %11440 = vmatpush2.msra.mxu0 %v11192_v61  ;;  %v11283_v53 = vld [vmem:[#allocation3 + $0x578] sm:$0xff] }
0x1a27   :  { %v11317_v0 = vld [vmem:[#allocation3 + $0x688] sm:$0xff]  ;;  %v11316_v40 = vld [vmem:[#allocation3 + $0x680] sm:$0xff]  ;;  %11511 = vmatpush2.msra.mxu1 %v11320_v52  ;;  %11441 = vmatprep.subr.mxu0 %v11189_v28  ;;  %v11154_v14 = vld [vmem:[#allocation3 + $0x170] sm:$0xff] }
0x1a28   :  { %v11185_v62 = vld [vmem:[#allocation3 + $0x268] sm:$0xff]  ;;  %11512 = vmatprep.subr.mxu1 %v11317_v0  ;;  %v11184_v44 = vld [vmem:[#allocation3 + $0x260] sm:$0xff]  ;;  %11442 = vmatpush2.msra.mxu0 %v11188_v2  ;;  %v11282_v47 = vld [vmem:[#allocation3 + $0x570] sm:$0xff] }
0x1a29   :  { %v11313_v4 = vld [vmem:[#allocation3 + $0x668] sm:$0xff]  ;;  %v11312_v51 = vld [vmem:[#allocation3 + $0x660] sm:$0xff]  ;;  %11513 = vmatpush2.msra.mxu1 %v11316_v40  ;;  %11443 = vmatprep.subr.mxu0 %v11185_v62  ;;  %v11151_v39 = vld [vmem:[#allocation3 + $0x158] sm:$0xff] }
0x1a2a   :  { %v11181_v20 = vld [vmem:[#allocation3 + $0x248] sm:$0xff]  ;;  %11514 = vmatprep.subr.mxu1 %v11313_v4  ;;  %v11180_v58 = vld [vmem:[#allocation3 + $0x240] sm:$0xff]  ;;  %11444 = vmatpush2.msra.mxu0 %v11184_v44  ;;  %v11279_v55 = vld [vmem:[#allocation3 + $0x558] sm:$0xff] }
0x1a2b   :  { %v11309_v41 = vld [vmem:[#allocation3 + $0x648] sm:$0xff]  ;;  %v11308_v21 = vld [vmem:[#allocation3 + $0x640] sm:$0xff]  ;;  %11515 = vmatpush2.msra.mxu1 %v11312_v51  ;;  %11445 = vmatprep.subr.mxu0 %v11181_v20  ;;  %v11150_v35 = vld [vmem:[#allocation3 + $0x150] sm:$0xff] }
0x1a2c   :  { %v11177_v16 = vld [vmem:[#allocation3 + $0x228] sm:$0xff]  ;;  %11516 = vmatprep.subr.mxu1 %v11309_v41  ;;  %v11176_v5 = vld [vmem:[#allocation3 + $0x220] sm:$0xff]  ;;  %11446 = vmatpush2.msra.mxu0 %v11180_v58  ;;  %v11278_v60 = vld [vmem:[#allocation3 + $0x550] sm:$0xff] }
0x1a2d   :  { %v11305_v32 = vld [vmem:[#allocation3 + $0x628] sm:$0xff]  ;;  %v11304_v25 = vld [vmem:[#allocation3 + $0x620] sm:$0xff]  ;;  %11517 = vmatpush2.msra.mxu1 %v11308_v21  ;;  %11447 = vmatprep.subr.mxu0 %v11177_v16  ;;  %v11147_v59 = vld [vmem:[#allocation3 + $0x138] sm:$0xff] }
0x1a2e   :  { %v11173_v12 = vld [vmem:[#allocation3 + $0x208] sm:$0xff]  ;;  %11518 = vmatprep.subr.mxu1 %v11305_v32  ;;  %v11172_v54 = vld [vmem:[#allocation3 + $0x200] sm:$0xff]  ;;  %11448 = vmatpush2.msra.mxu0 %v11176_v5  ;;  %v11275_v34 = vld [vmem:[#allocation3 + $0x538] sm:$0xff] }
0x1a2f   :  { %v11301_v48 = vld [vmem:[#allocation3 + $0x608] sm:$0xff]  ;;  %v11300_v11 = vld [vmem:[#allocation3 + $0x600] sm:$0xff]  ;;  %11519 = vmatpush2.msra.mxu1 %v11304_v25  ;;  %11449 = vmatprep.subr.mxu0 %v11173_v12  ;;  %v11146_v8 = vld [vmem:[#allocation3 + $0x130] sm:$0xff] }
0x1a30   :  { %11520 = vmatprep.subr.mxu1 %v11301_v48  ;;  %11450 = vmatpush2.msra.mxu0 %v11172_v54  ;;  %v11274_v15 = vld [vmem:[#allocation3 + $0x530] sm:$0xff]  ;;  %v11143_v22 = vld [vmem:[#allocation3 + $0x118] sm:$0xff] }
0x1a31   :  { %11521 = vmatpush2.msra.mxu1 %v11300_v11  ;;  %11452 = vmatmul.mubr.f32.vlgmr.msra.gmra.mxu0 %v14069_v30  ;;  %v11271_v27 = vld [vmem:[#allocation3 + $0x518] sm:$0xff]  ;;  %v11142_v10 = vld [vmem:[#allocation3 + $0x110] sm:$0xff] }
0x1a32   :  { %11529 = vmatprep.subr.mxu0 %v11171_v33  ;;  %11600 = vmatprep.subr.mxu1 %v11299_v6  ;;  %v11270_v24 = vld [vmem:[#allocation3 + $0x510] sm:$0xff]  ;;  %v11139_v23 = vld [vmem:[#allocation3 + $0xf8] sm:$0xff] }
0x1a33   :  { %11523 = vmatmul.mubr.f32.vlgmr.msra.gmra.mxu1 %v14075_v1  ;;  %11530 = vmatpush1.msra.mxu0 %v11170_v38  ;;  %v11267_v19 = vld [vmem:[#allocation3 + $0x4f8] sm:$0xff]  ;;  %v11138_v61 = vld [vmem:[#allocation3 + $0xf0] sm:$0xff] }
0x1a34   :  { %11601 = vmatpush1.msra.mxu1 %v11298_v36  ;;  %11531 = vmatprep.subr.mxu0 %v11167_v57  ;;  %v11266_v52 = vld [vmem:[#allocation3 + $0x4f0] sm:$0xff]  ;;  %v11135_v28 = vld [vmem:[#allocation3 + $0xd8] sm:$0xff] }
0x1a35   :  { %11602 = vmatprep.subr.mxu1 %v11295_v37  ;;  %11532 = vmatpush1.msra.mxu0 %v11166_v3  ;;  %v11263_v0 = vld [vmem:[#allocation3 + $0x4d8] sm:$0xff]  ;;  %v11134_v2 = vld [vmem:[#allocation3 + $0xd0] sm:$0xff] }
0x1a36   :  { %11603 = vmatpush1.msra.mxu1 %v11294_v29  ;;  %11533 = vmatprep.subr.mxu0 %v11163_v7  ;;  %v11262_v40 = vld [vmem:[#allocation3 + $0x4d0] sm:$0xff]  ;;  %v11131_v62 = vld [vmem:[#allocation3 + $0xb8] sm:$0xff] }
0x1a37   :  { %11604 = vmatprep.subr.mxu1 %v11291_v9  ;;  %11534 = vmatpush1.msra.mxu0 %v11162_v31  ;;  %v11259_v4 = vld [vmem:[#allocation3 + $0x4b8] sm:$0xff]  ;;  %v11130_v44 = vld [vmem:[#allocation3 + $0xb0] sm:$0xff] }
0x1a38   :  { %11605 = vmatpush1.msra.mxu1 %v11290_v13  ;;  %11535 = vmatprep.subr.mxu0 %v11159_v50  ;;  %v11258_v51 = vld [vmem:[#allocation3 + $0x4b0] sm:$0xff]  ;;  %v11127_v20 = vld [vmem:[#allocation3 + $0x98] sm:$0xff] }
0x1a39   :  { %11606 = vmatprep.subr.mxu1 %v11287_v17  ;;  %11536 = vmatpush1.msra.mxu0 %v11158_v56  ;;  %v11255_v41 = vld [vmem:[#allocation3 + $0x498] sm:$0xff]  ;;  %v11126_v58 = vld [vmem:[#allocation3 + $0x90] sm:$0xff] }
0x1a3a   :  { %11607 = vmatpush1.msra.mxu1 %v11286_v18  ;;  %11537 = vmatprep.subr.mxu0 %v11155_v26  ;;  %v11254_v21 = vld [vmem:[#allocation3 + $0x490] sm:$0xff]  ;;  %v11123_v16 = vld [vmem:[#allocation3 + $0x78] sm:$0xff] }
0x1a3b   :  { %11608 = vmatprep.subr.mxu1 %v11283_v53  ;;  %11538 = vmatpush1.msra.mxu0 %v11154_v14  ;;  %v11251_v32 = vld [vmem:[#allocation3 + $0x478] sm:$0xff]  ;;  %v11122_v5 = vld [vmem:[#allocation3 + $0x70] sm:$0xff] }
0x1a3c   :  { %11609 = vmatpush1.msra.mxu1 %v11282_v47  ;;  %11539 = vmatprep.subr.mxu0 %v11151_v39  ;;  %v11250_v25 = vld [vmem:[#allocation3 + $0x470] sm:$0xff]  ;;  %v11119_v12 = vld [vmem:[#allocation3 + $0x58] sm:$0xff] }
0x1a3d   :  { %11610 = vmatprep.subr.mxu1 %v11279_v55  ;;  %11540 = vmatpush1.msra.mxu0 %v11150_v35  ;;  %v11247_v48 = vld [vmem:[#allocation3 + $0x458] sm:$0xff]  ;;  %v11118_v54 = vld [vmem:[#allocation3 + $0x50] sm:$0xff] }
0x1a3e   :  { %11611 = vmatpush1.msra.mxu1 %v11278_v60  ;;  %11541 = vmatprep.subr.mxu0 %v11147_v59  ;;  %v11246_v11 = vld [vmem:[#allocation3 + $0x450] sm:$0xff]  ;;  %v11115_v33 = vld [vmem:[#allocation3 + $0x38] sm:$0xff] }
0x1a3f   :  { %11612 = vmatprep.subr.mxu1 %v11275_v34  ;;  %11542 = vmatpush1.msra.mxu0 %v11146_v8  ;;  %v11243_v6 = vld [vmem:[#allocation3 + $0x438] sm:$0xff]  ;;  %v11114_v38 = vld [vmem:[#allocation3 + $0x30] sm:$0xff] }
0x1a40   :  { %11613 = vmatpush1.msra.mxu1 %v11274_v15  ;;  %11543 = vmatprep.subr.mxu0 %v11143_v22  ;;  %v11242_v36 = vld [vmem:[#allocation3 + $0x430] sm:$0xff]  ;;  %v11111_v57 = vld [vmem:[#allocation3 + $0x18] sm:$0xff] }
0x1a41   :  { %11614 = vmatprep.subr.mxu1 %v11271_v27  ;;  %11544 = vmatpush1.msra.mxu0 %v11142_v10  ;;  %v11239_v37 = vld [vmem:[#allocation3 + $0x418] sm:$0xff]  ;;  %v11110_v3 = vld [vmem:[#allocation3 + $0x10] sm:$0xff] }
0x1a42   :  { %11615 = vmatpush1.msra.mxu1 %v11270_v24  ;;  %11545 = vmatprep.subr.mxu0 %v11139_v23  ;;  %v11238_v29 = vld [vmem:[#allocation3 + $0x410] sm:$0xff]  ;;  %v11235_v7 = vld [vmem:[#allocation3 + $0x3f8] sm:$0xff] }
0x1a43   :  { %11616 = vmatprep.subr.mxu1 %v11267_v19  ;;  %11546 = vmatpush1.msra.mxu0 %v11138_v61  ;;  %v11363_v9 = vld [vmem:[#allocation3 + $0x7f8] sm:$0xff]  ;;  %v11234_v31 = vld [vmem:[#allocation3 + $0x3f0] sm:$0xff] }
0x1a44   :  { %11617 = vmatpush1.msra.mxu1 %v11266_v52  ;;  %11547 = vmatprep.subr.mxu0 %v11135_v28  ;;  %v11362_v13 = vld [vmem:[#allocation3 + $0x7f0] sm:$0xff]  ;;  %v11231_v50 = vld [vmem:[#allocation3 + $0x3d8] sm:$0xff] }
0x1a45   :  { %11618 = vmatprep.subr.mxu1 %v11263_v0  ;;  %11548 = vmatpush1.msra.mxu0 %v11134_v2  ;;  %v11359_v17 = vld [vmem:[#allocation3 + $0x7d8] sm:$0xff]  ;;  %v11230_v56 = vld [vmem:[#allocation3 + $0x3d0] sm:$0xff] }
0x1a46   :  { %11619 = vmatpush1.msra.mxu1 %v11262_v40  ;;  %11549 = vmatprep.subr.mxu0 %v11131_v62  ;;  %v11358_v18 = vld [vmem:[#allocation3 + $0x7d0] sm:$0xff]  ;;  %v11227_v26 = vld [vmem:[#allocation3 + $0x3b8] sm:$0xff] }
0x1a47   :  { %11620 = vmatprep.subr.mxu1 %v11259_v4  ;;  %11550 = vmatpush1.msra.mxu0 %v11130_v44  ;;  %v11355_v53 = vld [vmem:[#allocation3 + $0x7b8] sm:$0xff]  ;;  %v11226_v14 = vld [vmem:[#allocation3 + $0x3b0] sm:$0xff] }
0x1a48   :  { %11621 = vmatpush1.msra.mxu1 %v11258_v51  ;;  %11551 = vmatprep.subr.mxu0 %v11127_v20  ;;  %v11354_v47 = vld [vmem:[#allocation3 + $0x7b0] sm:$0xff]  ;;  %v11223_v39 = vld [vmem:[#allocation3 + $0x398] sm:$0xff] }
0x1a49   :  { %11622 = vmatprep.subr.mxu1 %v11255_v41  ;;  %11552 = vmatpush1.msra.mxu0 %v11126_v58  ;;  %v11351_v55 = vld [vmem:[#allocation3 + $0x798] sm:$0xff]  ;;  %v11222_v35 = vld [vmem:[#allocation3 + $0x390] sm:$0xff] }
0x1a4a   :  { %11623 = vmatpush1.msra.mxu1 %v11254_v21  ;;  %11553 = vmatprep.subr.mxu0 %v11123_v16  ;;  %v11350_v60 = vld [vmem:[#allocation3 + $0x790] sm:$0xff]  ;;  %v11219_v59 = vld [vmem:[#allocation3 + $0x378] sm:$0xff] }
0x1a4b   :  { %11624 = vmatprep.subr.mxu1 %v11251_v32  ;;  %11554 = vmatpush1.msra.mxu0 %v11122_v5  ;;  %v11347_v34 = vld [vmem:[#allocation3 + $0x778] sm:$0xff]  ;;  %v11218_v8 = vld [vmem:[#allocation3 + $0x370] sm:$0xff] }
0x1a4c   :  { %11625 = vmatpush1.msra.mxu1 %v11250_v25  ;;  %11555 = vmatprep.subr.mxu0 %v11119_v12  ;;  %v11346_v15 = vld [vmem:[#allocation3 + $0x770] sm:$0xff]  ;;  %v11215_v22 = vld [vmem:[#allocation3 + $0x358] sm:$0xff] }
0x1a4d   :  { %11626 = vmatprep.subr.mxu1 %v11247_v48  ;;  %11556 = vmatpush1.msra.mxu0 %v11118_v54  ;;  %v11343_v27 = vld [vmem:[#allocation3 + $0x758] sm:$0xff]  ;;  %v11214_v10 = vld [vmem:[#allocation3 + $0x350] sm:$0xff] }
0x1a4e   :  { %11627 = vmatpush1.msra.mxu1 %v11246_v11  ;;  %11557 = vmatprep.subr.mxu0 %v11115_v33  ;;  %v11342_v24 = vld [vmem:[#allocation3 + $0x750] sm:$0xff]  ;;  %v11211_v23 = vld [vmem:[#allocation3 + $0x338] sm:$0xff] }
0x1a4f   :  { %11628 = vmatprep.subr.mxu1 %v11243_v6  ;;  %11558 = vmatpush1.msra.mxu0 %v11114_v38  ;;  %v11339_v19 = vld [vmem:[#allocation3 + $0x738] sm:$0xff]  ;;  %v11210_v61 = vld [vmem:[#allocation3 + $0x330] sm:$0xff] }
0x1a50   :  { %11629 = vmatpush1.msra.mxu1 %v11242_v36  ;;  %11559 = vmatprep.subr.mxu0 %v11111_v57  ;;  %v11338_v52 = vld [vmem:[#allocation3 + $0x730] sm:$0xff]  ;;  %v11207_v28 = vld [vmem:[#allocation3 + $0x318] sm:$0xff] }
0x1a51   :  { %11630 = vmatprep.subr.mxu1 %v11239_v37  ;;  %11560 = vmatpush1.msra.mxu0 %v11110_v3  ;;  %v11335_v0 = vld [vmem:[#allocation3 + $0x718] sm:$0xff]  ;;  %v11206_v2 = vld [vmem:[#allocation3 + $0x310] sm:$0xff] }
0x1a52   :  { %11631 = vmatpush1.msra.mxu1 %v11238_v29  ;;  %11561 = vmatprep.subr.mxu0 %v11235_v7  ;;  %v11334_v40 = vld [vmem:[#allocation3 + $0x710] sm:$0xff]  ;;  %v11203_v62 = vld [vmem:[#allocation3 + $0x2f8] sm:$0xff] }
0x1a53   :  { %11632 = vmatprep.subr.mxu1 %v11363_v9  ;;  %11562 = vmatpush2.msra.mxu0 %v11234_v31  ;;  %v11331_v4 = vld [vmem:[#allocation3 + $0x6f8] sm:$0xff]  ;;  %v11202_v44 = vld [vmem:[#allocation3 + $0x2f0] sm:$0xff] }
0x1a54   :  { %11633 = vmatpush2.msra.mxu1 %v11362_v13  ;;  %11563 = vmatprep.subr.mxu0 %v11231_v50  ;;  %v11330_v51 = vld [vmem:[#allocation3 + $0x6f0] sm:$0xff]  ;;  %v11199_v20 = vld [vmem:[#allocation3 + $0x2d8] sm:$0xff] }
0x1a55   :  { %11634 = vmatprep.subr.mxu1 %v11359_v17  ;;  %11564 = vmatpush2.msra.mxu0 %v11230_v56  ;;  %v11327_v41 = vld [vmem:[#allocation3 + $0x6d8] sm:$0xff]  ;;  %v11198_v58 = vld [vmem:[#allocation3 + $0x2d0] sm:$0xff] }
0x1a56   :  { %11635 = vmatpush2.msra.mxu1 %v11358_v18  ;;  %11565 = vmatprep.subr.mxu0 %v11227_v26  ;;  %v11326_v21 = vld [vmem:[#allocation3 + $0x6d0] sm:$0xff]  ;;  %v11195_v16 = vld [vmem:[#allocation3 + $0x2b8] sm:$0xff] }
0x1a57   :  { %11636 = vmatprep.subr.mxu1 %v11355_v53  ;;  %11566 = vmatpush2.msra.mxu0 %v11226_v14  ;;  %v11323_v32 = vld [vmem:[#allocation3 + $0x6b8] sm:$0xff]  ;;  %v11194_v5 = vld [vmem:[#allocation3 + $0x2b0] sm:$0xff] }
0x1a58   :  { %11637 = vmatpush2.msra.mxu1 %v11354_v47  ;;  %11567 = vmatprep.subr.mxu0 %v11223_v39  ;;  %v11322_v25 = vld [vmem:[#allocation3 + $0x6b0] sm:$0xff]  ;;  %v11191_v12 = vld [vmem:[#allocation3 + $0x298] sm:$0xff]  ;;  %v11695_v47 = vld [vmem:[%s14299_s6 + $0x60] sm:$0xff] }
0x1a59   :  { %11638 = vmatprep.subr.mxu1 %v11351_v55  ;;  %11568 = vmatpush2.msra.mxu0 %v11222_v35  ;;  %v11319_v48 = vld [vmem:[#allocation3 + $0x698] sm:$0xff]  ;;  %v11190_v54 = vld [vmem:[#allocation3 + $0x290] sm:$0xff] }
0x1a5a   :  { %11639 = vmatpush2.msra.mxu1 %v11350_v60  ;;  %11569 = vmatprep.subr.mxu0 %v11219_v59  ;;  %v11318_v11 = vld [vmem:[#allocation3 + $0x690] sm:$0xff]  ;;  %v11187_v33 = vld [vmem:[#allocation3 + $0x278] sm:$0xff] }
0x1a5b   :  { %11640 = vmatprep.subr.mxu1 %v11347_v34  ;;  %11570 = vmatpush2.msra.mxu0 %v11218_v8  ;;  %v11315_v6 = vld [vmem:[#allocation3 + $0x678] sm:$0xff]  ;;  %v11186_v38 = vld [vmem:[#allocation3 + $0x270] sm:$0xff] }
0x1a5c   :  { %11641 = vmatpush2.msra.mxu1 %v11346_v15  ;;  %11571 = vmatprep.subr.mxu0 %v11215_v22  ;;  %v11314_v36 = vld [vmem:[#allocation3 + $0x670] sm:$0xff]  ;;  %v11183_v57 = vld [vmem:[#allocation3 + $0x258] sm:$0xff]  ;;  %v11708_v15 = vld [vmem:[%s14299_s6 + $0xc8] sm:$0xff] }
0x1a5d   :  { %11642 = vmatprep.subr.mxu1 %v11343_v27  ;;  %11572 = vmatpush2.msra.mxu0 %v11214_v10  ;;  %v11311_v37 = vld [vmem:[#allocation3 + $0x658] sm:$0xff]  ;;  %v11182_v3 = vld [vmem:[#allocation3 + $0x250] sm:$0xff]  ;;  %v11692_v27 = vld [vmem:[%s14299_s6 + $0x48] sm:$0xff] }
0x1a5e   :  { %11643 = vmatpush2.msra.mxu1 %v11342_v24  ;;  %11573 = vmatprep.subr.mxu0 %v11211_v23  ;;  %v11310_v29 = vld [vmem:[#allocation3 + $0x650] sm:$0xff]  ;;  %v11179_v7 = vld [vmem:[#allocation3 + $0x238] sm:$0xff]  ;;  %v11744_v10 = vld [vmem:[%s14299_s6 + $0x1e8] sm:$0xff] }
0x1a5f   :  { %11644 = vmatprep.subr.mxu1 %v11339_v19  ;;  %11574 = vmatpush2.msra.mxu0 %v11210_v61  ;;  %v11307_v9 = vld [vmem:[#allocation3 + $0x638] sm:$0xff]  ;;  %v11178_v31 = vld [vmem:[#allocation3 + $0x230] sm:$0xff]  ;;  %v11707_v24 = vld [vmem:[%s14299_s6 + $0xc0] sm:$0xff] }
0x1a60   :  { %11645 = vmatpush2.msra.mxu1 %v11338_v52  ;;  %11575 = vmatprep.subr.mxu0 %v11207_v28  ;;  %v11306_v13 = vld [vmem:[#allocation3 + $0x630] sm:$0xff]  ;;  %v11175_v50 = vld [vmem:[#allocation3 + $0x218] sm:$0xff]  ;;  %v11728_v23 = vld [vmem:[%s14299_s6 + $0x168] sm:$0xff] }
0x1a61   :  { %11646 = vmatprep.subr.mxu1 %v11335_v0  ;;  %11576 = vmatpush2.msra.mxu0 %v11206_v2  ;;  %v11303_v17 = vld [vmem:[#allocation3 + $0x618] sm:$0xff]  ;;  %v11174_v56 = vld [vmem:[#allocation3 + $0x210] sm:$0xff]  ;;  %v11691_v19 = vld [vmem:[%s14299_s6 + $0x40] sm:$0xff] }
0x1a62   :  { %11647 = vmatpush2.msra.mxu1 %v11334_v40  ;;  %11577 = vmatprep.subr.mxu0 %v11203_v62  ;;  %v11302_v18 = vld [vmem:[#allocation3 + $0x610] sm:$0xff]  ;;  %v11714_v26 = vld [vmem:[%s14299_s6 + $0xf8] sm:$0xff]  ;;  %v11743_v61 = vld [vmem:[%s14299_s6 + $0x1e0] sm:$0xff] }
0x1a63   :  { %11648 = vmatprep.subr.mxu1 %v11331_v4  ;;  %11578 = vmatpush2.msra.mxu0 %v11202_v44  ;;  %v11698_v53 = vld [vmem:[%s14299_s6 + $0x78] sm:$0xff]  ;;  %v11713_v14 = vld [vmem:[%s14299_s6 + $0xf0] sm:$0xff]  ;;  %v11727_v28 = vld [vmem:[%s14299_s6 + $0x160] sm:$0xff] }
0x1a64   :  { %11649 = vmatpush2.msra.mxu1 %v11330_v51  ;;  %11579 = vmatprep.subr.mxu0 %v11199_v20  ;;  %v11710_v39 = vld [vmem:[%s14299_s6 + $0xd8] sm:$0xff]  ;;  %v11709_v35 = vld [vmem:[%s14299_s6 + $0xd0] sm:$0xff]  ;;  %v11704_v51 = vld [vmem:[%s14299_s6 + $0xa8] sm:$0xff] }
0x1a65   :  { %11650 = vmatprep.subr.mxu1 %v11327_v41  ;;  %11580 = vmatpush2.msra.mxu0 %v11198_v58  ;;  %v11694_v55 = vld [vmem:[%s14299_s6 + $0x58] sm:$0xff]  ;;  %v11693_v60 = vld [vmem:[%s14299_s6 + $0x50] sm:$0xff]  ;;  %v11688_v41 = vld [vmem:[%s14299_s6 + $0x28] sm:$0xff] }
0x1a66   :  { %11651 = vmatpush2.msra.mxu1 %v11326_v21  ;;  %11581 = vmatprep.subr.mxu0 %v11195_v16  ;;  %v11746_v59 = vld [vmem:[%s14299_s6 + $0x1f8] sm:$0xff]  ;;  %v11745_v8 = vld [vmem:[%s14299_s6 + $0x1f0] sm:$0xff]  ;;  %v11740_v58 = vld [vmem:[%s14299_s6 + $0x1c8] sm:$0xff] }
0x1a67   :  { %11652 = vmatprep.subr.mxu1 %v11323_v32  ;;  %11582 = vmatpush2.msra.mxu0 %v11194_v5  ;;  %v11730_v34 = vld [vmem:[%s14299_s6 + $0x178] sm:$0xff]  ;;  %v11729_v22 = vld [vmem:[%s14299_s6 + $0x170] sm:$0xff]  ;;  %v11703_v21 = vld [vmem:[%s14299_s6 + $0xa0] sm:$0xff] }
0x1a68   :  { %11653 = vmatpush2.msra.mxu1 %v11322_v25  ;;  %11583 = vmatprep.subr.mxu0 %v11191_v12  ;;  %v11706_v52 = vld [vmem:[%s14299_s6 + $0xb8] sm:$0xff]  ;;  %v11705_v40 = vld [vmem:[%s14299_s6 + $0xb0] sm:$0xff]  ;;  %v11724_v16 = vld [vmem:[%s14299_s6 + $0x148] sm:$0xff] }
0x1a69   :  { %11654 = vmatprep.subr.mxu1 %v11319_v48  ;;  %11584 = vmatpush2.msra.mxu0 %v11190_v54  ;;  %v11690_v0 = vld [vmem:[%s14299_s6 + $0x38] sm:$0xff]  ;;  %v11689_v4 = vld [vmem:[%s14299_s6 + $0x30] sm:$0xff]  ;;  %v11687_v32 = vld [vmem:[%s14299_s6 + $0x20] sm:$0xff] }
0x1a6a   :  { %11655 = vmatpush2.msra.mxu1 %v11318_v11  ;;  %11585 = vmatprep.subr.mxu0 %v11187_v33  ;;  %v11742_v2 = vld [vmem:[%s14299_s6 + $0x1d8] sm:$0xff]  ;;  %v11741_v44 = vld [vmem:[%s14299_s6 + $0x1d0] sm:$0xff]  ;;  %v11739_v5 = vld [vmem:[%s14299_s6 + $0x1c0] sm:$0xff] }
0x1a6b   :  { %11656 = vmatprep.subr.mxu1 %v11315_v6  ;;  %11586 = vmatpush2.msra.mxu0 %v11186_v38  ;;  %v11726_v62 = vld [vmem:[%s14299_s6 + $0x158] sm:$0xff]  ;;  %v11725_v20 = vld [vmem:[%s14299_s6 + $0x150] sm:$0xff]  ;;  %v11723_v12 = vld [vmem:[%s14299_s6 + $0x140] sm:$0xff] }
0x1a6c   :  { %11657 = vmatpush2.msra.mxu1 %v11314_v36  ;;  %11587 = vmatprep.subr.mxu0 %v11183_v57  ;;  %v11702_v25 = vld [vmem:[%s14299_s6 + $0x98] sm:$0xff]  ;;  %v11701_v11 = vld [vmem:[%s14299_s6 + $0x90] sm:$0xff]  ;;  %v11700_v36 = vld [vmem:[%s14299_s6 + $0x88] sm:$0xff] }
0x1a6d   :  { %11658 = vmatprep.subr.mxu1 %v11311_v37  ;;  %11588 = vmatpush2.msra.mxu0 %v11182_v3  ;;  %v11686_v48 = vld [vmem:[%s14299_s6 + $0x18] sm:$0xff]  ;;  %v11685_v6 = vld [vmem:[%s14299_s6 + $0x10] sm:$0xff]  ;;  %v11684_v37 = vld [vmem:[%s14299_s6 + $0x8] sm:$0xff] }
0x1a6e   :  { %11659 = vmatpush2.msra.mxu1 %v11310_v29  ;;  %11589 = vmatprep.subr.mxu0 %v11179_v7  ;;  %v11738_v54 = vld [vmem:[%s14299_s6 + $0x1b8] sm:$0xff]  ;;  %v11737_v38 = vld [vmem:[%s14299_s6 + $0x1b0] sm:$0xff]  ;;  %v11736_v3 = vld [vmem:[%s14299_s6 + $0x1a8] sm:$0xff] }
0x1a6f   :  { %11660 = vmatprep.subr.mxu1 %v11307_v9  ;;  %11590 = vmatpush2.msra.mxu0 %v11178_v31  ;;  %v11722_v33 = vld [vmem:[%s14299_s6 + $0x138] sm:$0xff]  ;;  %v11721_v57 = vld [vmem:[%s14299_s6 + $0x130] sm:$0xff]  ;;  %v11699_v29 = vld [vmem:[%s14299_s6 + $0x80] sm:$0xff] }
0x1a70   :  { %11661 = vmatpush2.msra.mxu1 %v11306_v13  ;;  %11591 = vmatprep.subr.mxu0 %v11175_v50  ;;  %v11683_v7 = vld [vmem:[%s14299_s6] sm:$0xff]  ;;  %v11720_v9 = vld [vmem:[%s14299_s6 + $0x128] sm:$0xff]  ;;  %v11734_v50 = vld [vmem:[%s14299_s6 + $0x198] sm:$0xff] }
0x1a71   :  { %11662 = vmatprep.subr.mxu1 %v11303_v17  ;;  %11592 = vmatpush2.msra.mxu0 %v11174_v56  ;;  %v11735_v31 = vld [vmem:[%s14299_s6 + $0x1a0] sm:$0xff]  ;;  %v11718_v17 = vld [vmem:[%s14299_s6 + $0x118] sm:$0xff]  ;;  %v11733_v56 = vld [vmem:[%s14299_s6 + $0x190] sm:$0xff] }
0x1a72   :  { %11593 = vmatprep.mubr.f32.mxu0 %v14071_v49  ;;  %11663 = vmatpush2.msra.mxu1 %v11302_v18  ;;  %v11697_v49 = vld [vmem:[%s14299_s6 + $0x70] sm:$0xff]  ;;  %v11719_v13 = vld [vmem:[%s14299_s6 + $0x120] sm:$0xff] }
0x1a73   :  { %11664 = vmatprep.mubr.f32.mxu1 %v14077_v63  ;;  %11594 = vmatmul.mubr.f32.vlgmr.msra.gmra.mxu0 %v14069_v30  ;;  %v11712_v63 = vld [vmem:[%s14299_s6 + $0xe8] sm:$0xff]  ;;  %v11717_v18 = vld [vmem:[%s14299_s6 + $0x110] sm:$0xff] }
0x1a74   :  { %11665 = vmatmul.mubr.f32.vlgmr.msra.gmra.mxu1 %v14075_v1  ;;  %12090 = vmatprep.subr.mxu0 %v11714_v26  ;;  %v11696_v30 = vld [vmem:[%s14299_s6 + $0x68] sm:$0xff]  ;;  %v11711_v1 = vld [vmem:[%s14299_s6 + $0xe0] sm:$0xff] }
0x1a75   :  { %12091 = vmatpush3.msra.mxu0 %v11698_v53  ;;  %12125 = vmatprep.subr.mxu1 %v11746_v59  ;;  %v11732_v26 = vld [vmem:[%s14299_s6 + $0x188] sm:$0xff] }
0x1a76   :  { %12092 = vmatprep.subr.mxu0 %v11713_v14  ;;  %12126 = vmatpush3.msra.mxu1 %v11730_v34  ;;  %v11716_v53 = vld [vmem:[%s14299_s6 + $0x108] sm:$0xff]  ;;  %v11731_v14 = vld [vmem:[%s14299_s6 + $0x180] sm:$0xff] }
0x1a77   :  { %12093 = vmatpush3.msra.mxu0 %v11697_v49  ;;  %12127 = vmatprep.subr.mxu1 %v11745_v8  ;;  %v11715_v49 = vld [vmem:[%s14299_s6 + $0x100] sm:$0xff] }
0x1a78   :  { %12094 = vmatprep.subr.mxu0 %v11712_v63  ;;  %12128 = vmatpush3.msra.mxu1 %v11729_v22  ;;  %v12086_v63 = vld [vmem:[%s14298_s5 + $0x2] ss:$4 sm:$0xf] }
0x1a79   :  { %12095 = vmatpush3.msra.mxu0 %v11696_v30  ;;  %12129 = vmatprep.subr.mxu1 %v11744_v10  ;;  %v11370_v30 = vrot.slane %v12086_v63, %v12734_v42  ;;  %v11378_v42 = vrot.slane %v12086_v63, %v12737_v43 }
0x1a7a   :  { %12096 = vmatprep.subr.mxu0 %v11711_v1  ;;  %12130 = vmatpush3.msra.mxu1 %v11728_v23  ;;  %v11374_v1 = vrot.slane %v12086_v63, %v12743_v45  ;;  %v11382_v45 = vrot.slane %v12086_v63, %v12746_v46  ;;  %v12087_v46 = vld [vmem:[%s14298_s5 + $0x3] ss:$0 sm:$0xff] }
0x1a7b   :  { %12097 = vmatpush3.msra.mxu0 %v11695_v47  ;;  %12131 = vmatprep.subr.mxu1 %v11743_v61 }
0x1a7c   :  { %12098 = vmatprep.subr.mxu0 %v11710_v39  ;;  %12132 = vmatpush3.msra.mxu1 %v11727_v28 }
0x1a7d   :  { %12099 = vmatpush3.msra.mxu0 %v11694_v55  ;;  %12133 = vmatprep.subr.mxu1 %v11742_v2 }
0x1a7e   :  { %12100 = vmatprep.subr.mxu0 %v11709_v35  ;;  %12134 = vmatpush3.msra.mxu1 %v11726_v62 }
0x1a7f   :  { %12101 = vmatpush3.msra.mxu0 %v11693_v60  ;;  %12135 = vmatprep.subr.mxu1 %v11741_v44 }
0x1a80   :  { %12102 = vmatprep.subr.mxu0 %v11708_v15  ;;  %12136 = vmatpush3.msra.mxu1 %v11725_v20 }
0x1a81   :  { %12103 = vmatpush3.msra.mxu0 %v11692_v27  ;;  %12137 = vmatprep.subr.mxu1 %v11740_v58 }
0x1a82   :  { %12104 = vmatprep.subr.mxu0 %v11707_v24  ;;  %12138 = vmatpush3.msra.mxu1 %v11724_v16 }
0x1a83   :  { %12105 = vmatpush3.msra.mxu0 %v11691_v19  ;;  %12139 = vmatprep.subr.mxu1 %v11739_v5 }
0x1a84   :  { %12106 = vmatprep.subr.mxu0 %v11706_v52  ;;  %12140 = vmatpush3.msra.mxu1 %v11723_v12 }
0x1a85   :  { %12107 = vmatpush3.msra.mxu0 %v11690_v0  ;;  %12141 = vmatprep.subr.mxu1 %v11738_v54 }
0x1a86   :  { %12108 = vmatprep.subr.mxu0 %v11705_v40  ;;  %12142 = vmatpush3.msra.mxu1 %v11722_v33 }
0x1a87   :  { %12109 = vmatpush3.msra.mxu0 %v11689_v4  ;;  %12143 = vmatprep.subr.mxu1 %v11737_v38 }
0x1a88   :  { %12110 = vmatprep.subr.mxu0 %v11704_v51  ;;  %12144 = vmatpush3.msra.mxu1 %v11721_v57 }
0x1a89   :  { %12111 = vmatpush3.msra.mxu0 %v11688_v41  ;;  %12145 = vmatprep.subr.mxu1 %v11736_v3 }
0x1a8a   :  { %12112 = vmatprep.subr.mxu0 %v11703_v21  ;;  %12146 = vmatpush3.msra.mxu1 %v11720_v9 }
0x1a8b   :  { %12113 = vmatpush3.msra.mxu0 %v11687_v32  ;;  %12147 = vmatprep.subr.mxu1 %v11735_v31 }
0x1a8c   :  { %12114 = vmatprep.subr.mxu0 %v11702_v25  ;;  %12148 = vmatpush3.msra.mxu1 %v11719_v13 }
0x1a8d   :  { %12115 = vmatpush3.msra.mxu0 %v11686_v48  ;;  %12149 = vmatprep.subr.mxu1 %v11734_v50 }
0x1a8e   :  { %12116 = vmatprep.subr.mxu0 %v11701_v11  ;;  %12150 = vmatpush3.msra.mxu1 %v11718_v17 }
0x1a8f   :  { %12117 = vmatpush3.msra.mxu0 %v11685_v6  ;;  %12151 = vmatprep.subr.mxu1 %v11733_v56 }
0x1a90   :  { %12118 = vmatprep.subr.mxu0 %v11700_v36  ;;  %12152 = vmatpush3.msra.mxu1 %v11717_v18 }
0x1a91   :  { %12119 = vmatpush3.msra.mxu0 %v11684_v37  ;;  %12153 = vmatprep.subr.mxu1 %v11732_v26 }
0x1a92   :  { %12120 = vmatprep.subr.mxu0 %v11699_v29  ;;  %12154 = vmatpush3.msra.mxu1 %v11716_v53 }
0x1a93   :  { %12121 = vmatpush3.msra.mxu0 %v11683_v7  ;;  %12155 = vmatprep.subr.mxu1 %v11731_v14 }
0x1a94   :  { %12156 = vmatpush3.msra.mxu1 %v11715_v49 }
0x1af1   :  { %v11453_v47 = vpop.f32.mrf.mxu0 }
0x1af2   :  { %v11454_v39 = vadd.f32 %v11453_v47, %v11370_v30 }
0x1af3   :  { %v11524_v55 = vpop.f32.mrf.mxu1  ;;  %v11455_v35 = vpop.f32.mrf.mxu0 }
0x1af4   :  { %v11525_v60 = vadd.f32 %v11524_v55, %v11454_v39  ;;  %v11456_v59 = vadd.f32 %v11455_v35, %v11374_v1 }
0x1af5   :  { %v11526_v34 = vpop.f32.mrf.mxu1 }
0x1af6   :  { %v11527_v8 = vadd.f32 %v11526_v34, %v11456_v59  ;;  %v11675_v15 = vmul.f32 0.01, %v11525_v60  ;;  %vm11671_vm13 = vcmp.ge.f32.partialorder %v11525_v60, 0.0 }
0x1af8   :  { %v11676_v22 = vmul.f32 0.01, %v11527_v8  ;;  %vm11672_vm14 = vcmp.ge.f32.partialorder %v11527_v8, 0.0  ;;  %v11679_v10 = vsel %vm11671_vm13, %v11525_v60, %v11675_v15 }
0x1afa   :  { %v11680_v27 = vsel %vm11672_vm14, %v11527_v8, %v11676_v22 }
0x1afb   :  { %11816 = vmatprep.mubr.f32.mxu0 %v11680_v27 }
0x1afc   :  { %11817 = vmatmul.mubr.f32.vlgmr.msra.gmra.mxu0 %v11679_v10 }
0x1b33   :  { %v11595_v24 = vpop.f32.mrf.mxu0 }
0x1b34   :  { %v11666_v23 = vpop.f32.mrf.mxu1  ;;  %v11596_v19 = vadd.f32 %v11595_v24, %v11378_v42 }
0x1b35   :  { %v11597_v61 = vpop.f32.mrf.mxu0 }
0x1b36   :  { %v11667_v52 = vadd.f32 %v11666_v23, %v11596_v19  ;;  %v11598_v28 = vadd.f32 %v11597_v61, %v11382_v45  ;;  %v11668_v0 = vpop.f32.mrf.mxu1 }
0x1b38   :  { %v11669_v2 = vadd.f32 %v11668_v0, %v11598_v28  ;;  %v11677_v40 = vmul.f32 0.01, %v11667_v52  ;;  %vm11673_vm15 = vcmp.ge.f32.partialorder %v11667_v52, 0.0 }
0x1b3a   :  { %v11678_v62 = vmul.f32 0.01, %v11669_v2  ;;  %vm11674_vm0 = vcmp.ge.f32.partialorder %v11669_v2, 0.0  ;;  %v11681_v44 = vsel %vm11673_vm15, %v11667_v52, %v11677_v40 }
0x1b3c   :  { %v11682_v4 = vsel %vm11674_vm0, %v11669_v2, %v11678_v62 }
0x1b3d   :  { %11886 = vmatprep.mubr.f32.mxu1 %v11682_v4 }
0x1b3e   :  { %11887 = vmatmul.mubr.f32.vlgmr.msra.gmra.mxu1 %v11681_v44 }
0x1bbc   :  { %v12122_v51 = vpop.f32.mrf.mxu0 }
0x1bbe   :  { %v12123_v43 = vpop.f32.mrf.mxu0 }
0x1bbf   :  { %v12124_v20 = vadd.f32 %v12123_v43, %v12122_v51 }
0x1bc1   :  { %v11819_v21 = vadd.f32 %v12124_v20, %v12087_v46 }
0x1bfe   :  { %v12157_v41 = vpop.f32.mrf.mxu1 }
0x1c00   :  { %v12158_v58 = vpop.f32.mrf.mxu1 }
0x1c01   :  { %v12159_v16 = vadd.f32 %v12158_v58, %v12157_v41 }
0x1c03   :  { %v11889_v32 = vadd.f32 %v12159_v16, %v11819_v21 }
0x1c05   :  { %v11892_v5 = vmax.f32 %v11889_v32, 0.0 }
0x1c07   :  { %11893 = vst.msk [vmem:[%s14302_s9] sm:$0xff] %vm1382_vm3, %v11892_v5 }
0x1c08   :  { %11898 = vsyncpa [#allocation8], 1 }
0x1c09   :  { %11899 = vsyncmov [#allocation4] }
0x1c0c   :  { %s11900_s28 = vpop.sfrf %11899 }
0x1c0d   :  { %p12088_p1 = scmp.ne.s32.totalorder %s11900_s28, 0 }
0x1c0f   :  { %11904 = shalt.err (%p12088_p1)  }
0x1c10   :  { %11906 = vsyncmov [#allocation4 + $0x1] }
0x1c13   :  { %s11907_s29 = vpop.sfrf %11906 }
0x1c14   :  { %p12089_p2 = scmp.ne.s32.totalorder %s11907_s29, 0 }
0x1c16   :  { %11911 = shalt.err (%p12089_p2)  }

</bundles_post_ra>
